<compile_context>
chip_gen: v5e
topology: v5e:2x2
jax: 0.10.0
libtpu: 0.0.40
codegen_flags: <defaults>
</compile_context>

<pallas_src>
import functools

import jax
import jax.numpy as jnp
from jax.experimental import pallas as pl
from jax.experimental.pallas import tpu as pltpu


_TILE_BUDGET_BYTES = 20 * 1024 * 1024   # double-buffered streamed x + out per block
_MAX_TILE_M = 2048                      # grid-step overhead fully amortised here
_MIN_SPLIT_M = 512                      # below this a 2-way megacore split isn't worth it
_VMEM_LIMIT_BYTES = 40 * 1024 * 1024    # < v7x's 64 MiB physical; > v5e's 16 MiB default
_S2D = 4                                # conv1 stride == space-to-depth factor


def _round_up(x, m):
    return ((x + m - 1) // m) * m


def _pick_tile_m(m, k, n, out_itemsize):
    """Pick the M tile from the double-buffered VMEM footprint (2*x + 2*out rows)."""
    per_row = 2 * k * 2 + 2 * n * out_itemsize            # bf16 x, out_dtype out
    tm = min(_MAX_TILE_M, max(256, (_TILE_BUDGET_BYTES // per_row) // 256 * 256))
    if m > tm:
        return tm                                          # streamed, >= 2 blocks
    # Whole problem fits in one block.  Split in two so the "parallel" M axis can
    # shard across both v7x TensorCores — but only when x-streaming (m*k) clearly
    # dominates the weight read (k*n) that the second core would duplicate.
    if m >= _MIN_SPLIT_M and m >= 4 * n:
        return _round_up((m + 1) // 2, 8)                  # 8-divisible => legal block
    return m                                               # single full-M block (always legal)


def _matmul_bias_kernel(x_ref, w_ref, b_ref, o_ref, *, apply_relu):
    # bf16 x bf16 -> f32 accumulation on the MXU; bias/ReLU epilogue in f32.
    acc = jnp.dot(x_ref[...], w_ref[...], preferred_element_type=jnp.float32)
    acc = acc + b_ref[...].astype(jnp.float32)
    if apply_relu:
        acc = jnp.maximum(acc, 0.0)
    o_ref[...] = acc.astype(o_ref.dtype)


def pallas_matmul_bias(x, w, b, *, apply_relu=False, out_dtype=jnp.float32):
    """y = x @ w + b (optionally ReLU).  M-tiled; weight/bias resident in VMEM."""
    m, k = x.shape
    k2, n = w.shape
    assert k == k2, (k, k2)
    b2 = b.reshape(1, n)

    out_itemsize = jnp.dtype(out_dtype).itemsize
    tm = _pick_tile_m(m, k, n, out_itemsize)
    grid = (pl.cdiv(m, tm),)          # trailing partial block handled/masked by Pallas

    flops = 2 * m * k * n
    bytes_accessed = (m * k * x.dtype.itemsize + k * n * w.dtype.itemsize
                      + n * b2.dtype.itemsize + m * n * out_itemsize)

    # NOTE: if profiling shows exposed input DMA on the tiny conv matmuls,
    # in_specs[0] can take pipeline_mode=pl.Buffered(3); left at the default
    # double-buffering here.
    return pl.pallas_call(
        functools.partial(_matmul_bias_kernel, apply_relu=apply_relu),
        out_shape=jax.ShapeDtypeStruct((m, n), out_dtype),
        grid=grid,
        in_specs=[
            pl.BlockSpec((tm, k), lambda i: (i, 0)),   # streamed / double-buffered
            pl.BlockSpec((k, n), lambda i: (0, 0)),    # resident weight
            pl.BlockSpec((1, n), lambda i: (0, 0)),    # resident bias
        ],
        out_specs=pl.BlockSpec((tm, n), lambda i: (i, 0)),
        compiler_params=pltpu.CompilerParams(
            dimension_semantics=("parallel",),          # shard M across TCs (v7x)
            vmem_limit_bytes=_VMEM_LIMIT_BYTES,
        ),
        cost_estimate=pl.CostEstimate(
            flops=flops, transcendentals=0, bytes_accessed=bytes_accessed),
    )(x, w, b2)


def _im2col_nhwc(x, kh, kw, stride):
    """x: (N, H, W, C) -> (N*OH*OW, KH*KW*C); column order (KH, KW, C)."""
    n, h, w, c = x.shape
    oh = (h - kh) // stride + 1
    ow = (w - kw) // stride + 1
    taps = []
    for i in range(kh):
        for j in range(kw):
            taps.append(x[:, i:i + stride * oh:stride, j:j + stride * ow:stride, :])
    patches = jnp.stack(taps, axis=3)                  # (N, OH, OW, KH*KW, C)
    return patches.reshape(n * oh * ow, kh * kw * c), oh, ow


def conv2d_nhwc(x, w2d, b, kh, kw, stride, *, out_dtype=jnp.bfloat16):
    """x: (N,H,W,C) bf16; w2d: (KH*KW*C, OC) bf16 prepped once; b: (OC,) f32."""
    n = x.shape[0]
    oc = w2d.shape[1]
    patches, oh, ow = _im2col_nhwc(x, kh, kw, stride)   # XLA glue (bf16 HBM traffic)
    y = pallas_matmul_bias(patches, w2d, b, out_dtype=out_dtype)
    return y.reshape(n, oh, ow, oc)                     # stays NHWC, no transpose


def _space_to_depth_nchw_to_nhwc(x, r):
    """(N, C, H, W) f32 -> (N, H/r, W/r, r*r*C) bf16; channel order (dh, dw, c)."""
    n, c, h, w = x.shape
    assert h % r == 0 and w % r == 0, (h, w, r)
    y = x.reshape(n, c, h // r, r, w // r, r)           # (n, c, H', dh, W', dw)
    y = jnp.transpose(y, (0, 2, 4, 3, 5, 1))            # (n, H', W', dh, dw, c)
    return y.reshape(n, h // r, w // r, r * r * c).astype(jnp.bfloat16)


def init_params(key, in_channels=4):
    """Raw parameters in PyTorch layouts (as the module would hold them)."""
    ks = jax.random.split(key, 8)

    def w(k, shape, scale=0.05):
        return (scale * jax.random.normal(k, shape)).astype(jnp.float32)

    return {
        "conv1_w": w(ks[0], (32, in_channels, 8, 8)),
        "conv1_b": w(ks[1], (32,)),
        "conv2_w": w(ks[2], (64, 32, 4, 4)),
        "conv2_b": w(ks[3], (64,)),
        "conv3_w": w(ks[4], (64, 64, 3, 3)),
        "conv3_b": w(ks[5], (64,)),
        "fc4_w": w(ks[6], (512, 7 * 7 * 64)),  # torch Linear: (out, in), in = (C,H,W) flat
        "fc4_b": w(ks[7], (512,)),
    }


def prepare_params(raw):
    """One-time layout/dtype prep, hoisted out of the per-call forward path."""
    def conv_w2d(wt):  # (OC, IC, KH, KW) torch -> (KH*KW*IC, OC) bf16, rows (KH,KW,C)
        oc, ic, kh, kw = wt.shape
        return jnp.transpose(wt, (2, 3, 1, 0)).reshape(kh * kw * ic, oc).astype(jnp.bfloat16)

    # conv1 on the space-to-depth input: split each kernel coordinate kh=4*ti+dh,
    # kw=4*tj+dw.  Row order (ti, tj, dh, dw, c) matches _im2col_nhwc of the s2d
    # activation whose channel order is (dh, dw, c).
    w1 = raw["conv1_w"]                                   # (32, C, 8, 8)
    oc, ic, kh, kw = w1.shape
    r = _S2D
    w1 = w1.reshape(oc, ic, kh // r, r, kw // r, r)       # (oc, c, ti, dh, tj, dw)
    w1 = jnp.transpose(w1, (2, 4, 3, 5, 1, 0))            # (ti, tj, dh, dw, c, oc)
    w1 = w1.reshape((kh // r) * (kw // r) * r * r * ic, oc).astype(jnp.bfloat16)

    # fc4: torch columns are flattened NCHW (C=64, H=7, W=7).  Our activations are
    # NHWC-flattened (H, W, C) -> permute columns once, then transpose to (K, N).
    fc_w = raw["fc4_w"].reshape(512, 64, 7, 7)            # (out, C, H, W)
    fc_w = jnp.transpose(fc_w, (2, 3, 1, 0)).reshape(7 * 7 * 64, 512)

    return {
        "conv1_w": w1, "conv1_b": raw["conv1_b"],
        "conv2_w": conv_w2d(raw["conv2_w"]), "conv2_b": raw["conv2_b"],
        "conv3_w": conv_w2d(raw["conv3_w"]), "conv3_b": raw["conv3_b"],
        "fc4_w": fc_w.astype(jnp.bfloat16), "fc4_b": raw["fc4_b"],
    }


def nature_conv_body_forward(p, x):
    """x: (N, C, H, W) float32, NCHW like the torch module.  Returns (N, 512) f32."""
    # Single layout op: space-to-depth folds the NCHW->NHWC transpose and the bf16
    # cast; conv1 (k=8, s=4) becomes k=2, s=1 over (21, 21, 64) with the same K=256.
    y = _space_to_depth_nchw_to_nhwc(x, _S2D)
    # conv1 -> conv2 -> conv3 (NO inter-conv ReLU in this refactored module).
    y = conv2d_nhwc(y, p["conv1_w"], p["conv1_b"], 8 // _S2D, 8 // _S2D, 1)
    y = conv2d_nhwc(y, p["conv2_w"], p["conv2_b"], 4, 4, 2)
    y = conv2d_nhwc(y, p["conv3_w"], p["conv3_b"], 3, 3, 1)
    n = y.shape[0]
    y = y.reshape(n, -1)                                  # (N, 7*7*64) in (H,W,C) order
    # F.relu(fc4(y)) fused in-kernel; output in f32.
    return pallas_matmul_bias(y, p["fc4_w"], p["fc4_b"],
                              apply_relu=True, out_dtype=jnp.float32)


def reference_forward(raw, x):
    """Pure-XLA float32 reference in torch layouts (numerics sanity check)."""
    def conv(z, w, b, s):
        z = jax.lax.conv_general_dilated(
            z, w, window_strides=(s, s), padding="VALID",
            dimension_numbers=("NCHW", "OIHW", "NCHW"))
        return z + b.reshape(1, -1, 1, 1)
    y = conv(x, raw["conv1_w"], raw["conv1_b"], 4)
    y = conv(y, raw["conv2_w"], raw["conv2_b"], 2)
    y = conv(y, raw["conv3_w"], raw["conv3_b"], 1)
    y = y.reshape(y.shape[0], -1)                         # torch .view: (C,H,W) flatten
    y = y @ raw["fc4_w"].T + raw["fc4_b"]
    return jnp.maximum(y, 0.0)


if __name__ == "__main__":
    key = jax.random.PRNGKey(0)
    k_params, k_x = jax.random.split(key)
    raw_params = init_params(k_params, in_channels=4)
    params = prepare_params(raw_params)   # one-time weight layout/dtype prep

    # fc4 input size (7*7*64) implies the canonical Atari 84x84 input.
    x = jax.random.normal(k_x, (2, 4, 84, 84), dtype=jnp.float32)

    fwd = jax.jit(nature_conv_body_forward)
    out = jax.block_until_ready(fwd(params, x))

    assert out.shape == (2, 512), out.shape
    assert out.dtype == jnp.float32
    assert bool(jnp.all(jnp.isfinite(out)))
    assert bool(jnp.all(out >= 0.0))      # final ReLU applied

    # Numerics check vs. a float32 XLA reference (bf16 activations => loose tol).
    ref = jax.block_until_ready(jax.jit(reference_forward)(raw_params, x))
    err = float(jnp.max(jnp.abs(out - ref)))
    tol = 5e-2 * float(jnp.max(jnp.abs(ref))) + 5e-2
    assert err < tol, (err, tol)

    print("KERNEL_OK")
</pallas_src>

<mosaic_0001>
module attributes {stable_mosaic.version = 11 : i64} {
  func.func @_matmul_bias_kernel(%arg0: i32, %arg1: memref<400x256xbf16, #tpu.memory_space<vmem>>, %arg2: memref<256x32xbf16, #tpu.memory_space<vmem>>, %arg3: memref<1x32xf32, #tpu.memory_space<vmem>>, %arg4: memref<400x32xbf16, #tpu.memory_space<vmem>>) attributes {dimension_semantics = [#tpu.dimension_semantics<parallel>], iteration_bounds = array<i64: 2>, scalar_prefetch = 0 : i64, scratch_operands = 0 : i64, tpu.core_type = #tpu.core_type<tc>, window_params = [{transform_indices = @transform_0, window_bounds = array<i64: 400, 256>}, {pipeline_mode = #tpu.pipeline_mode<synchronous>, transform_indices = @transform_1, window_bounds = array<i64: 256, 32>}, {pipeline_mode = #tpu.pipeline_mode<synchronous>, transform_indices = @transform_2, window_bounds = array<i64: 1, 32>}, {transform_indices = @transform_3, window_bounds = array<i64: 400, 32>}]} {
    %c0 = arith.constant 0 : index
    %c0_0 = arith.constant 0 : index
    %0 = vector.load %arg1[%c0, %c0_0] : memref<400x256xbf16, #tpu.memory_space<vmem>>, vector<400x256xbf16>
    %c0_1 = arith.constant 0 : index
    %c0_2 = arith.constant 0 : index
    %1 = vector.load %arg2[%c0_1, %c0_2] : memref<256x32xbf16, #tpu.memory_space<vmem>>, vector<256x32xbf16>
    %cst = arith.constant dense<0.000000e+00> : vector<400x32xf32>
    %2 = tpu.matmul %0, %1, %cst {dimension_numbers = #tpu.dot_dimension_numbers<[1], [0], [0], [1], [0, 0, 1, 1], [], []>} : vector<400x256xbf16>, vector<256x32xbf16>, vector<400x32xf32> -> vector<400x32xf32>
    %c0_3 = arith.constant 0 : index
    %c0_4 = arith.constant 0 : index
    %3 = vector.load %arg3[%c0_3, %c0_4] : memref<1x32xf32, #tpu.memory_space<vmem>>, vector<1x32xf32>
    %4 = vector.broadcast %3 : vector<1x32xf32> to vector<400x32xf32>
    %5 = arith.addf %2, %4 : vector<400x32xf32>
    %6 = arith.truncf %5 : vector<400x32xf32> to vector<400x32xbf16>
    %c0_5 = arith.constant 0 : index
    %c0_6 = arith.constant 0 : index
    %7 = vector.load %arg4[%c0_5, %c0_6] : memref<400x32xbf16, #tpu.memory_space<vmem>>, vector<400x32xbf16>
    tpu.vector_store %arg4[%c0_5, %c0_6], %6 {strides = array<i32>} : memref<400x32xbf16, #tpu.memory_space<vmem>>, vector<400x32xbf16>,
    return
  }
  func.func @transform_0(%arg0: i32) -> (i32, i32) {
    %c0_i32 = arith.constant 0 : i32
    %c0_i32_0 = arith.constant 0 : i32
    return %arg0, %c0_i32 : i32, i32
  }
  func.func @transform_1(%arg0: i32) -> (i32, i32) {
    %c0_i32 = arith.constant 0 : i32
    %c0_i32_0 = arith.constant 0 : i32
    %c0_i32_1 = arith.constant 0 : i32
    return %c0_i32, %c0_i32_0 : i32, i32
  }
  func.func @transform_2(%arg0: i32) -> (i32, i32) {
    %c0_i32 = arith.constant 0 : i32
    %c0_i32_0 = arith.constant 0 : i32
    %c0_i32_1 = arith.constant 0 : i32
    return %c0_i32, %c0_i32_0 : i32, i32
  }
  func.func @transform_3(%arg0: i32) -> (i32, i32) {
    %c0_i32 = arith.constant 0 : i32
    %c0_i32_0 = arith.constant 0 : i32
    return %arg0, %c0_i32 : i32, i32
  }
}

module attributes {stable_mosaic.version = 11 : i64} {
  func.func @_matmul_bias_kernel(%arg0: i32, %arg1: memref<162x512xbf16, #tpu.memory_space<vmem>>, %arg2: memref<512x64xbf16, #tpu.memory_space<vmem>>, %arg3: memref<1x64xf32, #tpu.memory_space<vmem>>, %arg4: memref<162x64xbf16, #tpu.memory_space<vmem>>) attributes {dimension_semantics = [#tpu.dimension_semantics<parallel>], iteration_bounds = array<i64: 1>, scalar_prefetch = 0 : i64, scratch_operands = 0 : i64, tpu.core_type = #tpu.core_type<tc>, window_params = [{transform_indices = @transform_0, window_bounds = array<i64: 162, 512>}, {pipeline_mode = #tpu.pipeline_mode<synchronous>, transform_indices = @transform_1, window_bounds = array<i64: 512, 64>}, {pipeline_mode = #tpu.pipeline_mode<synchronous>, transform_indices = @transform_2, window_bounds = array<i64: 1, 64>}, {transform_indices = @transform_3, window_bounds = array<i64: 162, 64>}]} {
    %c0 = arith.constant 0 : index
    %c0_0 = arith.constant 0 : index
    %0 = vector.load %arg1[%c0, %c0_0] : memref<162x512xbf16, #tpu.memory_space<vmem>>, vector<162x512xbf16>
    %c0_1 = arith.constant 0 : index
    %c0_2 = arith.constant 0 : index
    %1 = vector.load %arg2[%c0_1, %c0_2] : memref<512x64xbf16, #tpu.memory_space<vmem>>, vector<512x64xbf16>
    %cst = arith.constant dense<0.000000e+00> : vector<162x64xf32>
    %2 = tpu.matmul %0, %1, %cst {dimension_numbers = #tpu.dot_dimension_numbers<[1], [0], [0], [1], [0, 0, 1, 1], [], []>} : vector<162x512xbf16>, vector<512x64xbf16>, vector<162x64xf32> -> vector<162x64xf32>
    %c0_3 = arith.constant 0 : index
    %c0_4 = arith.constant 0 : index
    %3 = vector.load %arg3[%c0_3, %c0_4] : memref<1x64xf32, #tpu.memory_space<vmem>>, vector<1x64xf32>
    %4 = vector.broadcast %3 : vector<1x64xf32> to vector<162x64xf32>
    %5 = arith.addf %2, %4 : vector<162x64xf32>
    %6 = arith.truncf %5 : vector<162x64xf32> to vector<162x64xbf16>
    %c0_5 = arith.constant 0 : index
    %c0_6 = arith.constant 0 : index
    %7 = vector.load %arg4[%c0_5, %c0_6] : memref<162x64xbf16, #tpu.memory_space<vmem>>, vector<162x64xbf16>
    tpu.vector_store %arg4[%c0_5, %c0_6], %6 {strides = array<i32>} : memref<162x64xbf16, #tpu.memory_space<vmem>>, vector<162x64xbf16>,
    return
  }
  func.func @transform_0(%arg0: i32) -> (i32, i32) {
    %c0_i32 = arith.constant 0 : i32
    %c0_i32_0 = arith.constant 0 : i32
    return %arg0, %c0_i32 : i32, i32
  }
  func.func @transform_1(%arg0: i32) -> (i32, i32) {
    %c0_i32 = arith.constant 0 : i32
    %c0_i32_0 = arith.constant 0 : i32
    %c0_i32_1 = arith.constant 0 : i32
    return %c0_i32, %c0_i32_0 : i32, i32
  }
  func.func @transform_2(%arg0: i32) -> (i32, i32) {
    %c0_i32 = arith.constant 0 : i32
    %c0_i32_0 = arith.constant 0 : i32
    %c0_i32_1 = arith.constant 0 : i32
    return %c0_i32, %c0_i32_0 : i32, i32
  }
  func.func @transform_3(%arg0: i32) -> (i32, i32) {
    %c0_i32 = arith.constant 0 : i32
    %c0_i32_0 = arith.constant 0 : i32
    return %arg0, %c0_i32 : i32, i32
  }
}

module attributes {stable_mosaic.version = 11 : i64} {
  func.func @_matmul_bias_kernel(%arg0: i32, %arg1: memref<98x576xbf16, #tpu.memory_space<vmem>>, %arg2: memref<576x64xbf16, #tpu.memory_space<vmem>>, %arg3: memref<1x64xf32, #tpu.memory_space<vmem>>, %arg4: memref<98x64xbf16, #tpu.memory_space<vmem>>) attributes {dimension_semantics = [#tpu.dimension_semantics<parallel>], iteration_bounds = array<i64: 1>, scalar_prefetch = 0 : i64, scratch_operands = 0 : i64, tpu.core_type = #tpu.core_type<tc>, window_params = [{transform_indices = @transform_0, window_bounds = array<i64: 98, 576>}, {pipeline_mode = #tpu.pipeline_mode<synchronous>, transform_indices = @transform_1, window_bounds = array<i64: 576, 64>}, {pipeline_mode = #tpu.pipeline_mode<synchronous>, transform_indices = @transform_2, window_bounds = array<i64: 1, 64>}, {transform_indices = @transform_3, window_bounds = array<i64: 98, 64>}]} {
    %c0 = arith.constant 0 : index
    %c0_0 = arith.constant 0 : index
    %0 = vector.load %arg1[%c0, %c0_0] : memref<98x576xbf16, #tpu.memory_space<vmem>>, vector<98x576xbf16>
    %c0_1 = arith.constant 0 : index
    %c0_2 = arith.constant 0 : index
    %1 = vector.load %arg2[%c0_1, %c0_2] : memref<576x64xbf16, #tpu.memory_space<vmem>>, vector<576x64xbf16>
    %cst = arith.constant dense<0.000000e+00> : vector<98x64xf32>
    %2 = tpu.matmul %0, %1, %cst {dimension_numbers = #tpu.dot_dimension_numbers<[1], [0], [0], [1], [0, 0, 1, 1], [], []>} : vector<98x576xbf16>, vector<576x64xbf16>, vector<98x64xf32> -> vector<98x64xf32>
    %c0_3 = arith.constant 0 : index
    %c0_4 = arith.constant 0 : index
    %3 = vector.load %arg3[%c0_3, %c0_4] : memref<1x64xf32, #tpu.memory_space<vmem>>, vector<1x64xf32>
    %4 = vector.broadcast %3 : vector<1x64xf32> to vector<98x64xf32>
    %5 = arith.addf %2, %4 : vector<98x64xf32>
    %6 = arith.truncf %5 : vector<98x64xf32> to vector<98x64xbf16>
    %c0_5 = arith.constant 0 : index
    %c0_6 = arith.constant 0 : index
    %7 = vector.load %arg4[%c0_5, %c0_6] : memref<98x64xbf16, #tpu.memory_space<vmem>>, vector<98x64xbf16>
    tpu.vector_store %arg4[%c0_5, %c0_6], %6 {strides = array<i32>} : memref<98x64xbf16, #tpu.memory_space<vmem>>, vector<98x64xbf16>,
    return
  }
  func.func @transform_0(%arg0: i32) -> (i32, i32) {
    %c0_i32 = arith.constant 0 : i32
    %c0_i32_0 = arith.constant 0 : i32
    return %arg0, %c0_i32 : i32, i32
  }
  func.func @transform_1(%arg0: i32) -> (i32, i32) {
    %c0_i32 = arith.constant 0 : i32
    %c0_i32_0 = arith.constant 0 : i32
    %c0_i32_1 = arith.constant 0 : i32
    return %c0_i32, %c0_i32_0 : i32, i32
  }
  func.func @transform_2(%arg0: i32) -> (i32, i32) {
    %c0_i32 = arith.constant 0 : i32
    %c0_i32_0 = arith.constant 0 : i32
    %c0_i32_1 = arith.constant 0 : i32
    return %c0_i32, %c0_i32_0 : i32, i32
  }
  func.func @transform_3(%arg0: i32) -> (i32, i32) {
    %c0_i32 = arith.constant 0 : i32
    %c0_i32_0 = arith.constant 0 : i32
    return %arg0, %c0_i32 : i32, i32
  }
}

module attributes {stable_mosaic.version = 11 : i64} {
  func.func @_matmul_bias_kernel(%arg0: i32, %arg1: memref<2x3136xbf16, #tpu.memory_space<vmem>>, %arg2: memref<3136x512xbf16, #tpu.memory_space<vmem>>, %arg3: memref<1x512xf32, #tpu.memory_space<vmem>>, %arg4: memref<2x512xf32, #tpu.memory_space<vmem>>) attributes {dimension_semantics = [#tpu.dimension_semantics<parallel>], iteration_bounds = array<i64: 1>, scalar_prefetch = 0 : i64, scratch_operands = 0 : i64, tpu.core_type = #tpu.core_type<tc>, window_params = [{transform_indices = @transform_0, window_bounds = array<i64: 2, 3136>}, {pipeline_mode = #tpu.pipeline_mode<synchronous>, transform_indices = @transform_1, window_bounds = array<i64: 3136, 512>}, {pipeline_mode = #tpu.pipeline_mode<synchronous>, transform_indices = @transform_2, window_bounds = array<i64: 1, 512>}, {transform_indices = @transform_3, window_bounds = array<i64: 2, 512>}]} {
    %c0 = arith.constant 0 : index
    %c0_0 = arith.constant 0 : index
    %0 = vector.load %arg1[%c0, %c0_0] : memref<2x3136xbf16, #tpu.memory_space<vmem>>, vector<2x3136xbf16>
    %c0_1 = arith.constant 0 : index
    %c0_2 = arith.constant 0 : index
    %1 = vector.load %arg2[%c0_1, %c0_2] : memref<3136x512xbf16, #tpu.memory_space<vmem>>, vector<3136x512xbf16>
    %cst = arith.constant dense<0.000000e+00> : vector<2x512xf32>
    %2 = tpu.matmul %0, %1, %cst {dimension_numbers = #tpu.dot_dimension_numbers<[1], [0], [0], [1], [0, 0, 1, 1], [], []>} : vector<2x3136xbf16>, vector<3136x512xbf16>, vector<2x512xf32> -> vector<2x512xf32>
    %c0_3 = arith.constant 0 : index
    %c0_4 = arith.constant 0 : index
    %3 = vector.load %arg3[%c0_3, %c0_4] : memref<1x512xf32, #tpu.memory_space<vmem>>, vector<1x512xf32>
    %4 = vector.broadcast %3 : vector<1x512xf32> to vector<2x512xf32>
    %5 = arith.addf %2, %4 : vector<2x512xf32>
    %cst_5 = arith.constant 0.000000e+00 : f32
    %6 = vector.broadcast %cst_5 : f32 to vector<2x512xf32>
    %7 = arith.maximumf %5, %6 : vector<2x512xf32>
    %c0_6 = arith.constant 0 : index
    %c0_7 = arith.constant 0 : index
    %8 = vector.load %arg4[%c0_6, %c0_7] : memref<2x512xf32, #tpu.memory_space<vmem>>, vector<2x512xf32>
    tpu.vector_store %arg4[%c0_6, %c0_7], %7 {strides = array<i32>} : memref<2x512xf32, #tpu.memory_space<vmem>>, vector<2x512xf32>,
    return
  }
  func.func @transform_0(%arg0: i32) -> (i32, i32) {
    %c0_i32 = arith.constant 0 : i32
    %c0_i32_0 = arith.constant 0 : i32
    return %arg0, %c0_i32 : i32, i32
  }
  func.func @transform_1(%arg0: i32) -> (i32, i32) {
    %c0_i32 = arith.constant 0 : i32
    %c0_i32_0 = arith.constant 0 : i32
    %c0_i32_1 = arith.constant 0 : i32
    return %c0_i32, %c0_i32_0 : i32, i32
  }
  func.func @transform_2(%arg0: i32) -> (i32, i32) {
    %c0_i32 = arith.constant 0 : i32
    %c0_i32_0 = arith.constant 0 : i32
    %c0_i32_1 = arith.constant 0 : i32
    return %c0_i32, %c0_i32_0 : i32, i32
  }
  func.func @transform_3(%arg0: i32) -> (i32, i32) {
    %c0_i32 = arith.constant 0 : i32
    %c0_i32_0 = arith.constant 0 : i32
    return %arg0, %c0_i32 : i32, i32
  }
}

</mosaic_0001>

<bundles_post_ra>
// kernel: nature_conv_body_forward.4
= control target key start
LH: loop header
LB: loop body
LE: loop exit
PB: predicated region body
PF: predicated region fallthrough
CT: control target
= control target key end

     0   :  { %s1428_s12 = smov 0   ;;  %s1762_s0 = inlined_call_operand.vmem [shape: bf16[800,256], index: 0, kind: input, shape index: {}]   ;;  %s1763_s1 = inlined_call_operand.vmem [shape: bf16[256,32], index: 1, kind: input, shape index: {}]   ;;  %s1764_s2 = inlined_call_operand.vmem [shape: f32[1,32], index: 2, kind: input, shape index: {}]   ;;  %s1765_s3 = inlined_call_operand.vmem [shape: bf16[800,32], index: 3, kind: output, shape index: {}]  }
   0x1 LB: > { %s1034_s13 = sadd.s32 4294967295, %s1406_s12   ;;  %p1038_p0 = scmp.ge.s32.totalorder %s1406_s12, 1  ;;  %s1406_s12 = sphi %s1428_s12, %s13_s12  }
   0x2   : > { %p139_p1 = scmp.lt.s32.totalorder %s1406_s12, 3 }
   0x4   : > { %p140_p2 = pnand %p1038_p0, %p139_p1 }
   0x5   : > { %s164_s26 = smul.u32 (!%p140_p2), 50, %s1034_s13 }
   0x6   : > { %143 = sbr.rel (%p140_p2) target bundleno = 382 (0x17e), region = 32 }
   0x7   : > { %p165_p3 = scmp.lt.s32.totalorder (!%p140_p2), %s164_s26, 99 }
   0xb   : > { %v1366_v0 = vld [vmem:[%s1763_s1 + $0x38] sm:$0xff]  ;;  %v1365_v2 = vld [vmem:[%s1763_s1 + $0x30] sm:$0xff]  ;;  %v1364_v4 = vld [vmem:[%s1763_s1 + $0x28] sm:$0xff]  ;;  %s1767_s26 = smov (!%p165_p3, %s164_s26), 99  ;;  %vm927_vm0 = vcmask 257024  }
   0xc   : > { %v1374_v1 = vld [vmem:[%s1763_s1 + $0x78] sm:$0xff]  ;;  %609 = vmatpush.bf16.msra.mxu0 %v1366_v0  ;;  %1375 = vmatpush.bf16.msra.mxu2 %v1366_v0  ;;  %v1373_v3 = vld [vmem:[%s1763_s1 + $0x70] sm:$0xff]  ;;  %v1372_v5 = vld [vmem:[%s1763_s1 + $0x68] sm:$0xff]  ;;  %s1308_s13 = sshll.u32 %s1767_s26, 3  ;;  %s1041_s28 = sshll.u32 %s1767_s26, 2 }
   0xd   : > { %743 = vmatpush.bf16.msra.mxu1 %v1374_v1  ;;  %1383 = vmatpush.bf16.msra.mxu3 %v1374_v1  ;;  %v1363_v6 = vld [vmem:[%s1763_s1 + $0x20] sm:$0xff]  ;;  %v1362_v8 = vld [vmem:[%s1763_s1 + $0x18] sm:$0xff]  ;;  %v1361_v10 = vld [vmem:[%s1763_s1 + $0x10] sm:$0xff]  ;;  %s1481_s18 = scalar_lea.vmem %s1762_s0, %s1308_s13  ;;  %s1574_s4 = scalar_lea.vmem %s1765_s3, %s1041_s28 }
   0xe   : > { %v1371_v7 = vld [vmem:[%s1763_s1 + $0x60] sm:$0xff]  ;;  %v1370_v9 = vld [vmem:[%s1763_s1 + $0x58] sm:$0xff]  ;;  %v1369_v11 = vld [vmem:[%s1763_s1 + $0x50] sm:$0xff] }
   0xf   : > { %v1360_v12 = vld [vmem:[%s1763_s1 + $0x8] sm:$0xff]  ;;  %v1359_v14 = vld [vmem:[%s1763_s1] sm:$0xff]  ;;  %v1335_v22 = vld [vmem:[%s1481_s18 + $0xd4] sm:$0xf] }
  0x10   : > { %610 = vmatpush.bf16.msra.mxu0 %v1365_v2  ;;  %1376 = vmatpush.bf16.msra.mxu2 %v1365_v2  ;;  %v1368_v13 = vld [vmem:[%s1763_s1 + $0x48] sm:$0xff]  ;;  %v1367_v15 = vld [vmem:[%s1763_s1 + $0x40] sm:$0xff]  ;;  %v1150_v23 = vld [vmem:[%s1481_s18 + $0xd8] sm:$0xf0] }
  0x11   : > { %744 = vmatpush.bf16.msra.mxu1 %v1373_v3  ;;  %1384 = vmatpush.bf16.msra.mxu3 %v1373_v3  ;;  %v1044_v16 = vld [vmem:[%s1481_s18] sm:$0xf]  ;;  %v1310_v17 = vld [vmem:[%s1481_s18 + $0x4] sm:$0xf0]  ;;  %v1309_v20 = vld [vmem:[%s1481_s18 + $0x4] sm:$0xf]  ;;  %v1153_v27 = vor.u32 %v1335_v22, %v1150_v23 }
  0x12   : > { %v1140_v18 = vld [vmem:[%s1481_s18 + $0xc0] sm:$0xf]  ;;  %v1334_v19 = vld [vmem:[%s1481_s18 + $0xc4] sm:$0xf0]  ;;  %v1046_v21 = vld [vmem:[%s1481_s18 + $0x8] sm:$0xf0]  ;;  %v1045_v24 = vor.u32 %v1310_v17, %v1044_v16 }
  0x13   : > { %v1141_v25 = vor.u32 %v1334_v19, %v1140_v18  ;;  %v1049_v26 = vor.u32 %v1309_v20, %v1046_v21  ;;  %v1052_v28 = vld [vmem:[%s1481_s18 + $0x10] sm:$0xf]  ;;  %v1312_v29 = vld [vmem:[%s1481_s18 + $0x14] sm:$0xf0]  ;;  %v1311_v32 = vld [vmem:[%s1481_s18 + $0x14] sm:$0xf] }
  0x14   : > { %611 = vmatpush.bf16.msra.mxu0 %v1364_v4  ;;  %1377 = vmatpush.bf16.msra.mxu2 %v1364_v4  ;;  %v1148_v30 = vld [vmem:[%s1481_s18 + $0xd0] sm:$0xf]  ;;  %v1336_v31 = vld [vmem:[%s1481_s18 + $0xd4] sm:$0xf0]  ;;  %v1054_v33 = vld [vmem:[%s1481_s18 + $0x18] sm:$0xf0]  ;;  %v1053_v36 = vor.u32 %v1312_v29, %v1052_v28 }
  0x15   : > { %745 = vmatpush.bf16.msra.mxu1 %v1372_v5  ;;  %1385 = vmatpush.bf16.msra.mxu3 %v1372_v5  ;;  %v1337_v34 = vld [vmem:[%s1481_s18 + $0xe4] sm:$0xf]  ;;  %v1158_v35 = vld [vmem:[%s1481_s18 + $0xe8] sm:$0xf0]  ;;  %v1149_v37 = vor.u32 %v1336_v31, %v1148_v30  ;;  %v1057_v38 = vor.u32 %v1311_v32, %v1054_v33  ;;  %v1060_v40 = vld [vmem:[%s1481_s18 + $0x20] sm:$0xf] }
  0x16   : > { %v1161_v39 = vor.u32 %v1337_v34, %v1158_v35  ;;  %v1314_v41 = vld [vmem:[%s1481_s18 + $0x24] sm:$0xf0]  ;;  %v1156_v42 = vld [vmem:[%s1481_s18 + $0xe0] sm:$0xf]  ;;  %v1313_v44 = vld [vmem:[%s1481_s18 + $0x24] sm:$0xf] }
  0x17   : > { %v1338_v43 = vld [vmem:[%s1481_s18 + $0xe4] sm:$0xf0]  ;;  %v1062_v45 = vld [vmem:[%s1481_s18 + $0x28] sm:$0xf0]  ;;  %v1339_v46 = vld [vmem:[%s1481_s18 + $0xf4] sm:$0xf]  ;;  %v1061_v48 = vor.u32 %v1314_v41, %v1060_v40 }
  0x18   : > { %612 = vmatpush.bf16.msra.mxu0 %v1363_v6  ;;  %1378 = vmatpush.bf16.msra.mxu2 %v1363_v6  ;;  %v1166_v47 = vld [vmem:[%s1481_s18 + $0xf8] sm:$0xf0]  ;;  %v1157_v49 = vor.u32 %v1338_v43, %v1156_v42  ;;  %v1065_v50 = vor.u32 %v1313_v44, %v1062_v45  ;;  %v1068_v52 = vld [vmem:[%s1481_s18 + $0x30] sm:$0xf]  ;;  %v1316_v53 = vld [vmem:[%s1481_s18 + $0x34] sm:$0xf0] }
  0x19   : > { %746 = vmatpush.bf16.msra.mxu1 %v1371_v7  ;;  %1386 = vmatpush.bf16.msra.mxu3 %v1371_v7  ;;  %v1169_v51 = vor.u32 %v1339_v46, %v1166_v47  ;;  %v1164_v54 = vld [vmem:[%s1481_s18 + $0xf0] sm:$0xf]  ;;  %v1340_v55 = vld [vmem:[%s1481_s18 + $0xf4] sm:$0xf0]  ;;  %v1315_v56 = vld [vmem:[%s1481_s18 + $0x34] sm:$0xf]  ;;  %v1069_v60 = vor.u32 %v1316_v53, %v1068_v52 }
  0x1a   : > { %v1070_v57 = vld [vmem:[%s1481_s18 + $0x38] sm:$0xf0]  ;;  %v1341_v58 = vld [vmem:[%s1481_s18 + $0x104] sm:$0xf]  ;;  %v1174_v59 = vld [vmem:[%s1481_s18 + $0x108] sm:$0xf0]  ;;  %v1165_v61 = vor.u32 %v1340_v55, %v1164_v54 }
  0x1b   : > { %v1073_v62 = vor.u32 %v1315_v56, %v1070_v57  ;;  %v1177_v63 = vor.u32 %v1341_v58, %v1174_v59  ;;  %v1076_v0 = vld [vmem:[%s1481_s18 + $0x40] sm:$0xf]  ;;  %v1318_v1 = vld [vmem:[%s1481_s18 + $0x44] sm:$0xf0]  ;;  %v1317_v4 = vld [vmem:[%s1481_s18 + $0x44] sm:$0xf] }
  0x1c   : > { %613 = vmatpush.bf16.msra.mxu0 %v1362_v8  ;;  %1379 = vmatpush.bf16.msra.mxu2 %v1362_v8  ;;  %v1172_v2 = vld [vmem:[%s1481_s18 + $0x100] sm:$0xf]  ;;  %v1342_v3 = vld [vmem:[%s1481_s18 + $0x104] sm:$0xf0]  ;;  %v1078_v5 = vld [vmem:[%s1481_s18 + $0x48] sm:$0xf0]  ;;  %v1077_v8 = vor.u32 %v1318_v1, %v1076_v0 }
  0x1d   : > { %747 = vmatpush.bf16.msra.mxu1 %v1370_v9  ;;  %1387 = vmatpush.bf16.msra.mxu3 %v1370_v9  ;;  %v1343_v6 = vld [vmem:[%s1481_s18 + $0x114] sm:$0xf]  ;;  %v1182_v7 = vld [vmem:[%s1481_s18 + $0x118] sm:$0xf0]  ;;  %v1173_v9 = vor.u32 %v1342_v3, %v1172_v2  ;;  %v1345_v18 = vld [vmem:[%s1481_s18 + $0x124] sm:$0xf] }
  0x1e   : > { %v1319_v16 = vld [vmem:[%s1481_s18 + $0x54] sm:$0xf]  ;;  %v1086_v17 = vld [vmem:[%s1481_s18 + $0x58] sm:$0xf0]  ;;  %v1190_v19 = vld [vmem:[%s1481_s18 + $0x128] sm:$0xf0] }
  0x1f   : > { %v1089_v22 = vor.u32 %v1319_v16, %v1086_v17  ;;  %v1193_v23 = vor.u32 %v1345_v18, %v1190_v19  ;;  %v1321_v28 = vld [vmem:[%s1481_s18 + $0x64] sm:$0xf]  ;;  %v1094_v29 = vld [vmem:[%s1481_s18 + $0x68] sm:$0xf0]  ;;  %v1347_v30 = vld [vmem:[%s1481_s18 + $0x134] sm:$0xf] }
  0x20   : > { %614 = vmatpush.bf16.msra.mxu0 %v1361_v10  ;;  %1380 = vmatpush.bf16.msra.mxu2 %v1361_v10  ;;  %v1081_v10 = vor.u32 %v1317_v4, %v1078_v5  ;;  %v1198_v31 = vld [vmem:[%s1481_s18 + $0x138] sm:$0xf0]  ;;  %v1097_v34 = vor.u32 %v1321_v28, %v1094_v29  ;;  %v1323_v40 = vld [vmem:[%s1481_s18 + $0x74] sm:$0xf]  ;;  %v1349_v42 = vld [vmem:[%s1481_s18 + $0x144] sm:$0xf] }
  0x21   : > { %748 = vmatpush.bf16.msra.mxu1 %v1369_v11  ;;  %1388 = vmatpush.bf16.msra.mxu3 %v1369_v11  ;;  %v1185_v11 = vor.u32 %v1343_v6, %v1182_v7  ;;  %v1201_v35 = vor.u32 %v1347_v30, %v1198_v31  ;;  %v1102_v41 = vld [vmem:[%s1481_s18 + $0x78] sm:$0xf0]  ;;  %v1206_v43 = vld [vmem:[%s1481_s18 + $0x148] sm:$0xf0]  ;;  %v1350_v52 = vld [vmem:[%s1481_s18 + $0x144] sm:$0xf0] }
  0x22   : > { %v1105_v46 = vor.u32 %v1323_v40, %v1102_v41  ;;  %v1209_v47 = vor.u32 %v1349_v42, %v1206_v43  ;;  %v1325_v53 = vld [vmem:[%s1481_s18 + $0x84] sm:$0xf]  ;;  %v1110_v54 = vld [vmem:[%s1481_s18 + $0x88] sm:$0xf0]  ;;  %v1351_v55 = vld [vmem:[%s1481_s18 + $0x154] sm:$0xf] }
  0x23   : > { %v1214_v56 = vld [vmem:[%s1481_s18 + $0x158] sm:$0xf0]  ;;  %v1222_v16 = vld [vmem:[%s1481_s18 + $0x168] sm:$0xf0]  ;;  %v1354_v40 = vld [vmem:[%s1481_s18 + $0x164] sm:$0xf0] }
  0x24   : > { %615 = vmatpush.bf16.msra.mxu0 %v1360_v12  ;;  %1381 = vmatpush.bf16.msra.mxu2 %v1360_v12  ;;  %v1084_v12 = vld [vmem:[%s1481_s18 + $0x50] sm:$0xf]  ;;  %v1329_v41 = vld [vmem:[%s1481_s18 + $0xa4] sm:$0xf]  ;;  %v1126_v42 = vld [vmem:[%s1481_s18 + $0xa8] sm:$0xf0] }
  0x25   : > { %749 = vmatpush.bf16.msra.mxu1 %v1368_v13  ;;  %1389 = vmatpush.bf16.msra.mxu3 %v1368_v13  ;;  %v1320_v13 = vld [vmem:[%s1481_s18 + $0x54] sm:$0xf0] }
  0x26   : > { %v1085_v20 = vor.u32 %v1320_v13, %v1084_v12  ;;  %v1327_v12 = vld [vmem:[%s1481_s18 + $0x94] sm:$0xf] }
  0x28   : > { %616 = vmatpush.bf16.msra.mxu0 %v1359_v14  ;;  %1382 = vmatpush.bf16.msra.mxu2 %v1359_v14  ;;  %v1180_v14 = vld [vmem:[%s1481_s18 + $0x110] sm:$0xf] }
  0x29   : > { %750 = vmatpush.bf16.msra.mxu1 %v1367_v15  ;;  %1390 = vmatpush.bf16.msra.mxu3 %v1367_v15  ;;  %v1344_v15 = vld [vmem:[%s1481_s18 + $0x114] sm:$0xf0] }
  0x2a   : > { %v1181_v21 = vor.u32 %v1344_v15, %v1180_v14  ;;  %v1118_v14 = vld [vmem:[%s1481_s18 + $0x98] sm:$0xf0]  ;;  %v1353_v15 = vld [vmem:[%s1481_s18 + $0x164] sm:$0xf] }
  0x2b   : > { %617 = vmatmul.bf16.vlgmr.msra.gmra.mxu0 %v1045_v24  ;;  %677 = vmatmul.bf16.vlgmr.msra.gmra.mxu2 %v1141_v25  ;;  %v1092_v24 = vld [vmem:[%s1481_s18 + $0x60] sm:$0xf]  ;;  %v1322_v25 = vld [vmem:[%s1481_s18 + $0x64] sm:$0xf0] }
  0x2c   : > { %751 = vmatmul.bf16.vlgmr.msra.gmra.mxu1 %v1049_v26  ;;  %816 = vmatmul.bf16.vlgmr.msra.gmra.mxu3 %v1153_v27  ;;  %v1188_v26 = vld [vmem:[%s1481_s18 + $0x120] sm:$0xf]  ;;  %v1346_v27 = vld [vmem:[%s1481_s18 + $0x124] sm:$0xf0]  ;;  %v1093_v32 = vor.u32 %v1322_v25, %v1092_v24 }
  0x2d   : > { %v1189_v33 = vor.u32 %v1346_v27, %v1188_v26 }
  0x3b   : > { %622 = vmatmul.bf16.gmra.mxu0 %v1053_v36  ;;  %682 = vmatmul.bf16.gmra.mxu2 %v1149_v37  ;;  %v1100_v36 = vld [vmem:[%s1481_s18 + $0x70] sm:$0xf]  ;;  %v1324_v37 = vld [vmem:[%s1481_s18 + $0x74] sm:$0xf0] }
  0x3c   : > { %756 = vmatmul.bf16.gmra.mxu1 %v1057_v38  ;;  %821 = vmatmul.bf16.gmra.mxu3 %v1161_v39  ;;  %v1196_v38 = vld [vmem:[%s1481_s18 + $0x130] sm:$0xf]  ;;  %v1348_v39 = vld [vmem:[%s1481_s18 + $0x134] sm:$0xf0]  ;;  %v1101_v44 = vor.u32 %v1324_v37, %v1100_v36  ;;  %v1124_v37 = vld [vmem:[%s1481_s18 + $0xa0] sm:$0xf] }
  0x3d   : > { %v1197_v45 = vor.u32 %v1348_v39, %v1196_v38  ;;  %v1330_v38 = vld [vmem:[%s1481_s18 + $0xa4] sm:$0xf0]  ;;  %v1220_v39 = vld [vmem:[%s1481_s18 + $0x160] sm:$0xf] }
  0x4b   : > { %627 = vmatmul.bf16.gmra.mxu0 %v1061_v48  ;;  %687 = vmatmul.bf16.gmra.mxu2 %v1157_v49  ;;  %v1559_v48 = vld [vmem:[%s1764_s2] ss:$0 sm:$0xff] }
  0x4c   : > { %761 = vmatmul.bf16.gmra.mxu1 %v1065_v50  ;;  %826 = vmatmul.bf16.gmra.mxu3 %v1169_v51  ;;  %v1108_v49 = vld [vmem:[%s1481_s18 + $0x80] sm:$0xf]  ;;  %v1326_v50 = vld [vmem:[%s1481_s18 + $0x84] sm:$0xf0] }
  0x4d   : > { %v1204_v51 = vld [vmem:[%s1481_s18 + $0x140] sm:$0xf]  ;;  %v1109_v57 = vor.u32 %v1326_v50, %v1108_v49  ;;  %v1125_v49 = vor.u32 %v1330_v38, %v1124_v37  ;;  %v1221_v50 = vor.u32 %v1354_v40, %v1220_v39 }
  0x4e   : > { %v1205_v58 = vor.u32 %v1350_v52, %v1204_v51  ;;  %v1236_v40 = vld [vmem:[%s1481_s18 + $0x180] sm:$0xf] }
  0x5b   : > { %632 = vmatmul.bf16.gmra.mxu0 %v1069_v60  ;;  %692 = vmatmul.bf16.gmra.mxu2 %v1165_v61  ;;  %v1113_v60 = vor.u32 %v1325_v53, %v1110_v54  ;;  %v1217_v61 = vor.u32 %v1351_v55, %v1214_v56  ;;  %v1129_v53 = vor.u32 %v1329_v41, %v1126_v42  ;;  %v1358_v41 = vld [vmem:[%s1481_s18 + $0x184] sm:$0xf0] }
  0x5c   : > { %766 = vmatmul.bf16.gmra.mxu1 %v1073_v62  ;;  %831 = vmatmul.bf16.gmra.mxu3 %v1177_v63 }
  0x6b   : > { %637 = vmatmul.bf16.gmra.mxu0 %v1077_v8  ;;  %697 = vmatmul.bf16.gmra.mxu2 %v1173_v9  ;;  %v1116_v8 = vld [vmem:[%s1481_s18 + $0x90] sm:$0xf]  ;;  %v1328_v9 = vld [vmem:[%s1481_s18 + $0x94] sm:$0xf0] }
  0x6c   : > { %771 = vmatmul.bf16.gmra.mxu1 %v1081_v10  ;;  %836 = vmatmul.bf16.gmra.mxu3 %v1185_v11  ;;  %v1212_v10 = vld [vmem:[%s1481_s18 + $0x150] sm:$0xf]  ;;  %v1352_v11 = vld [vmem:[%s1481_s18 + $0x154] sm:$0xf0]  ;;  %v1117_v18 = vor.u32 %v1328_v9, %v1116_v8 }
  0x6d   : > { %v1213_v19 = vor.u32 %v1352_v11, %v1212_v10  ;;  %v1332_v8 = vld [vmem:[%s1481_s18 + $0xb4] sm:$0xf0]  ;;  %v1228_v9 = vld [vmem:[%s1481_s18 + $0x170] sm:$0xf]  ;;  %v1331_v11 = vld [vmem:[%s1481_s18 + $0xb4] sm:$0xf] }
  0x6e   : > { %v1356_v10 = vld [vmem:[%s1481_s18 + $0x174] sm:$0xf0] }
  0x7b   : > { %642 = vmatmul.bf16.gmra.mxu0 %v1085_v20  ;;  %702 = vmatmul.bf16.gmra.mxu2 %v1181_v21 }
  0x7c   : > { %776 = vmatmul.bf16.gmra.mxu1 %v1089_v22  ;;  %841 = vmatmul.bf16.gmra.mxu3 %v1193_v23  ;;  %v1121_v22 = vor.u32 %v1327_v12, %v1118_v14  ;;  %v1225_v23 = vor.u32 %v1353_v15, %v1222_v16  ;;  %v1134_v12 = vld [vmem:[%s1481_s18 + $0xb8] sm:$0xf0]  ;;  %v1357_v14 = vld [vmem:[%s1481_s18 + $0x184] sm:$0xf]  ;;  %v1238_v15 = vld [vmem:[%s1481_s18 + $0x188] sm:$0xf0] }
  0x8b   : > { %647 = vmatmul.bf16.gmra.mxu0 %v1093_v32  ;;  %707 = vmatmul.bf16.gmra.mxu2 %v1189_v33 }
  0x8c   : > { %781 = vmatmul.bf16.gmra.mxu1 %v1097_v34  ;;  %846 = vmatmul.bf16.gmra.mxu3 %v1201_v35 }
  0x9b   : > { %652 = vmatmul.bf16.gmra.mxu0 %v1101_v44  ;;  %712 = vmatmul.bf16.gmra.mxu2 %v1197_v45  ;;  %v1355_v44 = vld [vmem:[%s1481_s18 + $0x174] sm:$0xf]  ;;  %v1230_v45 = vld [vmem:[%s1481_s18 + $0x178] sm:$0xf0] }
  0x9c   : > { %786 = vmatmul.bf16.gmra.mxu1 %v1105_v46  ;;  %851 = vmatmul.bf16.gmra.mxu3 %v1209_v47  ;;  %v1233_v54 = vor.u32 %v1355_v44, %v1230_v45  ;;  %v1142_v44 = vld [vmem:[%s1481_s18 + $0xc8] sm:$0xf0] }
  0xa8   : > { %v618_v59 = vpop.f32.mrf.mxu0 }
  0xa9   : > { %v619_v62 = vadd.f32 %v1559_v48, %v618_v59  ;;  %v752_v63 = vpop.f32.mrf.mxu1 }
  0xab   : > { %v753_v0 = vadd.f32 %v752_v63, %v619_v62  ;;  %657 = vmatmul.bf16.gmra.mxu0 %v1109_v57  ;;  %717 = vmatmul.bf16.gmra.mxu2 %v1205_v58 }
  0xac   : > { %791 = vmatmul.bf16.gmra.mxu1 %v1113_v60  ;;  %856 = vmatmul.bf16.gmra.mxu3 %v1217_v61 }
  0xad   : > { %v877_v1 = vpack.c.bf16 %v753_v0, %v753_v0 }
  0xae   : > { %v1576_v2 = vpop.f32.mrf.mxu2 }
  0xaf   : > { %928 = vst.msk [vmem:[%s1574_s4] sm:$0xf] %vm927_vm0, %v877_v1  ;;  %v817_v3 = vpop.f32.mrf.mxu3 }
  0xb0   : > { %v620_v4 = vpop.f32.mrf.mxu0 }
  0xb1   : > { %v621_v5 = vadd.f32 %v1559_v48, %v620_v4  ;;  %v754_v6 = vpop.f32.mrf.mxu1 }
  0xb3   : > { %v755_v7 = vadd.f32 %v754_v6, %v621_v5 }
  0xb5   : > { %v878_v13 = vpack.c.bf16 %v755_v7, %v755_v7  ;;  %v1132_v7 = vld [vmem:[%s1481_s18 + $0xb0] sm:$0xf] }
  0xb6   : > { %v1589_v17 = vpop.f32.mrf.mxu2 }
  0xb7   : > { %929 = vst.msk [vmem:[%s1574_s4 + $0x4] sm:$0xf] %vm927_vm0, %v878_v13  ;;  %v819_v20 = vpop.f32.mrf.mxu3 }
  0xb8   : > { %v623_v21 = vpop.f32.mrf.mxu0 }
  0xb9   : > { %v624_v24 = vadd.f32 %v1559_v48, %v623_v21  ;;  %v757_v25 = vpop.f32.mrf.mxu1 }
  0xbb   : > { %v758_v26 = vadd.f32 %v757_v25, %v624_v24  ;;  %662 = vmatmul.bf16.gmra.mxu0 %v1117_v18  ;;  %722 = vmatmul.bf16.gmra.mxu2 %v1213_v19  ;;  %v1133_v19 = vor.u32 %v1332_v8, %v1132_v7  ;;  %v1241_v24 = vor.u32 %v1357_v14, %v1238_v15 }
  0xbc   : > { %796 = vmatmul.bf16.gmra.mxu1 %v1121_v22  ;;  %861 = vmatmul.bf16.gmra.mxu3 %v1225_v23  ;;  %v1137_v23 = vor.u32 %v1331_v11, %v1134_v12 }
  0xbd   : > { %v879_v27 = vpack.c.bf16 %v758_v26, %v758_v26 }
  0xbe   : > { %v683_v28 = vpop.f32.mrf.mxu2 }
  0xbf   : > { %930 = vst.msk [vmem:[%s1574_s4 + $0x8] sm:$0xf] %vm927_vm0, %v879_v27  ;;  %v684_v29 = vadd.f32 %v1559_v48, %v683_v28  ;;  %v822_v30 = vpop.f32.mrf.mxu3 }
  0xc0   : > { %v625_v31 = vpop.f32.mrf.mxu0 }
  0xc1   : > { %v818_v32 = vadd.f32 %v817_v3, %v684_v29  ;;  %v626_v33 = vadd.f32 %v1559_v48, %v625_v31  ;;  %v759_v34 = vpop.f32.mrf.mxu1 }
  0xc3   : > { %v903_v35 = vpack.c.bf16 %v818_v32, %v818_v32  ;;  %v760_v36 = vadd.f32 %v759_v34, %v626_v33 }
  0xc5   : > { %954 = vst.msk [vmem:[%s1574_s4 + $0x68] sm:$0xf] %vm927_vm0, %v903_v35  ;;  %v880_v43 = vpack.c.bf16 %v760_v36, %v760_v36 }
  0xc6   : > { %v685_v46 = vpop.f32.mrf.mxu2 }
  0xc7   : > { %931 = vst.msk [vmem:[%s1574_s4 + $0xc] sm:$0xf] %vm927_vm0, %v880_v43  ;;  %v686_v47 = vadd.f32 %v1559_v48, %v685_v46  ;;  %v824_v51 = vpop.f32.mrf.mxu3  ;;  %v1333_v43 = vld [vmem:[%s1481_s18 + $0xc4] sm:$0xf] }
  0xc8   : > { %v628_v52 = vpop.f32.mrf.mxu0 }
  0xc9   : > { %v820_v55 = vadd.f32 %v819_v20, %v686_v47  ;;  %v629_v56 = vadd.f32 %v1559_v48, %v628_v52  ;;  %v762_v57 = vpop.f32.mrf.mxu1  ;;  %v1229_v20 = vor.u32 %v1356_v10, %v1228_v9  ;;  %v1237_v47 = vor.u32 %v1358_v41, %v1236_v40 }
  0xcb   : > { %v904_v58 = vpack.c.bf16 %v820_v55, %v820_v55  ;;  %v763_v59 = vadd.f32 %v762_v57, %v629_v56  ;;  %667 = vmatmul.bf16.gmra.mxu0 %v1125_v49  ;;  %727 = vmatmul.bf16.gmra.mxu2 %v1221_v50 }
  0xcc   : > { %801 = vmatmul.bf16.gmra.mxu1 %v1129_v53  ;;  %866 = vmatmul.bf16.gmra.mxu3 %v1233_v54 }
  0xcd   : > { %955 = vst.msk [vmem:[%s1574_s4 + $0x6c] sm:$0xf] %vm927_vm0, %v904_v58  ;;  %v881_v60 = vpack.c.bf16 %v763_v59, %v763_v59 }
  0xce   : > { %v688_v61 = vpop.f32.mrf.mxu2 }
  0xcf   : > { %932 = vst.msk [vmem:[%s1574_s4 + $0x10] sm:$0xf] %vm927_vm0, %v881_v60  ;;  %v689_v62 = vadd.f32 %v1559_v48, %v688_v61  ;;  %v827_v63 = vpop.f32.mrf.mxu3 }
  0xd0   : > { %v630_v0 = vpop.f32.mrf.mxu0 }
  0xd1   : > { %v823_v1 = vadd.f32 %v822_v30, %v689_v62  ;;  %v631_v3 = vadd.f32 %v1559_v48, %v630_v0  ;;  %v764_v4 = vpop.f32.mrf.mxu1 }
  0xd3   : > { %v905_v5 = vpack.c.bf16 %v823_v1, %v823_v1  ;;  %v765_v6 = vadd.f32 %v764_v4, %v631_v3 }
  0xd5   : > { %956 = vst.msk [vmem:[%s1574_s4 + $0x70] sm:$0xf] %vm927_vm0, %v905_v5  ;;  %v882_v13 = vpack.c.bf16 %v765_v6, %v765_v6 }
  0xd6   : > { %v690_v16 = vpop.f32.mrf.mxu2 }
  0xd7   : > { %933 = vst.msk [vmem:[%s1574_s4 + $0x14] sm:$0xf] %vm927_vm0, %v882_v13  ;;  %v691_v18 = vadd.f32 %v1559_v48, %v690_v16  ;;  %v829_v21 = vpop.f32.mrf.mxu3 }
  0xd8   : > { %v633_v22 = vpop.f32.mrf.mxu0 }
  0xd9   : > { %v825_v25 = vadd.f32 %v824_v51, %v691_v18  ;;  %v634_v26 = vadd.f32 %v1559_v48, %v633_v22  ;;  %v767_v27 = vpop.f32.mrf.mxu1  ;;  %v1145_v51 = vor.u32 %v1333_v43, %v1142_v44 }
  0xdb   : > { %v906_v28 = vpack.c.bf16 %v825_v25, %v825_v25  ;;  %v768_v29 = vadd.f32 %v767_v27, %v634_v26  ;;  %672 = vmatmul.bf16.gmra.mxu0 %v1133_v19  ;;  %732 = vmatmul.bf16.gmra.mxu2 %v1229_v20 }
  0xdc   : > { %806 = vmatmul.bf16.gmra.mxu1 %v1137_v23  ;;  %871 = vmatmul.bf16.gmra.mxu3 %v1241_v24 }
  0xdd   : > { %957 = vst.msk [vmem:[%s1574_s4 + $0x74] sm:$0xf] %vm927_vm0, %v906_v28  ;;  %v883_v30 = vpack.c.bf16 %v768_v29, %v768_v29 }
  0xde   : > { %v693_v31 = vpop.f32.mrf.mxu2 }
  0xdf   : > { %934 = vst.msk [vmem:[%s1574_s4 + $0x18] sm:$0xf] %vm927_vm0, %v883_v30  ;;  %v694_v32 = vadd.f32 %v1559_v48, %v693_v31  ;;  %v832_v33 = vpop.f32.mrf.mxu3 }
  0xe0   : > { %v635_v34 = vpop.f32.mrf.mxu0 }
  0xe1   : > { %v828_v35 = vadd.f32 %v827_v63, %v694_v32  ;;  %v636_v36 = vadd.f32 %v1559_v48, %v635_v34  ;;  %v769_v37 = vpop.f32.mrf.mxu1 }
  0xe3   : > { %v907_v38 = vpack.c.bf16 %v828_v35, %v828_v35  ;;  %v770_v39 = vadd.f32 %v769_v37, %v636_v36 }
  0xe5   : > { %958 = vst.msk [vmem:[%s1574_s4 + $0x78] sm:$0xf] %vm927_vm0, %v907_v38  ;;  %v884_v42 = vpack.c.bf16 %v770_v39, %v770_v39 }
  0xe6   : > { %v695_v45 = vpop.f32.mrf.mxu2 }
  0xe7   : > { %935 = vst.msk [vmem:[%s1574_s4 + $0x1c] sm:$0xf] %vm927_vm0, %v884_v42  ;;  %v696_v46 = vadd.f32 %v1559_v48, %v695_v45  ;;  %v834_v49 = vpop.f32.mrf.mxu3 }
  0xe8   : > { %v638_v50 = vpop.f32.mrf.mxu0 }
  0xe9   : > { %v830_v52 = vadd.f32 %v829_v21, %v696_v46  ;;  %v639_v53 = vadd.f32 %v1559_v48, %v638_v50  ;;  %v772_v54 = vpop.f32.mrf.mxu1 }
  0xeb   : > { %v908_v55 = vpack.c.bf16 %v830_v52, %v830_v52  ;;  %v773_v56 = vadd.f32 %v772_v54, %v639_v53  ;;  %737 = vmatmul.bf16.gmra.mxu2 %v1237_v47 }
  0xec   : > { %811 = vmatmul.bf16.gmra.mxu1 %v1145_v51 }
  0xed   : > { %959 = vst.msk [vmem:[%s1574_s4 + $0x7c] sm:$0xf] %vm927_vm0, %v908_v55  ;;  %v885_v57 = vpack.c.bf16 %v773_v56, %v773_v56 }
  0xee   : > { %v698_v58 = vpop.f32.mrf.mxu2 }
  0xef   : > { %936 = vst.msk [vmem:[%s1574_s4 + $0x20] sm:$0xf] %vm927_vm0, %v885_v57  ;;  %v699_v59 = vadd.f32 %v1559_v48, %v698_v58  ;;  %v837_v60 = vpop.f32.mrf.mxu3 }
  0xf0   : > { %v640_v61 = vpop.f32.mrf.mxu0 }
  0xf1   : > { %v833_v62 = vadd.f32 %v832_v33, %v699_v59  ;;  %v641_v63 = vadd.f32 %v1559_v48, %v640_v61  ;;  %v774_v0 = vpop.f32.mrf.mxu1 }
  0xf3   : > { %v909_v1 = vpack.c.bf16 %v833_v62, %v833_v62  ;;  %v775_v3 = vadd.f32 %v774_v0, %v641_v63 }
  0xf5   : > { %960 = vst.msk [vmem:[%s1574_s4 + $0x80] sm:$0xf] %vm927_vm0, %v909_v1  ;;  %v886_v4 = vpack.c.bf16 %v775_v3, %v775_v3 }
  0xf6   : > { %v700_v5 = vpop.f32.mrf.mxu2 }
  0xf7   : > { %937 = vst.msk [vmem:[%s1574_s4 + $0x24] sm:$0xf] %vm927_vm0, %v886_v4  ;;  %v701_v6 = vadd.f32 %v1559_v48, %v700_v5  ;;  %v839_v7 = vpop.f32.mrf.mxu3 }
  0xf8   : > { %v643_v8 = vpop.f32.mrf.mxu0 }
  0xf9   : > { %v835_v9 = vadd.f32 %v834_v49, %v701_v6  ;;  %v644_v10 = vadd.f32 %v1559_v48, %v643_v8  ;;  %v777_v11 = vpop.f32.mrf.mxu1 }
  0xfb   : > { %v910_v12 = vpack.c.bf16 %v835_v9, %v835_v9  ;;  %v778_v13 = vadd.f32 %v777_v11, %v644_v10 }
  0xfd   : > { %961 = vst.msk [vmem:[%s1574_s4 + $0x84] sm:$0xf] %vm927_vm0, %v910_v12  ;;  %v887_v14 = vpack.c.bf16 %v778_v13, %v778_v13 }
  0xfe   : > { %v703_v15 = vpop.f32.mrf.mxu2 }
  0xff   : > { %938 = vst.msk [vmem:[%s1574_s4 + $0x28] sm:$0xf] %vm927_vm0, %v887_v14  ;;  %v704_v16 = vadd.f32 %v1559_v48, %v703_v15  ;;  %v842_v18 = vpop.f32.mrf.mxu3 }
 0x100   : > { %v645_v19 = vpop.f32.mrf.mxu0 }
 0x101   : > { %v838_v20 = vadd.f32 %v837_v60, %v704_v16  ;;  %v646_v21 = vadd.f32 %v1559_v48, %v645_v19  ;;  %v779_v22 = vpop.f32.mrf.mxu1 }
 0x103   : > { %v911_v23 = vpack.c.bf16 %v838_v20, %v838_v20  ;;  %v780_v24 = vadd.f32 %v779_v22, %v646_v21 }
 0x105   : > { %962 = vst.msk [vmem:[%s1574_s4 + $0x88] sm:$0xf] %vm927_vm0, %v911_v23  ;;  %v888_v25 = vpack.c.bf16 %v780_v24, %v780_v24 }
 0x106   : > { %v705_v26 = vpop.f32.mrf.mxu2 }
 0x107   : > { %939 = vst.msk [vmem:[%s1574_s4 + $0x2c] sm:$0xf] %vm927_vm0, %v888_v25  ;;  %v706_v27 = vadd.f32 %v1559_v48, %v705_v26  ;;  %v844_v28 = vpop.f32.mrf.mxu3 }
 0x108   : > { %v648_v29 = vpop.f32.mrf.mxu0 }
 0x109   : > { %v840_v30 = vadd.f32 %v839_v7, %v706_v27  ;;  %v649_v31 = vadd.f32 %v1559_v48, %v648_v29  ;;  %v782_v32 = vpop.f32.mrf.mxu1 }
 0x10b   : > { %v912_v33 = vpack.c.bf16 %v840_v30, %v840_v30  ;;  %v783_v34 = vadd.f32 %v782_v32, %v649_v31 }
 0x10d   : > { %963 = vst.msk [vmem:[%s1574_s4 + $0x8c] sm:$0xf] %vm927_vm0, %v912_v33  ;;  %v889_v35 = vpack.c.bf16 %v783_v34, %v783_v34 }
 0x10e   : > { %v708_v36 = vpop.f32.mrf.mxu2 }
 0x10f   : > { %940 = vst.msk [vmem:[%s1574_s4 + $0x30] sm:$0xf] %vm927_vm0, %v889_v35  ;;  %v709_v37 = vadd.f32 %v1559_v48, %v708_v36  ;;  %v847_v38 = vpop.f32.mrf.mxu3 }
 0x110   : > { %v650_v39 = vpop.f32.mrf.mxu0 }
 0x111   : > { %v843_v40 = vadd.f32 %v842_v18, %v709_v37  ;;  %v651_v41 = vadd.f32 %v1559_v48, %v650_v39  ;;  %v784_v42 = vpop.f32.mrf.mxu1 }
 0x113   : > { %v913_v43 = vpack.c.bf16 %v843_v40, %v843_v40  ;;  %v785_v44 = vadd.f32 %v784_v42, %v651_v41 }
 0x115   : > { %964 = vst.msk [vmem:[%s1574_s4 + $0x90] sm:$0xf] %vm927_vm0, %v913_v43  ;;  %v890_v45 = vpack.c.bf16 %v785_v44, %v785_v44 }
 0x116   : > { %v710_v46 = vpop.f32.mrf.mxu2 }
 0x117   : > { %941 = vst.msk [vmem:[%s1574_s4 + $0x34] sm:$0xf] %vm927_vm0, %v890_v45  ;;  %v711_v47 = vadd.f32 %v1559_v48, %v710_v46  ;;  %v849_v49 = vpop.f32.mrf.mxu3 }
 0x118   : > { %v653_v50 = vpop.f32.mrf.mxu0 }
 0x119   : > { %v845_v51 = vadd.f32 %v844_v28, %v711_v47  ;;  %v654_v52 = vadd.f32 %v1559_v48, %v653_v50  ;;  %v787_v53 = vpop.f32.mrf.mxu1 }
 0x11b   : > { %v914_v54 = vpack.c.bf16 %v845_v51, %v845_v51  ;;  %v788_v55 = vadd.f32 %v787_v53, %v654_v52 }
 0x11d   : > { %965 = vst.msk [vmem:[%s1574_s4 + $0x94] sm:$0xf] %vm927_vm0, %v914_v54  ;;  %v891_v56 = vpack.c.bf16 %v788_v55, %v788_v55 }
 0x11e   : > { %v713_v57 = vpop.f32.mrf.mxu2 }
 0x11f   : > { %942 = vst.msk [vmem:[%s1574_s4 + $0x38] sm:$0xf] %vm927_vm0, %v891_v56  ;;  %v714_v58 = vadd.f32 %v1559_v48, %v713_v57  ;;  %v852_v59 = vpop.f32.mrf.mxu3 }
 0x120   : > { %v655_v60 = vpop.f32.mrf.mxu0 }
 0x121   : > { %v848_v61 = vadd.f32 %v847_v38, %v714_v58  ;;  %v656_v62 = vadd.f32 %v1559_v48, %v655_v60  ;;  %v789_v63 = vpop.f32.mrf.mxu1 }
 0x123   : > { %v915_v0 = vpack.c.bf16 %v848_v61, %v848_v61  ;;  %v790_v1 = vadd.f32 %v789_v63, %v656_v62 }
 0x125   : > { %966 = vst.msk [vmem:[%s1574_s4 + $0x98] sm:$0xf] %vm927_vm0, %v915_v0  ;;  %v892_v3 = vpack.c.bf16 %v790_v1, %v790_v1 }
 0x126   : > { %v715_v4 = vpop.f32.mrf.mxu2 }
 0x127   : > { %943 = vst.msk [vmem:[%s1574_s4 + $0x3c] sm:$0xf] %vm927_vm0, %v892_v3  ;;  %v716_v5 = vadd.f32 %v1559_v48, %v715_v4  ;;  %v854_v7 = vpop.f32.mrf.mxu3 }
 0x128   : > { %v658_v6 = vpop.f32.mrf.mxu0 }
 0x129   : > { %v850_v8 = vadd.f32 %v849_v49, %v716_v5  ;;  %v659_v9 = vadd.f32 %v1559_v48, %v658_v6  ;;  %v792_v10 = vpop.f32.mrf.mxu1 }
 0x12b   : > { %v916_v11 = vpack.c.bf16 %v850_v8, %v850_v8  ;;  %v793_v12 = vadd.f32 %v792_v10, %v659_v9 }
 0x12d   : > { %967 = vst.msk [vmem:[%s1574_s4 + $0x9c] sm:$0xf] %vm927_vm0, %v916_v11  ;;  %v893_v13 = vpack.c.bf16 %v793_v12, %v793_v12 }
 0x12e   : > { %v718_v14 = vpop.f32.mrf.mxu2 }
 0x12f   : > { %944 = vst.msk [vmem:[%s1574_s4 + $0x40] sm:$0xf] %vm927_vm0, %v893_v13  ;;  %v719_v15 = vadd.f32 %v1559_v48, %v718_v14  ;;  %v857_v21 = vpop.f32.mrf.mxu3 }
 0x130   : > { %v660_v16 = vpop.f32.mrf.mxu0 }
 0x131   : > { %v853_v18 = vadd.f32 %v852_v59, %v719_v15  ;;  %v661_v19 = vadd.f32 %v1559_v48, %v660_v16  ;;  %v794_v20 = vpop.f32.mrf.mxu1 }
 0x133   : > { %v917_v22 = vpack.c.bf16 %v853_v18, %v853_v18  ;;  %v795_v23 = vadd.f32 %v794_v20, %v661_v19 }
 0x135   : > { %968 = vst.msk [vmem:[%s1574_s4 + $0xa0] sm:$0xf] %vm927_vm0, %v917_v22  ;;  %v894_v24 = vpack.c.bf16 %v795_v23, %v795_v23 }
 0x136   : > { %v720_v25 = vpop.f32.mrf.mxu2 }
 0x137   : > { %945 = vst.msk [vmem:[%s1574_s4 + $0x44] sm:$0xf] %vm927_vm0, %v894_v24  ;;  %v721_v26 = vadd.f32 %v1559_v48, %v720_v25  ;;  %v859_v33 = vpop.f32.mrf.mxu3  ;;  %v679_v25 = vadd.f32 %v1559_v48, %v1576_v2 }
 0x138   : > { %v663_v27 = vpop.f32.mrf.mxu0 }
 0x139   : > { %v855_v28 = vadd.f32 %v854_v7, %v721_v26  ;;  %v664_v29 = vadd.f32 %v1559_v48, %v663_v27  ;;  %v797_v30 = vpop.f32.mrf.mxu1 }
 0x13b   : > { %v918_v31 = vpack.c.bf16 %v855_v28, %v855_v28  ;;  %v798_v32 = vadd.f32 %v797_v30, %v664_v29 }
 0x13d   : > { %969 = vst.msk [vmem:[%s1574_s4 + $0xa4] sm:$0xf] %vm927_vm0, %v918_v31  ;;  %v895_v34 = vpack.c.bf16 %v798_v32, %v798_v32 }
 0x13e   : > { %v723_v35 = vpop.f32.mrf.mxu2 }
 0x13f   : > { %946 = vst.msk [vmem:[%s1574_s4 + $0x48] sm:$0xf] %vm927_vm0, %v895_v34  ;;  %v724_v36 = vadd.f32 %v1559_v48, %v723_v35  ;;  %v862_v45 = vpop.f32.mrf.mxu3  ;;  %v681_v34 = vadd.f32 %v1559_v48, %v1589_v17 }
 0x140   : > { %v665_v37 = vpop.f32.mrf.mxu0 }
 0x141   : > { %v858_v38 = vadd.f32 %v857_v21, %v724_v36  ;;  %v666_v39 = vadd.f32 %v1559_v48, %v665_v37  ;;  %v799_v40 = vpop.f32.mrf.mxu1 }
 0x143   : > { %v919_v41 = vpack.c.bf16 %v858_v38, %v858_v38  ;;  %v800_v42 = vadd.f32 %v799_v40, %v666_v39 }
 0x145   : > { %970 = vst.msk [vmem:[%s1574_s4 + $0xa8] sm:$0xf] %vm927_vm0, %v919_v41  ;;  %v896_v43 = vpack.c.bf16 %v800_v42, %v800_v42 }
 0x146   : > { %v725_v44 = vpop.f32.mrf.mxu2 }
 0x147   : > { %947 = vst.msk [vmem:[%s1574_s4 + $0x4c] sm:$0xf] %vm927_vm0, %v896_v43  ;;  %v726_v46 = vadd.f32 %v1559_v48, %v725_v44  ;;  %v864_v58 = vpop.f32.mrf.mxu3 }
 0x148   : > { %v668_v47 = vpop.f32.mrf.mxu0 }
 0x149   : > { %v860_v49 = vadd.f32 %v859_v33, %v726_v46  ;;  %v669_v50 = vadd.f32 %v1559_v48, %v668_v47  ;;  %v802_v51 = vpop.f32.mrf.mxu1 }
 0x14b   : > { %v920_v52 = vpack.c.bf16 %v860_v49, %v860_v49  ;;  %v803_v53 = vadd.f32 %v802_v51, %v669_v50 }
 0x14d   : > { %971 = vst.msk [vmem:[%s1574_s4 + $0xac] sm:$0xf] %vm927_vm0, %v920_v52  ;;  %v897_v54 = vpack.c.bf16 %v803_v53, %v803_v53 }
 0x14e   : > { %v728_v55 = vpop.f32.mrf.mxu2 }
 0x14f   : > { %948 = vst.msk [vmem:[%s1574_s4 + $0x50] sm:$0xf] %vm927_vm0, %v897_v54  ;;  %v729_v56 = vadd.f32 %v1559_v48, %v728_v55  ;;  %v867_v8 = vpop.f32.mrf.mxu3 }
 0x150   : > { %v670_v57 = vpop.f32.mrf.mxu0 }
 0x151   : > { %v863_v59 = vadd.f32 %v862_v45, %v729_v56  ;;  %v671_v60 = vadd.f32 %v1559_v48, %v670_v57  ;;  %v804_v61 = vpop.f32.mrf.mxu1 }
 0x153   : > { %v921_v62 = vpack.c.bf16 %v863_v59, %v863_v59  ;;  %v805_v63 = vadd.f32 %v804_v61, %v671_v60 }
 0x155   : > { %972 = vst.msk [vmem:[%s1574_s4 + $0xb0] sm:$0xf] %vm927_vm0, %v921_v62  ;;  %v898_v0 = vpack.c.bf16 %v805_v63, %v805_v63 }
 0x156   : > { %v730_v1 = vpop.f32.mrf.mxu2 }
 0x157   : > { %949 = vst.msk [vmem:[%s1574_s4 + $0x54] sm:$0xf] %vm927_vm0, %v898_v0  ;;  %v731_v3 = vadd.f32 %v1559_v48, %v730_v1  ;;  %v869_v21 = vpop.f32.mrf.mxu3 }
 0x158   : > { %v673_v4 = vpop.f32.mrf.mxu0 }
 0x159   : > { %v865_v5 = vadd.f32 %v864_v58, %v731_v3  ;;  %v674_v6 = vadd.f32 %v1559_v48, %v673_v4  ;;  %v807_v7 = vpop.f32.mrf.mxu1 }
 0x15b   : > { %v922_v9 = vpack.c.bf16 %v865_v5, %v865_v5  ;;  %v808_v10 = vadd.f32 %v807_v7, %v674_v6 }
 0x15d   : > { %973 = vst.msk [vmem:[%s1574_s4 + $0xb4] sm:$0xf] %vm927_vm0, %v922_v9  ;;  %v899_v11 = vpack.c.bf16 %v808_v10, %v808_v10 }
 0x15e   : > { %v733_v12 = vpop.f32.mrf.mxu2 }
 0x15f   : > { %950 = vst.msk [vmem:[%s1574_s4 + $0x58] sm:$0xf] %vm927_vm0, %v899_v11  ;;  %v734_v13 = vadd.f32 %v1559_v48, %v733_v12  ;;  %v872_v31 = vpop.f32.mrf.mxu3 }
 0x160   : > { %v675_v14 = vpop.f32.mrf.mxu0 }
 0x161   : > { %v868_v15 = vadd.f32 %v867_v8, %v734_v13  ;;  %v676_v16 = vadd.f32 %v1559_v48, %v675_v14  ;;  %v809_v18 = vpop.f32.mrf.mxu1 }
 0x163   : > { %v923_v19 = vpack.c.bf16 %v868_v15, %v868_v15  ;;  %v810_v20 = vadd.f32 %v809_v18, %v676_v16 }
 0x165   : > { %974 = vst.msk [vmem:[%s1574_s4 + $0xb8] sm:$0xf] %vm927_vm0, %v923_v19  ;;  %v900_v22 = vpack.c.bf16 %v810_v20, %v810_v20 }
 0x166   : > { %v735_v23 = vpop.f32.mrf.mxu2 }
 0x167   : > { %951 = vst.msk [vmem:[%s1574_s4 + $0x5c] sm:$0xf] %vm927_vm0, %v900_v22  ;;  %v736_v24 = vadd.f32 %v1559_v48, %v735_v23  ;;  %v874_v41 = vpop.f32.mrf.mxu3 }
 0x169   : > { %v870_v26 = vadd.f32 %v869_v21, %v736_v24  ;;  %v812_v27 = vpop.f32.mrf.mxu1 }
 0x16a   : > { %v813_v28 = vadd.f32 %v812_v27, %v679_v25 }
 0x16b   : > { %v924_v29 = vpack.c.bf16 %v870_v26, %v870_v26 }
 0x16c   : > { %v901_v30 = vpack.c.bf16 %v813_v28, %v813_v28 }
 0x16d   : > { %975 = vst.msk [vmem:[%s1574_s4 + $0xbc] sm:$0xf] %vm927_vm0, %v924_v29 }
 0x16e   : > { %952 = vst.msk [vmem:[%s1574_s4 + $0x60] sm:$0xf] %vm927_vm0, %v901_v30  ;;  %v738_v32 = vpop.f32.mrf.mxu2 }
 0x16f   : > { %v739_v33 = vadd.f32 %v1559_v48, %v738_v32 }
 0x171   : > { %v873_v2 = vadd.f32 %v872_v31, %v739_v33  ;;  %v814_v35 = vpop.f32.mrf.mxu1 }
 0x172   : > { %v815_v36 = vadd.f32 %v814_v35, %v681_v34 }
 0x173   : > { %v925_v37 = vpack.c.bf16 %v873_v2, %v873_v2 }
 0x174   : > { %v902_v38 = vpack.c.bf16 %v815_v36, %v815_v36 }
 0x175   : > { %976 = vst.msk [vmem:[%s1574_s4 + $0xc0] sm:$0xf] %vm927_vm0, %v925_v37 }
 0x176   : > { %953 = vst.msk [vmem:[%s1574_s4 + $0x64] sm:$0xf] %vm927_vm0, %v902_v38  ;;  %v740_v39 = vpop.f32.mrf.mxu2 }
 0x177   : > { %v741_v40 = vadd.f32 %v1559_v48, %v740_v39 }
 0x179   : > { %v875_v42 = vadd.f32 %v874_v41, %v741_v40 }
 0x17b   : > { %v926_v43 = vpack.c.bf16 %v875_v42, %v875_v42 }
 0x17d   : > { %977 = vst.msk [vmem:[%s1574_s4 + $0xc4] sm:$0xf] %vm927_vm0, %v926_v43 }
 0x17e PF: > { %s13_s12 = sadd.s32 1, %s1406_s12  }
 0x17f   : > { %p10_p4 = scmp.ge.s32.totalorder %s13_s12, 4  }
 0x181   :  { %12 = sbr.rel (!%p10_p4) target bundleno = 1 (0x1), region = 62 }

// kernel: nature_conv_body_forward.5
= control target key start
LH: loop header
LB: loop body
LE: loop exit
PB: predicated region body
PF: predicated region fallthrough
CT: control target
= control target key end

     0   :  { %vm803_vm0 = vcmask 519168   ;;  %vm824_vm1 = vcmask 516096   ;;  %s1662_s1 = inlined_call_operand.vmem [shape: bf16[512,64], index: 1, kind: input, shape index: {}]   ;;  %s1663_s2 = inlined_call_operand.vmem [shape: f32[1,64], index: 2, kind: input, shape index: {}]   ;;  %s1664_s0 = inlined_call_operand.vmem [shape: bf16[162,512], index: 0, kind: input, shape index: {}]   ;;  %s1665_s3 = inlined_call_operand.vmem [shape: bf16[162,64], index: 3, kind: output, shape index: {}]  }
   0x1   :  { %v1165_v0 = vld [vmem:[%s1662_s1 + $0x38] sm:$0xff]  ;;  %v1164_v4 = vld [vmem:[%s1662_s1 + $0x30] sm:$0xff]  ;;  %v1163_v8 = vld [vmem:[%s1662_s1 + $0x28] sm:$0xff] }
   0x2   :  { %v1173_v1 = vld [vmem:[%s1662_s1 + $0x78] sm:$0xff]  ;;  %530 = vmatpush.bf16.msra.mxu0 %v1165_v0  ;;  %v1172_v5 = vld [vmem:[%s1662_s1 + $0x70] sm:$0xff]  ;;  %v1171_v9 = vld [vmem:[%s1662_s1 + $0x68] sm:$0xff] }
   0x3   :  { %v1181_v2 = vld [vmem:[%s1662_s1 + $0xb8] sm:$0xff]  ;;  %593 = vmatpush.bf16.msra.mxu1 %v1173_v1  ;;  %v1180_v6 = vld [vmem:[%s1662_s1 + $0xb0] sm:$0xff]  ;;  %v1179_v10 = vld [vmem:[%s1662_s1 + $0xa8] sm:$0xff] }
   0x4   :  { %v1189_v3 = vld [vmem:[%s1662_s1 + $0xf8] sm:$0xff]  ;;  %656 = vmatpush.bf16.msra.mxu2 %v1181_v2  ;;  %v1188_v7 = vld [vmem:[%s1662_s1 + $0xf0] sm:$0xff]  ;;  %v1187_v11 = vld [vmem:[%s1662_s1 + $0xe8] sm:$0xff] }
   0x5   :  { %719 = vmatpush.bf16.msra.mxu3 %v1189_v3  ;;  %v1162_v12 = vld [vmem:[%s1662_s1 + $0x20] sm:$0xff]  ;;  %v1161_v16 = vld [vmem:[%s1662_s1 + $0x18] sm:$0xff]  ;;  %v1160_v20 = vld [vmem:[%s1662_s1 + $0x10] sm:$0xff] }
   0x6   :  { %531 = vmatpush.bf16.msra.mxu0 %v1164_v4  ;;  %v1170_v13 = vld [vmem:[%s1662_s1 + $0x60] sm:$0xff]  ;;  %v1169_v17 = vld [vmem:[%s1662_s1 + $0x58] sm:$0xff]  ;;  %v1168_v21 = vld [vmem:[%s1662_s1 + $0x50] sm:$0xff] }
   0x7   :  { %594 = vmatpush.bf16.msra.mxu1 %v1172_v5  ;;  %v1178_v14 = vld [vmem:[%s1662_s1 + $0xa0] sm:$0xff]  ;;  %v1177_v18 = vld [vmem:[%s1662_s1 + $0x98] sm:$0xff]  ;;  %v1176_v22 = vld [vmem:[%s1662_s1 + $0x90] sm:$0xff] }
   0x8   :  { %657 = vmatpush.bf16.msra.mxu2 %v1180_v6  ;;  %v1186_v15 = vld [vmem:[%s1662_s1 + $0xe0] sm:$0xff]  ;;  %v1185_v19 = vld [vmem:[%s1662_s1 + $0xd8] sm:$0xff]  ;;  %v1184_v23 = vld [vmem:[%s1662_s1 + $0xd0] sm:$0xff] }
   0x9   :  { %720 = vmatpush.bf16.msra.mxu3 %v1188_v7  ;;  %v1159_v24 = vld [vmem:[%s1662_s1 + $0x8] sm:$0xff]  ;;  %v1158_v28 = vld [vmem:[%s1662_s1] sm:$0xff]  ;;  %v1120_v33 = vld [vmem:[%s1664_s0 + $0xc] sm:$0xf0] }
   0xa   :  { %532 = vmatpush.bf16.msra.mxu0 %v1163_v8  ;;  %v1167_v25 = vld [vmem:[%s1662_s1 + $0x48] sm:$0xff]  ;;  %v1166_v29 = vld [vmem:[%s1662_s1 + $0x40] sm:$0xff]  ;;  %v834_v35 = vld [vmem:[%s1664_s0 + $0x10] sm:$0xf0] }
   0xb   :  { %595 = vmatpush.bf16.msra.mxu1 %v1171_v9  ;;  %v1175_v26 = vld [vmem:[%s1662_s1 + $0x88] sm:$0xff]  ;;  %v1174_v30 = vld [vmem:[%s1662_s1 + $0x80] sm:$0xff]  ;;  %v1121_v37 = vld [vmem:[%s1664_s0 + $0x14] sm:$0xf0] }
   0xc   :  { %658 = vmatpush.bf16.msra.mxu2 %v1179_v10  ;;  %v1183_v27 = vld [vmem:[%s1662_s1 + $0xc8] sm:$0xff]  ;;  %v1182_v31 = vld [vmem:[%s1662_s1 + $0xc0] sm:$0xff]  ;;  %v842_v39 = vld [vmem:[%s1664_s0 + $0x18] sm:$0xf0] }
   0xd   :  { %721 = vmatpush.bf16.msra.mxu3 %v1187_v11  ;;  %v832_v32 = vld [vmem:[%s1664_s0] sm:$0xf]  ;;  %v1118_v34 = vld [vmem:[%s1664_s0 + $0x4] sm:$0xf]  ;;  %v840_v36 = vld [vmem:[%s1664_s0 + $0x8] sm:$0xf] }
   0xe   :  { %533 = vmatpush.bf16.msra.mxu0 %v1162_v12  ;;  %v1119_v38 = vld [vmem:[%s1664_s0 + $0xc] sm:$0xf]  ;;  %v833_v40 = vor.u32 %v1120_v33, %v832_v32  ;;  %v837_v41 = vor.u32 %v1118_v34, %v834_v35  ;;  %v841_v42 = vor.u32 %v1121_v37, %v840_v36  ;;  %v848_v44 = vld [vmem:[%s1664_s0 + $0x20] sm:$0xf]  ;;  %v1124_v45 = vld [vmem:[%s1664_s0 + $0x2c] sm:$0xf0] }
   0xf   :  { %596 = vmatpush.bf16.msra.mxu1 %v1170_v13  ;;  %v845_v43 = vor.u32 %v1119_v38, %v842_v39  ;;  %v1122_v46 = vld [vmem:[%s1664_s0 + $0x24] sm:$0xf]  ;;  %v850_v47 = vld [vmem:[%s1664_s0 + $0x30] sm:$0xf0]  ;;  %v856_v48 = vld [vmem:[%s1664_s0 + $0x28] sm:$0xf]  ;;  %v849_v52 = vor.u32 %v1124_v45, %v848_v44 }
  0x10   :  { %659 = vmatpush.bf16.msra.mxu2 %v1178_v14  ;;  %v1125_v49 = vld [vmem:[%s1664_s0 + $0x34] sm:$0xf0]  ;;  %v1123_v50 = vld [vmem:[%s1664_s0 + $0x2c] sm:$0xf]  ;;  %v858_v51 = vld [vmem:[%s1664_s0 + $0x38] sm:$0xf0]  ;;  %v853_v53 = vor.u32 %v1122_v46, %v850_v47 }
  0x11   :  { %722 = vmatpush.bf16.msra.mxu3 %v1186_v15  ;;  %v857_v54 = vor.u32 %v1125_v49, %v856_v48  ;;  %v861_v55 = vor.u32 %v1123_v50, %v858_v51  ;;  %v864_v56 = vld [vmem:[%s1664_s0 + $0x40] sm:$0xf]  ;;  %v1128_v57 = vld [vmem:[%s1664_s0 + $0x4c] sm:$0xf0]  ;;  %v1126_v58 = vld [vmem:[%s1664_s0 + $0x44] sm:$0xf] }
  0x12   :  { %534 = vmatpush.bf16.msra.mxu0 %v1161_v16  ;;  %v866_v59 = vld [vmem:[%s1664_s0 + $0x50] sm:$0xf0]  ;;  %v872_v60 = vld [vmem:[%s1664_s0 + $0x48] sm:$0xf]  ;;  %v1129_v61 = vld [vmem:[%s1664_s0 + $0x54] sm:$0xf0]  ;;  %v865_v0 = vor.u32 %v1128_v57, %v864_v56 }
  0x13   :  { %597 = vmatpush.bf16.msra.mxu1 %v1169_v17  ;;  %v1127_v62 = vld [vmem:[%s1664_s0 + $0x4c] sm:$0xf]  ;;  %v874_v63 = vld [vmem:[%s1664_s0 + $0x58] sm:$0xf0]  ;;  %v869_v1 = vor.u32 %v1126_v58, %v866_v59  ;;  %v873_v2 = vor.u32 %v1129_v61, %v872_v60  ;;  %v880_v4 = vld [vmem:[%s1664_s0 + $0x60] sm:$0xf] }
  0x14   :  { %660 = vmatpush.bf16.msra.mxu2 %v1177_v18  ;;  %v877_v3 = vor.u32 %v1127_v62, %v874_v63  ;;  %v1132_v5 = vld [vmem:[%s1664_s0 + $0x6c] sm:$0xf0]  ;;  %v1130_v6 = vld [vmem:[%s1664_s0 + $0x64] sm:$0xf]  ;;  %v882_v7 = vld [vmem:[%s1664_s0 + $0x70] sm:$0xf0] }
  0x15   :  { %723 = vmatpush.bf16.msra.mxu3 %v1185_v19  ;;  %v888_v8 = vld [vmem:[%s1664_s0 + $0x68] sm:$0xf]  ;;  %v1133_v9 = vld [vmem:[%s1664_s0 + $0x74] sm:$0xf0]  ;;  %v1131_v10 = vld [vmem:[%s1664_s0 + $0x6c] sm:$0xf]  ;;  %v881_v12 = vor.u32 %v1132_v5, %v880_v4  ;;  %v885_v13 = vor.u32 %v1130_v6, %v882_v7 }
  0x16   :  { %535 = vmatpush.bf16.msra.mxu0 %v1160_v20  ;;  %v890_v11 = vld [vmem:[%s1664_s0 + $0x78] sm:$0xf0]  ;;  %v889_v14 = vor.u32 %v1133_v9, %v888_v8  ;;  %v896_v16 = vld [vmem:[%s1664_s0 + $0x80] sm:$0xf]  ;;  %v1136_v17 = vld [vmem:[%s1664_s0 + $0x8c] sm:$0xf0] }
  0x17   :  { %598 = vmatpush.bf16.msra.mxu1 %v1168_v21  ;;  %v893_v15 = vor.u32 %v1131_v10, %v890_v11  ;;  %v1134_v18 = vld [vmem:[%s1664_s0 + $0x84] sm:$0xf]  ;;  %v898_v19 = vld [vmem:[%s1664_s0 + $0x90] sm:$0xf0]  ;;  %v904_v20 = vld [vmem:[%s1664_s0 + $0x88] sm:$0xf] }
  0x18   :  { %661 = vmatpush.bf16.msra.mxu2 %v1176_v22  ;;  %v1137_v21 = vld [vmem:[%s1664_s0 + $0x94] sm:$0xf0]  ;;  %v1135_v22 = vld [vmem:[%s1664_s0 + $0x8c] sm:$0xf]  ;;  %v920_v32 = vld [vmem:[%s1664_s0 + $0xa8] sm:$0xf] }
  0x19   :  { %724 = vmatpush.bf16.msra.mxu3 %v1184_v23  ;;  %v906_v23 = vld [vmem:[%s1664_s0 + $0x98] sm:$0xf0]  ;;  %v1141_v33 = vld [vmem:[%s1664_s0 + $0xb4] sm:$0xf0]  ;;  %v1139_v34 = vld [vmem:[%s1664_s0 + $0xac] sm:$0xf] }
  0x1a   :  { %536 = vmatpush.bf16.msra.mxu0 %v1159_v24  ;;  %v897_v24 = vor.u32 %v1136_v17, %v896_v16  ;;  %v922_v35 = vld [vmem:[%s1664_s0 + $0xb8] sm:$0xf0]  ;;  %v921_v38 = vor.u32 %v1141_v33, %v920_v32  ;;  %v936_v44 = vld [vmem:[%s1664_s0 + $0xc8] sm:$0xf]  ;;  %v1145_v45 = vld [vmem:[%s1664_s0 + $0xd4] sm:$0xf0] }
  0x1b   :  { %599 = vmatpush.bf16.msra.mxu1 %v1167_v25  ;;  %v901_v25 = vor.u32 %v1134_v18, %v898_v19  ;;  %v925_v39 = vor.u32 %v1139_v34, %v922_v35  ;;  %v1143_v46 = vld [vmem:[%s1664_s0 + $0xcc] sm:$0xf]  ;;  %v938_v47 = vld [vmem:[%s1664_s0 + $0xd8] sm:$0xf0]  ;;  %v937_v50 = vor.u32 %v1145_v45, %v936_v44  ;;  %v952_v56 = vld [vmem:[%s1664_s0 + $0xe8] sm:$0xf] }
  0x1c   :  { %662 = vmatpush.bf16.msra.mxu2 %v1175_v26  ;;  %v905_v26 = vor.u32 %v1137_v21, %v904_v20  ;;  %v941_v51 = vor.u32 %v1143_v46, %v938_v47  ;;  %v1149_v57 = vld [vmem:[%s1664_s0 + $0xf4] sm:$0xf0]  ;;  %v1147_v58 = vld [vmem:[%s1664_s0 + $0xec] sm:$0xf]  ;;  %v954_v59 = vld [vmem:[%s1664_s0 + $0xf8] sm:$0xf0] }
  0x1d   :  { %725 = vmatpush.bf16.msra.mxu3 %v1183_v27  ;;  %v909_v27 = vor.u32 %v1135_v22, %v906_v23  ;;  %v953_v62 = vor.u32 %v1149_v57, %v952_v56  ;;  %v957_v63 = vor.u32 %v1147_v58, %v954_v59  ;;  %v962_v4 = vld [vmem:[%s1664_s0 + $0x110] sm:$0xf0]  ;;  %v968_v5 = vld [vmem:[%s1664_s0 + $0x108] sm:$0xf]  ;;  %v1153_v6 = vld [vmem:[%s1664_s0 + $0x114] sm:$0xf0] }
  0x1e   :  { %537 = vmatpush.bf16.msra.mxu0 %v1158_v28  ;;  %v912_v28 = vld [vmem:[%s1664_s0 + $0xa0] sm:$0xf]  ;;  %v1151_v7 = vld [vmem:[%s1664_s0 + $0x10c] sm:$0xf]  ;;  %v970_v8 = vld [vmem:[%s1664_s0 + $0x118] sm:$0xf0] }
  0x1f   :  { %600 = vmatpush.bf16.msra.mxu1 %v1166_v29  ;;  %v1140_v29 = vld [vmem:[%s1664_s0 + $0xac] sm:$0xf0]  ;;  %v986_v32 = vld [vmem:[%s1664_s0 + $0x138] sm:$0xf0] }
  0x20   :  { %663 = vmatpush.bf16.msra.mxu2 %v1174_v30  ;;  %v1138_v30 = vld [vmem:[%s1664_s0 + $0xa4] sm:$0xf]  ;;  %v913_v36 = vor.u32 %v1140_v29, %v912_v28  ;;  %v978_v28 = vld [vmem:[%s1664_s0 + $0x130] sm:$0xf0]  ;;  %v984_v29 = vld [vmem:[%s1664_s0 + $0x128] sm:$0xf] }
  0x21   :  { %726 = vmatpush.bf16.msra.mxu3 %v1182_v31  ;;  %538 = vmatmul.bf16.vlgmr.msra.gmra.mxu0 %v833_v40  ;;  %v914_v31 = vld [vmem:[%s1664_s0 + $0xb0] sm:$0xf0]  ;;  %v928_v40 = vld [vmem:[%s1664_s0 + $0xc0] sm:$0xf] }
  0x22   :  { %601 = vmatmul.bf16.vlgmr.msra.gmra.mxu1 %v837_v41  ;;  %v917_v37 = vor.u32 %v1138_v30, %v914_v31  ;;  %v1144_v41 = vld [vmem:[%s1664_s0 + $0xcc] sm:$0xf0]  ;;  %v1157_v30 = vld [vmem:[%s1664_s0 + $0x134] sm:$0xf0]  ;;  %v1155_v31 = vld [vmem:[%s1664_s0 + $0x12c] sm:$0xf] }
  0x23   :  { %664 = vmatmul.bf16.vlgmr.msra.gmra.mxu2 %v841_v42  ;;  %v1142_v42 = vld [vmem:[%s1664_s0 + $0xc4] sm:$0xf]  ;;  %v929_v48 = vor.u32 %v1144_v41, %v928_v40  ;;  %v985_v41 = vor.u32 %v1157_v30, %v984_v29 }
  0x24   :  { %727 = vmatmul.bf16.vlgmr.msra.gmra.mxu3 %v845_v43  ;;  %v930_v43 = vld [vmem:[%s1664_s0 + $0xd0] sm:$0xf0] }
  0x25   :  { %v933_v49 = vor.u32 %v1142_v42, %v930_v43  ;;  %v989_v42 = vor.u32 %v1155_v31, %v986_v32 }
  0x31   :  { %543 = vmatmul.bf16.gmra.mxu0 %v849_v52  ;;  %v944_v52 = vld [vmem:[%s1664_s0 + $0xe0] sm:$0xf] }
  0x32   :  { %606 = vmatmul.bf16.gmra.mxu1 %v853_v53  ;;  %v1148_v53 = vld [vmem:[%s1664_s0 + $0xec] sm:$0xf0] }
  0x33   :  { %669 = vmatmul.bf16.gmra.mxu2 %v857_v54  ;;  %v1146_v54 = vld [vmem:[%s1664_s0 + $0xe4] sm:$0xf]  ;;  %v945_v60 = vor.u32 %v1148_v53, %v944_v52  ;;  %v55_v53 = vld [vmem:[%s1664_s0 + $0x148] sm:$0x11] }
  0x34   :  { %732 = vmatmul.bf16.gmra.mxu3 %v861_v55  ;;  %v946_v55 = vld [vmem:[%s1664_s0 + $0xf0] sm:$0xf0]  ;;  %v54_v52 = vld [vmem:[%s1664_s0 + $0x140] sm:$0x11]  ;;  %v248_v59 = vunpack.c.l.b16 %v55_v53 }
  0x35   :  { %v949_v61 = vor.u32 %v1146_v54, %v946_v55  ;;  %v246_v56 = vunpack.c.l.b16 %v54_v52  ;;  %v247_v57 = vunpack.c.h.b16 %v54_v52 }
  0x41   :  { %548 = vmatmul.bf16.gmra.mxu0 %v865_v0  ;;  %v1502_v0 = vld [vmem:[%s1663_s2] ss:$0 sm:$0xff] }
  0x42   :  { %611 = vmatmul.bf16.gmra.mxu1 %v869_v1  ;;  %v960_v1 = vld [vmem:[%s1664_s0 + $0x100] sm:$0xf] }
  0x43   :  { %674 = vmatmul.bf16.gmra.mxu2 %v873_v2  ;;  %v1152_v2 = vld [vmem:[%s1664_s0 + $0x10c] sm:$0xf0] }
  0x44   :  { %737 = vmatmul.bf16.gmra.mxu3 %v877_v3  ;;  %v1150_v3 = vld [vmem:[%s1664_s0 + $0x104] sm:$0xf]  ;;  %v961_v9 = vor.u32 %v1152_v2, %v960_v1  ;;  %v290_v1 = vpack.c.b16 %v246_v56, %v246_v56  ;;  %v291_v2 = vpack.c.b16 %v247_v57, %v247_v57 }
  0x45   :  { %v965_v10 = vor.u32 %v1150_v3, %v962_v4 }
  0x51   :  { %553 = vmatmul.bf16.gmra.mxu0 %v881_v12 }
  0x52   :  { %616 = vmatmul.bf16.gmra.mxu1 %v885_v13  ;;  %v969_v13 = vor.u32 %v1153_v6, %v968_v5  ;;  %v292_v6 = vpack.c.b16 %v248_v59, %v248_v59 }
  0x53   :  { %679 = vmatmul.bf16.gmra.mxu2 %v889_v14  ;;  %v973_v14 = vor.u32 %v1151_v7, %v970_v8 }
  0x54   :  { %742 = vmatmul.bf16.gmra.mxu3 %v893_v15 }
  0x61   :  { %558 = vmatmul.bf16.gmra.mxu0 %v897_v24  ;;  %v976_v24 = vld [vmem:[%s1664_s0 + $0x120] sm:$0xf] }
  0x62   :  { %621 = vmatmul.bf16.gmra.mxu1 %v901_v25  ;;  %v1156_v25 = vld [vmem:[%s1664_s0 + $0x12c] sm:$0xf0] }
  0x63   :  { %684 = vmatmul.bf16.gmra.mxu2 %v905_v26 }
  0x64   :  { %747 = vmatmul.bf16.gmra.mxu3 %v909_v27  ;;  %v1154_v27 = vld [vmem:[%s1664_s0 + $0x124] sm:$0xf] }
  0x71   :  { %563 = vmatmul.bf16.gmra.mxu0 %v913_v36  ;;  %v977_v36 = vor.u32 %v1156_v25, %v976_v24 }
  0x72   :  { %626 = vmatmul.bf16.gmra.mxu1 %v917_v37  ;;  %v981_v37 = vor.u32 %v1154_v27, %v978_v28 }
  0x73   :  { %689 = vmatmul.bf16.gmra.mxu2 %v921_v38 }
  0x74   :  { %752 = vmatmul.bf16.gmra.mxu3 %v925_v39 }
  0x81   :  { %568 = vmatmul.bf16.gmra.mxu0 %v929_v48 }
  0x82   :  { %631 = vmatmul.bf16.gmra.mxu1 %v933_v49 }
  0x83   :  { %694 = vmatmul.bf16.gmra.mxu2 %v937_v50 }
  0x84   :  { %757 = vmatmul.bf16.gmra.mxu3 %v941_v51 }
  0x91   :  { %573 = vmatmul.bf16.gmra.mxu0 %v945_v60  ;;  %v249_v60 = vunpack.c.h.b16 %v55_v53 }
  0x92   :  { %636 = vmatmul.bf16.gmra.mxu1 %v949_v61 }
  0x93   :  { %699 = vmatmul.bf16.gmra.mxu2 %v953_v62  ;;  %v293_v7 = vpack.c.b16 %v249_v60, %v249_v60 }
  0x94   :  { %762 = vmatmul.bf16.gmra.mxu3 %v957_v63 }
  0x9e   :  { %v539_v11 = vpop.f32.mrf.mxu0 }
  0x9f   :  { %v602_v12 = vpop.f32.mrf.mxu1  ;;  %v540_v15 = vadd.f32 %v1502_v0, %v539_v11 }
  0xa1   :  { %578 = vmatmul.bf16.gmra.mxu0 %v961_v9  ;;  %v603_v16 = vadd.f32 %v602_v12, %v540_v15 }
  0xa2   :  { %641 = vmatmul.bf16.gmra.mxu1 %v965_v10 }
  0xa3   :  { %704 = vmatmul.bf16.gmra.mxu2 %v969_v13 }
  0xa4   :  { %767 = vmatmul.bf16.gmra.mxu3 %v973_v14 }
  0xa6   :  { %v665_v17 = vpop.f32.mrf.mxu2  ;;  %v541_v20 = vpop.f32.mrf.mxu0 }
  0xa7   :  { %v728_v18 = vpop.f32.mrf.mxu3  ;;  %v666_v19 = vadd.f32 %v665_v17, %v603_v16  ;;  %v604_v21 = vpop.f32.mrf.mxu1  ;;  %v542_v23 = vadd.f32 %v1502_v0, %v541_v20 }
  0xa9   :  { %v729_v22 = vadd.f32 %v728_v18, %v666_v19  ;;  %v605_v33 = vadd.f32 %v604_v21, %v542_v23 }
  0xab   :  { %v782_v26 = vpack.c.bf16 %v729_v22, %v729_v22 }
  0xad   :  { %804 = vst.msk [vmem:[%s1665_s3] sm:$0xf] %vm803_vm0, %v782_v26 }
  0xae   :  { %v667_v34 = vpop.f32.mrf.mxu2  ;;  %v544_v39 = vpop.f32.mrf.mxu0 }
  0xaf   :  { %v730_v35 = vpop.f32.mrf.mxu3  ;;  %v668_v38 = vadd.f32 %v667_v34, %v605_v33  ;;  %v607_v40 = vpop.f32.mrf.mxu1  ;;  %v545_v43 = vadd.f32 %v1502_v0, %v544_v39 }
  0xb1   :  { %v731_v44 = vadd.f32 %v730_v35, %v668_v38  ;;  %583 = vmatmul.bf16.gmra.mxu0 %v977_v36  ;;  %v608_v46 = vadd.f32 %v607_v40, %v545_v43 }
  0xb2   :  { %646 = vmatmul.bf16.gmra.mxu1 %v981_v37 }
  0xb3   :  { %v783_v45 = vpack.c.bf16 %v731_v44, %v731_v44  ;;  %709 = vmatmul.bf16.gmra.mxu2 %v985_v41 }
  0xb4   :  { %772 = vmatmul.bf16.gmra.mxu3 %v989_v42 }
  0xb5   :  { %805 = vst.msk [vmem:[%s1665_s3 + $0x4] sm:$0xf] %vm803_vm0, %v783_v45 }
  0xb6   :  { %v670_v47 = vpop.f32.mrf.mxu2  ;;  %v546_v50 = vpop.f32.mrf.mxu0 }
  0xb7   :  { %v733_v48 = vpop.f32.mrf.mxu3  ;;  %v671_v49 = vadd.f32 %v670_v47, %v608_v46  ;;  %v609_v51 = vpop.f32.mrf.mxu1  ;;  %v547_v55 = vadd.f32 %v1502_v0, %v546_v50 }
  0xb9   :  { %v734_v54 = vadd.f32 %v733_v48, %v671_v49  ;;  %v610_v61 = vadd.f32 %v609_v51, %v547_v55 }
  0xbb   :  { %v784_v58 = vpack.c.bf16 %v734_v54, %v734_v54 }
  0xbd   :  { %806 = vst.msk [vmem:[%s1665_s3 + $0x8] sm:$0xf] %vm803_vm0, %v784_v58 }
  0xbe   :  { %v672_v62 = vpop.f32.mrf.mxu2  ;;  %v549_v4 = vpop.f32.mrf.mxu0 }
  0xbf   :  { %v735_v63 = vpop.f32.mrf.mxu3  ;;  %v673_v3 = vadd.f32 %v672_v62, %v610_v61  ;;  %v612_v5 = vpop.f32.mrf.mxu1  ;;  %v550_v8 = vadd.f32 %v1502_v0, %v549_v4 }
  0xc1   :  { %v736_v9 = vadd.f32 %v735_v63, %v673_v3  ;;  %588 = vmatmul.bf16.gmra.mxu0 %v290_v1  ;;  %v613_v11 = vadd.f32 %v612_v5, %v550_v8 }
  0xc2   :  { %651 = vmatmul.bf16.gmra.mxu1 %v291_v2 }
  0xc3   :  { %v785_v10 = vpack.c.bf16 %v736_v9, %v736_v9  ;;  %714 = vmatmul.bf16.gmra.mxu2 %v292_v6 }
  0xc4   :  { %777 = vmatmul.bf16.gmra.mxu3 %v293_v7 }
  0xc5   :  { %807 = vst.msk [vmem:[%s1665_s3 + $0xc] sm:$0xf] %vm803_vm0, %v785_v10 }
  0xc6   :  { %v675_v12 = vpop.f32.mrf.mxu2  ;;  %v551_v15 = vpop.f32.mrf.mxu0 }
  0xc7   :  { %v738_v13 = vpop.f32.mrf.mxu3  ;;  %v676_v14 = vadd.f32 %v675_v12, %v613_v11  ;;  %v614_v16 = vpop.f32.mrf.mxu1  ;;  %v552_v18 = vadd.f32 %v1502_v0, %v551_v15 }
  0xc9   :  { %v739_v17 = vadd.f32 %v738_v13, %v676_v14  ;;  %v615_v20 = vadd.f32 %v614_v16, %v552_v18 }
  0xcb   :  { %v786_v19 = vpack.c.bf16 %v739_v17, %v739_v17 }
  0xcd   :  { %808 = vst.msk [vmem:[%s1665_s3 + $0x10] sm:$0xf] %vm803_vm0, %v786_v19 }
  0xce   :  { %v677_v21 = vpop.f32.mrf.mxu2  ;;  %v554_v24 = vpop.f32.mrf.mxu0 }
  0xcf   :  { %v740_v22 = vpop.f32.mrf.mxu3  ;;  %v678_v23 = vadd.f32 %v677_v21, %v615_v20  ;;  %v617_v25 = vpop.f32.mrf.mxu1  ;;  %v555_v26 = vadd.f32 %v1502_v0, %v554_v24 }
  0xd1   :  { %v741_v27 = vadd.f32 %v740_v22, %v678_v23  ;;  %v618_v29 = vadd.f32 %v617_v25, %v555_v26 }
  0xd3   :  { %v787_v28 = vpack.c.bf16 %v741_v27, %v741_v27 }
  0xd5   :  { %809 = vst.msk [vmem:[%s1665_s3 + $0x14] sm:$0xf] %vm803_vm0, %v787_v28 }
  0xd6   :  { %v680_v30 = vpop.f32.mrf.mxu2  ;;  %v556_v33 = vpop.f32.mrf.mxu0 }
  0xd7   :  { %v743_v31 = vpop.f32.mrf.mxu3  ;;  %v681_v32 = vadd.f32 %v680_v30, %v618_v29  ;;  %v619_v34 = vpop.f32.mrf.mxu1  ;;  %v557_v36 = vadd.f32 %v1502_v0, %v556_v33 }
  0xd9   :  { %v744_v35 = vadd.f32 %v743_v31, %v681_v32  ;;  %v620_v38 = vadd.f32 %v619_v34, %v557_v36 }
  0xdb   :  { %v788_v37 = vpack.c.bf16 %v744_v35, %v744_v35 }
  0xdd   :  { %810 = vst.msk [vmem:[%s1665_s3 + $0x18] sm:$0xf] %vm803_vm0, %v788_v37 }
  0xde   :  { %v682_v39 = vpop.f32.mrf.mxu2  ;;  %v559_v42 = vpop.f32.mrf.mxu0 }
  0xdf   :  { %v745_v40 = vpop.f32.mrf.mxu3  ;;  %v683_v41 = vadd.f32 %v682_v39, %v620_v38  ;;  %v622_v43 = vpop.f32.mrf.mxu1  ;;  %v560_v44 = vadd.f32 %v1502_v0, %v559_v42 }
  0xe1   :  { %v746_v45 = vadd.f32 %v745_v40, %v683_v41  ;;  %v623_v47 = vadd.f32 %v622_v43, %v560_v44 }
  0xe3   :  { %v789_v46 = vpack.c.bf16 %v746_v45, %v746_v45 }
  0xe5   :  { %811 = vst.msk [vmem:[%s1665_s3 + $0x1c] sm:$0xf] %vm803_vm0, %v789_v46 }
  0xe6   :  { %v685_v48 = vpop.f32.mrf.mxu2  ;;  %v561_v51 = vpop.f32.mrf.mxu0 }
  0xe7   :  { %v748_v49 = vpop.f32.mrf.mxu3  ;;  %v686_v50 = vadd.f32 %v685_v48, %v623_v47  ;;  %v624_v52 = vpop.f32.mrf.mxu1  ;;  %v562_v54 = vadd.f32 %v1502_v0, %v561_v51 }
  0xe9   :  { %v749_v53 = vadd.f32 %v748_v49, %v686_v50  ;;  %v625_v56 = vadd.f32 %v624_v52, %v562_v54 }
  0xeb   :  { %v790_v55 = vpack.c.bf16 %v749_v53, %v749_v53 }
  0xed   :  { %812 = vst.msk [vmem:[%s1665_s3 + $0x20] sm:$0xf] %vm803_vm0, %v790_v55 }
  0xee   :  { %v687_v57 = vpop.f32.mrf.mxu2  ;;  %v564_v60 = vpop.f32.mrf.mxu0 }
  0xef   :  { %v750_v58 = vpop.f32.mrf.mxu3  ;;  %v688_v59 = vadd.f32 %v687_v57, %v625_v56  ;;  %v627_v61 = vpop.f32.mrf.mxu1  ;;  %v565_v62 = vadd.f32 %v1502_v0, %v564_v60 }
  0xf1   :  { %v751_v63 = vadd.f32 %v750_v58, %v688_v59  ;;  %v628_v2 = vadd.f32 %v627_v61, %v565_v62 }
  0xf3   :  { %v791_v1 = vpack.c.bf16 %v751_v63, %v751_v63 }
  0xf5   :  { %813 = vst.msk [vmem:[%s1665_s3 + $0x24] sm:$0xf] %vm803_vm0, %v791_v1 }
  0xf6   :  { %v690_v3 = vpop.f32.mrf.mxu2  ;;  %v566_v6 = vpop.f32.mrf.mxu0 }
  0xf7   :  { %v753_v4 = vpop.f32.mrf.mxu3  ;;  %v691_v5 = vadd.f32 %v690_v3, %v628_v2  ;;  %v629_v7 = vpop.f32.mrf.mxu1  ;;  %v567_v9 = vadd.f32 %v1502_v0, %v566_v6 }
  0xf9   :  { %v754_v8 = vadd.f32 %v753_v4, %v691_v5  ;;  %v630_v11 = vadd.f32 %v629_v7, %v567_v9 }
  0xfb   :  { %v792_v10 = vpack.c.bf16 %v754_v8, %v754_v8 }
  0xfd   :  { %814 = vst.msk [vmem:[%s1665_s3 + $0x28] sm:$0xf] %vm803_vm0, %v792_v10 }
  0xfe   :  { %v692_v12 = vpop.f32.mrf.mxu2  ;;  %v569_v15 = vpop.f32.mrf.mxu0 }
  0xff   :  { %v755_v13 = vpop.f32.mrf.mxu3  ;;  %v693_v14 = vadd.f32 %v692_v12, %v630_v11  ;;  %v632_v16 = vpop.f32.mrf.mxu1  ;;  %v570_v17 = vadd.f32 %v1502_v0, %v569_v15 }
 0x101   :  { %v756_v18 = vadd.f32 %v755_v13, %v693_v14  ;;  %v633_v20 = vadd.f32 %v632_v16, %v570_v17 }
 0x103   :  { %v793_v19 = vpack.c.bf16 %v756_v18, %v756_v18 }
 0x105   :  { %815 = vst.msk [vmem:[%s1665_s3 + $0x2c] sm:$0xf] %vm803_vm0, %v793_v19 }
 0x106   :  { %v695_v21 = vpop.f32.mrf.mxu2  ;;  %v571_v24 = vpop.f32.mrf.mxu0 }
 0x107   :  { %v758_v22 = vpop.f32.mrf.mxu3  ;;  %v696_v23 = vadd.f32 %v695_v21, %v633_v20  ;;  %v634_v25 = vpop.f32.mrf.mxu1  ;;  %v572_v27 = vadd.f32 %v1502_v0, %v571_v24 }
 0x109   :  { %v759_v26 = vadd.f32 %v758_v22, %v696_v23  ;;  %v635_v29 = vadd.f32 %v634_v25, %v572_v27 }
 0x10b   :  { %v794_v28 = vpack.c.bf16 %v759_v26, %v759_v26 }
 0x10d   :  { %816 = vst.msk [vmem:[%s1665_s3 + $0x30] sm:$0xf] %vm803_vm0, %v794_v28 }
 0x10e   :  { %v697_v30 = vpop.f32.mrf.mxu2  ;;  %v574_v33 = vpop.f32.mrf.mxu0 }
 0x10f   :  { %v760_v31 = vpop.f32.mrf.mxu3  ;;  %v698_v32 = vadd.f32 %v697_v30, %v635_v29  ;;  %v637_v34 = vpop.f32.mrf.mxu1  ;;  %v575_v35 = vadd.f32 %v1502_v0, %v574_v33 }
 0x111   :  { %v761_v36 = vadd.f32 %v760_v31, %v698_v32  ;;  %v638_v38 = vadd.f32 %v637_v34, %v575_v35 }
 0x113   :  { %v795_v37 = vpack.c.bf16 %v761_v36, %v761_v36 }
 0x115   :  { %817 = vst.msk [vmem:[%s1665_s3 + $0x34] sm:$0xf] %vm803_vm0, %v795_v37 }
 0x116   :  { %v700_v39 = vpop.f32.mrf.mxu2  ;;  %v576_v42 = vpop.f32.mrf.mxu0 }
 0x117   :  { %v763_v40 = vpop.f32.mrf.mxu3  ;;  %v701_v41 = vadd.f32 %v700_v39, %v638_v38  ;;  %v639_v43 = vpop.f32.mrf.mxu1  ;;  %v577_v45 = vadd.f32 %v1502_v0, %v576_v42 }
 0x119   :  { %v764_v44 = vadd.f32 %v763_v40, %v701_v41  ;;  %v640_v47 = vadd.f32 %v639_v43, %v577_v45 }
 0x11b   :  { %v796_v46 = vpack.c.bf16 %v764_v44, %v764_v44 }
 0x11d   :  { %818 = vst.msk [vmem:[%s1665_s3 + $0x38] sm:$0xf] %vm803_vm0, %v796_v46 }
 0x11e   :  { %v702_v48 = vpop.f32.mrf.mxu2  ;;  %v579_v51 = vpop.f32.mrf.mxu0 }
 0x11f   :  { %v765_v49 = vpop.f32.mrf.mxu3  ;;  %v703_v50 = vadd.f32 %v702_v48, %v640_v47  ;;  %v642_v52 = vpop.f32.mrf.mxu1  ;;  %v580_v53 = vadd.f32 %v1502_v0, %v579_v51 }
 0x121   :  { %v766_v54 = vadd.f32 %v765_v49, %v703_v50  ;;  %v643_v56 = vadd.f32 %v642_v52, %v580_v53 }
 0x123   :  { %v797_v55 = vpack.c.bf16 %v766_v54, %v766_v54 }
 0x125   :  { %819 = vst.msk [vmem:[%s1665_s3 + $0x3c] sm:$0xf] %vm803_vm0, %v797_v55 }
 0x126   :  { %v705_v57 = vpop.f32.mrf.mxu2  ;;  %v581_v60 = vpop.f32.mrf.mxu0 }
 0x127   :  { %v768_v58 = vpop.f32.mrf.mxu3  ;;  %v706_v59 = vadd.f32 %v705_v57, %v643_v56  ;;  %v644_v61 = vpop.f32.mrf.mxu1  ;;  %v582_v63 = vadd.f32 %v1502_v0, %v581_v60 }
 0x129   :  { %v769_v62 = vadd.f32 %v768_v58, %v706_v59  ;;  %v645_v2 = vadd.f32 %v644_v61, %v582_v63 }
 0x12b   :  { %v798_v1 = vpack.c.bf16 %v769_v62, %v769_v62 }
 0x12d   :  { %820 = vst.msk [vmem:[%s1665_s3 + $0x40] sm:$0xf] %vm803_vm0, %v798_v1 }
 0x12e   :  { %v707_v3 = vpop.f32.mrf.mxu2  ;;  %v584_v6 = vpop.f32.mrf.mxu0 }
 0x12f   :  { %v770_v4 = vpop.f32.mrf.mxu3  ;;  %v708_v5 = vadd.f32 %v707_v3, %v645_v2  ;;  %v647_v7 = vpop.f32.mrf.mxu1  ;;  %v585_v8 = vadd.f32 %v1502_v0, %v584_v6 }
 0x131   :  { %v771_v9 = vadd.f32 %v770_v4, %v708_v5  ;;  %v648_v11 = vadd.f32 %v647_v7, %v585_v8 }
 0x133   :  { %v799_v10 = vpack.c.bf16 %v771_v9, %v771_v9 }
 0x135   :  { %821 = vst.msk [vmem:[%s1665_s3 + $0x44] sm:$0xf] %vm803_vm0, %v799_v10 }
 0x136   :  { %v710_v12 = vpop.f32.mrf.mxu2  ;;  %v586_v15 = vpop.f32.mrf.mxu0 }
 0x137   :  { %v773_v13 = vpop.f32.mrf.mxu3  ;;  %v711_v14 = vadd.f32 %v710_v12, %v648_v11  ;;  %v649_v16 = vpop.f32.mrf.mxu1  ;;  %v587_v18 = vadd.f32 %v1502_v0, %v586_v15 }
 0x139   :  { %v774_v17 = vadd.f32 %v773_v13, %v711_v14  ;;  %v650_v20 = vadd.f32 %v649_v16, %v587_v18 }
 0x13b   :  { %v800_v19 = vpack.c.bf16 %v774_v17, %v774_v17 }
 0x13d   :  { %822 = vst.msk [vmem:[%s1665_s3 + $0x48] sm:$0xf] %vm803_vm0, %v800_v19 }
 0x13e   :  { %v712_v21 = vpop.f32.mrf.mxu2  ;;  %v589_v24 = vpop.f32.mrf.mxu0 }
 0x13f   :  { %v775_v22 = vpop.f32.mrf.mxu3  ;;  %v713_v23 = vadd.f32 %v712_v21, %v650_v20  ;;  %v652_v25 = vpop.f32.mrf.mxu1  ;;  %v590_v26 = vadd.f32 %v1502_v0, %v589_v24 }
 0x141   :  { %v776_v27 = vadd.f32 %v775_v22, %v713_v23  ;;  %v653_v29 = vadd.f32 %v652_v25, %v590_v26 }
 0x143   :  { %v801_v28 = vpack.c.bf16 %v776_v27, %v776_v27 }
 0x145   :  { %823 = vst.msk [vmem:[%s1665_s3 + $0x4c] sm:$0xf] %vm803_vm0, %v801_v28 }
 0x146   :  { %v715_v30 = vpop.f32.mrf.mxu2  ;;  %v591_v33 = vpop.f32.mrf.mxu0 }
 0x147   :  { %v778_v31 = vpop.f32.mrf.mxu3  ;;  %v716_v32 = vadd.f32 %v715_v30, %v653_v29  ;;  %v654_v34 = vpop.f32.mrf.mxu1 }
 0x149   :  { %v779_v35 = vadd.f32 %v778_v31, %v716_v32 }
 0x14b   :  { %v802_v36 = vpack.c.bf16 %v779_v35, %v779_v35 }
 0x14d   :  { %825 = vst.msk [vmem:[%s1665_s3 + $0x50] sm:$0x1] %vm824_vm1, %v802_v36 }
 0x14e   :  { %v717_v0 = vpop.f32.mrf.mxu2 }
 0x14f   :  { %v780_v37 = vpop.f32.mrf.mxu3 }

// kernel: nature_conv_body_forward.6
= control target key start
LH: loop header
LB: loop body
LE: loop exit
PB: predicated region body
PF: predicated region fallthrough
CT: control target
= control target key end

     0   :  { %vm513_vm0 = vcmask 523264   ;;  %vm763_vm1 = vcmask 519168   ;;  %vm776_vm2 = vcmask 516096   ;;  %s1568_s1 = inlined_call_operand.vmem [shape: bf16[576,64], index: 1, kind: input, shape index: {}]   ;;  %s1569_s2 = inlined_call_operand.vmem [shape: f32[1,64], index: 2, kind: input, shape index: {}]   ;;  %s1570_s0 = inlined_call_operand.vmem [shape: bf16[98,576], index: 0, kind: input, shape index: {}]   ;;  %s1571_s3 = inlined_call_operand.vmem [shape: bf16[98,64], index: 3, kind: output, shape index: {}]  }
   0x1   :  { %v1090_v0 = vld [vmem:[%s1568_s1 + $0x38] sm:$0xff]  ;;  %v1089_v1 = vld [vmem:[%s1568_s1 + $0x30] sm:$0xff]  ;;  %v1088_v2 = vld [vmem:[%s1568_s1 + $0x28] sm:$0xff] }
   0x2   :  { %535 = vmatpush.bf16.msra.mxu0 %v1090_v0  ;;  %1119 = vmatpush.bf16.msra.mxu1 %v1090_v0  ;;  %v1087_v3 = vld [vmem:[%s1568_s1 + $0x20] sm:$0xff]  ;;  %v1086_v4 = vld [vmem:[%s1568_s1 + $0x18] sm:$0xff]  ;;  %v1085_v5 = vld [vmem:[%s1568_s1 + $0x10] sm:$0xff] }
   0x3   :  { %1120 = vmatpush.bf16.msra.mxu2 %v1090_v0  ;;  %1121 = vmatpush.bf16.msra.mxu3 %v1090_v0  ;;  %v1084_v6 = vld [vmem:[%s1568_s1 + $0x8] sm:$0xff]  ;;  %v1188_v7 = vld [vmem:[%s1570_s0 + $0xf0] sm:$0x11]  ;;  %v1083_v8 = vld [vmem:[%s1568_s1] sm:$0xff] }
   0x4   :  { %v784_v9 = vld [vmem:[%s1570_s0] sm:$0xf]  ;;  %v1055_v10 = vld [vmem:[%s1570_s0 + $0x10] sm:$0xf0]  ;;  %v824_v11 = vld [vmem:[%s1570_s0 + $0x50] sm:$0xf]  ;;  %v229_v15 = vunpack.c.l.b16 %v1188_v7 }
   0x5   :  { %v1065_v12 = vld [vmem:[%s1570_s0 + $0x60] sm:$0xf0]  ;;  %v864_v13 = vld [vmem:[%s1570_s0 + $0xa0] sm:$0xf]  ;;  %v1075_v14 = vld [vmem:[%s1570_s0 + $0xb0] sm:$0xf0]  ;;  %v785_v18 = vor.u32 %v1055_v10, %v784_v9 }
   0x6   :  { %536 = vmatpush.bf16.msra.mxu0 %v1089_v1  ;;  %1122 = vmatpush.bf16.msra.mxu1 %v1089_v1  ;;  %v1114_v16 = vld [vmem:[%s1568_s1 + $0xf8] sm:$0xff]  ;;  %v825_v19 = vor.u32 %v1065_v12, %v824_v11  ;;  %v865_v20 = vor.u32 %v1075_v14, %v864_v13  ;;  %v264_v23 = vpack.c.b16 %v229_v15, %v229_v15  ;;  %v1113_v24 = vld [vmem:[%s1568_s1 + $0xf0] sm:$0xff]  ;;  %v1112_v28 = vld [vmem:[%s1568_s1 + $0xe8] sm:$0xff] }
   0x7   :  { %1123 = vmatpush.bf16.msra.mxu2 %v1089_v1  ;;  %1124 = vmatpush.bf16.msra.mxu3 %v1089_v1  ;;  %v1106_v17 = vld [vmem:[%s1568_s1 + $0xb8] sm:$0xff]  ;;  %v1105_v25 = vld [vmem:[%s1568_s1 + $0xb0] sm:$0xff]  ;;  %v1104_v29 = vld [vmem:[%s1568_s1 + $0xa8] sm:$0xff] }
   0x8   :  { %v1098_v21 = vld [vmem:[%s1568_s1 + $0x78] sm:$0xff]  ;;  %v1097_v26 = vld [vmem:[%s1568_s1 + $0x70] sm:$0xff]  ;;  %v1096_v30 = vld [vmem:[%s1568_s1 + $0x68] sm:$0xff] }
   0x9   :  { %v1118_v22 = vld [vmem:[%s1568_s1 + $0x118] sm:$0xff]  ;;  %v1117_v27 = vld [vmem:[%s1568_s1 + $0x110] sm:$0xff]  ;;  %v1116_v31 = vld [vmem:[%s1568_s1 + $0x108] sm:$0xff] }
   0xa   :  { %537 = vmatpush.bf16.msra.mxu0 %v1088_v2  ;;  %1125 = vmatpush.bf16.msra.mxu1 %v1088_v2  ;;  %v1111_v32 = vld [vmem:[%s1568_s1 + $0xe0] sm:$0xff]  ;;  %v804_v35 = vld [vmem:[%s1570_s0 + $0x28] sm:$0xf]  ;;  %v1060_v36 = vld [vmem:[%s1570_s0 + $0x38] sm:$0xf0] }
   0xb   :  { %1126 = vmatpush.bf16.msra.mxu2 %v1088_v2  ;;  %1127 = vmatpush.bf16.msra.mxu3 %v1088_v2  ;;  %v1103_v33 = vld [vmem:[%s1568_s1 + $0xa0] sm:$0xff]  ;;  %v844_v37 = vld [vmem:[%s1570_s0 + $0x78] sm:$0xf]  ;;  %v1070_v38 = vld [vmem:[%s1570_s0 + $0x88] sm:$0xf0]  ;;  %v805_v44 = vor.u32 %v1060_v36, %v804_v35 }
   0xc   :  { %v1095_v34 = vld [vmem:[%s1568_s1 + $0x60] sm:$0xff]  ;;  %v884_v39 = vld [vmem:[%s1570_s0 + $0xc8] sm:$0xf]  ;;  %v1080_v40 = vld [vmem:[%s1570_s0 + $0xd8] sm:$0xf0]  ;;  %v845_v45 = vor.u32 %v1070_v38, %v844_v37 }
   0xd   :  { %v1115_v41 = vld [vmem:[%s1568_s1 + $0x100] sm:$0xff]  ;;  %v1110_v42 = vld [vmem:[%s1568_s1 + $0xd8] sm:$0xff]  ;;  %v885_v46 = vor.u32 %v1080_v40, %v884_v39  ;;  %v1109_v48 = vld [vmem:[%s1568_s1 + $0xd0] sm:$0xff] }
   0xe   :  { %538 = vmatpush.bf16.msra.mxu0 %v1087_v3  ;;  %1128 = vmatpush.bf16.msra.mxu1 %v1087_v3  ;;  %v1102_v43 = vld [vmem:[%s1568_s1 + $0x98] sm:$0xff]  ;;  %v1101_v49 = vld [vmem:[%s1568_s1 + $0x90] sm:$0xff]  ;;  %v1108_v51 = vld [vmem:[%s1568_s1 + $0xc8] sm:$0xff] }
   0xf   :  { %1129 = vmatpush.bf16.msra.mxu2 %v1087_v3  ;;  %1130 = vmatpush.bf16.msra.mxu3 %v1087_v3  ;;  %v1094_v47 = vld [vmem:[%s1568_s1 + $0x58] sm:$0xff]  ;;  %v1093_v50 = vld [vmem:[%s1568_s1 + $0x50] sm:$0xff]  ;;  %v1100_v52 = vld [vmem:[%s1568_s1 + $0x88] sm:$0xff] }
  0x10   :  { %v1092_v53 = vld [vmem:[%s1568_s1 + $0x48] sm:$0xff]  ;;  %v1107_v54 = vld [vmem:[%s1568_s1 + $0xc0] sm:$0xff]  ;;  %v786_v60 = vld [vmem:[%s1570_s0 + $0x14] sm:$0xf0] }
  0x11   :  { %v1099_v55 = vld [vmem:[%s1568_s1 + $0x80] sm:$0xff]  ;;  %v1054_v56 = vld [vmem:[%s1570_s0 + $0xc] sm:$0xf]  ;;  %v800_v61 = vld [vmem:[%s1570_s0 + $0x10] sm:$0xf] }
  0x12   :  { %539 = vmatpush.bf16.msra.mxu0 %v1086_v4  ;;  %1131 = vmatpush.bf16.msra.mxu1 %v1086_v4  ;;  %v794_v57 = vld [vmem:[%s1570_s0 + $0x1c] sm:$0xf0]  ;;  %v1053_v59 = vld [vmem:[%s1570_s0 + $0x4] sm:$0xf]  ;;  %v792_v0 = vld [vmem:[%s1570_s0 + $0x8] sm:$0xf] }
  0x13   :  { %1132 = vmatpush.bf16.msra.mxu2 %v1086_v4  ;;  %1133 = vmatpush.bf16.msra.mxu3 %v1086_v4  ;;  %v1091_v58 = vld [vmem:[%s1568_s1 + $0x40] sm:$0xff]  ;;  %v797_v63 = vor.u32 %v1054_v56, %v794_v57  ;;  %v1056_v1 = vld [vmem:[%s1570_s0 + $0x18] sm:$0xf0]  ;;  %v789_v2 = vor.u32 %v1053_v59, %v786_v60  ;;  %v820_v10 = vld [vmem:[%s1570_s0 + $0x38] sm:$0xf] }
  0x14   :  { %v1057_v62 = vld [vmem:[%s1570_s0 + $0x20] sm:$0xf0]  ;;  %v793_v4 = vor.u32 %v1056_v1, %v792_v0  ;;  %v806_v9 = vld [vmem:[%s1570_s0 + $0x3c] sm:$0xf0]  ;;  %v1062_v11 = vld [vmem:[%s1570_s0 + $0x48] sm:$0xf0] }
  0x15   :  { %v801_v3 = vor.u32 %v1057_v62, %v800_v61  ;;  %v812_v13 = vld [vmem:[%s1570_s0 + $0x30] sm:$0xf]  ;;  %v1061_v14 = vld [vmem:[%s1570_s0 + $0x40] sm:$0xf0]  ;;  %v1072_v35 = vld [vmem:[%s1570_s0 + $0x98] sm:$0xf0] }
  0x16   :  { %540 = vmatpush.bf16.msra.mxu0 %v1085_v5  ;;  %1134 = vmatpush.bf16.msra.mxu1 %v1085_v5  ;;  %v852_v37 = vld [vmem:[%s1570_s0 + $0x80] sm:$0xf]  ;;  %v1071_v38 = vld [vmem:[%s1570_s0 + $0x90] sm:$0xf0]  ;;  %v1078_v56 = vld [vmem:[%s1570_s0 + $0xcc] sm:$0xf] }
  0x17   :  { %1135 = vmatpush.bf16.msra.mxu2 %v1085_v5  ;;  %1136 = vmatpush.bf16.msra.mxu3 %v1085_v5  ;;  %v1059_v5 = vld [vmem:[%s1570_s0 + $0x34] sm:$0xf]  ;;  %v886_v57 = vld [vmem:[%s1570_s0 + $0xdc] sm:$0xf0]  ;;  %v1082_v59 = vld [vmem:[%s1570_s0 + $0xe8] sm:$0xf0] }
  0x18   :  { %v892_v61 = vld [vmem:[%s1570_s0 + $0xd0] sm:$0xf]  ;;  %v1081_v62 = vld [vmem:[%s1570_s0 + $0xe0] sm:$0xf0] }
  0x19   :  { %v893_v1 = vor.u32 %v1081_v62, %v892_v61 }
  0x1a   :  { %541 = vmatpush.bf16.msra.mxu0 %v1084_v6  ;;  %1137 = vmatpush.bf16.msra.mxu1 %v1084_v6 }
  0x1b   :  { %1138 = vmatpush.bf16.msra.mxu2 %v1084_v6  ;;  %1139 = vmatpush.bf16.msra.mxu3 %v1084_v6  ;;  %v814_v6 = vld [vmem:[%s1570_s0 + $0x44] sm:$0xf0] }
  0x1c   :  { %v817_v12 = vor.u32 %v1059_v5, %v814_v6  ;;  %v230_v5 = vunpack.c.h.b16 %v1188_v7 }
  0x1e   :  { %542 = vmatpush.bf16.msra.mxu0 %v1083_v8  ;;  %1140 = vmatpush.bf16.msra.mxu1 %v1083_v8 }
  0x1f   :  { %1141 = vmatpush.bf16.msra.mxu2 %v1083_v8  ;;  %1142 = vmatpush.bf16.msra.mxu3 %v1083_v8  ;;  %v1058_v8 = vld [vmem:[%s1570_s0 + $0x2c] sm:$0xf] }
  0x20   :  { %v809_v15 = vor.u32 %v1058_v8, %v806_v9 }
  0x21   :  { %543 = vmatmul.bf16.vlgmr.msra.gmra.mxu0 %v785_v18  ;;  %553 = vmatmul.bf16.vlgmr.msra.gmra.mxu1 %v825_v19  ;;  %v1064_v18 = vld [vmem:[%s1570_s0 + $0x5c] sm:$0xf]  ;;  %v834_v19 = vld [vmem:[%s1570_s0 + $0x6c] sm:$0xf0] }
  0x22   :  { %563 = vmatmul.bf16.vlgmr.msra.gmra.mxu2 %v865_v20  ;;  %578 = vmatpush.bf16.msrb.mxu1 %v1098_v21  ;;  %v1063_v20 = vld [vmem:[%s1570_s0 + $0x54] sm:$0xf]  ;;  %v826_v21 = vld [vmem:[%s1570_s0 + $0x64] sm:$0xf0] }
  0x23   :  { %664 = vmatpush.bf16.msrb.mxu3 %v1114_v16  ;;  %621 = vmatpush.bf16.msrb.mxu2 %v1106_v17  ;;  %v821_v16 = vor.u32 %v1062_v11, %v820_v10  ;;  %v813_v17 = vor.u32 %v1061_v14, %v812_v13  ;;  %v265_v10 = vpack.c.b16 %v230_v5, %v230_v5 }
  0x24   :  { %711 = vmatpush.bf16.msrb.mxu0 %v1118_v22  ;;  %573 = vmatmul.bf16.vlgmr.msra.gmra.mxu3 %v264_v23  ;;  %v840_v22 = vld [vmem:[%s1570_s0 + $0x60] sm:$0xf]  ;;  %v1067_v23 = vld [vmem:[%s1570_s0 + $0x70] sm:$0xf0] }
  0x26   :  { %579 = vmatpush.bf16.msrb.mxu1 %v1097_v26  ;;  %v1066_v26 = vld [vmem:[%s1570_s0 + $0x68] sm:$0xf0] }
  0x27   :  { %665 = vmatpush.bf16.msrb.mxu3 %v1113_v24  ;;  %622 = vmatpush.bf16.msrb.mxu2 %v1105_v25  ;;  %v837_v24 = vor.u32 %v1064_v18, %v834_v19  ;;  %v832_v25 = vld [vmem:[%s1570_s0 + $0x58] sm:$0xf] }
  0x28   :  { %712 = vmatpush.bf16.msrb.mxu0 %v1117_v27  ;;  %v829_v27 = vor.u32 %v1063_v20, %v826_v21 }
  0x2a   :  { %580 = vmatpush.bf16.msrb.mxu1 %v1096_v30  ;;  %v1069_v30 = vld [vmem:[%s1570_s0 + $0x84] sm:$0xf] }
  0x2b   :  { %666 = vmatpush.bf16.msrb.mxu3 %v1112_v28  ;;  %623 = vmatpush.bf16.msrb.mxu2 %v1104_v29  ;;  %v841_v28 = vor.u32 %v1067_v23, %v840_v22  ;;  %v833_v29 = vor.u32 %v1066_v26, %v832_v25 }
  0x2c   :  { %713 = vmatpush.bf16.msrb.mxu0 %v1116_v31  ;;  %v854_v31 = vld [vmem:[%s1570_s0 + $0x94] sm:$0xf0] }
  0x2d   :  { %v857_v36 = vor.u32 %v1069_v30, %v854_v31 }
  0x2e   :  { %581 = vmatpush.bf16.msrb.mxu1 %v1095_v34  ;;  %v860_v34 = vld [vmem:[%s1570_s0 + $0x88] sm:$0xf] }
  0x2f   :  { %667 = vmatpush.bf16.msrb.mxu3 %v1111_v32  ;;  %624 = vmatpush.bf16.msrb.mxu2 %v1103_v33  ;;  %v1068_v32 = vld [vmem:[%s1570_s0 + $0x7c] sm:$0xf]  ;;  %v846_v33 = vld [vmem:[%s1570_s0 + $0x8c] sm:$0xf0]  ;;  %v861_v40 = vor.u32 %v1072_v35, %v860_v34 }
  0x30   :  { %714 = vmatpush.bf16.msrb.mxu0 %v1115_v41  ;;  %v849_v39 = vor.u32 %v1068_v32, %v846_v33  ;;  %v853_v41 = vor.u32 %v1071_v38, %v852_v37 }
  0x31   :  { %548 = vmatmul.bf16.gmra.mxu0 %v805_v44  ;;  %558 = vmatmul.bf16.gmra.mxu1 %v845_v45  ;;  %v1073_v44 = vld [vmem:[%s1570_s0 + $0xa4] sm:$0xf]  ;;  %v866_v45 = vld [vmem:[%s1570_s0 + $0xb4] sm:$0xf0] }
  0x32   :  { %568 = vmatmul.bf16.gmra.mxu2 %v885_v46  ;;  %582 = vmatpush.bf16.msrb.mxu1 %v1094_v47  ;;  %v880_v46 = vld [vmem:[%s1570_s0 + $0xb0] sm:$0xf]  ;;  %v1077_v47 = vld [vmem:[%s1570_s0 + $0xc0] sm:$0xf0] }
  0x33   :  { %668 = vmatpush.bf16.msrb.mxu3 %v1110_v42  ;;  %625 = vmatpush.bf16.msrb.mxu2 %v1102_v43  ;;  %v1074_v42 = vld [vmem:[%s1570_s0 + $0xac] sm:$0xf]  ;;  %v874_v43 = vld [vmem:[%s1570_s0 + $0xbc] sm:$0xf0] }
  0x36   :  { %583 = vmatpush.bf16.msrb.mxu1 %v1093_v50  ;;  %v1076_v50 = vld [vmem:[%s1570_s0 + $0xb8] sm:$0xf0] }
  0x37   :  { %669 = vmatpush.bf16.msrb.mxu3 %v1109_v48  ;;  %626 = vmatpush.bf16.msrb.mxu2 %v1101_v49  ;;  %v877_v48 = vor.u32 %v1074_v42, %v874_v43  ;;  %v872_v49 = vld [vmem:[%s1570_s0 + $0xa8] sm:$0xf] }
  0x3a   :  { %584 = vmatpush.bf16.msrb.mxu1 %v1092_v53  ;;  %v873_v53 = vor.u32 %v1076_v50, %v872_v49 }
  0x3b   :  { %670 = vmatpush.bf16.msrb.mxu3 %v1108_v51  ;;  %627 = vmatpush.bf16.msrb.mxu2 %v1100_v52  ;;  %v869_v51 = vor.u32 %v1073_v44, %v866_v45  ;;  %v881_v52 = vor.u32 %v1077_v47, %v880_v46 }
  0x3e   :  { %585 = vmatpush.bf16.msrb.mxu1 %v1091_v58  ;;  %v900_v58 = vld [vmem:[%s1570_s0 + $0xd8] sm:$0xf] }
  0x3f   :  { %671 = vmatpush.bf16.msrb.mxu3 %v1107_v54  ;;  %628 = vmatpush.bf16.msrb.mxu2 %v1099_v55  ;;  %v1079_v54 = vld [vmem:[%s1570_s0 + $0xd4] sm:$0xf]  ;;  %v894_v55 = vld [vmem:[%s1570_s0 + $0xe4] sm:$0xf0]  ;;  %v901_v0 = vor.u32 %v1082_v59, %v900_v58 }
  0x40   :  { %v897_v60 = vor.u32 %v1079_v54, %v894_v55 }
  0x41   :  { %586 = vmatmul.bf16.vlgmr.msrb.gmra.mxu1 %v789_v2  ;;  %1046 = vmatmul.msk.bf16.vlgmr.msrb.gmra.mxu0 %vm513_vm0, %v801_v3  ;;  %v52_v2 = vld [vmem:[%s1570_s0 + $0xf8] sm:$0x11]  ;;  %v53_v3 = vld [vmem:[%s1570_s0 + $0x100] sm:$0x1] }
  0x42   :  { %672 = vmatmul.bf16.vlgmr.msrb.gmra.mxu3 %v797_v63  ;;  %629 = vmatmul.bf16.vlgmr.msrb.gmra.mxu2 %v793_v4  ;;  %v889_v63 = vor.u32 %v1078_v56, %v886_v57  ;;  %v232_v4 = vunpack.c.h.b16 %v52_v2  ;;  %v233_v6 = vunpack.c.l.b16 %v53_v3  ;;  %v231_v8 = vunpack.c.l.b16 %v52_v2 }
  0x44   :  { %v267_v9 = vpack.c.b16 %v232_v4, %v232_v4  ;;  %v268_v11 = vpack.c.b16 %v233_v6, %v233_v6  ;;  %v266_v14 = vpack.c.b16 %v231_v8, %v231_v8 }
  0x51   :  { %591 = vmatmul.bf16.gmra.mxu1 %v809_v15  ;;  %1047 = vmatmul.msk.bf16.gmra.mxu0 %vm513_vm0, %v821_v16  ;;  %v1477_v15 = vld [vmem:[%s1569_s2] ss:$0 sm:$0xff] }
  0x52   :  { %677 = vmatmul.bf16.gmra.mxu3 %v817_v12  ;;  %634 = vmatmul.bf16.gmra.mxu2 %v813_v17 }
  0x61   :  { %596 = vmatmul.bf16.gmra.mxu1 %v829_v27  ;;  %1048 = vmatmul.msk.bf16.gmra.mxu0 %vm513_vm0, %v841_v28 }
  0x62   :  { %682 = vmatmul.bf16.gmra.mxu3 %v837_v24  ;;  %639 = vmatmul.bf16.gmra.mxu2 %v833_v29 }
  0x71   :  { %601 = vmatmul.bf16.gmra.mxu1 %v849_v39  ;;  %1049 = vmatmul.msk.bf16.gmra.mxu0 %vm513_vm0, %v861_v40 }
  0x72   :  { %687 = vmatmul.bf16.gmra.mxu3 %v857_v36  ;;  %644 = vmatmul.bf16.gmra.mxu2 %v853_v41 }
  0x81   :  { %606 = vmatmul.bf16.gmra.mxu1 %v869_v51  ;;  %1050 = vmatmul.msk.bf16.gmra.mxu0 %vm513_vm0, %v881_v52 }
  0x82   :  { %692 = vmatmul.bf16.gmra.mxu3 %v877_v48  ;;  %649 = vmatmul.bf16.gmra.mxu2 %v873_v53 }
  0x91   :  { %611 = vmatmul.bf16.gmra.mxu1 %v889_v63  ;;  %1051 = vmatmul.msk.bf16.gmra.mxu0 %vm513_vm0, %v901_v0 }
  0x92   :  { %697 = vmatmul.bf16.gmra.mxu3 %v897_v60  ;;  %654 = vmatmul.bf16.gmra.mxu2 %v893_v1 }
  0x9e   :  { %v544_v12 = vpop.f32.mrf.mxu0  ;;  %v1471_v13 = vpop.f32.mrf.mxu1 }
  0x9f   :  { %v545_v34 = vadd.f32 %v1477_v15, %v544_v12 }
  0xa1   :  { %616 = vmatmul.bf16.gmra.mxu1 %v265_v10  ;;  %1052 = vmatmul.msk.bf16.gmra.mxu0 %vm513_vm0, %v268_v11 }
  0xa2   :  { %702 = vmatmul.bf16.gmra.mxu3 %v267_v9  ;;  %659 = vmatmul.bf16.gmra.mxu2 %v266_v14  ;;  %v555_v9 = vadd.f32 %v1477_v15, %v1471_v13 }
  0xa5   :  { %v564_v7 = vpop.f32.mrf.mxu2 }
  0xa6   :  { %v1480_v16 = vadd.f32 %v1477_v15, %v564_v7  ;;  %v546_v17 = vpop.f32.mrf.mxu0  ;;  %v1482_v18 = vpop.f32.mrf.mxu1 }
  0xa7   :  { %v574_v19 = vpop.f32.mrf.mxu3  ;;  %v547_v42 = vadd.f32 %v1477_v15, %v546_v17 }
  0xa8   :  { %v1485_v20 = vadd.f32 %v1477_v15, %v574_v19 }
  0xad   :  { %v566_v21 = vpop.f32.mrf.mxu2 }
  0xae   :  { %v1488_v22 = vadd.f32 %v1477_v15, %v566_v21  ;;  %v549_v23 = vpop.f32.mrf.mxu0  ;;  %v1490_v24 = vpop.f32.mrf.mxu1 }
  0xaf   :  { %v576_v25 = vpop.f32.mrf.mxu3  ;;  %v550_v52 = vadd.f32 %v1477_v15, %v549_v23 }
  0xb0   :  { %v557_v25 = vadd.f32 %v1477_v15, %v1482_v18 }
  0xb5   :  { %v569_v26 = vpop.f32.mrf.mxu2 }
  0xb6   :  { %v1493_v27 = vadd.f32 %v1477_v15, %v569_v26  ;;  %v551_v28 = vpop.f32.mrf.mxu0  ;;  %v1495_v29 = vpop.f32.mrf.mxu1 }
  0xb7   :  { %v552_v62 = vadd.f32 %v1477_v15, %v551_v28 }
  0xbd   :  { %v571_v30 = vpop.f32.mrf.mxu2 }
  0xbe   :  { %v1498_v31 = vadd.f32 %v1477_v15, %v571_v30  ;;  %v587_v32 = vpop.f32.mrf.mxu1  ;;  %v716_v33 = vpop.f32.mrf.mxu0 }
  0xbf   :  { %v588_v36 = vadd.f32 %v587_v32, %v545_v34 }
  0xc5   :  { %v673_v35 = vpop.f32.mrf.mxu3  ;;  %v630_v37 = vpop.f32.mrf.mxu2 }
  0xc6   :  { %v631_v38 = vadd.f32 %v630_v37, %v588_v36  ;;  %v589_v39 = vpop.f32.mrf.mxu1  ;;  %v718_v40 = vpop.f32.mrf.mxu0  ;;  %v560_v37 = vadd.f32 %v1477_v15, %v1490_v24 }
  0xc7   :  { %v590_v46 = vadd.f32 %v589_v39, %v547_v42 }
  0xc8   :  { %v674_v41 = vadd.f32 %v673_v35, %v631_v38 }
  0xca   :  { %v717_v43 = vadd.f32 %v716_v33, %v674_v41 }
  0xcc   :  { %v750_v45 = vpack.c.bf16 %v717_v43, %v717_v43 }
  0xcd   :  { %v675_v44 = vpop.f32.mrf.mxu3  ;;  %v632_v47 = vpop.f32.mrf.mxu2 }
  0xce   :  { %764 = vst.msk [vmem:[%s1571_s3] sm:$0xf] %vm763_vm1, %v750_v45  ;;  %v633_v48 = vadd.f32 %v632_v47, %v590_v46  ;;  %v592_v49 = vpop.f32.mrf.mxu1  ;;  %v721_v50 = vpop.f32.mrf.mxu0  ;;  %v562_v46 = vadd.f32 %v1477_v15, %v1495_v29 }
  0xcf   :  { %v593_v56 = vadd.f32 %v592_v49, %v550_v52 }
  0xd0   :  { %v676_v51 = vadd.f32 %v675_v44, %v633_v48 }
  0xd2   :  { %v719_v53 = vadd.f32 %v718_v40, %v676_v51 }
  0xd4   :  { %v751_v55 = vpack.c.bf16 %v719_v53, %v719_v53 }
  0xd5   :  { %v678_v54 = vpop.f32.mrf.mxu3  ;;  %v635_v57 = vpop.f32.mrf.mxu2 }
  0xd6   :  { %765 = vst.msk [vmem:[%s1571_s3 + $0x4] sm:$0xf] %vm763_vm1, %v751_v55  ;;  %v636_v58 = vadd.f32 %v635_v57, %v593_v56  ;;  %v594_v59 = vpop.f32.mrf.mxu1  ;;  %v723_v60 = vpop.f32.mrf.mxu0 }
  0xd7   :  { %v595_v2 = vadd.f32 %v594_v59, %v552_v62 }
  0xd8   :  { %v679_v61 = vadd.f32 %v678_v54, %v636_v58 }
  0xda   :  { %v722_v63 = vadd.f32 %v721_v50, %v679_v61 }
  0xdc   :  { %v752_v1 = vpack.c.bf16 %v722_v63, %v722_v63 }
  0xdd   :  { %v680_v0 = vpop.f32.mrf.mxu3  ;;  %v637_v3 = vpop.f32.mrf.mxu2 }
  0xde   :  { %766 = vst.msk [vmem:[%s1571_s3 + $0x8] sm:$0xf] %vm763_vm1, %v752_v1  ;;  %v638_v4 = vadd.f32 %v637_v3, %v595_v2  ;;  %v597_v5 = vpop.f32.mrf.mxu1  ;;  %v726_v6 = vpop.f32.mrf.mxu0 }
  0xdf   :  { %v598_v14 = vadd.f32 %v597_v5, %v555_v9 }
  0xe0   :  { %v681_v8 = vadd.f32 %v680_v0, %v638_v4 }
  0xe2   :  { %v724_v10 = vadd.f32 %v723_v60, %v681_v8 }
  0xe4   :  { %v753_v12 = vpack.c.bf16 %v724_v10, %v724_v10 }
  0xe5   :  { %v683_v11 = vpop.f32.mrf.mxu3  ;;  %v640_v7 = vpop.f32.mrf.mxu2 }
  0xe6   :  { %767 = vst.msk [vmem:[%s1571_s3 + $0xc] sm:$0xf] %vm763_vm1, %v753_v12  ;;  %v641_v17 = vadd.f32 %v640_v7, %v598_v14  ;;  %v599_v19 = vpop.f32.mrf.mxu1  ;;  %v728_v21 = vpop.f32.mrf.mxu0 }
  0xe7   :  { %v600_v30 = vadd.f32 %v599_v19, %v557_v25 }
  0xe8   :  { %v684_v23 = vadd.f32 %v683_v11, %v641_v17 }
  0xea   :  { %v727_v26 = vadd.f32 %v726_v6, %v684_v23 }
  0xec   :  { %v754_v13 = vpack.c.bf16 %v727_v26, %v727_v26 }
  0xed   :  { %v685_v28 = vpop.f32.mrf.mxu3  ;;  %v642_v32 = vpop.f32.mrf.mxu2 }
  0xee   :  { %768 = vst.msk [vmem:[%s1571_s3 + $0x10] sm:$0xf] %vm763_vm1, %v754_v13  ;;  %v643_v33 = vadd.f32 %v642_v32, %v600_v30  ;;  %v602_v34 = vpop.f32.mrf.mxu1  ;;  %v731_v35 = vpop.f32.mrf.mxu0 }
  0xef   :  { %v603_v40 = vadd.f32 %v602_v34, %v560_v37 }
  0xf0   :  { %v686_v36 = vadd.f32 %v685_v28, %v643_v33 }
  0xf2   :  { %v729_v38 = vadd.f32 %v728_v21, %v686_v36 }
  0xf4   :  { %v755_v18 = vpack.c.bf16 %v729_v38, %v729_v38 }
  0xf5   :  { %v688_v39 = vpop.f32.mrf.mxu3  ;;  %v645_v41 = vpop.f32.mrf.mxu2 }
  0xf6   :  { %769 = vst.msk [vmem:[%s1571_s3 + $0x14] sm:$0xf] %vm763_vm1, %v755_v18  ;;  %v646_v42 = vadd.f32 %v645_v41, %v603_v40  ;;  %v604_v43 = vpop.f32.mrf.mxu1  ;;  %v733_v44 = vpop.f32.mrf.mxu0 }
  0xf7   :  { %v605_v49 = vadd.f32 %v604_v43, %v562_v46 }
  0xf8   :  { %v689_v45 = vadd.f32 %v688_v39, %v646_v42 }
  0xfa   :  { %v732_v47 = vadd.f32 %v731_v35, %v689_v45 }
  0xfc   :  { %v756_v24 = vpack.c.bf16 %v732_v47, %v732_v47 }
  0xfd   :  { %v690_v48 = vpop.f32.mrf.mxu3  ;;  %v647_v50 = vpop.f32.mrf.mxu2 }
  0xfe   :  { %770 = vst.msk [vmem:[%s1571_s3 + $0x18] sm:$0xf] %vm763_vm1, %v756_v24  ;;  %v648_v51 = vadd.f32 %v647_v50, %v605_v49  ;;  %v607_v52 = vpop.f32.mrf.mxu1  ;;  %v736_v53 = vpop.f32.mrf.mxu0 }
  0xff   :  { %v608_v58 = vadd.f32 %v607_v52, %v1480_v16 }
 0x100   :  { %v691_v54 = vadd.f32 %v690_v48, %v648_v51 }
 0x102   :  { %v734_v55 = vadd.f32 %v733_v44, %v691_v54 }
 0x104   :  { %v757_v57 = vpack.c.bf16 %v734_v55, %v734_v55 }
 0x105   :  { %v693_v56 = vpop.f32.mrf.mxu3  ;;  %v650_v15 = vpop.f32.mrf.mxu2 }
 0x106   :  { %771 = vst.msk [vmem:[%s1571_s3 + $0x1c] sm:$0xf] %vm763_vm1, %v757_v57  ;;  %v651_v29 = vadd.f32 %v650_v15, %v608_v58  ;;  %v609_v59 = vpop.f32.mrf.mxu1  ;;  %v738_v60 = vpop.f32.mrf.mxu0 }
 0x107   :  { %v610_v1 = vadd.f32 %v609_v59, %v1488_v22 }
 0x108   :  { %v694_v61 = vadd.f32 %v693_v56, %v651_v29 }
 0x10a   :  { %v737_v62 = vadd.f32 %v736_v53, %v694_v61 }
 0x10c   :  { %v758_v0 = vpack.c.bf16 %v737_v62, %v737_v62 }
 0x10d   :  { %v695_v63 = vpop.f32.mrf.mxu3  ;;  %v652_v2 = vpop.f32.mrf.mxu2 }
 0x10e   :  { %772 = vst.msk [vmem:[%s1571_s3 + $0x20] sm:$0xf] %vm763_vm1, %v758_v0  ;;  %v653_v16 = vadd.f32 %v652_v2, %v610_v1  ;;  %v612_v3 = vpop.f32.mrf.mxu1  ;;  %v741_v4 = vpop.f32.mrf.mxu0 }
 0x10f   :  { %v613_v10 = vadd.f32 %v612_v3, %v1493_v27 }
 0x110   :  { %v696_v5 = vadd.f32 %v695_v63, %v653_v16 }
 0x112   :  { %v739_v6 = vadd.f32 %v738_v60, %v696_v5 }
 0x114   :  { %v759_v9 = vpack.c.bf16 %v739_v6, %v739_v6 }
 0x115   :  { %v698_v8 = vpop.f32.mrf.mxu3  ;;  %v655_v11 = vpop.f32.mrf.mxu2 }
 0x116   :  { %773 = vst.msk [vmem:[%s1571_s3 + $0x24] sm:$0xf] %vm763_vm1, %v759_v9  ;;  %v656_v22 = vadd.f32 %v655_v11, %v613_v10  ;;  %v614_v12 = vpop.f32.mrf.mxu1  ;;  %v743_v14 = vpop.f32.mrf.mxu0 }
 0x117   :  { %v615_v23 = vadd.f32 %v614_v12, %v1498_v31 }
 0x118   :  { %v699_v7 = vadd.f32 %v698_v8, %v656_v22 }
 0x11a   :  { %v742_v17 = vadd.f32 %v741_v4, %v699_v7 }
 0x11c   :  { %v760_v21 = vpack.c.bf16 %v742_v17, %v742_v17 }
 0x11d   :  { %v700_v19 = vpop.f32.mrf.mxu3  ;;  %v657_v25 = vpop.f32.mrf.mxu2 }
 0x11e   :  { %774 = vst.msk [vmem:[%s1571_s3 + $0x28] sm:$0xf] %vm763_vm1, %v760_v21  ;;  %v658_v27 = vadd.f32 %v657_v25, %v615_v23  ;;  %v617_v26 = vpop.f32.mrf.mxu1  ;;  %v746_v28 = vpop.f32.mrf.mxu0 }
 0x11f   :  { %v618_v34 = vadd.f32 %v617_v26, %v1485_v20 }
 0x120   :  { %v701_v13 = vadd.f32 %v700_v19, %v658_v27 }
 0x122   :  { %v744_v30 = vadd.f32 %v743_v14, %v701_v13 }
 0x124   :  { %v761_v33 = vpack.c.bf16 %v744_v30, %v744_v30 }
 0x125   :  { %v703_v32 = vpop.f32.mrf.mxu3  ;;  %v660_v35 = vpop.f32.mrf.mxu2 }
 0x126   :  { %775 = vst.msk [vmem:[%s1571_s3 + $0x2c] sm:$0xf] %vm763_vm1, %v761_v33  ;;  %v661_v31 = vadd.f32 %v660_v35, %v618_v34  ;;  %v619_v36 = vpop.f32.mrf.mxu1  ;;  %v748_v37 = vpop.f32.mrf.mxu0 }
 0x128   :  { %v704_v38 = vadd.f32 %v703_v32, %v661_v31 }
 0x12a   :  { %v747_v39 = vadd.f32 %v746_v28, %v704_v38 }
 0x12c   :  { %v762_v40 = vpack.c.bf16 %v747_v39, %v747_v39 }
 0x12d   :  { %v705_v18 = vpop.f32.mrf.mxu3  ;;  %v662_v41 = vpop.f32.mrf.mxu2 }
 0x12e   :  { %777 = vst.msk [vmem:[%s1571_s3 + $0x30] sm:$0x1] %vm776_vm2, %v762_v40 }

// kernel: nature_conv_body_forward.7
= control target key start
LH: loop header
LB: loop body
LE: loop exit
PB: predicated region body
PF: predicated region fallthrough
CT: control target
= control target key end

     0   :  { %s15041_s0 = inlined_call_operand.vmem [shape: bf16[2,3136], index: 0, kind: input, shape index: {}]   ;;  %s15042_s1 = inlined_call_operand.vmem [shape: bf16[3136,512], index: 1, kind: input, shape index: {}]   ;;  %s15043_s2 = inlined_call_operand.vmem [shape: f32[1,512], index: 2, kind: input, shape index: {}]   ;;  %s15044_s3 = inlined_call_operand.hbm [shape: f32[2,512], index: 3, kind: output, shape index: {}]  }
   0x1   :  { %v6243_v0 = vld [vmem:[%s15042_s1 + $0xe0] sm:$0xf]  ;;  %v9299_v1 = vld [vmem:[%s15042_s1 + $0xec] sm:$0xf0] }
   0x2   :  { %v6371_v2 = vld [vmem:[%s15042_s1 + $0x1e0] sm:$0xf]  ;;  %v6244_v3 = vor.u32 %v9299_v1, %v6243_v0  ;;  %v9331_v4 = vld [vmem:[%s15042_s1 + $0x1ec] sm:$0xf0] }
   0x3   :  { %v6499_v5 = vld [vmem:[%s15042_s1 + $0x2e0] sm:$0xf]  ;;  %v9363_v6 = vld [vmem:[%s15042_s1 + $0x2ec] sm:$0xf0]  ;;  %v6372_v7 = vor.u32 %v9331_v4, %v6371_v2 }
   0x4   :  { %v6500_v8 = vor.u32 %v9363_v6, %v6499_v5  ;;  %v6627_v9 = vld [vmem:[%s15042_s1 + $0x3e0] sm:$0xf]  ;;  %v9395_v10 = vld [vmem:[%s15042_s1 + $0x3ec] sm:$0xf0]  ;;  %4794 = vmatpush.bf16.msra.mxu0 %v6244_v3 }
   0x5   :  { %v6227_v11 = vld [vmem:[%s15042_s1 + $0xc0] sm:$0xf]  ;;  %v6628_v12 = vor.u32 %v9395_v10, %v6627_v9  ;;  %v9295_v13 = vld [vmem:[%s15042_s1 + $0xcc] sm:$0xf0]  ;;  %4807 = vmatpush.bf16.msra.mxu1 %v6372_v7 }
   0x6   :  { %v6355_v14 = vld [vmem:[%s15042_s1 + $0x1c0] sm:$0xf]  ;;  %v9327_v15 = vld [vmem:[%s15042_s1 + $0x1cc] sm:$0xf0]  ;;  %4820 = vmatpush.bf16.msra.mxu2 %v6500_v8  ;;  %v6228_v16 = vor.u32 %v9295_v13, %v6227_v11 }
   0x7   :  { %v6356_v17 = vor.u32 %v9327_v15, %v6355_v14  ;;  %v6483_v18 = vld [vmem:[%s15042_s1 + $0x2c0] sm:$0xf]  ;;  %v9359_v19 = vld [vmem:[%s15042_s1 + $0x2cc] sm:$0xf0]  ;;  %4833 = vmatpush.bf16.msra.mxu3 %v6628_v12 }
   0x8   :  { %v6611_v20 = vld [vmem:[%s15042_s1 + $0x3c0] sm:$0xf]  ;;  %v6484_v21 = vor.u32 %v9359_v19, %v6483_v18  ;;  %v9391_v22 = vld [vmem:[%s15042_s1 + $0x3cc] sm:$0xf0]  ;;  %4795 = vmatpush.bf16.msra.mxu0 %v6228_v16 }
   0x9   :  { %v6211_v23 = vld [vmem:[%s15042_s1 + $0xa0] sm:$0xf]  ;;  %v9291_v24 = vld [vmem:[%s15042_s1 + $0xac] sm:$0xf0]  ;;  %v6612_v25 = vor.u32 %v9391_v22, %v6611_v20  ;;  %4808 = vmatpush.bf16.msra.mxu1 %v6356_v17 }
   0xa   :  { %v6339_v26 = vld [vmem:[%s15042_s1 + $0x1a0] sm:$0xf]  ;;  %v9323_v27 = vld [vmem:[%s15042_s1 + $0x1ac] sm:$0xf0]  ;;  %v6212_v29 = vor.u32 %v9291_v24, %v6211_v23  ;;  %4821 = vmatpush.bf16.msra.mxu2 %v6484_v21 }
   0xb   :  { %v6467_v28 = vld [vmem:[%s15042_s1 + $0x2a0] sm:$0xf]  ;;  %v9355_v30 = vld [vmem:[%s15042_s1 + $0x2ac] sm:$0xf0]  ;;  %v6340_v33 = vor.u32 %v9323_v27, %v6339_v26  ;;  %4834 = vmatpush.bf16.msra.mxu3 %v6612_v25 }
   0xc   :  { %v6595_v31 = vld [vmem:[%s15042_s1 + $0x3a0] sm:$0xf]  ;;  %v9387_v32 = vld [vmem:[%s15042_s1 + $0x3ac] sm:$0xf0]  ;;  %v6468_v34 = vor.u32 %v9355_v30, %v6467_v28  ;;  %4796 = vmatpush.bf16.msra.mxu0 %v6212_v29 }
   0xd   :  { %v6195_v35 = vld [vmem:[%s15042_s1 + $0x80] sm:$0xf]  ;;  %v9287_v36 = vld [vmem:[%s15042_s1 + $0x8c] sm:$0xf0]  ;;  %v6596_v38 = vor.u32 %v9387_v32, %v6595_v31  ;;  %4809 = vmatpush.bf16.msra.mxu1 %v6340_v33 }
   0xe   :  { %v6323_v37 = vld [vmem:[%s15042_s1 + $0x180] sm:$0xf]  ;;  %v9319_v39 = vld [vmem:[%s15042_s1 + $0x18c] sm:$0xf0]  ;;  %v6196_v44 = vor.u32 %v9287_v36, %v6195_v35  ;;  %4822 = vmatpush.bf16.msra.mxu2 %v6468_v34 }
   0xf   :  { %v6451_v40 = vld [vmem:[%s15042_s1 + $0x280] sm:$0xf]  ;;  %v9351_v41 = vld [vmem:[%s15042_s1 + $0x28c] sm:$0xf0]  ;;  %v6324_v45 = vor.u32 %v9319_v39, %v6323_v37  ;;  %4835 = vmatpush.bf16.msra.mxu3 %v6596_v38 }
  0x10   :  { %v6579_v42 = vld [vmem:[%s15042_s1 + $0x380] sm:$0xf]  ;;  %v9383_v43 = vld [vmem:[%s15042_s1 + $0x38c] sm:$0xf0]  ;;  %v6452_v46 = vor.u32 %v9351_v41, %v6451_v40  ;;  %4797 = vmatpush.bf16.msra.mxu0 %v6196_v44 }
  0x11   :  { %v6179_v47 = vld [vmem:[%s15042_s1 + $0x60] sm:$0xf]  ;;  %v9283_v48 = vld [vmem:[%s15042_s1 + $0x6c] sm:$0xf0]  ;;  %v6580_v50 = vor.u32 %v9383_v43, %v6579_v42  ;;  %4810 = vmatpush.bf16.msra.mxu1 %v6324_v45 }
  0x12   :  { %v6307_v49 = vld [vmem:[%s15042_s1 + $0x160] sm:$0xf]  ;;  %v9315_v51 = vld [vmem:[%s15042_s1 + $0x16c] sm:$0xf0]  ;;  %v6180_v56 = vor.u32 %v9283_v48, %v6179_v47  ;;  %4823 = vmatpush.bf16.msra.mxu2 %v6452_v46 }
  0x13   :  { %v6435_v52 = vld [vmem:[%s15042_s1 + $0x260] sm:$0xf]  ;;  %v9347_v53 = vld [vmem:[%s15042_s1 + $0x26c] sm:$0xf0]  ;;  %v6308_v57 = vor.u32 %v9315_v51, %v6307_v49  ;;  %4836 = vmatpush.bf16.msra.mxu3 %v6580_v50 }
  0x14   :  { %v6563_v54 = vld [vmem:[%s15042_s1 + $0x360] sm:$0xf]  ;;  %v9379_v55 = vld [vmem:[%s15042_s1 + $0x36c] sm:$0xf0]  ;;  %v6436_v58 = vor.u32 %v9347_v53, %v6435_v52  ;;  %4798 = vmatpush.bf16.msra.mxu0 %v6180_v56 }
  0x15   :  { %v6163_v59 = vld [vmem:[%s15042_s1 + $0x40] sm:$0xf]  ;;  %v9279_v60 = vld [vmem:[%s15042_s1 + $0x4c] sm:$0xf0]  ;;  %v6564_v62 = vor.u32 %v9379_v55, %v6563_v54  ;;  %4811 = vmatpush.bf16.msra.mxu1 %v6308_v57 }
  0x16   :  { %v6291_v61 = vld [vmem:[%s15042_s1 + $0x140] sm:$0xf]  ;;  %v9311_v63 = vld [vmem:[%s15042_s1 + $0x14c] sm:$0xf0]  ;;  %v6164_v4 = vor.u32 %v9279_v60, %v6163_v59  ;;  %4824 = vmatpush.bf16.msra.mxu2 %v6436_v58 }
  0x17   :  { %v6419_v0 = vld [vmem:[%s15042_s1 + $0x240] sm:$0xf]  ;;  %v9343_v1 = vld [vmem:[%s15042_s1 + $0x24c] sm:$0xf0]  ;;  %v6292_v5 = vor.u32 %v9311_v63, %v6291_v61  ;;  %4837 = vmatpush.bf16.msra.mxu3 %v6564_v62 }
  0x18   :  { %v6547_v2 = vld [vmem:[%s15042_s1 + $0x340] sm:$0xf]  ;;  %v9375_v3 = vld [vmem:[%s15042_s1 + $0x34c] sm:$0xf0]  ;;  %v6420_v6 = vor.u32 %v9343_v1, %v6419_v0  ;;  %4799 = vmatpush.bf16.msra.mxu0 %v6164_v4 }
  0x19   :  { %v6147_v7 = vld [vmem:[%s15042_s1 + $0x20] sm:$0xf]  ;;  %v9275_v8 = vld [vmem:[%s15042_s1 + $0x2c] sm:$0xf0]  ;;  %v6548_v10 = vor.u32 %v9375_v3, %v6547_v2  ;;  %4812 = vmatpush.bf16.msra.mxu1 %v6292_v5 }
  0x1a   :  { %v6275_v9 = vld [vmem:[%s15042_s1 + $0x120] sm:$0xf]  ;;  %v9307_v11 = vld [vmem:[%s15042_s1 + $0x12c] sm:$0xf0]  ;;  %v6148_v16 = vor.u32 %v9275_v8, %v6147_v7  ;;  %4825 = vmatpush.bf16.msra.mxu2 %v6420_v6 }
  0x1b   :  { %v6403_v12 = vld [vmem:[%s15042_s1 + $0x220] sm:$0xf]  ;;  %v9339_v13 = vld [vmem:[%s15042_s1 + $0x22c] sm:$0xf0]  ;;  %v6276_v19 = vor.u32 %v9307_v11, %v6275_v9  ;;  %4838 = vmatpush.bf16.msra.mxu3 %v6548_v10 }
  0x1c   :  { %v6531_v14 = vld [vmem:[%s15042_s1 + $0x320] sm:$0xf]  ;;  %v9371_v15 = vld [vmem:[%s15042_s1 + $0x32c] sm:$0xf0]  ;;  %v6404_v20 = vor.u32 %v9339_v13, %v6403_v12  ;;  %4800 = vmatpush.bf16.msra.mxu0 %v6148_v16 }
  0x1d   :  { %v6131_v17 = vld [vmem:[%s15042_s1] sm:$0xf]  ;;  %v9271_v18 = vld [vmem:[%s15042_s1 + $0xc] sm:$0xf0]  ;;  %v6532_v24 = vor.u32 %v9371_v15, %v6531_v14  ;;  %4813 = vmatpush.bf16.msra.mxu1 %v6276_v19 }
  0x1e   :  { %v6259_v21 = vld [vmem:[%s15042_s1 + $0x100] sm:$0xf]  ;;  %v9303_v22 = vld [vmem:[%s15042_s1 + $0x10c] sm:$0xf0]  ;;  %v6132_v31 = vor.u32 %v9271_v18, %v6131_v17  ;;  %4826 = vmatpush.bf16.msra.mxu2 %v6404_v20 }
  0x1f   :  { %v6387_v23 = vld [vmem:[%s15042_s1 + $0x200] sm:$0xf]  ;;  %v9335_v25 = vld [vmem:[%s15042_s1 + $0x20c] sm:$0xf0]  ;;  %v6260_v35 = vor.u32 %v9303_v22, %v6259_v21  ;;  %4839 = vmatpush.bf16.msra.mxu3 %v6532_v24 }
  0x20   :  { %v6515_v26 = vld [vmem:[%s15042_s1 + $0x300] sm:$0xf]  ;;  %v9367_v27 = vld [vmem:[%s15042_s1 + $0x30c] sm:$0xf0]  ;;  %v6388_v36 = vor.u32 %v9335_v25, %v6387_v23  ;;  %4801 = vmatpush.bf16.msra.mxu0 %v6132_v31 }
  0x21   :  { %v6755_v28 = vld [vmem:[%s15042_s1 + $0x4e0] sm:$0xf]  ;;  %v9427_v29 = vld [vmem:[%s15042_s1 + $0x4ec] sm:$0xf0]  ;;  %v6516_v39 = vor.u32 %v9367_v27, %v6515_v26  ;;  %4814 = vmatpush.bf16.msra.mxu1 %v6260_v35 }
  0x22   :  { %v6883_v30 = vld [vmem:[%s15042_s1 + $0x5e0] sm:$0xf]  ;;  %v9459_v32 = vld [vmem:[%s15042_s1 + $0x5ec] sm:$0xf0]  ;;  %v6756_v40 = vor.u32 %v9427_v29, %v6755_v28  ;;  %4827 = vmatpush.bf16.msra.mxu2 %v6388_v36 }
  0x23   :  { %v7011_v33 = vld [vmem:[%s15042_s1 + $0x6e0] sm:$0xf]  ;;  %v9491_v34 = vld [vmem:[%s15042_s1 + $0x6ec] sm:$0xf0]  ;;  %v6884_v41 = vor.u32 %v9459_v32, %v6883_v30  ;;  %4840 = vmatpush.bf16.msra.mxu3 %v6516_v39 }
  0x24   :  { %v7139_v37 = vld [vmem:[%s15042_s1 + $0x7e0] sm:$0xf]  ;;  %v9523_v38 = vld [vmem:[%s15042_s1 + $0x7ec] sm:$0xf0]  ;;  %v7012_v42 = vor.u32 %v9491_v34, %v7011_v33  ;;  %4846 = vmatpush.bf16.msrb.mxu0 %v6756_v40 }
  0x25   :  { %v6739_v43 = vld [vmem:[%s15042_s1 + $0x4c0] sm:$0xf]  ;;  %v9423_v44 = vld [vmem:[%s15042_s1 + $0x4cc] sm:$0xf0]  ;;  %v7140_v46 = vor.u32 %v9523_v38, %v7139_v37  ;;  %4859 = vmatpush.bf16.msrb.mxu1 %v6884_v41 }
  0x26   :  { %v6867_v45 = vld [vmem:[%s15042_s1 + $0x5c0] sm:$0xf]  ;;  %v9455_v47 = vld [vmem:[%s15042_s1 + $0x5cc] sm:$0xf0]  ;;  %v6740_v52 = vor.u32 %v9423_v44, %v6739_v43  ;;  %4872 = vmatpush.bf16.msrb.mxu2 %v7012_v42 }
  0x27   :  { %v6995_v48 = vld [vmem:[%s15042_s1 + $0x6c0] sm:$0xf]  ;;  %v9487_v49 = vld [vmem:[%s15042_s1 + $0x6cc] sm:$0xf0]  ;;  %v6868_v55 = vor.u32 %v9455_v47, %v6867_v45  ;;  %4885 = vmatpush.bf16.msrb.mxu3 %v7140_v46 }
  0x28   :  { %v7123_v50 = vld [vmem:[%s15042_s1 + $0x7c0] sm:$0xf]  ;;  %v9519_v51 = vld [vmem:[%s15042_s1 + $0x7cc] sm:$0xf0]  ;;  %v6996_v56 = vor.u32 %v9487_v49, %v6995_v48  ;;  %4847 = vmatpush.bf16.msrb.mxu0 %v6740_v52 }
  0x29   :  { %v6723_v53 = vld [vmem:[%s15042_s1 + $0x4a0] sm:$0xf]  ;;  %v9419_v54 = vld [vmem:[%s15042_s1 + $0x4ac] sm:$0xf0]  ;;  %v7124_v60 = vor.u32 %v9519_v51, %v7123_v50  ;;  %4860 = vmatpush.bf16.msrb.mxu1 %v6868_v55 }
  0x2a   :  { %v6851_v57 = vld [vmem:[%s15042_s1 + $0x5a0] sm:$0xf]  ;;  %v9451_v58 = vld [vmem:[%s15042_s1 + $0x5ac] sm:$0xf0]  ;;  %v6724_v1 = vor.u32 %v9419_v54, %v6723_v53  ;;  %4873 = vmatpush.bf16.msrb.mxu2 %v6996_v56 }
  0x2b   :  { %v16_v59 = vld [vmem:[%s15041_s0] sm:$0xff]  ;;  %v9483_v62 = vld [vmem:[%s15042_s1 + $0x6ac] sm:$0xf0]  ;;  %v6852_v2 = vor.u32 %v9451_v58, %v6851_v57  ;;  %4886 = vmatpush.bf16.msrb.mxu3 %v7124_v60 }
  0x2c   :  { %v6979_v61 = vld [vmem:[%s15042_s1 + $0x6a0] sm:$0xf]  ;;  %815 = vst [vmem:[#allocation1] ss:$9 sm:$0xff] %v16_v59  ;;  %v9515_v0 = vld [vmem:[%s15042_s1 + $0x7ac] sm:$0xf0]  ;;  %4848 = vmatpush.bf16.msrb.mxu0 %v6724_v1 }
  0x2d   :  { %v7107_v63 = vld [vmem:[%s15042_s1 + $0x7a0] sm:$0xf]  ;;  %v6980_v3 = vor.u32 %v9483_v62, %v6979_v61  ;;  %v9415_v5 = vld [vmem:[%s15042_s1 + $0x48c] sm:$0xf0]  ;;  %4861 = vmatpush.bf16.msrb.mxu1 %v6852_v2  ;;  %v17_v61 = vld [vmem:[%s15041_s0 + $0x8] sm:$0xff] }
  0x2e   :  { %v6707_v4 = vld [vmem:[%s15042_s1 + $0x480] sm:$0xf]  ;;  %v7108_v7 = vor.u32 %v9515_v0, %v7107_v63  ;;  %v9447_v8 = vld [vmem:[%s15042_s1 + $0x58c] sm:$0xf0] }
  0x2f   :  { %v6835_v6 = vld [vmem:[%s15042_s1 + $0x580] sm:$0xf]  ;;  %v9479_v10 = vld [vmem:[%s15042_s1 + $0x68c] sm:$0xf0]  ;;  %v6708_v14 = vor.u32 %v9415_v5, %v6707_v4  ;;  %4874 = vmatpush.bf16.msrb.mxu2 %v6980_v3 }
  0x30   :  { %v6963_v9 = vld [vmem:[%s15042_s1 + $0x680] sm:$0xf]  ;;  %v9511_v12 = vld [vmem:[%s15042_s1 + $0x78c] sm:$0xf0]  ;;  %v6836_v18 = vor.u32 %v9447_v8, %v6835_v6  ;;  %4887 = vmatpush.bf16.msrb.mxu3 %v7108_v7 }
  0x31   :  { %v7091_v11 = vld [vmem:[%s15042_s1 + $0x780] sm:$0xf]  ;;  %v9411_v15 = vld [vmem:[%s15042_s1 + $0x46c] sm:$0xf0]  ;;  %v6964_v19 = vor.u32 %v9479_v10, %v6963_v9  ;;  %4849 = vmatpush.bf16.msrb.mxu0 %v6708_v14 }
  0x32   :  { %v6691_v13 = vld [vmem:[%s15042_s1 + $0x460] sm:$0xf]  ;;  %v9443_v17 = vld [vmem:[%s15042_s1 + $0x56c] sm:$0xf0]  ;;  %v7092_v23 = vor.u32 %v9511_v12, %v7091_v11  ;;  %4862 = vmatpush.bf16.msrb.mxu1 %v6836_v18 }
  0x33   :  { %v6819_v16 = vld [vmem:[%s15042_s1 + $0x560] sm:$0xf]  ;;  %v10410_v20 = vld [vmem:[#allocation1 + $0x12] sm:$0xff]  ;;  %v10423_v26 = vld [vmem:[#allocation1 + $0x9] sm:$0xff]  ;;  %v6692_v29 = vor.u32 %v9411_v15, %v6691_v13  ;;  %4875 = vmatpush.bf16.msrb.mxu2 %v6964_v19 }
  0x34   :  { %v10412_v21 = vld [vmem:[#allocation1] sm:$0xff]  ;;  %v9475_v25 = vld [vmem:[%s15042_s1 + $0x66c] sm:$0xf0]  ;;  %4828 = vmatmul.bf16.vlgmr.msra.gmra.mxu2 %v10410_v20  ;;  %4815 = vmatmul.bf16.vlgmr.msra.gmra.mxu1 %v10423_v26  ;;  %v6820_v30 = vor.u32 %v9443_v17, %v6819_v16  ;;  %v10500_v60 = vld [vmem:[#allocation1 + $0x36] sm:$0xff] }
  0x35   :  { %v10414_v22 = vld [vmem:[#allocation1 + $0x1b] sm:$0xff]  ;;  %v9507_v28 = vld [vmem:[%s15042_s1 + $0x76c] sm:$0xf0]  ;;  %4802 = vmatmul.bf16.vlgmr.msra.gmra.mxu0 %v10412_v21  ;;  %4888 = vmatpush.bf16.msrb.mxu3 %v7092_v23  ;;  %v10505_v0 = vld [vmem:[#allocation1 + $0x24] sm:$0xff] }
  0x36   :  { %v6947_v24 = vld [vmem:[%s15042_s1 + $0x660] sm:$0xf]  ;;  %4841 = vmatmul.bf16.vlgmr.msra.gmra.mxu3 %v10414_v22  ;;  %v9407_v33 = vld [vmem:[%s15042_s1 + $0x44c] sm:$0xf0]  ;;  %4850 = vmatpush.bf16.msrb.mxu0 %v6692_v29 }
  0x37   :  { %v7075_v27 = vld [vmem:[%s15042_s1 + $0x760] sm:$0xf]  ;;  %v6948_v31 = vor.u32 %v9475_v25, %v6947_v24  ;;  %v9439_v36 = vld [vmem:[%s15042_s1 + $0x54c] sm:$0xf0]  ;;  %4863 = vmatpush.bf16.msrb.mxu1 %v6820_v30 }
  0x38   :  { %v6675_v32 = vld [vmem:[%s15042_s1 + $0x440] sm:$0xf]  ;;  %v7076_v35 = vor.u32 %v9507_v28, %v7075_v27  ;;  %v9471_v38 = vld [vmem:[%s15042_s1 + $0x64c] sm:$0xf0] }
  0x39   :  { %v6803_v34 = vld [vmem:[%s15042_s1 + $0x540] sm:$0xf]  ;;  %v9503_v40 = vld [vmem:[%s15042_s1 + $0x74c] sm:$0xf0]  ;;  %v6676_v41 = vor.u32 %v9407_v33, %v6675_v32  ;;  %4876 = vmatpush.bf16.msrb.mxu2 %v6948_v31 }
  0x3a   :  { %v6931_v37 = vld [vmem:[%s15042_s1 + $0x640] sm:$0xf]  ;;  %v6804_v43 = vor.u32 %v9439_v36, %v6803_v34  ;;  %v9403_v45 = vld [vmem:[%s15042_s1 + $0x42c] sm:$0xf0]  ;;  %4889 = vmatpush.bf16.msrb.mxu3 %v7076_v35 }
  0x3b   :  { %v7059_v39 = vld [vmem:[%s15042_s1 + $0x740] sm:$0xf]  ;;  %v6932_v44 = vor.u32 %v9471_v38, %v6931_v37  ;;  %v9435_v47 = vld [vmem:[%s15042_s1 + $0x52c] sm:$0xf0]  ;;  %4851 = vmatpush.bf16.msrb.mxu0 %v6676_v41 }
  0x3c   :  { %v6659_v42 = vld [vmem:[%s15042_s1 + $0x420] sm:$0xf]  ;;  %v7060_v48 = vor.u32 %v9503_v40, %v7059_v39  ;;  %v9467_v50 = vld [vmem:[%s15042_s1 + $0x62c] sm:$0xf0]  ;;  %4864 = vmatpush.bf16.msrb.mxu1 %v6804_v43 }
  0x3d   :  { %v6787_v46 = vld [vmem:[%s15042_s1 + $0x520] sm:$0xf]  ;;  %v9499_v52 = vld [vmem:[%s15042_s1 + $0x72c] sm:$0xf0]  ;;  %v6660_v55 = vor.u32 %v9403_v45, %v6659_v42  ;;  %4877 = vmatpush.bf16.msrb.mxu2 %v6932_v44 }
  0x3e   :  { %v6915_v49 = vld [vmem:[%s15042_s1 + $0x620] sm:$0xf]  ;;  %v9399_v54 = vld [vmem:[%s15042_s1 + $0x40c] sm:$0xf0]  ;;  %v6788_v62 = vor.u32 %v9435_v47, %v6787_v46  ;;  %4890 = vmatpush.bf16.msrb.mxu3 %v7060_v48 }
  0x3f   :  { %v7043_v51 = vld [vmem:[%s15042_s1 + $0x720] sm:$0xf]  ;;  %v9431_v57 = vld [vmem:[%s15042_s1 + $0x50c] sm:$0xf0]  ;;  %v6916_v63 = vor.u32 %v9467_v50, %v6915_v49  ;;  %4852 = vmatpush.bf16.msrb.mxu0 %v6660_v55 }
  0x40   :  { %v6643_v53 = vld [vmem:[%s15042_s1 + $0x400] sm:$0xf]  ;;  %v9463_v59 = vld [vmem:[%s15042_s1 + $0x60c] sm:$0xf0]  ;;  %v7044_v3 = vor.u32 %v9499_v52, %v7043_v51  ;;  %4865 = vmatpush.bf16.msrb.mxu1 %v6788_v62 }
  0x41   :  { %v6771_v56 = vld [vmem:[%s15042_s1 + $0x500] sm:$0xf]  ;;  %v10509_v2 = vld [vmem:[#allocation1 + $0x2d] sm:$0xff]  ;;  %v6644_v9 = vor.u32 %v9399_v54, %v6643_v53  ;;  %4878 = vmatpush.bf16.msrb.mxu2 %v6916_v63 }
  0x42   :  { %v6899_v58 = vld [vmem:[%s15042_s1 + $0x600] sm:$0xf]  ;;  %v9495_v5 = vld [vmem:[%s15042_s1 + $0x70c] sm:$0xf0]  ;;  %v6772_v13 = vor.u32 %v9431_v57, %v6771_v56  ;;  %4891 = vmatpush.bf16.msrb.mxu3 %v7044_v3 }
  0x43   :  { %v10507_v1 = vld [vmem:[#allocation1 + $0x3f] sm:$0xff]  ;;  %v9555_v7 = vld [vmem:[%s15042_s1 + $0x8ec] sm:$0xf0]  ;;  %v6900_v14 = vor.u32 %v9463_v59, %v6899_v58  ;;  %4853 = vmatpush.bf16.msrb.mxu0 %v6644_v9 }
  0x44   :  { %v7027_v4 = vld [vmem:[%s15042_s1 + $0x700] sm:$0xf]  ;;  %825 = vst [vmem:[#allocation1] ss:$9 sm:$0xff] %v17_v61  ;;  %v9587_v10 = vld [vmem:[%s15042_s1 + $0x9ec] sm:$0xf0]  ;;  %4866 = vmatpush.bf16.msrb.mxu1 %v6772_v13 }
  0x45   :  { %v7267_v6 = vld [vmem:[%s15042_s1 + $0x8e0] sm:$0xf]  ;;  %v9619_v12 = vld [vmem:[%s15042_s1 + $0xaec] sm:$0xf0]  ;;  %v7028_v17 = vor.u32 %v9495_v5, %v7027_v4  ;;  %4879 = vmatpush.bf16.msrb.mxu2 %v6900_v14 }
  0x46   :  { %v7395_v8 = vld [vmem:[%s15042_s1 + $0x9e0] sm:$0xf]  ;;  %v9651_v16 = vld [vmem:[%s15042_s1 + $0xbec] sm:$0xf0]  ;;  %v7268_v18 = vor.u32 %v9555_v7, %v7267_v6  ;;  %4854 = vmatmul.bf16.vlgmr.msrb.gmra.mxu0 %v10505_v0 }
  0x47   :  { %v7523_v11 = vld [vmem:[%s15042_s1 + $0xae0] sm:$0xf]  ;;  %v7396_v19 = vor.u32 %v9587_v10, %v7395_v8  ;;  %v9551_v25 = vld [vmem:[%s15042_s1 + $0x8cc] sm:$0xf0]  ;;  %4892 = vmatpush.bf16.msrb.mxu3 %v7028_v17  ;;  %4867 = vmatmul.bf16.vlgmr.msrb.gmra.mxu1 %v10509_v2 }
  0x48   :  { %v7651_v15 = vld [vmem:[%s15042_s1 + $0xbe0] sm:$0xf]  ;;  %v7524_v23 = vor.u32 %v9619_v12, %v7523_v11  ;;  %v9583_v29 = vld [vmem:[%s15042_s1 + $0x9cc] sm:$0xf0]  ;;  %4898 = vmatpush.bf16.msra.mxu0 %v7268_v18  ;;  %4880 = vmatmul.bf16.vlgmr.msrb.gmra.mxu2 %v10500_v60 }
  0x49   :  { %v7251_v24 = vld [vmem:[%s15042_s1 + $0x8c0] sm:$0xf]  ;;  %v7652_v28 = vor.u32 %v9651_v16, %v7651_v15  ;;  %v9615_v31 = vld [vmem:[%s15042_s1 + $0xacc] sm:$0xf0]  ;;  %4911 = vmatpush.bf16.msra.mxu1 %v7396_v19 }
  0x4a   :  { %v7379_v27 = vld [vmem:[%s15042_s1 + $0x9c0] sm:$0xf]  ;;  %v9647_v33 = vld [vmem:[%s15042_s1 + $0xbcc] sm:$0xf0]  ;;  %v7252_v34 = vor.u32 %v9551_v25, %v7251_v24  ;;  %4924 = vmatpush.bf16.msra.mxu2 %v7524_v23  ;;  %4893 = vmatmul.bf16.vlgmr.msrb.gmra.mxu3 %v10507_v1 }
  0x4b   :  { %v7507_v30 = vld [vmem:[%s15042_s1 + $0xac0] sm:$0xf]  ;;  %v7380_v35 = vor.u32 %v9583_v29, %v7379_v27  ;;  %v9547_v38 = vld [vmem:[%s15042_s1 + $0x8ac] sm:$0xf0]  ;;  %4937 = vmatpush.bf16.msra.mxu3 %v7652_v28 }
  0x4c   :  { %v7635_v32 = vld [vmem:[%s15042_s1 + $0xbc0] sm:$0xf]  ;;  %v7508_v36 = vor.u32 %v9615_v31, %v7507_v30  ;;  %v9579_v41 = vld [vmem:[%s15042_s1 + $0x9ac] sm:$0xf0]  ;;  %4899 = vmatpush.bf16.msra.mxu0 %v7252_v34 }
  0x4d   :  { %v7235_v37 = vld [vmem:[%s15042_s1 + $0x8a0] sm:$0xf]  ;;  %v7636_v40 = vor.u32 %v9647_v33, %v7635_v32  ;;  %v9611_v43 = vld [vmem:[%s15042_s1 + $0xaac] sm:$0xf0]  ;;  %4912 = vmatpush.bf16.msra.mxu1 %v7380_v35 }
  0x4e   :  { %v7363_v39 = vld [vmem:[%s15042_s1 + $0x9a0] sm:$0xf]  ;;  %v9643_v45 = vld [vmem:[%s15042_s1 + $0xbac] sm:$0xf0]  ;;  %v7236_v46 = vor.u32 %v9547_v38, %v7235_v37  ;;  %4925 = vmatpush.bf16.msra.mxu2 %v7508_v36 }
  0x4f   :  { %v7491_v42 = vld [vmem:[%s15042_s1 + $0xaa0] sm:$0xf]  ;;  %v7364_v47 = vor.u32 %v9579_v41, %v7363_v39  ;;  %v9543_v50 = vld [vmem:[%s15042_s1 + $0x88c] sm:$0xf0]  ;;  %4938 = vmatpush.bf16.msra.mxu3 %v7636_v40 }
  0x50   :  { %v7619_v44 = vld [vmem:[%s15042_s1 + $0xba0] sm:$0xf]  ;;  %v7492_v48 = vor.u32 %v9611_v43, %v7491_v42  ;;  %v9575_v53 = vld [vmem:[%s15042_s1 + $0x98c] sm:$0xf0]  ;;  %4900 = vmatpush.bf16.msra.mxu0 %v7236_v46 }
  0x51   :  { %v7219_v49 = vld [vmem:[%s15042_s1 + $0x880] sm:$0xf]  ;;  %v7620_v52 = vor.u32 %v9643_v45, %v7619_v44  ;;  %v9607_v55 = vld [vmem:[%s15042_s1 + $0xa8c] sm:$0xf0]  ;;  %4913 = vmatpush.bf16.msra.mxu1 %v7364_v47 }
  0x52   :  { %v7347_v51 = vld [vmem:[%s15042_s1 + $0x980] sm:$0xf]  ;;  %v9639_v57 = vld [vmem:[%s15042_s1 + $0xb8c] sm:$0xf0]  ;;  %v7220_v58 = vor.u32 %v9543_v50, %v7219_v49  ;;  %4926 = vmatpush.bf16.msra.mxu2 %v7492_v48 }
  0x53   :  { %v7475_v54 = vld [vmem:[%s15042_s1 + $0xa80] sm:$0xf]  ;;  %v7348_v59 = vor.u32 %v9575_v53, %v7347_v51  ;;  %v9539_v63 = vld [vmem:[%s15042_s1 + $0x86c] sm:$0xf0]  ;;  %4939 = vmatpush.bf16.msra.mxu3 %v7620_v52 }
  0x54   :  { %v7603_v56 = vld [vmem:[%s15042_s1 + $0xb80] sm:$0xf]  ;;  %v7476_v61 = vor.u32 %v9607_v55, %v7475_v54  ;;  %v9571_v5 = vld [vmem:[%s15042_s1 + $0x96c] sm:$0xf0]  ;;  %4901 = vmatpush.bf16.msra.mxu0 %v7220_v58 }
  0x55   :  { %v7203_v62 = vld [vmem:[%s15042_s1 + $0x860] sm:$0xf]  ;;  %v7604_v4 = vor.u32 %v9639_v57, %v7603_v56  ;;  %v9603_v7 = vld [vmem:[%s15042_s1 + $0xa6c] sm:$0xf0]  ;;  %4914 = vmatpush.bf16.msra.mxu1 %v7348_v59 }
  0x56   :  { %v7331_v3 = vld [vmem:[%s15042_s1 + $0x960] sm:$0xf]  ;;  %v9635_v9 = vld [vmem:[%s15042_s1 + $0xb6c] sm:$0xf0]  ;;  %v7204_v10 = vor.u32 %v9539_v63, %v7203_v62  ;;  %4927 = vmatpush.bf16.msra.mxu2 %v7476_v61 }
  0x57   :  { %v7459_v6 = vld [vmem:[%s15042_s1 + $0xa60] sm:$0xf]  ;;  %v7332_v11 = vor.u32 %v9571_v5, %v7331_v3  ;;  %v9535_v14 = vld [vmem:[%s15042_s1 + $0x84c] sm:$0xf0]  ;;  %4940 = vmatpush.bf16.msra.mxu3 %v7604_v4 }
  0x58   :  { %v7587_v8 = vld [vmem:[%s15042_s1 + $0xb60] sm:$0xf]  ;;  %v7460_v12 = vor.u32 %v9603_v7, %v7459_v6  ;;  %v9567_v17 = vld [vmem:[%s15042_s1 + $0x94c] sm:$0xf0]  ;;  %4902 = vmatpush.bf16.msra.mxu0 %v7204_v10 }
  0x59   :  { %v7187_v13 = vld [vmem:[%s15042_s1 + $0x840] sm:$0xf]  ;;  %v7588_v16 = vor.u32 %v9635_v9, %v7587_v8  ;;  %v9599_v19 = vld [vmem:[%s15042_s1 + $0xa4c] sm:$0xf0]  ;;  %4915 = vmatpush.bf16.msra.mxu1 %v7332_v11 }
  0x5a   :  { %v7315_v15 = vld [vmem:[%s15042_s1 + $0x940] sm:$0xf]  ;;  %v9631_v24 = vld [vmem:[%s15042_s1 + $0xb4c] sm:$0xf0]  ;;  %v7188_v25 = vor.u32 %v9535_v14, %v7187_v13  ;;  %4928 = vmatpush.bf16.msra.mxu2 %v7460_v12 }
  0x5b   :  { %v7443_v18 = vld [vmem:[%s15042_s1 + $0xa40] sm:$0xf]  ;;  %v7316_v27 = vor.u32 %v9567_v17, %v7315_v15  ;;  %v9531_v30 = vld [vmem:[%s15042_s1 + $0x82c] sm:$0xf0]  ;;  %4941 = vmatpush.bf16.msra.mxu3 %v7588_v16 }
  0x5c   :  { %v7571_v23 = vld [vmem:[%s15042_s1 + $0xb40] sm:$0xf]  ;;  %v7444_v28 = vor.u32 %v9599_v19, %v7443_v18  ;;  %v9563_v33 = vld [vmem:[%s15042_s1 + $0x92c] sm:$0xf0]  ;;  %4903 = vmatpush.bf16.msra.mxu0 %v7188_v25 }
  0x5d   :  { %v7171_v29 = vld [vmem:[%s15042_s1 + $0x820] sm:$0xf]  ;;  %v7572_v32 = vor.u32 %v9631_v24, %v7571_v23  ;;  %v9595_v35 = vld [vmem:[%s15042_s1 + $0xa2c] sm:$0xf0]  ;;  %4916 = vmatpush.bf16.msra.mxu1 %v7316_v27 }
  0x5e   :  { %v7299_v31 = vld [vmem:[%s15042_s1 + $0x920] sm:$0xf]  ;;  %v9627_v37 = vld [vmem:[%s15042_s1 + $0xb2c] sm:$0xf0]  ;;  %v7172_v38 = vor.u32 %v9531_v30, %v7171_v29  ;;  %4929 = vmatpush.bf16.msra.mxu2 %v7444_v28 }
  0x5f   :  { %v7427_v34 = vld [vmem:[%s15042_s1 + $0xa20] sm:$0xf]  ;;  %v9527_v40 = vld [vmem:[%s15042_s1 + $0x80c] sm:$0xf0]  ;;  %v7300_v41 = vor.u32 %v9563_v33, %v7299_v31  ;;  %4942 = vmatpush.bf16.msra.mxu3 %v7572_v32 }
  0x60   :  { %v7555_v36 = vld [vmem:[%s15042_s1 + $0xb20] sm:$0xf]  ;;  %v7428_v42 = vor.u32 %v9595_v35, %v7427_v34  ;;  %v9559_v44 = vld [vmem:[%s15042_s1 + $0x90c] sm:$0xf0]  ;;  %4904 = vmatpush.bf16.msra.mxu0 %v7172_v38 }
  0x61   :  { %v7155_v39 = vld [vmem:[%s15042_s1 + $0x800] sm:$0xf]  ;;  %v7556_v46 = vor.u32 %v9627_v37, %v7555_v36  ;;  %v9591_v47 = vld [vmem:[%s15042_s1 + $0xa0c] sm:$0xf0]  ;;  %4917 = vmatpush.bf16.msra.mxu1 %v7300_v41 }
  0x62   :  { %v7283_v43 = vld [vmem:[%s15042_s1 + $0x900] sm:$0xf]  ;;  %v9623_v49 = vld [vmem:[%s15042_s1 + $0xb0c] sm:$0xf0]  ;;  %v7156_v53 = vor.u32 %v9527_v40, %v7155_v39  ;;  %4930 = vmatpush.bf16.msra.mxu2 %v7428_v42 }
  0x63   :  { %v7411_v45 = vld [vmem:[%s15042_s1 + $0xa00] sm:$0xf]  ;;  %v9683_v51 = vld [vmem:[%s15042_s1 + $0xcec] sm:$0xf0]  ;;  %v7284_v57 = vor.u32 %v9559_v44, %v7283_v43  ;;  %4943 = vmatpush.bf16.msra.mxu3 %v7556_v46 }
  0x64   :  { %v7539_v48 = vld [vmem:[%s15042_s1 + $0xb00] sm:$0xf]  ;;  %v9715_v54 = vld [vmem:[%s15042_s1 + $0xdec] sm:$0xf0]  ;;  %v7412_v58 = vor.u32 %v9591_v47, %v7411_v45  ;;  %4905 = vmatpush.bf16.msra.mxu0 %v7156_v53 }
  0x65   :  { %v7779_v50 = vld [vmem:[%s15042_s1 + $0xce0] sm:$0xf]  ;;  %v9747_v56 = vld [vmem:[%s15042_s1 + $0xeec] sm:$0xf0]  ;;  %v7540_v62 = vor.u32 %v9623_v49, %v7539_v48  ;;  %4918 = vmatpush.bf16.msra.mxu1 %v7284_v57 }
  0x66   :  { %v7907_v52 = vld [vmem:[%s15042_s1 + $0xde0] sm:$0xf]  ;;  %v9779_v61 = vld [vmem:[%s15042_s1 + $0xfec] sm:$0xf0]  ;;  %v7780_v63 = vor.u32 %v9683_v51, %v7779_v50  ;;  %4931 = vmatpush.bf16.msra.mxu2 %v7412_v58 }
  0x67   :  { %v8035_v55 = vld [vmem:[%s15042_s1 + $0xee0] sm:$0xf]  ;;  %v7908_v3 = vor.u32 %v9715_v54, %v7907_v52  ;;  %v9679_v6 = vld [vmem:[%s15042_s1 + $0xccc] sm:$0xf0]  ;;  %4944 = vmatpush.bf16.msra.mxu3 %v7540_v62 }
  0x68   :  { %v8163_v59 = vld [vmem:[%s15042_s1 + $0xfe0] sm:$0xf]  ;;  %v8036_v4 = vor.u32 %v9747_v56, %v8035_v55  ;;  %v9711_v9 = vld [vmem:[%s15042_s1 + $0xdcc] sm:$0xf0]  ;;  %4950 = vmatpush.bf16.msrb.mxu0 %v7780_v63 }
  0x69   :  { %v7763_v5 = vld [vmem:[%s15042_s1 + $0xcc0] sm:$0xf]  ;;  %v8164_v8 = vor.u32 %v9779_v61, %v8163_v59  ;;  %v9743_v11 = vld [vmem:[%s15042_s1 + $0xecc] sm:$0xf0]  ;;  %4963 = vmatpush.bf16.msrb.mxu1 %v7908_v3 }
  0x6a   :  { %v7891_v7 = vld [vmem:[%s15042_s1 + $0xdc0] sm:$0xf]  ;;  %v9775_v14 = vld [vmem:[%s15042_s1 + $0xfcc] sm:$0xf0]  ;;  %v7764_v18 = vor.u32 %v9679_v6, %v7763_v5  ;;  %4976 = vmatpush.bf16.msrb.mxu2 %v8036_v4 }
  0x6b   :  { %v8019_v10 = vld [vmem:[%s15042_s1 + $0xec0] sm:$0xf]  ;;  %v10763_v15 = vld [vmem:[#allocation1 + $0x12] sm:$0xff]  ;;  %v10765_v16 = vld [vmem:[#allocation1 + $0x9] sm:$0xff]  ;;  %v7892_v19 = vor.u32 %v9711_v9, %v7891_v7  ;;  %4989 = vmatpush.bf16.msrb.mxu3 %v8164_v8 }
  0x6c   :  { %v10755_v12 = vld [vmem:[#allocation1] sm:$0xff]  ;;  %v8020_v23 = vor.u32 %v9743_v11, %v8019_v10  ;;  %v9675_v25 = vld [vmem:[%s15042_s1 + $0xcac] sm:$0xf0]  ;;  %4932 = vmatmul.bf16.vlgmr.msra.gmra.mxu2 %v10763_v15  ;;  %4919 = vmatmul.bf16.vlgmr.msra.gmra.mxu1 %v10765_v16 }
  0x6d   :  { %v8147_v13 = vld [vmem:[%s15042_s1 + $0xfc0] sm:$0xf]  ;;  %4906 = vmatmul.bf16.vlgmr.msra.gmra.mxu0 %v10755_v12  ;;  %v9707_v29 = vld [vmem:[%s15042_s1 + $0xdac] sm:$0xf0]  ;;  %4964 = vmatpush.bf16.msrb.mxu1 %v7892_v19 }
  0x6e   :  { %v10767_v17 = vld [vmem:[#allocation1 + $0x1b] sm:$0xff]  ;;  %v8148_v28 = vor.u32 %v9775_v14, %v8147_v13  ;;  %v9739_v31 = vld [vmem:[%s15042_s1 + $0xeac] sm:$0xf0]  ;;  %4951 = vmatpush.bf16.msrb.mxu0 %v7764_v18  ;;  %4977 = vmatpush.bf16.msrb.mxu2 %v8020_v23 }
  0x6f   :  { %v7747_v24 = vld [vmem:[%s15042_s1 + $0xca0] sm:$0xf]  ;;  %v9771_v33 = vld [vmem:[%s15042_s1 + $0xfac] sm:$0xf0]  ;;  %4945 = vmatmul.bf16.vlgmr.msra.gmra.mxu3 %v10767_v17 }
  0x70   :  { %v7875_v27 = vld [vmem:[%s15042_s1 + $0xda0] sm:$0xf]  ;;  %v7748_v34 = vor.u32 %v9675_v25, %v7747_v24  ;;  %v9671_v38 = vld [vmem:[%s15042_s1 + $0xc8c] sm:$0xf0]  ;;  %4990 = vmatpush.bf16.msrb.mxu3 %v8148_v28 }
  0x71   :  { %v8003_v30 = vld [vmem:[%s15042_s1 + $0xea0] sm:$0xf]  ;;  %v7876_v35 = vor.u32 %v9707_v29, %v7875_v27  ;;  %v9703_v41 = vld [vmem:[%s15042_s1 + $0xd8c] sm:$0xf0] }
  0x72   :  { %v8131_v32 = vld [vmem:[%s15042_s1 + $0xfa0] sm:$0xf]  ;;  %v8004_v36 = vor.u32 %v9739_v31, %v8003_v30  ;;  %v9735_v43 = vld [vmem:[%s15042_s1 + $0xe8c] sm:$0xf0] }
  0x73   :  { %v7731_v37 = vld [vmem:[%s15042_s1 + $0xc80] sm:$0xf]  ;;  %v8132_v40 = vor.u32 %v9771_v33, %v8131_v32  ;;  %v9767_v45 = vld [vmem:[%s15042_s1 + $0xf8c] sm:$0xf0] }
  0x74   :  { %v7859_v39 = vld [vmem:[%s15042_s1 + $0xd80] sm:$0xf] }
  0x75   :  { %v7987_v42 = vld [vmem:[%s15042_s1 + $0xe80] sm:$0xf] }
  0x76   :  { %v8115_v44 = vld [vmem:[%s15042_s1 + $0xf80] sm:$0xf] }
  0x77   :  { %8 = vsyncpa [#allocation3], 0  ;;  %4952 = vmatpush.bf16.msrb.mxu0 %v7748_v34  ;;  %v7732_v46 = vor.u32 %v9671_v38, %v7731_v37  ;;  %4965 = vmatpush.bf16.msrb.mxu1 %v7876_v35  ;;  %v7860_v47 = vor.u32 %v9703_v41, %v7859_v39  ;;  %v7988_v48 = vor.u32 %v9735_v43, %v7987_v42  ;;  %v7715_v49 = vld [vmem:[%s15042_s1 + $0xc60] sm:$0xf]  ;;  %v9667_v50 = vld [vmem:[%s15042_s1 + $0xc6c] sm:$0xf0] }
  0x78   :  { %4978 = vmatpush.bf16.msrb.mxu2 %v8004_v36  ;;  %v7843_v51 = vld [vmem:[%s15042_s1 + $0xd60] sm:$0xf]  ;;  %4991 = vmatpush.bf16.msrb.mxu3 %v8132_v40  ;;  %v8116_v52 = vor.u32 %v9767_v45, %v8115_v44  ;;  %v9699_v53 = vld [vmem:[%s15042_s1 + $0xd6c] sm:$0xf0]  ;;  %v7716_v58 = vor.u32 %v9667_v50, %v7715_v49  ;;  %vm4791_vm0 = vcmask 523264   ;;  %vm6105_vm1 = vcmask 1041408  }
  0x79   :  { %v7971_v54 = vld [vmem:[%s15042_s1 + $0xe60] sm:$0xf]  ;;  %v9731_v55 = vld [vmem:[%s15042_s1 + $0xe6c] sm:$0xf0]  ;;  %v7844_v59 = vor.u32 %v9699_v53, %v7843_v51  ;;  %vm6107_vm2 = vcmask 1045508   ;;  %s6120_s25 = sshll.u32 %s15044_s3, 4  ;;  %s6121_s25 = int_to_ptr.hbm [resolvable:$true] %s6120_s25 }
  0x7a   :  { %v8099_v56 = vld [vmem:[%s15042_s1 + $0xf60] sm:$0xf]  ;;  %v9763_v57 = vld [vmem:[%s15042_s1 + $0xf6c] sm:$0xf0]  ;;  %v7972_v61 = vor.u32 %v9731_v55, %v7971_v54  ;;  %vm6109_vm3 = vcmask 1043456  }
  0x7b   :  { %4953 = vmatpush.bf16.msrb.mxu0 %v7732_v46  ;;  %4966 = vmatpush.bf16.msrb.mxu1 %v7860_v47  ;;  %v7699_v62 = vld [vmem:[%s15042_s1 + $0xc40] sm:$0xf]  ;;  %v9663_v63 = vld [vmem:[%s15042_s1 + $0xc4c] sm:$0xf0]  ;;  %v8100_v4 = vor.u32 %v9763_v57, %v8099_v56  ;;  %v10929_v46 = vld [vmem:[#allocation1 + $0x24] sm:$0xff] }
  0x7c   :  { %4979 = vmatpush.bf16.msrb.mxu2 %v7988_v48  ;;  %v7827_v3 = vld [vmem:[%s15042_s1 + $0xd40] sm:$0xf]  ;;  %4992 = vmatpush.bf16.msrb.mxu3 %v8116_v52  ;;  %v9695_v5 = vld [vmem:[%s15042_s1 + $0xd4c] sm:$0xf0]  ;;  %v7700_v10 = vor.u32 %v9663_v63, %v7699_v62  ;;  %v10931_v47 = vld [vmem:[#allocation1 + $0x36] sm:$0xff] }
  0x7d   :  { %v7955_v6 = vld [vmem:[%s15042_s1 + $0xe40] sm:$0xf]  ;;  %v9727_v7 = vld [vmem:[%s15042_s1 + $0xe4c] sm:$0xf0]  ;;  %v7828_v13 = vor.u32 %v9695_v5, %v7827_v3 }
  0x7e   :  { %v8083_v8 = vld [vmem:[%s15042_s1 + $0xf40] sm:$0xf]  ;;  %v9759_v9 = vld [vmem:[%s15042_s1 + $0xf4c] sm:$0xf0]  ;;  %v7956_v14 = vor.u32 %v9727_v7, %v7955_v6 }
  0x7f   :  { %4954 = vmatpush.bf16.msrb.mxu0 %v7716_v58  ;;  %v7683_v11 = vld [vmem:[%s15042_s1 + $0xc20] sm:$0xf]  ;;  %4967 = vmatpush.bf16.msrb.mxu1 %v7844_v59  ;;  %v9659_v18 = vld [vmem:[%s15042_s1 + $0xc2c] sm:$0xf0]  ;;  %v8084_v24 = vor.u32 %v9759_v9, %v8083_v8 }
  0x80   :  { %4980 = vmatpush.bf16.msrb.mxu2 %v7972_v61  ;;  %v7811_v19 = vld [vmem:[%s15042_s1 + $0xd20] sm:$0xf]  ;;  %v9691_v23 = vld [vmem:[%s15042_s1 + $0xd2c] sm:$0xf0]  ;;  %4993 = vmatpush.bf16.msrb.mxu3 %v8100_v4  ;;  %v7684_v32 = vor.u32 %v9659_v18, %v7683_v11 }
  0x81   :  { %v7939_v25 = vld [vmem:[%s15042_s1 + $0xe20] sm:$0xf]  ;;  %v9723_v27 = vld [vmem:[%s15042_s1 + $0xe2c] sm:$0xf0]  ;;  %v7812_v37 = vor.u32 %v9691_v23, %v7811_v19 }
  0x82   :  { %v8067_v28 = vld [vmem:[%s15042_s1 + $0xf20] sm:$0xf]  ;;  %v9755_v29 = vld [vmem:[%s15042_s1 + $0xf2c] sm:$0xf0]  ;;  %v7940_v38 = vor.u32 %v9723_v27, %v7939_v25 }
  0x83   :  { %v7667_v30 = vld [vmem:[%s15042_s1 + $0xc00] sm:$0xf]  ;;  %v9655_v31 = vld [vmem:[%s15042_s1 + $0xc0c] sm:$0xf0]  ;;  %4955 = vmatpush.bf16.msrb.mxu0 %v7700_v10  ;;  %4968 = vmatpush.bf16.msrb.mxu1 %v7828_v13  ;;  %v8068_v43 = vor.u32 %v9755_v29, %v8067_v28 }
  0x84   :  { %v7795_v33 = vld [vmem:[%s15042_s1 + $0xd00] sm:$0xf]  ;;  %v9687_v34 = vld [vmem:[%s15042_s1 + $0xd0c] sm:$0xf0]  ;;  %4981 = vmatpush.bf16.msrb.mxu2 %v7956_v14  ;;  %4994 = vmatpush.bf16.msrb.mxu3 %v8084_v24  ;;  %v7668_v51 = vor.u32 %v9655_v31, %v7667_v30 }
  0x85   :  { %v7923_v35 = vld [vmem:[%s15042_s1 + $0xe00] sm:$0xf]  ;;  %v9719_v36 = vld [vmem:[%s15042_s1 + $0xe0c] sm:$0xf0]  ;;  %v7796_v54 = vor.u32 %v9687_v34, %v7795_v33 }
  0x86   :  { %v8051_v39 = vld [vmem:[%s15042_s1 + $0xf00] sm:$0xf]  ;;  %v9751_v40 = vld [vmem:[%s15042_s1 + $0xf0c] sm:$0xf0]  ;;  %v7924_v55 = vor.u32 %v9719_v36, %v7923_v35 }
  0x87   :  { %v8291_v41 = vld [vmem:[%s15042_s1 + $0x10e0] sm:$0xf]  ;;  %v9811_v42 = vld [vmem:[%s15042_s1 + $0x10ec] sm:$0xf0]  ;;  %4956 = vmatpush.bf16.msrb.mxu0 %v7684_v32  ;;  %4969 = vmatpush.bf16.msrb.mxu1 %v7812_v37  ;;  %v8052_v58 = vor.u32 %v9751_v40, %v8051_v39 }
  0x88   :  { %v8419_v44 = vld [vmem:[%s15042_s1 + $0x11e0] sm:$0xf]  ;;  %v9843_v45 = vld [vmem:[%s15042_s1 + $0x11ec] sm:$0xf0]  ;;  %4982 = vmatpush.bf16.msrb.mxu2 %v7940_v38  ;;  %4995 = vmatpush.bf16.msrb.mxu3 %v8068_v43  ;;  %v8292_v59 = vor.u32 %v9811_v42, %v8291_v41 }
  0x89   :  { %v10933_v48 = vld [vmem:[#allocation1 + $0x2d] sm:$0xff]  ;;  %v10935_v49 = vld [vmem:[#allocation1 + $0x3f] sm:$0xff]  ;;  %v8420_v61 = vor.u32 %v9843_v45, %v8419_v44 }
  0x8a   :  { %v18_v50 = vld [vmem:[%s15041_s0 + $0x10] sm:$0xff]  ;;  %v8547_v52 = vld [vmem:[%s15042_s1 + $0x12e0] sm:$0xf] }
  0x8b   :  { %v9875_v53 = vld [vmem:[%s15042_s1 + $0x12ec] sm:$0xf0]  ;;  %835 = vst [vmem:[#allocation1] ss:$9 sm:$0xff] %v18_v50  ;;  %v8675_v56 = vld [vmem:[%s15042_s1 + $0x13e0] sm:$0xf]  ;;  %4957 = vmatpush.bf16.msrb.mxu0 %v7668_v51  ;;  %4970 = vmatpush.bf16.msrb.mxu1 %v7796_v54 }
  0x8c   :  { %v9907_v57 = vld [vmem:[%s15042_s1 + $0x13ec] sm:$0xf0]  ;;  %v8548_v62 = vor.u32 %v9875_v53, %v8547_v52  ;;  %v8275_v63 = vld [vmem:[%s15042_s1 + $0x10c0] sm:$0xf]  ;;  %4983 = vmatpush.bf16.msrb.mxu2 %v7924_v55  ;;  %4996 = vmatpush.bf16.msrb.mxu3 %v8052_v58 }
  0x8d   :  { %v9807_v3 = vld [vmem:[%s15042_s1 + $0x10cc] sm:$0xf0]  ;;  %v8403_v4 = vld [vmem:[%s15042_s1 + $0x11c0] sm:$0xf]  ;;  %v8676_v5 = vor.u32 %v9907_v57, %v8675_v56 }
  0x8e   :  { %v9839_v6 = vld [vmem:[%s15042_s1 + $0x11cc] sm:$0xf0]  ;;  %v8531_v7 = vld [vmem:[%s15042_s1 + $0x12c0] sm:$0xf]  ;;  %v8276_v11 = vor.u32 %v9807_v3, %v8275_v63  ;;  %4958 = vmatmul.bf16.vlgmr.msrb.gmra.mxu0 %v10929_v46  ;;  %4971 = vmatmul.bf16.vlgmr.msrb.gmra.mxu1 %v10933_v48 }
  0x8f   :  { %v9871_v8 = vld [vmem:[%s15042_s1 + $0x12cc] sm:$0xf0]  ;;  %v8659_v9 = vld [vmem:[%s15042_s1 + $0x13c0] sm:$0xf]  ;;  %5002 = vmatpush.bf16.msra.mxu0 %v8292_v59  ;;  %5015 = vmatpush.bf16.msra.mxu1 %v8420_v61  ;;  %v8404_v13 = vor.u32 %v9839_v6, %v8403_v4 }
  0x90   :  { %v9903_v10 = vld [vmem:[%s15042_s1 + $0x13cc] sm:$0xf0]  ;;  %5028 = vmatpush.bf16.msra.mxu2 %v8548_v62  ;;  %v8532_v14 = vor.u32 %v9871_v8, %v8531_v7  ;;  %v8259_v18 = vld [vmem:[%s15042_s1 + $0x10a0] sm:$0xf]  ;;  %5041 = vmatpush.bf16.msra.mxu3 %v8676_v5 }
  0x91   :  { %v9803_v19 = vld [vmem:[%s15042_s1 + $0x10ac] sm:$0xf0]  ;;  %v8387_v23 = vld [vmem:[%s15042_s1 + $0x11a0] sm:$0xf]  ;;  %v8660_v24 = vor.u32 %v9903_v10, %v8659_v9  ;;  %4984 = vmatmul.bf16.vlgmr.msrb.gmra.mxu2 %v10931_v47  ;;  %4997 = vmatmul.bf16.vlgmr.msrb.gmra.mxu3 %v10935_v49 }
  0x92   :  { %v9835_v25 = vld [vmem:[%s15042_s1 + $0x11ac] sm:$0xf0]  ;;  %v8515_v27 = vld [vmem:[%s15042_s1 + $0x12a0] sm:$0xf]  ;;  %v8260_v31 = vor.u32 %v9803_v19, %v8259_v18 }
  0x93   :  { %v9867_v28 = vld [vmem:[%s15042_s1 + $0x12ac] sm:$0xf0]  ;;  %v8643_v29 = vld [vmem:[%s15042_s1 + $0x13a0] sm:$0xf]  ;;  %5003 = vmatpush.bf16.msra.mxu0 %v8276_v11  ;;  %5016 = vmatpush.bf16.msra.mxu1 %v8404_v13  ;;  %v8388_v32 = vor.u32 %v9835_v25, %v8387_v23 }
  0x94   :  { %v9899_v30 = vld [vmem:[%s15042_s1 + $0x13ac] sm:$0xf0]  ;;  %5029 = vmatpush.bf16.msra.mxu2 %v8532_v14  ;;  %v8516_v33 = vor.u32 %v9867_v28, %v8515_v27  ;;  %v8243_v34 = vld [vmem:[%s15042_s1 + $0x1080] sm:$0xf]  ;;  %5042 = vmatpush.bf16.msra.mxu3 %v8660_v24 }
  0x95   :  { %v9799_v35 = vld [vmem:[%s15042_s1 + $0x108c] sm:$0xf0]  ;;  %v8371_v36 = vld [vmem:[%s15042_s1 + $0x1180] sm:$0xf]  ;;  %v8644_v37 = vor.u32 %v9899_v30, %v8643_v29 }
  0x96   :  { %v9831_v38 = vld [vmem:[%s15042_s1 + $0x118c] sm:$0xf0]  ;;  %v8499_v39 = vld [vmem:[%s15042_s1 + $0x1280] sm:$0xf]  ;;  %v8244_v43 = vor.u32 %v9799_v35, %v8243_v34 }
  0x97   :  { %v9863_v40 = vld [vmem:[%s15042_s1 + $0x128c] sm:$0xf0]  ;;  %v8627_v41 = vld [vmem:[%s15042_s1 + $0x1380] sm:$0xf]  ;;  %5004 = vmatpush.bf16.msra.mxu0 %v8260_v31  ;;  %5017 = vmatpush.bf16.msra.mxu1 %v8388_v32  ;;  %v8372_v44 = vor.u32 %v9831_v38, %v8371_v36 }
  0x98   :  { %v9895_v42 = vld [vmem:[%s15042_s1 + $0x138c] sm:$0xf0]  ;;  %5030 = vmatpush.bf16.msra.mxu2 %v8516_v33  ;;  %v8500_v45 = vor.u32 %v9863_v40, %v8499_v39  ;;  %v8227_v50 = vld [vmem:[%s15042_s1 + $0x1060] sm:$0xf]  ;;  %5043 = vmatpush.bf16.msra.mxu3 %v8644_v37 }
  0x99   :  { %v9795_v51 = vld [vmem:[%s15042_s1 + $0x106c] sm:$0xf0]  ;;  %v8355_v52 = vld [vmem:[%s15042_s1 + $0x1160] sm:$0xf]  ;;  %v8628_v53 = vor.u32 %v9895_v42, %v8627_v41 }
  0x9a   :  { %v9827_v54 = vld [vmem:[%s15042_s1 + $0x116c] sm:$0xf0]  ;;  %v8483_v55 = vld [vmem:[%s15042_s1 + $0x1260] sm:$0xf]  ;;  %v8228_v59 = vor.u32 %v9795_v51, %v8227_v50 }
  0x9b   :  { %v9859_v56 = vld [vmem:[%s15042_s1 + $0x126c] sm:$0xf0]  ;;  %v8611_v57 = vld [vmem:[%s15042_s1 + $0x1360] sm:$0xf]  ;;  %5005 = vmatpush.bf16.msra.mxu0 %v8244_v43  ;;  %5018 = vmatpush.bf16.msra.mxu1 %v8372_v44  ;;  %v8356_v61 = vor.u32 %v9827_v54, %v8355_v52 }
  0x9c   :  { %v9891_v58 = vld [vmem:[%s15042_s1 + $0x136c] sm:$0xf0]  ;;  %5031 = vmatpush.bf16.msra.mxu2 %v8500_v45  ;;  %v8484_v62 = vor.u32 %v9859_v56, %v8483_v55  ;;  %v8211_v63 = vld [vmem:[%s15042_s1 + $0x1040] sm:$0xf]  ;;  %5044 = vmatpush.bf16.msra.mxu3 %v8628_v53 }
  0x9d   :  { %v9791_v3 = vld [vmem:[%s15042_s1 + $0x104c] sm:$0xf0]  ;;  %v8339_v4 = vld [vmem:[%s15042_s1 + $0x1140] sm:$0xf]  ;;  %v8612_v5 = vor.u32 %v9891_v58, %v8611_v57 }
  0x9e   :  { %v9823_v6 = vld [vmem:[%s15042_s1 + $0x114c] sm:$0xf0]  ;;  %v8467_v7 = vld [vmem:[%s15042_s1 + $0x1240] sm:$0xf]  ;;  %v8212_v11 = vor.u32 %v9791_v3, %v8211_v63 }
  0x9f   :  { %v9855_v8 = vld [vmem:[%s15042_s1 + $0x124c] sm:$0xf0]  ;;  %v8595_v9 = vld [vmem:[%s15042_s1 + $0x1340] sm:$0xf]  ;;  %5006 = vmatpush.bf16.msra.mxu0 %v8228_v59  ;;  %5019 = vmatpush.bf16.msra.mxu1 %v8356_v61  ;;  %v8340_v13 = vor.u32 %v9823_v6, %v8339_v4 }
  0xa0   :  { %v9887_v10 = vld [vmem:[%s15042_s1 + $0x134c] sm:$0xf0]  ;;  %5032 = vmatpush.bf16.msra.mxu2 %v8484_v62  ;;  %v8468_v14 = vor.u32 %v9855_v8, %v8467_v7  ;;  %v8195_v18 = vld [vmem:[%s15042_s1 + $0x1020] sm:$0xf]  ;;  %5045 = vmatpush.bf16.msra.mxu3 %v8612_v5 }
  0xa1   :  { %v9787_v19 = vld [vmem:[%s15042_s1 + $0x102c] sm:$0xf0]  ;;  %v8323_v23 = vld [vmem:[%s15042_s1 + $0x1120] sm:$0xf]  ;;  %v8596_v24 = vor.u32 %v9887_v10, %v8595_v9 }
  0xa2   :  { %v9819_v25 = vld [vmem:[%s15042_s1 + $0x112c] sm:$0xf0]  ;;  %v8451_v27 = vld [vmem:[%s15042_s1 + $0x1220] sm:$0xf]  ;;  %v8196_v31 = vor.u32 %v9787_v19, %v8195_v18 }
  0xa3   :  { %v9851_v28 = vld [vmem:[%s15042_s1 + $0x122c] sm:$0xf0]  ;;  %v8579_v29 = vld [vmem:[%s15042_s1 + $0x1320] sm:$0xf]  ;;  %5007 = vmatpush.bf16.msra.mxu0 %v8212_v11  ;;  %5020 = vmatpush.bf16.msra.mxu1 %v8340_v13  ;;  %v8324_v34 = vor.u32 %v9819_v25, %v8323_v23 }
  0xa4   :  { %v9883_v30 = vld [vmem:[%s15042_s1 + $0x132c] sm:$0xf0]  ;;  %v8179_v32 = vld [vmem:[%s15042_s1 + $0x1000] sm:$0xf]  ;;  %5033 = vmatpush.bf16.msra.mxu2 %v8468_v14  ;;  %v8452_v35 = vor.u32 %v9851_v28, %v8451_v27  ;;  %5046 = vmatpush.bf16.msra.mxu3 %v8596_v24 }
  0xa5   :  { %v9783_v33 = vld [vmem:[%s15042_s1 + $0x100c] sm:$0xf0]  ;;  %v8307_v36 = vld [vmem:[%s15042_s1 + $0x1100] sm:$0xf]  ;;  %v8580_v39 = vor.u32 %v9883_v30, %v8579_v29 }
  0xa6   :  { %v9815_v37 = vld [vmem:[%s15042_s1 + $0x110c] sm:$0xf0]  ;;  %v8435_v38 = vld [vmem:[%s15042_s1 + $0x1200] sm:$0xf]  ;;  %v8180_v50 = vor.u32 %v9783_v33, %v8179_v32 }
  0xa7   :  { %v9847_v40 = vld [vmem:[%s15042_s1 + $0x120c] sm:$0xf0]  ;;  %v8563_v41 = vld [vmem:[%s15042_s1 + $0x1300] sm:$0xf]  ;;  %5008 = vmatpush.bf16.msra.mxu0 %v8196_v31  ;;  %5021 = vmatpush.bf16.msra.mxu1 %v8324_v34  ;;  %v8308_v54 = vor.u32 %v9815_v37, %v8307_v36 }
  0xa8   :  { %v9879_v42 = vld [vmem:[%s15042_s1 + $0x130c] sm:$0xf0]  ;;  %v8803_v43 = vld [vmem:[%s15042_s1 + $0x14e0] sm:$0xf]  ;;  %5034 = vmatpush.bf16.msra.mxu2 %v8452_v35  ;;  %v8436_v55 = vor.u32 %v9847_v40, %v8435_v38  ;;  %5047 = vmatpush.bf16.msra.mxu3 %v8580_v39 }
  0xa9   :  { %v9939_v44 = vld [vmem:[%s15042_s1 + $0x14ec] sm:$0xf0]  ;;  %v8931_v45 = vld [vmem:[%s15042_s1 + $0x15e0] sm:$0xf]  ;;  %v8564_v58 = vor.u32 %v9879_v42, %v8563_v41 }
  0xaa   :  { %v9971_v51 = vld [vmem:[%s15042_s1 + $0x15ec] sm:$0xf0]  ;;  %v9059_v52 = vld [vmem:[%s15042_s1 + $0x16e0] sm:$0xf]  ;;  %v8804_v59 = vor.u32 %v9939_v44, %v8803_v43 }
  0xab   :  { %v10003_v53 = vld [vmem:[%s15042_s1 + $0x16ec] sm:$0xf0]  ;;  %v9187_v56 = vld [vmem:[%s15042_s1 + $0x17e0] sm:$0xf]  ;;  %v8932_v61 = vor.u32 %v9971_v51, %v8931_v45  ;;  %5009 = vmatpush.bf16.msra.mxu0 %v8180_v50  ;;  %5022 = vmatpush.bf16.msra.mxu1 %v8308_v54 }
  0xac   :  { %v10035_v57 = vld [vmem:[%s15042_s1 + $0x17ec] sm:$0xf0]  ;;  %v9060_v62 = vor.u32 %v10003_v53, %v9059_v52  ;;  %v8787_v63 = vld [vmem:[%s15042_s1 + $0x14c0] sm:$0xf]  ;;  %5035 = vmatpush.bf16.msra.mxu2 %v8436_v55  ;;  %5048 = vmatpush.bf16.msra.mxu3 %v8564_v58 }
  0xad   :  { %v9935_v3 = vld [vmem:[%s15042_s1 + $0x14cc] sm:$0xf0]  ;;  %v8915_v4 = vld [vmem:[%s15042_s1 + $0x15c0] sm:$0xf]  ;;  %v9188_v5 = vor.u32 %v10035_v57, %v9187_v56 }
  0xae   :  { %v9967_v6 = vld [vmem:[%s15042_s1 + $0x15cc] sm:$0xf0]  ;;  %v9043_v7 = vld [vmem:[%s15042_s1 + $0x16c0] sm:$0xf]  ;;  %v8788_v19 = vor.u32 %v9935_v3, %v8787_v63 }
  0xaf   :  { %v9999_v8 = vld [vmem:[%s15042_s1 + $0x16cc] sm:$0xf0]  ;;  %v11166_v9 = vld [vmem:[#allocation1] sm:$0xff]  ;;  %5054 = vmatpush.bf16.msrb.mxu0 %v8804_v59  ;;  %5067 = vmatpush.bf16.msrb.mxu1 %v8932_v61  ;;  %v8916_v23 = vor.u32 %v9967_v6, %v8915_v4 }
  0xb0   :  { %v9171_v10 = vld [vmem:[%s15042_s1 + $0x17c0] sm:$0xf]  ;;  %v10031_v11 = vld [vmem:[%s15042_s1 + $0x17cc] sm:$0xf0]  ;;  %5080 = vmatpush.bf16.msrb.mxu2 %v9060_v62  ;;  %v9044_v24 = vor.u32 %v9999_v8, %v9043_v7  ;;  %5093 = vmatpush.bf16.msrb.mxu3 %v9188_v5  ;;  %v11259_v4 = vld [vmem:[#allocation1 + $0x24] sm:$0xff] }
  0xb1   :  { %v11174_v13 = vld [vmem:[#allocation1 + $0x12] sm:$0xff]  ;;  %v11176_v14 = vld [vmem:[#allocation1 + $0x9] sm:$0xff]  ;;  %v11178_v18 = vld [vmem:[#allocation1 + $0x1b] sm:$0xff]  ;;  %5010 = vmatmul.bf16.vlgmr.msra.gmra.mxu0 %v11166_v9  ;;  %v9172_v29 = vor.u32 %v10031_v11, %v9171_v10 }
  0xb2   :  { %v8771_v25 = vld [vmem:[%s15042_s1 + $0x14a0] sm:$0xf]  ;;  %v9931_v27 = vld [vmem:[%s15042_s1 + $0x14ac] sm:$0xf0]  ;;  %5036 = vmatmul.bf16.vlgmr.msra.gmra.mxu2 %v11174_v13  ;;  %5023 = vmatmul.bf16.vlgmr.msra.gmra.mxu1 %v11176_v14  ;;  %v11261_v5 = vld [vmem:[#allocation1 + $0x36] sm:$0xff] }
  0xb3   :  { %v8899_v28 = vld [vmem:[%s15042_s1 + $0x15a0] sm:$0xf]  ;;  %v9963_v30 = vld [vmem:[%s15042_s1 + $0x15ac] sm:$0xf0]  ;;  %5049 = vmatmul.bf16.vlgmr.msra.gmra.mxu3 %v11178_v18  ;;  %5055 = vmatpush.bf16.msrb.mxu0 %v8788_v19  ;;  %v8772_v35 = vor.u32 %v9931_v27, %v8771_v25  ;;  %v19_v8 = vld [vmem:[%s15041_s0 + $0x18] sm:$0x1] }
  0xb4   :  { %v9027_v31 = vld [vmem:[%s15042_s1 + $0x16a0] sm:$0xf]  ;;  %v9995_v32 = vld [vmem:[%s15042_s1 + $0x16ac] sm:$0xf0]  ;;  %5068 = vmatpush.bf16.msrb.mxu1 %v8916_v23  ;;  %5081 = vmatpush.bf16.msrb.mxu2 %v9044_v24  ;;  %v8900_v37 = vor.u32 %v9963_v30, %v8899_v28 }
  0xb5   :  { %v9155_v33 = vld [vmem:[%s15042_s1 + $0x17a0] sm:$0xf]  ;;  %v10027_v34 = vld [vmem:[%s15042_s1 + $0x17ac] sm:$0xf0]  ;;  %v9028_v38 = vor.u32 %v9995_v32, %v9027_v31  ;;  %5094 = vmatpush.bf16.msrb.mxu3 %v9172_v29 }
  0xb6   :  { %v8755_v36 = vld [vmem:[%s15042_s1 + $0x1480] sm:$0xf]  ;;  %v9927_v39 = vld [vmem:[%s15042_s1 + $0x148c] sm:$0xf0]  ;;  %v9156_v42 = vor.u32 %v10027_v34, %v9155_v33 }
  0xb7   :  { %v8883_v40 = vld [vmem:[%s15042_s1 + $0x1580] sm:$0xf]  ;;  %v9959_v41 = vld [vmem:[%s15042_s1 + $0x158c] sm:$0xf0]  ;;  %5056 = vmatpush.bf16.msrb.mxu0 %v8772_v35  ;;  %v8756_v53 = vor.u32 %v9927_v39, %v8755_v36  ;;  %v4803_v35 = vpop.f32.mrf.mxu0 }
  0xb8   :  { %v9011_v43 = vld [vmem:[%s15042_s1 + $0x1680] sm:$0xf]  ;;  %v9991_v44 = vld [vmem:[%s15042_s1 + $0x168c] sm:$0xf0]  ;;  %5069 = vmatpush.bf16.msrb.mxu1 %v8900_v37  ;;  %5082 = vmatpush.bf16.msrb.mxu2 %v9028_v38  ;;  %v8884_v57 = vor.u32 %v9959_v41, %v8883_v40 }
  0xb9   :  { %v9139_v45 = vld [vmem:[%s15042_s1 + $0x1780] sm:$0xf]  ;;  %v10023_v50 = vld [vmem:[%s15042_s1 + $0x178c] sm:$0xf0]  ;;  %v9012_v58 = vor.u32 %v9991_v44, %v9011_v43  ;;  %5095 = vmatpush.bf16.msrb.mxu3 %v9156_v42  ;;  %v4816_v42 = vpop.f32.mrf.mxu1 }
  0xba   :  { %v8739_v51 = vld [vmem:[%s15042_s1 + $0x1460] sm:$0xf]  ;;  %v9923_v52 = vld [vmem:[%s15042_s1 + $0x146c] sm:$0xf0]  ;;  %v9140_v63 = vor.u32 %v10023_v50, %v9139_v45 }
  0xbb   :  { %v8867_v54 = vld [vmem:[%s15042_s1 + $0x1560] sm:$0xf]  ;;  %v9955_v55 = vld [vmem:[%s15042_s1 + $0x156c] sm:$0xf0]  ;;  %5057 = vmatpush.bf16.msrb.mxu0 %v8756_v53  ;;  %v8740_v10 = vor.u32 %v9923_v52, %v8739_v51 }
  0xbc   :  { %v8995_v56 = vld [vmem:[%s15042_s1 + $0x1660] sm:$0xf]  ;;  %v9987_v59 = vld [vmem:[%s15042_s1 + $0x166c] sm:$0xf0]  ;;  %5070 = vmatpush.bf16.msrb.mxu1 %v8884_v57  ;;  %5083 = vmatpush.bf16.msrb.mxu2 %v9012_v58  ;;  %v8868_v19 = vor.u32 %v9955_v55, %v8867_v54 }
  0xbd   :  { %v9123_v61 = vld [vmem:[%s15042_s1 + $0x1760] sm:$0xf]  ;;  %v10019_v62 = vld [vmem:[%s15042_s1 + $0x176c] sm:$0xf0]  ;;  %v8996_v23 = vor.u32 %v9987_v59, %v8995_v56  ;;  %5096 = vmatpush.bf16.msrb.mxu3 %v9140_v63  ;;  %v4829_v63 = vpop.f32.mrf.mxu2 }
  0xbe   :  { %v804_v3 = vld [vmem:[%s15043_s2] sm:$0xf]  ;;  %v11263_v6 = vld [vmem:[#allocation1 + $0x2d] sm:$0xff]  ;;  %v9124_v28 = vor.u32 %v10019_v62, %v9123_v61 }
  0xbf   :  { %v11265_v7 = vld [vmem:[#allocation1 + $0x3f] sm:$0xff]  ;;  %v9919_v24 = vld [vmem:[%s15042_s1 + $0x144c] sm:$0xf0]  ;;  %v806_v27 = vperm.slane %v804_v3, 0  ;;  %5058 = vmatpush.bf16.msrb.mxu0 %v8740_v10 }
  0xc0   :  { %v8723_v11 = vld [vmem:[%s15042_s1 + $0x1440] sm:$0xf]  ;;  %845 = vst [vmem:[#allocation1] ss:$9 sm:$0xff] %v19_v8  ;;  %v9951_v29 = vld [vmem:[%s15042_s1 + $0x154c] sm:$0xf0]  ;;  %5071 = vmatpush.bf16.msrb.mxu1 %v8868_v19  ;;  %5084 = vmatpush.bf16.msrb.mxu2 %v8996_v23  ;;  %v4842_v23 = vpop.f32.mrf.mxu3 }
  0xc1   :  { %v8851_v25 = vld [vmem:[%s15042_s1 + $0x1540] sm:$0xf]  ;;  %v9983_v31 = vld [vmem:[%s15042_s1 + $0x164c] sm:$0xf0]  ;;  %v8724_v34 = vor.u32 %v9919_v24, %v8723_v11  ;;  %v4804_v41 = vadd.f32 %v4803_v35, %v806_v27  ;;  %5097 = vmatpush.bf16.msrb.mxu3 %v9124_v28  ;;  %v9297_v27 = vld [vmem:[%s15042_s1 + $0xe4] sm:$0xf] }
  0xc2   :  { %v8979_v30 = vld [vmem:[%s15042_s1 + $0x1640] sm:$0xf]  ;;  %v10015_v33 = vld [vmem:[%s15042_s1 + $0x174c] sm:$0xf0]  ;;  %v8852_v36 = vor.u32 %v9951_v29, %v8851_v25  ;;  %v6245_v29 = vld [vmem:[%s15042_s1 + $0xf0] sm:$0xf0] }
  0xc3   :  { %v9107_v32 = vld [vmem:[%s15042_s1 + $0x1740] sm:$0xf]  ;;  %v8980_v37 = vor.u32 %v9983_v31, %v8979_v30  ;;  %v9915_v39 = vld [vmem:[%s15042_s1 + $0x142c] sm:$0xf0]  ;;  %v4817_v53 = vadd.f32 %v4816_v42, %v4804_v41  ;;  %5059 = vmatpush.bf16.msrb.mxu0 %v8724_v34  ;;  %v9329_v30 = vld [vmem:[%s15042_s1 + $0x1e4] sm:$0xf]  ;;  %v6248_v41 = vor.u32 %v9297_v27, %v6245_v29 }
  0xc4   :  { %v8707_v38 = vld [vmem:[%s15042_s1 + $0x1420] sm:$0xf]  ;;  %v9108_v43 = vor.u32 %v10015_v33, %v9107_v32  ;;  %v9947_v44 = vld [vmem:[%s15042_s1 + $0x152c] sm:$0xf0]  ;;  %5072 = vmatpush.bf16.msrb.mxu1 %v8852_v36  ;;  %v6373_v31 = vld [vmem:[%s15042_s1 + $0x1f0] sm:$0xf0]  ;;  %v4805_v33 = vpop.f32.mrf.mxu0 }
  0xc5   :  { %v8835_v40 = vld [vmem:[%s15042_s1 + $0x1520] sm:$0xf]  ;;  %v9979_v50 = vld [vmem:[%s15042_s1 + $0x162c] sm:$0xf0]  ;;  %v8708_v54 = vor.u32 %v9915_v39, %v8707_v38  ;;  %5085 = vmatpush.bf16.msrb.mxu2 %v8980_v37  ;;  %v4830_v19 = vadd.f32 %v4829_v63, %v4817_v53  ;;  %v9361_v36 = vld [vmem:[%s15042_s1 + $0x2e4] sm:$0xf]  ;;  %v4818_v38 = vpop.f32.mrf.mxu1  ;;  %v6376_v42 = vor.u32 %v9329_v30, %v6373_v31 }
  0xc6   :  { %v8963_v45 = vld [vmem:[%s15042_s1 + $0x1620] sm:$0xf]  ;;  %v10011_v52 = vld [vmem:[%s15042_s1 + $0x172c] sm:$0xf0]  ;;  %v8836_v57 = vor.u32 %v9947_v44, %v8835_v40  ;;  %5098 = vmatpush.bf16.msrb.mxu3 %v9108_v43  ;;  %v6501_v37 = vld [vmem:[%s15042_s1 + $0x2f0] sm:$0xf0] }
  0xc7   :  { %v9091_v51 = vld [vmem:[%s15042_s1 + $0x1720] sm:$0xf]  ;;  %v9911_v56 = vld [vmem:[%s15042_s1 + $0x140c] sm:$0xf0]  ;;  %v8964_v58 = vor.u32 %v9979_v50, %v8963_v45  ;;  %5060 = vmatpush.bf16.msrb.mxu0 %v8708_v54  ;;  %v11360_v32 = vadd.f32 %v4842_v23, %v4830_v19  ;;  %v9293_v45 = vld [vmem:[%s15042_s1 + $0xc4] sm:$0xf]  ;;  %v6504_v50 = vor.u32 %v9361_v36, %v6501_v37 }
  0xc8   :  { %v8691_v55 = vld [vmem:[%s15042_s1 + $0x1400] sm:$0xf]  ;;  %v9943_v61 = vld [vmem:[%s15042_s1 + $0x150c] sm:$0xf0]  ;;  %v9092_v3 = vor.u32 %v10011_v52, %v9091_v51  ;;  %5073 = vmatpush.bf16.msrb.mxu1 %v8836_v57  ;;  %v6229_v51 = vld [vmem:[%s15042_s1 + $0xd0] sm:$0xf0] }
  0xc9   :  { %v8819_v59 = vld [vmem:[%s15042_s1 + $0x1500] sm:$0xf]  ;;  %v9975_v8 = vld [vmem:[%s15042_s1 + $0x160c] sm:$0xf0]  ;;  %v8692_v28 = vor.u32 %v9911_v56, %v8691_v55  ;;  %5086 = vmatpush.bf16.msrb.mxu2 %v8964_v58  ;;  %v9325_v52 = vld [vmem:[%s15042_s1 + $0x1c4] sm:$0xf]  ;;  %v4831_v56 = vpop.f32.mrf.mxu2  ;;  %v4844_v58 = vpop.f32.mrf.mxu3 }
  0xca   :  { %v8947_v62 = vld [vmem:[%s15042_s1 + $0x1600] sm:$0xf]  ;;  %v10007_v11 = vld [vmem:[%s15042_s1 + $0x170c] sm:$0xf0]  ;;  %v8820_v34 = vor.u32 %v9943_v61, %v8819_v59  ;;  %5099 = vmatpush.bf16.msrb.mxu3 %v9092_v3  ;;  %v6357_v53 = vld [vmem:[%s15042_s1 + $0x1d0] sm:$0xf0]  ;;  %v6232_v59 = vor.u32 %v9293_v45, %v6229_v51 }
  0xcb   :  { %v9075_v10 = vld [vmem:[%s15042_s1 + $0x1700] sm:$0xf]  ;;  %v10051_v25 = vld [vmem:[%s15042_s1 + $0x186c] sm:$0xf0]  ;;  %v8948_v35 = vor.u32 %v9975_v8, %v8947_v62  ;;  %5061 = vmatpush.bf16.msrb.mxu0 %v8692_v28  ;;  %v9357_v54 = vld [vmem:[%s15042_s1 + $0x2c4] sm:$0xf]  ;;  %v6360_v61 = vor.u32 %v9325_v52, %v6357_v53 }
  0xcc   :  { %v9251_v24 = vld [vmem:[%s15042_s1 + $0x1860] sm:$0xf]  ;;  %v9076_v39 = vor.u32 %v10007_v11, %v9075_v10  ;;  %v10047_v44 = vld [vmem:[%s15042_s1 + $0x184c] sm:$0xf0]  ;;  %5074 = vmatpush.bf16.msrb.mxu1 %v8820_v34  ;;  %v6485_v55 = vld [vmem:[%s15042_s1 + $0x2d0] sm:$0xf0] }
  0xcd   :  { %v9252_v40 = vor.u32 %v10051_v25, %v9251_v24  ;;  %v9235_v43 = vld [vmem:[%s15042_s1 + $0x1840] sm:$0xf]  ;;  %5087 = vmatpush.bf16.msrb.mxu2 %v8948_v35  ;;  %v10043_v63 = vld [vmem:[%s15042_s1 + $0x182c] sm:$0xf0]  ;;  %v9289_v3 = vld [vmem:[%s15042_s1 + $0xa4] sm:$0xf]  ;;  %v6488_v8 = vor.u32 %v9357_v54, %v6485_v55  ;;  %v4868_v52 = vpop.f32.mrf.mxu1 }
  0xce   :  { %5100 = vmatpush.bf16.msrb.mxu3 %v9076_v39  ;;  %v9236_v57 = vor.u32 %v10047_v44, %v9235_v43  ;;  %v9219_v62 = vld [vmem:[%s15042_s1 + $0x1820] sm:$0xf]  ;;  %5062 = vmatmul.bf16.vlgmr.msrb.gmra.mxu0 %v11259_v4  ;;  %v6213_v10 = vld [vmem:[%s15042_s1 + $0xb0] sm:$0xf0]  ;;  %v9321_v11 = vld [vmem:[%s15042_s1 + $0x1a4] sm:$0xf] }
  0xcf   :  { %5110 = vmatpush.bf16.msra.mxu0 %v9252_v40  ;;  %v6341_v19 = vld [vmem:[%s15042_s1 + $0x1b0] sm:$0xf0]  ;;  %5075 = vmatmul.bf16.vlgmr.msrb.gmra.mxu1 %v11263_v6  ;;  %v9353_v23 = vld [vmem:[%s15042_s1 + $0x2a4] sm:$0xf]  ;;  %v9220_v25 = vor.u32 %v10043_v63, %v9219_v62  ;;  %v9203_v27 = vld [vmem:[%s15042_s1 + $0x1800] sm:$0xf]  ;;  %v6216_v28 = vor.u32 %v9289_v3, %v6213_v10 }
  0xd0   :  { %5119 = vmatpush.bf16.msra.mxu1 %v6248_v41  ;;  %5088 = vmatmul.bf16.vlgmr.msrb.gmra.mxu2 %v11261_v5  ;;  %v6469_v24 = vld [vmem:[%s15042_s1 + $0x2b0] sm:$0xf0]  ;;  %v6344_v29 = vor.u32 %v9321_v11, %v6341_v19  ;;  %v10039_v30 = vld [vmem:[%s15042_s1 + $0x180c] sm:$0xf0]  ;;  %v9285_v31 = vld [vmem:[%s15042_s1 + $0x84] sm:$0xf] }
  0xd1   :  { %5132 = vmatpush.bf16.msra.mxu2 %v6376_v42  ;;  %5101 = vmatmul.bf16.vlgmr.msrb.gmra.mxu3 %v11265_v7  ;;  %v6197_v33 = vld [vmem:[%s15042_s1 + $0x90] sm:$0xf0]  ;;  %v6472_v34 = vor.u32 %v9353_v23, %v6469_v24  ;;  %v9317_v35 = vld [vmem:[%s15042_s1 + $0x184] sm:$0xf]  ;;  %v9204_v41 = vor.u32 %v10039_v30, %v9203_v27  ;;  %v4855_v42 = vpop.f32.mrf.mxu0  ;;  %v4881_v10 = vpop.f32.mrf.mxu2 }
  0xd2   :  { %5145 = vmatpush.bf16.msra.mxu3 %v6504_v50  ;;  %v6325_v36 = vld [vmem:[%s15042_s1 + $0x190] sm:$0xf0]  ;;  %v9349_v37 = vld [vmem:[%s15042_s1 + $0x284] sm:$0xf]  ;;  %v6200_v43 = vor.u32 %v9285_v31, %v6197_v33  ;;  %v4856_v51 = vadd.f32 %v4855_v42, %v11360_v32 }
  0xd3   :  { %5111 = vmatpush.bf16.msra.mxu0 %v9236_v57  ;;  %v6453_v38 = vld [vmem:[%s15042_s1 + $0x290] sm:$0xf0]  ;;  %v9393_v39 = vld [vmem:[%s15042_s1 + $0x3e4] sm:$0xf]  ;;  %v6328_v44 = vor.u32 %v9317_v35, %v6325_v36 }
  0xd4   :  { %5120 = vmatpush.bf16.msra.mxu1 %v6232_v59  ;;  %v6629_v40 = vld [vmem:[%s15042_s1 + $0x3f0] sm:$0xf0]  ;;  %v9281_v45 = vld [vmem:[%s15042_s1 + $0x64] sm:$0xf]  ;;  %v6456_v53 = vor.u32 %v9349_v37, %v6453_v38 }
  0xd5   :  { %5133 = vmatpush.bf16.msra.mxu2 %v6360_v61  ;;  %v6181_v50 = vld [vmem:[%s15042_s1 + $0x70] sm:$0xf0]  ;;  %v6632_v54 = vor.u32 %v9393_v39, %v6629_v40  ;;  %v9313_v55 = vld [vmem:[%s15042_s1 + $0x164] sm:$0xf]  ;;  %v4869_v61 = vadd.f32 %v4868_v52, %v4856_v51  ;;  %v4870_v40 = vpop.f32.mrf.mxu1 }
  0xd6   :  { %5146 = vmatpush.bf16.msra.mxu3 %v6488_v8  ;;  %v6309_v56 = vld [vmem:[%s15042_s1 + $0x170] sm:$0xf0]  ;;  %v9345_v57 = vld [vmem:[%s15042_s1 + $0x264] sm:$0xf]  ;;  %v6184_v62 = vor.u32 %v9281_v45, %v6181_v50 }
  0xd7   :  { %5112 = vmatpush.bf16.msra.mxu0 %v9220_v25  ;;  %v6437_v32 = vld [vmem:[%s15042_s1 + $0x270] sm:$0xf0]  ;;  %v9389_v58 = vld [vmem:[%s15042_s1 + $0x3c4] sm:$0xf]  ;;  %v6312_v63 = vor.u32 %v9313_v55, %v6309_v56  ;;  %v4882_v27 = vadd.f32 %v4881_v10, %v4869_v61 }
  0xd8   :  { %5121 = vmatpush.bf16.msra.mxu1 %v6216_v28  ;;  %v6613_v59 = vld [vmem:[%s15042_s1 + $0x3d0] sm:$0xf0]  ;;  %v9277_v3 = vld [vmem:[%s15042_s1 + $0x44] sm:$0xf]  ;;  %v6440_v11 = vor.u32 %v9345_v57, %v6437_v32  ;;  %v4894_v28 = vpop.f32.mrf.mxu3 }
  0xd9   :  { %5134 = vmatpush.bf16.msra.mxu2 %v6344_v29  ;;  %v6165_v8 = vld [vmem:[%s15042_s1 + $0x50] sm:$0xf0]  ;;  %v6616_v19 = vor.u32 %v9389_v58, %v6613_v59  ;;  %v9309_v23 = vld [vmem:[%s15042_s1 + $0x144] sm:$0xf]  ;;  %v4857_v35 = vpop.f32.mrf.mxu0  ;;  %v4883_v32 = vpop.f32.mrf.mxu2 }
  0xda   :  { %5147 = vmatpush.bf16.msra.mxu3 %v6472_v34  ;;  %v6293_v24 = vld [vmem:[%s15042_s1 + $0x150] sm:$0xf0]  ;;  %v9341_v25 = vld [vmem:[%s15042_s1 + $0x244] sm:$0xf]  ;;  %v11499_v34 = vadd.f32 %v4894_v28, %v4882_v27  ;;  %v6168_v36 = vor.u32 %v9277_v3, %v6165_v8 }
  0xdb   :  { %5113 = vmatpush.bf16.msra.mxu0 %v9204_v41  ;;  %v6421_v29 = vld [vmem:[%s15042_s1 + $0x250] sm:$0xf0]  ;;  %v9385_v30 = vld [vmem:[%s15042_s1 + $0x3a4] sm:$0xf]  ;;  %v6296_v37 = vor.u32 %v9309_v23, %v6293_v24 }
  0xdc   :  { %5122 = vmatpush.bf16.msra.mxu1 %v6200_v43  ;;  %v6597_v31 = vld [vmem:[%s15042_s1 + $0x3b0] sm:$0xf0]  ;;  %v846_v33 = vld [vmem:[#allocation1] sm:$0xff]  ;;  %v6424_v41 = vor.u32 %v9341_v25, %v6421_v29 }
  0xdd   :  { %5135 = vmatpush.bf16.msra.mxu2 %v6328_v44  ;;  %v9273_v38 = vld [vmem:[%s15042_s1 + $0x24] sm:$0xf]  ;;  %v6149_v39 = vld [vmem:[%s15042_s1 + $0x30] sm:$0xf0]  ;;  %v6600_v42 = vor.u32 %v9385_v30, %v6597_v31 }
  0xde   :  { %5148 = vmatpush.bf16.msra.mxu3 %v6456_v53  ;;  %v9305_v43 = vld [vmem:[%s15042_s1 + $0x124] sm:$0xf]  ;;  %v6277_v44 = vld [vmem:[%s15042_s1 + $0x130] sm:$0xf0]  ;;  %9265 = vmatmul.msk.bf16.vlgmr.msra.gmra.mxu0 %vm4791_vm0, %v846_v33  ;;  %v6152_v53 = vor.u32 %v9273_v38, %v6149_v39 }
  0xdf   :  { %5158 = vmatpush.bf16.msrb.mxu0 %v6632_v54  ;;  %v9337_v45 = vld [vmem:[%s15042_s1 + $0x224] sm:$0xf]  ;;  %v6405_v50 = vld [vmem:[%s15042_s1 + $0x230] sm:$0xf0]  ;;  %v6280_v54 = vor.u32 %v9305_v43, %v6277_v44 }
  0xe0   :  { %5123 = vmatpush.bf16.msra.mxu1 %v6184_v62  ;;  %v9381_v51 = vld [vmem:[%s15042_s1 + $0x384] sm:$0xf]  ;;  %v6581_v52 = vld [vmem:[%s15042_s1 + $0x390] sm:$0xf0]  ;;  %v6408_v58 = vor.u32 %v9337_v45, %v6405_v50  ;;  %v4896_v3 = vpop.f32.mrf.mxu3 }
  0xe1   :  { %5136 = vmatpush.bf16.msra.mxu2 %v6312_v63  ;;  %v9269_v55 = vld [vmem:[%s15042_s1 + $0x4] sm:$0xf]  ;;  %v6133_v56 = vld [vmem:[%s15042_s1 + $0x10] sm:$0xf0]  ;;  %v6584_v59 = vor.u32 %v9381_v51, %v6581_v52 }
  0xe2   :  { %5149 = vmatpush.bf16.msra.mxu3 %v6440_v11  ;;  %v9301_v57 = vld [vmem:[%s15042_s1 + $0x104] sm:$0xf]  ;;  %v6261_v61 = vld [vmem:[%s15042_s1 + $0x110] sm:$0xf0]  ;;  %v6136_v25 = vor.u32 %v9269_v55, %v6133_v56 }
  0xe3   :  { %5159 = vmatpush.bf16.msrb.mxu0 %v6616_v19  ;;  %v9333_v62 = vld [vmem:[%s15042_s1 + $0x204] sm:$0xf]  ;;  %v6389_v63 = vld [vmem:[%s15042_s1 + $0x210] sm:$0xf0]  ;;  %v6264_v27 = vor.u32 %v9301_v57, %v6261_v61 }
  0xe4   :  { %5124 = vmatpush.bf16.msra.mxu1 %v6168_v36  ;;  %v9377_v8 = vld [vmem:[%s15042_s1 + $0x364] sm:$0xf]  ;;  %v6565_v10 = vld [vmem:[%s15042_s1 + $0x370] sm:$0xf0]  ;;  %v6392_v30 = vor.u32 %v9333_v62, %v6389_v63 }
  0xe5   :  { %5137 = vmatpush.bf16.msra.mxu2 %v6296_v37  ;;  %v9425_v11 = vld [vmem:[%s15042_s1 + $0x4e4] sm:$0xf]  ;;  %v6757_v19 = vld [vmem:[%s15042_s1 + $0x4f0] sm:$0xf0]  ;;  %v6568_v31 = vor.u32 %v9377_v8, %v6565_v10 }
  0xe6   :  { %5150 = vmatpush.bf16.msra.mxu3 %v6424_v41  ;;  %v9457_v23 = vld [vmem:[%s15042_s1 + $0x5e4] sm:$0xf]  ;;  %v6885_v24 = vld [vmem:[%s15042_s1 + $0x5f0] sm:$0xf0]  ;;  %v6760_v33 = vor.u32 %v9425_v11, %v6757_v19 }
  0xe7   :  { %5160 = vmatpush.bf16.msrb.mxu0 %v6600_v42  ;;  %v9489_v28 = vld [vmem:[%s15042_s1 + $0x6e4] sm:$0xf]  ;;  %v7013_v29 = vld [vmem:[%s15042_s1 + $0x6f0] sm:$0xf0]  ;;  %v6888_v35 = vor.u32 %v9457_v23, %v6885_v24 }
  0xe8   :  { %5125 = vmatpush.bf16.msra.mxu1 %v6152_v53  ;;  %v9373_v36 = vld [vmem:[%s15042_s1 + $0x344] sm:$0xf]  ;;  %v6549_v37 = vld [vmem:[%s15042_s1 + $0x350] sm:$0xf0]  ;;  %v7016_v39 = vor.u32 %v9489_v28, %v7013_v29 }
  0xe9   :  { %5138 = vmatpush.bf16.msra.mxu2 %v6280_v54  ;;  %v9421_v38 = vld [vmem:[%s15042_s1 + $0x4c4] sm:$0xf]  ;;  %v6741_v40 = vld [vmem:[%s15042_s1 + $0x4d0] sm:$0xf0]  ;;  %v6552_v45 = vor.u32 %v9373_v36, %v6549_v37 }
  0xea   :  { %5151 = vmatpush.bf16.msra.mxu3 %v6408_v58  ;;  %v9453_v41 = vld [vmem:[%s15042_s1 + $0x5c4] sm:$0xf]  ;;  %v6869_v42 = vld [vmem:[%s15042_s1 + $0x5d0] sm:$0xf0]  ;;  %v6744_v50 = vor.u32 %v9421_v38, %v6741_v40 }
  0xeb   :  { %5161 = vmatpush.bf16.msrb.mxu0 %v6584_v59  ;;  %v9485_v43 = vld [vmem:[%s15042_s1 + $0x6c4] sm:$0xf]  ;;  %v6997_v44 = vld [vmem:[%s15042_s1 + $0x6d0] sm:$0xf0]  ;;  %v6872_v51 = vor.u32 %v9453_v41, %v6869_v42 }
  0xec   :  { %5126 = vmatpush.bf16.msra.mxu1 %v6136_v25  ;;  %v9369_v52 = vld [vmem:[%s15042_s1 + $0x324] sm:$0xf]  ;;  %v6533_v53 = vld [vmem:[%s15042_s1 + $0x330] sm:$0xf0]  ;;  %v7000_v55 = vor.u32 %v9485_v43, %v6997_v44 }
  0xed   :  { %5139 = vmatpush.bf16.msra.mxu2 %v6264_v27  ;;  %v9417_v54 = vld [vmem:[%s15042_s1 + $0x4a4] sm:$0xf]  ;;  %v6725_v56 = vld [vmem:[%s15042_s1 + $0x4b0] sm:$0xf0]  ;;  %v6536_v61 = vor.u32 %v9369_v52, %v6533_v53  ;;  %v4907_v27 = vpop.f32.mrf.mxu0 }
  0xee   :  { %5152 = vmatpush.bf16.msra.mxu3 %v6392_v30  ;;  %v9449_v57 = vld [vmem:[%s15042_s1 + $0x5a4] sm:$0xf]  ;;  %v6853_v32 = vld [vmem:[%s15042_s1 + $0x5b0] sm:$0xf0]  ;;  %v6728_v63 = vor.u32 %v9417_v54, %v6725_v56 }
  0xef   :  { %5162 = vmatpush.bf16.msrb.mxu0 %v6568_v31  ;;  %v9481_v58 = vld [vmem:[%s15042_s1 + $0x6a4] sm:$0xf]  ;;  %v6981_v59 = vld [vmem:[%s15042_s1 + $0x6b0] sm:$0xf0]  ;;  %5127 = vmatmul.bf16.vlgmr.msra.gmra.mxu1 %v10412_v21  ;;  %v6856_v3 = vor.u32 %v9449_v57, %v6853_v32  ;;  %v4908_v31 = vadd.f32 %v4907_v27, %v11499_v34  ;;  %v4933_v57 = vpop.f32.mrf.mxu2 }
  0xf0   :  { %5171 = vmatpush.bf16.msrb.mxu1 %v6760_v33  ;;  %5140 = vmatmul.bf16.vlgmr.msra.gmra.mxu2 %v10423_v26  ;;  %v9365_v62 = vld [vmem:[%s15042_s1 + $0x304] sm:$0xf]  ;;  %v6517_v8 = vld [vmem:[%s15042_s1 + $0x310] sm:$0xf0]  ;;  %v6984_v19 = vor.u32 %v9481_v58, %v6981_v59 }
  0xf1   :  { %5184 = vmatpush.bf16.msrb.mxu2 %v6888_v35  ;;  %5153 = vmatmul.bf16.vlgmr.msra.gmra.mxu3 %v10410_v20  ;;  %v9413_v10 = vld [vmem:[%s15042_s1 + $0x484] sm:$0xf]  ;;  %v6709_v11 = vld [vmem:[%s15042_s1 + $0x490] sm:$0xf0]  ;;  %v6520_v33 = vor.u32 %v9365_v62, %v6517_v8  ;;  %v4920_v35 = vpop.f32.mrf.mxu1 }
  0xf2   :  { %5197 = vmatpush.bf16.msrb.mxu3 %v7016_v39  ;;  %v9445_v23 = vld [vmem:[%s15042_s1 + $0x584] sm:$0xf]  ;;  %v6837_v24 = vld [vmem:[%s15042_s1 + $0x590] sm:$0xf0]  ;;  %v6712_v36 = vor.u32 %v9413_v10, %v6709_v11  ;;  %v4921_v41 = vadd.f32 %v4920_v35, %v4908_v31 }
  0xf3   :  { %5163 = vmatpush.bf16.msrb.mxu0 %v6552_v45  ;;  %v9477_v25 = vld [vmem:[%s15042_s1 + $0x684] sm:$0xf]  ;;  %v6965_v28 = vld [vmem:[%s15042_s1 + $0x690] sm:$0xf0]  ;;  %v6840_v37 = vor.u32 %v9445_v23, %v6837_v24 }
  0xf4   :  { %5172 = vmatpush.bf16.msrb.mxu1 %v6744_v50  ;;  %v9521_v29 = vld [vmem:[%s15042_s1 + $0x7e4] sm:$0xf]  ;;  %v7141_v30 = vld [vmem:[%s15042_s1 + $0x7f0] sm:$0xf0]  ;;  %v6968_v40 = vor.u32 %v9477_v25, %v6965_v28  ;;  %v4934_v62 = vadd.f32 %v4933_v57, %v4921_v41 }
  0xf5   :  { %5185 = vmatpush.bf16.msrb.mxu2 %v6872_v51  ;;  %v9409_v38 = vld [vmem:[%s15042_s1 + $0x464] sm:$0xf]  ;;  %v6693_v39 = vld [vmem:[%s15042_s1 + $0x470] sm:$0xf0]  ;;  %v7144_v42 = vor.u32 %v9521_v29, %v7141_v30  ;;  %v4909_v11 = vpop.f32.mrf.mxu0 }
  0xf6   :  { %5198 = vmatpush.bf16.msrb.mxu3 %v7000_v55  ;;  %v9441_v34 = vld [vmem:[%s15042_s1 + $0x564] sm:$0xf]  ;;  %v6821_v43 = vld [vmem:[%s15042_s1 + $0x570] sm:$0xf0]  ;;  %v6696_v52 = vor.u32 %v9409_v38, %v6693_v39 }
  0xf7   :  { %5164 = vmatpush.bf16.msrb.mxu0 %v6536_v61  ;;  %v9473_v44 = vld [vmem:[%s15042_s1 + $0x664] sm:$0xf]  ;;  %v6949_v45 = vld [vmem:[%s15042_s1 + $0x670] sm:$0xf0]  ;;  %v6824_v53 = vor.u32 %v9441_v34, %v6821_v43 }
  0xf8   :  { %5173 = vmatpush.bf16.msrb.mxu1 %v6728_v63  ;;  %v9517_v50 = vld [vmem:[%s15042_s1 + $0x7c4] sm:$0xf]  ;;  %v7125_v51 = vld [vmem:[%s15042_s1 + $0x7d0] sm:$0xf0]  ;;  %v6952_v56 = vor.u32 %v9473_v44, %v6949_v45  ;;  %v4946_v63 = vpop.f32.mrf.mxu3 }
  0xf9   :  { %5186 = vmatpush.bf16.msrb.mxu2 %v6856_v3  ;;  %v9405_v54 = vld [vmem:[%s15042_s1 + $0x444] sm:$0xf]  ;;  %v6677_v55 = vld [vmem:[%s15042_s1 + $0x450] sm:$0xf0]  ;;  %v7128_v32 = vor.u32 %v9517_v50, %v7125_v51  ;;  %v11699_v23 = vadd.f32 %v4946_v63, %v4934_v62 }
  0xfa   :  { %5199 = vmatpush.bf16.msrb.mxu3 %v6984_v19  ;;  %v9437_v58 = vld [vmem:[%s15042_s1 + $0x544] sm:$0xf]  ;;  %v6805_v59 = vld [vmem:[%s15042_s1 + $0x550] sm:$0xf0]  ;;  %v4922_v19 = vpop.f32.mrf.mxu1  ;;  %v6680_v24 = vor.u32 %v9405_v54, %v6677_v55 }
  0xfb   :  { %5165 = vmatpush.bf16.msrb.mxu0 %v6520_v33  ;;  %v9469_v61 = vld [vmem:[%s15042_s1 + $0x644] sm:$0xf]  ;;  %v6933_v3 = vld [vmem:[%s15042_s1 + $0x650] sm:$0xf0]  ;;  %v6808_v25 = vor.u32 %v9437_v58, %v6805_v59 }
  0xfc   :  { %5174 = vmatpush.bf16.msrb.mxu1 %v6712_v36  ;;  %v9513_v8 = vld [vmem:[%s15042_s1 + $0x7a4] sm:$0xf]  ;;  %v7109_v10 = vld [vmem:[%s15042_s1 + $0x7b0] sm:$0xf0]  ;;  %v6936_v29 = vor.u32 %v9469_v61, %v6933_v3 }
  0xfd   :  { %5187 = vmatpush.bf16.msrb.mxu2 %v6840_v37  ;;  %v9401_v27 = vld [vmem:[%s15042_s1 + $0x424] sm:$0xf]  ;;  %v6661_v28 = vld [vmem:[%s15042_s1 + $0x430] sm:$0xf0]  ;;  %v7112_v30 = vor.u32 %v9513_v8, %v7109_v10 }
  0xfe   :  { %5200 = vmatpush.bf16.msrb.mxu3 %v6968_v40  ;;  %5166 = vmatmul.bf16.vlgmr.msrb.gmra.mxu0 %v10414_v22  ;;  %v9433_v31 = vld [vmem:[%s15042_s1 + $0x524] sm:$0xf]  ;;  %v6789_v33 = vld [vmem:[%s15042_s1 + $0x530] sm:$0xf0]  ;;  %v6664_v39 = vor.u32 %v9401_v27, %v6661_v28 }
  0xff   :  { %5210 = vmatpush.bf16.msra.mxu0 %v7144_v42  ;;  %v9465_v35 = vld [vmem:[%s15042_s1 + $0x624] sm:$0xf]  ;;  %v6917_v36 = vld [vmem:[%s15042_s1 + $0x630] sm:$0xf0]  ;;  %v6792_v40 = vor.u32 %v9433_v31, %v6789_v33 }
 0x100   :  { %5175 = vmatpush.bf16.msrb.mxu1 %v6696_v52  ;;  %v9509_v37 = vld [vmem:[%s15042_s1 + $0x784] sm:$0xf]  ;;  %v7093_v38 = vld [vmem:[%s15042_s1 + $0x790] sm:$0xf0]  ;;  %v6920_v43 = vor.u32 %v9465_v35, %v6917_v36  ;;  %v4935_v52 = vpop.f32.mrf.mxu2 }
 0x101   :  { %5188 = vmatpush.bf16.msrb.mxu2 %v6824_v53  ;;  %v9397_v41 = vld [vmem:[%s15042_s1 + $0x404] sm:$0xf]  ;;  %v6645_v42 = vld [vmem:[%s15042_s1 + $0x410] sm:$0xf0]  ;;  %v7096_v44 = vor.u32 %v9509_v37, %v7093_v38 }
 0x102   :  { %5201 = vmatpush.bf16.msrb.mxu3 %v6952_v56  ;;  %v9429_v34 = vld [vmem:[%s15042_s1 + $0x504] sm:$0xf]  ;;  %v6773_v45 = vld [vmem:[%s15042_s1 + $0x510] sm:$0xf0]  ;;  %v4948_v56 = vpop.f32.mrf.mxu3  ;;  %v6648_v59 = vor.u32 %v9397_v41, %v6645_v42 }
 0x103   :  { %5211 = vmatpush.bf16.msra.mxu0 %v7128_v32  ;;  %v9461_v50 = vld [vmem:[%s15042_s1 + $0x604] sm:$0xf]  ;;  %v6901_v51 = vld [vmem:[%s15042_s1 + $0x610] sm:$0xf0]  ;;  %v6776_v61 = vor.u32 %v9429_v34, %v6773_v45 }
 0x104   :  { %5176 = vmatpush.bf16.msrb.mxu1 %v6680_v24  ;;  %v9505_v53 = vld [vmem:[%s15042_s1 + $0x764] sm:$0xf]  ;;  %v7077_v54 = vld [vmem:[%s15042_s1 + $0x770] sm:$0xf0]  ;;  %v6904_v3 = vor.u32 %v9461_v50, %v6901_v51 }
 0x105   :  { %5189 = vmatpush.bf16.msrb.mxu2 %v6808_v25  ;;  %v9553_v55 = vld [vmem:[%s15042_s1 + $0x8e4] sm:$0xf]  ;;  %v7269_v57 = vld [vmem:[%s15042_s1 + $0x8f0] sm:$0xf0]  ;;  %v7080_v8 = vor.u32 %v9505_v53, %v7077_v54 }
 0x106   :  { %5202 = vmatpush.bf16.msrb.mxu3 %v6936_v29  ;;  %v9585_v32 = vld [vmem:[%s15042_s1 + $0x9e4] sm:$0xf]  ;;  %v7397_v58 = vld [vmem:[%s15042_s1 + $0x9f0] sm:$0xf0]  ;;  %v7272_v10 = vor.u32 %v9553_v55, %v7269_v57 }
 0x107   :  { %5212 = vmatpush.bf16.msra.mxu0 %v7112_v30  ;;  %v9617_v62 = vld [vmem:[%s15042_s1 + $0xae4] sm:$0xf]  ;;  %v7525_v63 = vld [vmem:[%s15042_s1 + $0xaf0] sm:$0xf0]  ;;  %v7400_v11 = vor.u32 %v9585_v32, %v7397_v58 }
 0x108   :  { %5177 = vmatpush.bf16.msrb.mxu1 %v6664_v39  ;;  %v9501_v19 = vld [vmem:[%s15042_s1 + $0x744] sm:$0xf]  ;;  %v7061_v24 = vld [vmem:[%s15042_s1 + $0x750] sm:$0xf0]  ;;  %v7528_v27 = vor.u32 %v9617_v62, %v7525_v63 }
 0x109   :  { %5190 = vmatpush.bf16.msrb.mxu2 %v6792_v40  ;;  %v9549_v25 = vld [vmem:[%s15042_s1 + $0x8c4] sm:$0xf]  ;;  %v7253_v28 = vld [vmem:[%s15042_s1 + $0x8d0] sm:$0xf0]  ;;  %v7064_v35 = vor.u32 %v9501_v19, %v7061_v24 }
 0x10a   :  { %5203 = vmatpush.bf16.msrb.mxu3 %v6920_v43  ;;  %v9581_v29 = vld [vmem:[%s15042_s1 + $0x9c4] sm:$0xf]  ;;  %v7381_v30 = vld [vmem:[%s15042_s1 + $0x9d0] sm:$0xf0]  ;;  %v7256_v36 = vor.u32 %v9549_v25, %v7253_v28 }
 0x10b   :  { %5213 = vmatpush.bf16.msra.mxu0 %v7096_v44  ;;  %v9613_v31 = vld [vmem:[%s15042_s1 + $0xac4] sm:$0xf]  ;;  %v7509_v33 = vld [vmem:[%s15042_s1 + $0xad0] sm:$0xf0]  ;;  %v7384_v37 = vor.u32 %v9581_v29, %v7381_v30 }
 0x10c   :  { %5178 = vmatpush.bf16.msrb.mxu1 %v6648_v59  ;;  %v9497_v38 = vld [vmem:[%s15042_s1 + $0x724] sm:$0xf]  ;;  %v7045_v39 = vld [vmem:[%s15042_s1 + $0x730] sm:$0xf0]  ;;  %v7512_v41 = vor.u32 %v9613_v31, %v7509_v33 }
 0x10d   :  { %5191 = vmatpush.bf16.msrb.mxu2 %v6776_v61  ;;  %v9545_v40 = vld [vmem:[%s15042_s1 + $0x8a4] sm:$0xf]  ;;  %v7237_v42 = vld [vmem:[%s15042_s1 + $0x8b0] sm:$0xf0]  ;;  %v7048_v50 = vor.u32 %v9497_v38, %v7045_v39  ;;  %v4959_v61 = vpop.f32.mrf.mxu0 }
 0x10e   :  { %5204 = vmatpush.bf16.msrb.mxu3 %v6904_v3  ;;  %v9577_v34 = vld [vmem:[%s15042_s1 + $0x9a4] sm:$0xf]  ;;  %v7365_v43 = vld [vmem:[%s15042_s1 + $0x9b0] sm:$0xf0]  ;;  %v7240_v52 = vor.u32 %v9545_v40, %v7237_v42 }
 0x10f   :  { %5214 = vmatpush.bf16.msra.mxu0 %v7080_v8  ;;  %v9609_v44 = vld [vmem:[%s15042_s1 + $0xaa4] sm:$0xf]  ;;  %v7493_v45 = vld [vmem:[%s15042_s1 + $0xab0] sm:$0xf0]  ;;  %5179 = vmatmul.bf16.vlgmr.msrb.gmra.mxu1 %v10505_v0  ;;  %v7368_v53 = vor.u32 %v9577_v34, %v7365_v43  ;;  %v4960_v8 = vadd.f32 %v4959_v61, %v11699_v23 }
 0x110   :  { %5223 = vmatpush.bf16.msra.mxu1 %v7272_v10  ;;  %5192 = vmatmul.bf16.vlgmr.msrb.gmra.mxu2 %v10509_v2  ;;  %v9493_v51 = vld [vmem:[%s15042_s1 + $0x704] sm:$0xf]  ;;  %v7029_v54 = vld [vmem:[%s15042_s1 + $0x710] sm:$0xf0]  ;;  %v7496_v57 = vor.u32 %v9609_v44, %v7493_v45 }
 0x111   :  { %5236 = vmatpush.bf16.msra.mxu2 %v7400_v11  ;;  %5205 = vmatmul.bf16.vlgmr.msrb.gmra.mxu3 %v10500_v60  ;;  %v9541_v55 = vld [vmem:[%s15042_s1 + $0x884] sm:$0xf]  ;;  %v7221_v56 = vld [vmem:[%s15042_s1 + $0x890] sm:$0xf0]  ;;  %v7032_v10 = vor.u32 %v9493_v51, %v7029_v54  ;;  %v4972_v11 = vpop.f32.mrf.mxu1 }
 0x112   :  { %5249 = vmatpush.bf16.msra.mxu3 %v7528_v27  ;;  %v9573_v32 = vld [vmem:[%s15042_s1 + $0x984] sm:$0xf]  ;;  %v7349_v58 = vld [vmem:[%s15042_s1 + $0x990] sm:$0xf0]  ;;  %v7224_v19 = vor.u32 %v9541_v55, %v7221_v56  ;;  %v4973_v29 = vadd.f32 %v4972_v11, %v4960_v8 }
 0x113   :  { %5215 = vmatpush.bf16.msra.mxu0 %v7064_v35  ;;  %v9605_v59 = vld [vmem:[%s15042_s1 + $0xa84] sm:$0xf]  ;;  %v7477_v62 = vld [vmem:[%s15042_s1 + $0xa90] sm:$0xf0]  ;;  %v7352_v24 = vor.u32 %v9573_v32, %v7349_v58 }
 0x114   :  { %5224 = vmatpush.bf16.msra.mxu1 %v7256_v36  ;;  %v9649_v63 = vld [vmem:[%s15042_s1 + $0xbe4] sm:$0xf]  ;;  %v7653_v3 = vld [vmem:[%s15042_s1 + $0xbf0] sm:$0xf0]  ;;  %v7480_v28 = vor.u32 %v9605_v59, %v7477_v62  ;;  %v4985_v34 = vpop.f32.mrf.mxu2 }
 0x115   :  { %5237 = vmatpush.bf16.msra.mxu2 %v7384_v37  ;;  %v9537_v25 = vld [vmem:[%s15042_s1 + $0x864] sm:$0xf]  ;;  %v7205_v27 = vld [vmem:[%s15042_s1 + $0x870] sm:$0xf0]  ;;  %v7656_v30 = vor.u32 %v9649_v63, %v7653_v3  ;;  %v4986_v51 = vadd.f32 %v4985_v34, %v4973_v29  ;;  %v4961_v56 = vpop.f32.mrf.mxu0 }
 0x116   :  { %5250 = vmatpush.bf16.msra.mxu3 %v7512_v41  ;;  %v9569_v23 = vld [vmem:[%s15042_s1 + $0x964] sm:$0xf]  ;;  %v7333_v31 = vld [vmem:[%s15042_s1 + $0x970] sm:$0xf0]  ;;  %v7208_v38 = vor.u32 %v9537_v25, %v7205_v27 }
 0x117   :  { %5216 = vmatpush.bf16.msra.mxu0 %v7048_v50  ;;  %v9601_v33 = vld [vmem:[%s15042_s1 + $0xa64] sm:$0xf]  ;;  %v7461_v35 = vld [vmem:[%s15042_s1 + $0xa70] sm:$0xf0]  ;;  %v7336_v39 = vor.u32 %v9569_v23, %v7333_v31 }
 0x118   :  { %5225 = vmatpush.bf16.msra.mxu1 %v7240_v52  ;;  %v9645_v36 = vld [vmem:[%s15042_s1 + $0xbc4] sm:$0xf]  ;;  %v7637_v37 = vld [vmem:[%s15042_s1 + $0xbd0] sm:$0xf0]  ;;  %v7464_v42 = vor.u32 %v9601_v33, %v7461_v35  ;;  %v4998_v52 = vpop.f32.mrf.mxu3 }
 0x119   :  { %5238 = vmatpush.bf16.msra.mxu2 %v7368_v53  ;;  %v9533_v40 = vld [vmem:[%s15042_s1 + $0x844] sm:$0xf]  ;;  %v7189_v41 = vld [vmem:[%s15042_s1 + $0x850] sm:$0xf0]  ;;  %v7640_v43 = vor.u32 %v9645_v36, %v7637_v37  ;;  %v11898_v32 = vadd.f32 %v4998_v52, %v4986_v51 }
 0x11a   :  { %5251 = vmatpush.bf16.msra.mxu3 %v7496_v57  ;;  %v9565_v44 = vld [vmem:[%s15042_s1 + $0x944] sm:$0xf]  ;;  %v7317_v45 = vld [vmem:[%s15042_s1 + $0x950] sm:$0xf0]  ;;  %v4974_v57 = vpop.f32.mrf.mxu1  ;;  %v7192_v58 = vor.u32 %v9533_v40, %v7189_v41 }
 0x11b   :  { %5217 = vmatpush.bf16.msra.mxu0 %v7032_v10  ;;  %v9597_v50 = vld [vmem:[%s15042_s1 + $0xa44] sm:$0xf]  ;;  %v7445_v53 = vld [vmem:[%s15042_s1 + $0xa50] sm:$0xf0]  ;;  %v7320_v59 = vor.u32 %v9565_v44, %v7317_v45 }
 0x11c   :  { %5226 = vmatpush.bf16.msra.mxu1 %v7224_v19  ;;  %v9641_v54 = vld [vmem:[%s15042_s1 + $0xba4] sm:$0xf]  ;;  %v7621_v55 = vld [vmem:[%s15042_s1 + $0xbb0] sm:$0xf0]  ;;  %v7448_v63 = vor.u32 %v9597_v50, %v7445_v53 }
 0x11d   :  { %5239 = vmatpush.bf16.msra.mxu2 %v7352_v24  ;;  %v9529_v61 = vld [vmem:[%s15042_s1 + $0x824] sm:$0xf]  ;;  %v7173_v62 = vld [vmem:[%s15042_s1 + $0x830] sm:$0xf0]  ;;  %v7624_v3 = vor.u32 %v9641_v54, %v7621_v55 }
 0x11e   :  { %5252 = vmatpush.bf16.msra.mxu3 %v7480_v28  ;;  %5218 = vmatmul.bf16.vlgmr.msra.gmra.mxu0 %v10507_v1  ;;  %v9561_v8 = vld [vmem:[%s15042_s1 + $0x924] sm:$0xf]  ;;  %v7301_v10 = vld [vmem:[%s15042_s1 + $0x930] sm:$0xf0]  ;;  %v7176_v27 = vor.u32 %v9529_v61, %v7173_v62 }
 0x11f   :  { %5262 = vmatpush.bf16.msrb.mxu0 %v7656_v30  ;;  %v9593_v11 = vld [vmem:[%s15042_s1 + $0xa24] sm:$0xf]  ;;  %v7429_v19 = vld [vmem:[%s15042_s1 + $0xa30] sm:$0xf0]  ;;  %v7304_v28 = vor.u32 %v9561_v8, %v7301_v10 }
 0x120   :  { %5227 = vmatpush.bf16.msra.mxu1 %v7208_v38  ;;  %v9637_v24 = vld [vmem:[%s15042_s1 + $0xb84] sm:$0xf]  ;;  %v7605_v25 = vld [vmem:[%s15042_s1 + $0xb90] sm:$0xf0]  ;;  %v7432_v31 = vor.u32 %v9593_v11, %v7429_v19  ;;  %v4987_v38 = vpop.f32.mrf.mxu2 }
 0x121   :  { %5240 = vmatpush.bf16.msra.mxu2 %v7336_v39  ;;  %v9525_v29 = vld [vmem:[%s15042_s1 + $0x804] sm:$0xf]  ;;  %v7157_v30 = vld [vmem:[%s15042_s1 + $0x810] sm:$0xf0]  ;;  %v7608_v33 = vor.u32 %v9637_v24, %v7605_v25 }
 0x122   :  { %5253 = vmatpush.bf16.msra.mxu3 %v7464_v42  ;;  %v9557_v23 = vld [vmem:[%s15042_s1 + $0x904] sm:$0xf]  ;;  %v7285_v35 = vld [vmem:[%s15042_s1 + $0x910] sm:$0xf0]  ;;  %v5000_v42 = vpop.f32.mrf.mxu3  ;;  %v7160_v45 = vor.u32 %v9525_v29, %v7157_v30 }
 0x123   :  { %5263 = vmatpush.bf16.msrb.mxu0 %v7640_v43  ;;  %v9589_v36 = vld [vmem:[%s15042_s1 + $0xa04] sm:$0xf]  ;;  %v7413_v37 = vld [vmem:[%s15042_s1 + $0xa10] sm:$0xf0]  ;;  %v7288_v50 = vor.u32 %v9557_v23, %v7285_v35 }
 0x124   :  { %5228 = vmatpush.bf16.msra.mxu1 %v7192_v58  ;;  %v9633_v39 = vld [vmem:[%s15042_s1 + $0xb64] sm:$0xf]  ;;  %v7589_v40 = vld [vmem:[%s15042_s1 + $0xb70] sm:$0xf0]  ;;  %v7416_v53 = vor.u32 %v9589_v36, %v7413_v37 }
 0x125   :  { %5241 = vmatpush.bf16.msra.mxu2 %v7320_v59  ;;  %v9681_v41 = vld [vmem:[%s15042_s1 + $0xce4] sm:$0xf]  ;;  %v7781_v34 = vld [vmem:[%s15042_s1 + $0xcf0] sm:$0xf0]  ;;  %v7592_v54 = vor.u32 %v9633_v39, %v7589_v40 }
 0x126   :  { %5254 = vmatpush.bf16.msra.mxu3 %v7448_v63  ;;  %v9713_v43 = vld [vmem:[%s15042_s1 + $0xde4] sm:$0xf]  ;;  %v7909_v44 = vld [vmem:[%s15042_s1 + $0xdf0] sm:$0xf0]  ;;  %v7784_v55 = vor.u32 %v9681_v41, %v7781_v34 }
 0x127   :  { %5264 = vmatpush.bf16.msrb.mxu0 %v7624_v3  ;;  %v9745_v51 = vld [vmem:[%s15042_s1 + $0xee4] sm:$0xf]  ;;  %v8037_v52 = vld [vmem:[%s15042_s1 + $0xef0] sm:$0xf0]  ;;  %v7912_v56 = vor.u32 %v9713_v43, %v7909_v44 }
 0x128   :  { %5229 = vmatpush.bf16.msra.mxu1 %v7176_v27  ;;  %v9629_v57 = vld [vmem:[%s15042_s1 + $0xb44] sm:$0xf]  ;;  %v7573_v58 = vld [vmem:[%s15042_s1 + $0xb50] sm:$0xf0]  ;;  %v8040_v61 = vor.u32 %v9745_v51, %v8037_v52 }
 0x129   :  { %5242 = vmatpush.bf16.msra.mxu2 %v7304_v28  ;;  %v9677_v59 = vld [vmem:[%s15042_s1 + $0xcc4] sm:$0xf]  ;;  %v7765_v62 = vld [vmem:[%s15042_s1 + $0xcd0] sm:$0xf0]  ;;  %v7576_v11 = vor.u32 %v9629_v57, %v7573_v58 }
 0x12a   :  { %5255 = vmatpush.bf16.msra.mxu3 %v7432_v31  ;;  %v9709_v63 = vld [vmem:[%s15042_s1 + $0xdc4] sm:$0xf]  ;;  %v7893_v3 = vld [vmem:[%s15042_s1 + $0xdd0] sm:$0xf0]  ;;  %v7768_v19 = vor.u32 %v9677_v59, %v7765_v62 }
 0x12b   :  { %5265 = vmatpush.bf16.msrb.mxu0 %v7608_v33  ;;  %v9741_v8 = vld [vmem:[%s15042_s1 + $0xec4] sm:$0xf]  ;;  %v8021_v10 = vld [vmem:[%s15042_s1 + $0xed0] sm:$0xf0]  ;;  %v7896_v24 = vor.u32 %v9709_v63, %v7893_v3 }
 0x12c   :  { %5230 = vmatpush.bf16.msra.mxu1 %v7160_v45  ;;  %v9625_v25 = vld [vmem:[%s15042_s1 + $0xb24] sm:$0xf]  ;;  %v7557_v27 = vld [vmem:[%s15042_s1 + $0xb30] sm:$0xf0]  ;;  %v8024_v29 = vor.u32 %v9741_v8, %v8021_v10 }
 0x12d   :  { %5243 = vmatpush.bf16.msra.mxu2 %v7288_v50  ;;  %v9673_v28 = vld [vmem:[%s15042_s1 + $0xca4] sm:$0xf]  ;;  %v7749_v30 = vld [vmem:[%s15042_s1 + $0xcb0] sm:$0xf0]  ;;  %v7560_v36 = vor.u32 %v9625_v25, %v7557_v27 }
 0x12e   :  { %5256 = vmatpush.bf16.msra.mxu3 %v7416_v53  ;;  %v9705_v23 = vld [vmem:[%s15042_s1 + $0xda4] sm:$0xf]  ;;  %v7877_v31 = vld [vmem:[%s15042_s1 + $0xdb0] sm:$0xf0]  ;;  %v7752_v38 = vor.u32 %v9673_v28, %v7749_v30  ;;  %v5011_v50 = vpop.f32.mrf.mxu0 }
 0x12f   :  { %5266 = vmatpush.bf16.msrb.mxu0 %v7592_v54  ;;  %5231 = vmatmul.bf16.vlgmr.msra.gmra.mxu1 %v10755_v12  ;;  %v9737_v33 = vld [vmem:[%s15042_s1 + $0xea4] sm:$0xf]  ;;  %v8005_v35 = vld [vmem:[%s15042_s1 + $0xeb0] sm:$0xf0]  ;;  %v7880_v39 = vor.u32 %v9705_v23, %v7877_v31  ;;  %v5012_v54 = vadd.f32 %v5011_v50, %v11898_v32 }
 0x130   :  { %5275 = vmatpush.bf16.msrb.mxu1 %v7784_v55  ;;  %5244 = vmatmul.bf16.vlgmr.msra.gmra.mxu2 %v10765_v16  ;;  %v9621_v37 = vld [vmem:[%s15042_s1 + $0xb04] sm:$0xf]  ;;  %v7541_v40 = vld [vmem:[%s15042_s1 + $0xb10] sm:$0xf0]  ;;  %v8008_v34 = vor.u32 %v9737_v33, %v8005_v35 }
 0x131   :  { %5288 = vmatpush.bf16.msrb.mxu2 %v7912_v56  ;;  %5257 = vmatmul.bf16.vlgmr.msra.gmra.mxu3 %v10763_v15  ;;  %v9669_v41 = vld [vmem:[%s15042_s1 + $0xc84] sm:$0xf]  ;;  %v7733_v42 = vld [vmem:[%s15042_s1 + $0xc90] sm:$0xf0]  ;;  %v7544_v55 = vor.u32 %v9621_v37, %v7541_v40  ;;  %v5024_v56 = vpop.f32.mrf.mxu1 }
 0x132   :  { %5301 = vmatpush.bf16.msrb.mxu3 %v8040_v61  ;;  %v9701_v43 = vld [vmem:[%s15042_s1 + $0xd84] sm:$0xf]  ;;  %v7861_v44 = vld [vmem:[%s15042_s1 + $0xd90] sm:$0xf0]  ;;  %v7736_v57 = vor.u32 %v9669_v41, %v7733_v42  ;;  %v5025_v63 = vadd.f32 %v5024_v56, %v5012_v54 }
 0x133   :  { %5267 = vmatpush.bf16.msrb.mxu0 %v7576_v11  ;;  %v9733_v45 = vld [vmem:[%s15042_s1 + $0xe84] sm:$0xf]  ;;  %v7989_v51 = vld [vmem:[%s15042_s1 + $0xe90] sm:$0xf0]  ;;  %v7864_v58 = vor.u32 %v9701_v43, %v7861_v44 }
 0x134   :  { %5276 = vmatpush.bf16.msrb.mxu1 %v7768_v19  ;;  %v9777_v52 = vld [vmem:[%s15042_s1 + $0xfe4] sm:$0xf]  ;;  %v8165_v53 = vld [vmem:[%s15042_s1 + $0xff0] sm:$0xf0]  ;;  %v7992_v62 = vor.u32 %v9733_v45, %v7989_v51 }
 0x135   :  { %5289 = vmatpush.bf16.msrb.mxu2 %v7896_v24  ;;  %v9665_v59 = vld [vmem:[%s15042_s1 + $0xc64] sm:$0xf]  ;;  %v7717_v61 = vld [vmem:[%s15042_s1 + $0xc70] sm:$0xf0]  ;;  %v8168_v3 = vor.u32 %v9777_v52, %v8165_v53  ;;  %v5037_v23 = vpop.f32.mrf.mxu2 }
 0x136   :  { %5302 = vmatpush.bf16.msrb.mxu3 %v8024_v29  ;;  %v9697_v32 = vld [vmem:[%s15042_s1 + $0xd64] sm:$0xf]  ;;  %v7845_v8 = vld [vmem:[%s15042_s1 + $0xd70] sm:$0xf0]  ;;  %v7720_v25 = vor.u32 %v9665_v59, %v7717_v61  ;;  %v5038_v37 = vadd.f32 %v5037_v23, %v5025_v63  ;;  %v5013_v42 = vpop.f32.mrf.mxu0 }
 0x137   :  { %5268 = vmatpush.bf16.msrb.mxu0 %v7560_v36  ;;  %v9729_v10 = vld [vmem:[%s15042_s1 + $0xe64] sm:$0xf]  ;;  %v7973_v11 = vld [vmem:[%s15042_s1 + $0xe70] sm:$0xf0]  ;;  %v7848_v27 = vor.u32 %v9697_v32, %v7845_v8 }
 0x138   :  { %5277 = vmatpush.bf16.msrb.mxu1 %v7752_v38  ;;  %v9773_v19 = vld [vmem:[%s15042_s1 + $0xfc4] sm:$0xf]  ;;  %v8149_v24 = vld [vmem:[%s15042_s1 + $0xfd0] sm:$0xf0]  ;;  %v7976_v30 = vor.u32 %v9729_v10, %v7973_v11  ;;  %v5050_v38 = vpop.f32.mrf.mxu3 }
 0x139   :  { %5290 = vmatpush.bf16.msrb.mxu2 %v7880_v39  ;;  %v9661_v28 = vld [vmem:[%s15042_s1 + $0xc44] sm:$0xf]  ;;  %v7701_v29 = vld [vmem:[%s15042_s1 + $0xc50] sm:$0xf0]  ;;  %v8152_v31 = vor.u32 %v9773_v19, %v8149_v24  ;;  %v12097_v43 = vadd.f32 %v5050_v38, %v5038_v37 }
 0x13a   :  { %5303 = vmatpush.bf16.msrb.mxu3 %v8008_v34  ;;  %v9693_v33 = vld [vmem:[%s15042_s1 + $0xd44] sm:$0xf]  ;;  %v7829_v35 = vld [vmem:[%s15042_s1 + $0xd50] sm:$0xf0]  ;;  %v5026_v34 = vpop.f32.mrf.mxu1  ;;  %v7704_v44 = vor.u32 %v9661_v28, %v7701_v29 }
 0x13b   :  { %5269 = vmatpush.bf16.msrb.mxu0 %v7544_v55  ;;  %v9725_v36 = vld [vmem:[%s15042_s1 + $0xe44] sm:$0xf]  ;;  %v7957_v39 = vld [vmem:[%s15042_s1 + $0xe50] sm:$0xf0]  ;;  %v7832_v45 = vor.u32 %v9693_v33, %v7829_v35 }
 0x13c   :  { %5278 = vmatpush.bf16.msrb.mxu1 %v7736_v57  ;;  %v9769_v40 = vld [vmem:[%s15042_s1 + $0xfa4] sm:$0xf]  ;;  %v8133_v41 = vld [vmem:[%s15042_s1 + $0xfb0] sm:$0xf0]  ;;  %v7960_v52 = vor.u32 %v9725_v36, %v7957_v39 }
 0x13d   :  { %5291 = vmatpush.bf16.msrb.mxu2 %v7864_v58  ;;  %v9657_v50 = vld [vmem:[%s15042_s1 + $0xc24] sm:$0xf]  ;;  %v7685_v51 = vld [vmem:[%s15042_s1 + $0xc30] sm:$0xf0]  ;;  %v8136_v53 = vor.u32 %v9769_v40, %v8133_v41 }
 0x13e   :  { %5304 = vmatpush.bf16.msrb.mxu3 %v7992_v62  ;;  %5270 = vmatmul.bf16.vlgmr.msrb.gmra.mxu0 %v10767_v17  ;;  %v9689_v54 = vld [vmem:[%s15042_s1 + $0xd24] sm:$0xf]  ;;  %v7813_v55 = vld [vmem:[%s15042_s1 + $0xd30] sm:$0xf0]  ;;  %v7688_v61 = vor.u32 %v9657_v50, %v7685_v51 }
 0x13f   :  { %5314 = vmatpush.bf16.msra.mxu0 %v8168_v3  ;;  %v9721_v56 = vld [vmem:[%s15042_s1 + $0xe24] sm:$0xf]  ;;  %v7941_v57 = vld [vmem:[%s15042_s1 + $0xe30] sm:$0xf0]  ;;  %v7816_v62 = vor.u32 %v9689_v54, %v7813_v55 }
 0x140   :  { %5279 = vmatpush.bf16.msrb.mxu1 %v7720_v25  ;;  %v9765_v58 = vld [vmem:[%s15042_s1 + $0xf84] sm:$0xf]  ;;  %v8117_v59 = vld [vmem:[%s15042_s1 + $0xf90] sm:$0xf0]  ;;  %v7944_v8 = vor.u32 %v9721_v56, %v7941_v57  ;;  %v5039_v25 = vpop.f32.mrf.mxu2 }
 0x141   :  { %5292 = vmatpush.bf16.msrb.mxu2 %v7848_v27  ;;  %v9653_v63 = vld [vmem:[%s15042_s1 + $0xc04] sm:$0xf]  ;;  %v7669_v3 = vld [vmem:[%s15042_s1 + $0xc10] sm:$0xf0]  ;;  %v8120_v10 = vor.u32 %v9765_v58, %v8117_v59 }
 0x142   :  { %5305 = vmatpush.bf16.msrb.mxu3 %v7976_v30  ;;  %v9685_v32 = vld [vmem:[%s15042_s1 + $0xd04] sm:$0xf]  ;;  %v7797_v11 = vld [vmem:[%s15042_s1 + $0xd10] sm:$0xf0]  ;;  %v5052_v30 = vpop.f32.mrf.mxu3  ;;  %v7672_v35 = vor.u32 %v9653_v63, %v7669_v3 }
 0x143   :  { %5315 = vmatpush.bf16.msra.mxu0 %v8152_v31  ;;  %v9717_v19 = vld [vmem:[%s15042_s1 + $0xe04] sm:$0xf]  ;;  %v7925_v24 = vld [vmem:[%s15042_s1 + $0xe10] sm:$0xf0]  ;;  %v7800_v36 = vor.u32 %v9685_v32, %v7797_v11 }
 0x144   :  { %5280 = vmatpush.bf16.msrb.mxu1 %v7704_v44  ;;  %v9761_v27 = vld [vmem:[%s15042_s1 + $0xf64] sm:$0xf]  ;;  %v8101_v28 = vld [vmem:[%s15042_s1 + $0xf70] sm:$0xf0]  ;;  %v7928_v39 = vor.u32 %v9717_v19, %v7925_v24 }
 0x145   :  { %5293 = vmatpush.bf16.msrb.mxu2 %v7832_v45  ;;  %v9809_v29 = vld [vmem:[%s15042_s1 + $0x10e4] sm:$0xf]  ;;  %v8293_v23 = vld [vmem:[%s15042_s1 + $0x10f0] sm:$0xf0]  ;;  %v8104_v40 = vor.u32 %v9761_v27, %v8101_v28 }
 0x146   :  { %5306 = vmatpush.bf16.msrb.mxu3 %v7960_v52  ;;  %v9841_v31 = vld [vmem:[%s15042_s1 + $0x11e4] sm:$0xf]  ;;  %v8421_v33 = vld [vmem:[%s15042_s1 + $0x11f0] sm:$0xf0]  ;;  %v8296_v41 = vor.u32 %v9809_v29, %v8293_v23 }
 0x147   :  { %5316 = vmatpush.bf16.msra.mxu0 %v8136_v53  ;;  %v9873_v37 = vld [vmem:[%s15042_s1 + $0x12e4] sm:$0xf]  ;;  %v8549_v38 = vld [vmem:[%s15042_s1 + $0x12f0] sm:$0xf0]  ;;  %v8424_v42 = vor.u32 %v9841_v31, %v8421_v33 }
 0x148   :  { %5281 = vmatpush.bf16.msrb.mxu1 %v7688_v61  ;;  %v9757_v34 = vld [vmem:[%s15042_s1 + $0xf44] sm:$0xf]  ;;  %v8085_v44 = vld [vmem:[%s15042_s1 + $0xf50] sm:$0xf0]  ;;  %v8552_v50 = vor.u32 %v9873_v37, %v8549_v38 }
 0x149   :  { %5294 = vmatpush.bf16.msrb.mxu2 %v7816_v62  ;;  %v9805_v45 = vld [vmem:[%s15042_s1 + $0x10c4] sm:$0xf]  ;;  %v8277_v51 = vld [vmem:[%s15042_s1 + $0x10d0] sm:$0xf0]  ;;  %v8088_v56 = vor.u32 %v9757_v34, %v8085_v44 }
 0x14a   :  { %5307 = vmatpush.bf16.msrb.mxu3 %v7944_v8  ;;  %v9837_v52 = vld [vmem:[%s15042_s1 + $0x11c4] sm:$0xf]  ;;  %v8405_v53 = vld [vmem:[%s15042_s1 + $0x11d0] sm:$0xf0]  ;;  %v8280_v57 = vor.u32 %v9805_v45, %v8277_v51 }
 0x14b   :  { %5317 = vmatpush.bf16.msra.mxu0 %v8120_v10  ;;  %v9869_v54 = vld [vmem:[%s15042_s1 + $0x12c4] sm:$0xf]  ;;  %v8533_v55 = vld [vmem:[%s15042_s1 + $0x12d0] sm:$0xf0]  ;;  %v8408_v58 = vor.u32 %v9837_v52, %v8405_v53 }
 0x14c   :  { %5282 = vmatpush.bf16.msrb.mxu1 %v7672_v35  ;;  %v9753_v59 = vld [vmem:[%s15042_s1 + $0xf24] sm:$0xf]  ;;  %v8069_v61 = vld [vmem:[%s15042_s1 + $0xf30] sm:$0xf0]  ;;  %v8536_v63 = vor.u32 %v9869_v54, %v8533_v55 }
 0x14d   :  { %5295 = vmatpush.bf16.msrb.mxu2 %v7800_v36  ;;  %v9801_v62 = vld [vmem:[%s15042_s1 + $0x10a4] sm:$0xf]  ;;  %v8261_v3 = vld [vmem:[%s15042_s1 + $0x10b0] sm:$0xf0]  ;;  %v8072_v19 = vor.u32 %v9753_v59, %v8069_v61  ;;  %v5063_v36 = vpop.f32.mrf.mxu0 }
 0x14e   :  { %5308 = vmatpush.bf16.msrb.mxu3 %v7928_v39  ;;  %v9833_v32 = vld [vmem:[%s15042_s1 + $0x11a4] sm:$0xf]  ;;  %v8389_v8 = vld [vmem:[%s15042_s1 + $0x11b0] sm:$0xf0]  ;;  %v8264_v25 = vor.u32 %v9801_v62, %v8261_v3 }
 0x14f   :  { %5318 = vmatpush.bf16.msra.mxu0 %v8104_v40  ;;  %5283 = vmatmul.bf16.vlgmr.msrb.gmra.mxu1 %v10929_v46  ;;  %v9865_v10 = vld [vmem:[%s15042_s1 + $0x12a4] sm:$0xf]  ;;  %v8517_v11 = vld [vmem:[%s15042_s1 + $0x12b0] sm:$0xf0]  ;;  %v8392_v27 = vor.u32 %v9833_v32, %v8389_v8  ;;  %v5064_v40 = vadd.f32 %v5063_v36, %v12097_v43 }
 0x150   :  { %5327 = vmatpush.bf16.msra.mxu1 %v8296_v41  ;;  %5296 = vmatmul.bf16.vlgmr.msrb.gmra.mxu2 %v10933_v48  ;;  %v9749_v24 = vld [vmem:[%s15042_s1 + $0xf04] sm:$0xf]  ;;  %v8053_v28 = vld [vmem:[%s15042_s1 + $0xf10] sm:$0xf0]  ;;  %v8520_v23 = vor.u32 %v9865_v10, %v8517_v11 }
 0x151   :  { %5340 = vmatpush.bf16.msra.mxu2 %v8424_v42  ;;  %5309 = vmatmul.bf16.vlgmr.msrb.gmra.mxu3 %v10931_v47  ;;  %v9797_v29 = vld [vmem:[%s15042_s1 + $0x1084] sm:$0xf]  ;;  %v8245_v30 = vld [vmem:[%s15042_s1 + $0x1090] sm:$0xf0]  ;;  %v8056_v41 = vor.u32 %v9749_v24, %v8053_v28  ;;  %v5076_v42 = vpop.f32.mrf.mxu1 }
 0x152   :  { %5353 = vmatpush.bf16.msra.mxu3 %v8552_v50  ;;  %v9829_v31 = vld [vmem:[%s15042_s1 + $0x1184] sm:$0xf]  ;;  %v8373_v33 = vld [vmem:[%s15042_s1 + $0x1190] sm:$0xf0]  ;;  %v8248_v34 = vor.u32 %v9797_v29, %v8245_v30  ;;  %v5077_v52 = vadd.f32 %v5076_v42, %v5064_v40 }
 0x153   :  { %5319 = vmatpush.bf16.msra.mxu0 %v8088_v56  ;;  %v9861_v35 = vld [vmem:[%s15042_s1 + $0x1284] sm:$0xf]  ;;  %v8501_v37 = vld [vmem:[%s15042_s1 + $0x1290] sm:$0xf0]  ;;  %v8376_v44 = vor.u32 %v9829_v31, %v8373_v33  ;;  %v5089_v32 = vpop.f32.mrf.mxu2 }
 0x154   :  { %5328 = vmatpush.bf16.msra.mxu1 %v8280_v57  ;;  %v9905_v38 = vld [vmem:[%s15042_s1 + $0x13e4] sm:$0xf]  ;;  %v8677_v39 = vld [vmem:[%s15042_s1 + $0x13f0] sm:$0xf0]  ;;  %v8504_v51 = vor.u32 %v9861_v35, %v8501_v37  ;;  %v5090_v24 = vadd.f32 %v5089_v32, %v5077_v52 }
 0x155   :  { %5341 = vmatpush.bf16.msra.mxu2 %v8408_v58  ;;  %v9793_v45 = vld [vmem:[%s15042_s1 + $0x1064] sm:$0xf]  ;;  %v8229_v50 = vld [vmem:[%s15042_s1 + $0x1070] sm:$0xf0]  ;;  %v8680_v53 = vor.u32 %v9905_v38, %v8677_v39 }
 0x156   :  { %5354 = vmatpush.bf16.msra.mxu3 %v8536_v63  ;;  %v9825_v43 = vld [vmem:[%s15042_s1 + $0x1164] sm:$0xf]  ;;  %v8357_v54 = vld [vmem:[%s15042_s1 + $0x1170] sm:$0xf0]  ;;  %v8232_v59 = vor.u32 %v9793_v45, %v8229_v50 }
 0x157   :  { %5320 = vmatpush.bf16.msra.mxu0 %v8072_v19  ;;  %v9857_v55 = vld [vmem:[%s15042_s1 + $0x1264] sm:$0xf]  ;;  %v8485_v56 = vld [vmem:[%s15042_s1 + $0x1270] sm:$0xf0]  ;;  %v8360_v61 = vor.u32 %v9825_v43, %v8357_v54 }
 0x158   :  { %5329 = vmatpush.bf16.msra.mxu1 %v8264_v25  ;;  %v9901_v57 = vld [vmem:[%s15042_s1 + $0x13c4] sm:$0xf]  ;;  %v8661_v58 = vld [vmem:[%s15042_s1 + $0x13d0] sm:$0xf0]  ;;  %v8488_v3 = vor.u32 %v9857_v55, %v8485_v56  ;;  %v5065_v25 = vpop.f32.mrf.mxu0 }
 0x159   :  { %5342 = vmatpush.bf16.msra.mxu2 %v8392_v27  ;;  %v9789_v62 = vld [vmem:[%s15042_s1 + $0x1044] sm:$0xf]  ;;  %v8213_v63 = vld [vmem:[%s15042_s1 + $0x1050] sm:$0xf0]  ;;  %v8664_v8 = vor.u32 %v9901_v57, %v8661_v58  ;;  %v5102_v27 = vpop.f32.mrf.mxu3 }
 0x15a   :  { %5355 = vmatpush.bf16.msra.mxu3 %v8520_v23  ;;  %v9821_v10 = vld [vmem:[%s15042_s1 + $0x1144] sm:$0xf]  ;;  %v8341_v11 = vld [vmem:[%s15042_s1 + $0x1150] sm:$0xf0]  ;;  %v5078_v23 = vpop.f32.mrf.mxu1  ;;  %v5103_v31 = vadd.f32 %v5102_v27, %v5090_v24  ;;  %v8216_v33 = vor.u32 %v9789_v62, %v8213_v63 }
 0x15b   :  { %5321 = vmatpush.bf16.msra.mxu0 %v8056_v41  ;;  %v9853_v19 = vld [vmem:[%s15042_s1 + $0x1244] sm:$0xf]  ;;  %v8469_v28 = vld [vmem:[%s15042_s1 + $0x1250] sm:$0xf0]  ;;  %v8344_v35 = vor.u32 %v9821_v10, %v8341_v11 }
 0x15c   :  { %5330 = vmatpush.bf16.msra.mxu1 %v8248_v34  ;;  %v9897_v29 = vld [vmem:[%s15042_s1 + $0x13a4] sm:$0xf]  ;;  %v8645_v30 = vld [vmem:[%s15042_s1 + $0x13b0] sm:$0xf0]  ;;  %v8472_v38 = vor.u32 %v9853_v19, %v8469_v28 }
 0x15d   :  { %5343 = vmatpush.bf16.msra.mxu2 %v8376_v44  ;;  %v9785_v36 = vld [vmem:[%s15042_s1 + $0x1024] sm:$0xf]  ;;  %v8197_v37 = vld [vmem:[%s15042_s1 + $0x1030] sm:$0xf0]  ;;  %v8648_v39 = vor.u32 %v9897_v29, %v8645_v30 }
 0x15e   :  { %5356 = vmatpush.bf16.msra.mxu3 %v8504_v51  ;;  %5322 = vmatmul.bf16.vlgmr.msra.gmra.mxu0 %v10935_v49  ;;  %v9817_v40 = vld [vmem:[%s15042_s1 + $0x1124] sm:$0xf]  ;;  %v8325_v41 = vld [vmem:[%s15042_s1 + $0x1130] sm:$0xf0]  ;;  %v8200_v50 = vor.u32 %v9785_v36, %v8197_v37 }
 0x15f   :  { %5366 = vmatpush.bf16.msrb.mxu0 %v8680_v53  ;;  %v9849_v42 = vld [vmem:[%s15042_s1 + $0x1224] sm:$0xf]  ;;  %v8453_v34 = vld [vmem:[%s15042_s1 + $0x1230] sm:$0xf0]  ;;  %v8328_v51 = vor.u32 %v9817_v40, %v8325_v41 }
 0x160   :  { %5331 = vmatpush.bf16.msra.mxu1 %v8232_v59  ;;  %v9893_v44 = vld [vmem:[%s15042_s1 + $0x1384] sm:$0xf]  ;;  %v8629_v45 = vld [vmem:[%s15042_s1 + $0x1390] sm:$0xf0]  ;;  %v8456_v54 = vor.u32 %v9849_v42, %v8453_v34  ;;  %v5091_v59 = vpop.f32.mrf.mxu2  ;;  %v5115_v32 = vpop.f32.mrf.mxu0 }
 0x161   :  { %5344 = vmatpush.bf16.msra.mxu2 %v8360_v61  ;;  %v9781_v52 = vld [vmem:[%s15042_s1 + $0x1004] sm:$0xf]  ;;  %v8181_v53 = vld [vmem:[%s15042_s1 + $0x1010] sm:$0xf0]  ;;  %v8632_v55 = vor.u32 %v9893_v44, %v8629_v45  ;;  %v12356_v19 = vadd.f32 %v5115_v32, %v5103_v31 }
 0x162   :  { %5357 = vmatpush.bf16.msra.mxu3 %v8488_v3  ;;  %v9813_v43 = vld [vmem:[%s15042_s1 + $0x1104] sm:$0xf]  ;;  %v8309_v56 = vld [vmem:[%s15042_s1 + $0x1110] sm:$0xf0]  ;;  %v5104_v3 = vpop.f32.mrf.mxu3  ;;  %v8184_v24 = vor.u32 %v9781_v52, %v8181_v53 }
 0x163   :  { %5367 = vmatpush.bf16.msrb.mxu0 %v8664_v8  ;;  %v9845_v57 = vld [vmem:[%s15042_s1 + $0x1204] sm:$0xf]  ;;  %v8437_v58 = vld [vmem:[%s15042_s1 + $0x1210] sm:$0xf0]  ;;  %v8312_v25 = vor.u32 %v9813_v43, %v8309_v56 }
 0x164   :  { %5332 = vmatpush.bf16.msra.mxu1 %v8216_v33  ;;  %v9889_v61 = vld [vmem:[%s15042_s1 + $0x1364] sm:$0xf]  ;;  %v8613_v62 = vld [vmem:[%s15042_s1 + $0x1370] sm:$0xf0]  ;;  %v8440_v29 = vor.u32 %v9845_v57, %v8437_v58 }
 0x165   :  { %5345 = vmatpush.bf16.msra.mxu2 %v8344_v35  ;;  %v9937_v63 = vld [vmem:[%s15042_s1 + $0x14e4] sm:$0xf]  ;;  %v8805_v8 = vld [vmem:[%s15042_s1 + $0x14f0] sm:$0xf0]  ;;  %v8616_v30 = vor.u32 %v9889_v61, %v8613_v62 }
 0x166   :  { %5358 = vmatpush.bf16.msra.mxu3 %v8472_v38  ;;  %v9969_v10 = vld [vmem:[%s15042_s1 + $0x15e4] sm:$0xf]  ;;  %v8933_v11 = vld [vmem:[%s15042_s1 + $0x15f0] sm:$0xf0]  ;;  %v8808_v23 = vor.u32 %v9937_v63, %v8805_v8 }
 0x167   :  { %5368 = vmatpush.bf16.msrb.mxu0 %v8648_v39  ;;  %v10001_v27 = vld [vmem:[%s15042_s1 + $0x16e4] sm:$0xf]  ;;  %v9061_v28 = vld [vmem:[%s15042_s1 + $0x16f0] sm:$0xf0]  ;;  %v8936_v33 = vor.u32 %v9969_v10, %v8933_v11 }
 0x168   :  { %5333 = vmatpush.bf16.msra.mxu1 %v8200_v50  ;;  %v9885_v31 = vld [vmem:[%s15042_s1 + $0x1344] sm:$0xf]  ;;  %v8597_v35 = vld [vmem:[%s15042_s1 + $0x1350] sm:$0xf0]  ;;  %v9064_v37 = vor.u32 %v10001_v27, %v9061_v28  ;;  %v5117_v56 = vpop.f32.mrf.mxu0  ;;  %v10054_v27 = vld [vmem:[%s15043_s2] sm:$0xf] }
 0x169   :  { %5346 = vmatpush.bf16.msra.mxu2 %v8328_v51  ;;  %v9933_v36 = vld [vmem:[%s15042_s1 + $0x14c4] sm:$0xf]  ;;  %v8789_v38 = vld [vmem:[%s15042_s1 + $0x14d0] sm:$0xf0]  ;;  %v8600_v34 = vor.u32 %v9885_v31, %v8597_v35  ;;  %v807_v28 = vperm.slane %v10054_v27, 1 }
 0x16a   :  { %5359 = vmatpush.bf16.msra.mxu3 %v8456_v54  ;;  %v9965_v39 = vld [vmem:[%s15042_s1 + $0x15c4] sm:$0xf]  ;;  %v8917_v40 = vld [vmem:[%s15042_s1 + $0x15d0] sm:$0xf0]  ;;  %v8792_v44 = vor.u32 %v9933_v36, %v8789_v38 }
 0x16b   :  { %5369 = vmatpush.bf16.msrb.mxu0 %v8632_v55  ;;  %v9997_v41 = vld [vmem:[%s15042_s1 + $0x16c4] sm:$0xf]  ;;  %v9045_v42 = vld [vmem:[%s15042_s1 + $0x16d0] sm:$0xf0]  ;;  %v8920_v45 = vor.u32 %v9965_v39, %v8917_v40 }
 0x16c   :  { %5334 = vmatpush.bf16.msra.mxu1 %v8184_v24  ;;  %v9881_v50 = vld [vmem:[%s15042_s1 + $0x1324] sm:$0xf]  ;;  %v8581_v51 = vld [vmem:[%s15042_s1 + $0x1330] sm:$0xf0]  ;;  %v9048_v53 = vor.u32 %v9997_v41, %v9045_v42  ;;  %v5128_v31 = vpop.f32.mrf.mxu1 }
 0x16d   :  { %5347 = vmatpush.bf16.msra.mxu2 %v8312_v25  ;;  %v9929_v52 = vld [vmem:[%s15042_s1 + $0x14a4] sm:$0xf]  ;;  %v8773_v43 = vld [vmem:[%s15042_s1 + $0x14b0] sm:$0xf0]  ;;  %v8584_v59 = vor.u32 %v9881_v50, %v8581_v51 }
 0x16e   :  { %5360 = vmatpush.bf16.msra.mxu3 %v8440_v29  ;;  %v9961_v54 = vld [vmem:[%s15042_s1 + $0x15a4] sm:$0xf]  ;;  %v8901_v55 = vld [vmem:[%s15042_s1 + $0x15b0] sm:$0xf0]  ;;  %v8776_v63 = vor.u32 %v9929_v52, %v8773_v43 }
 0x16f   :  { %5370 = vmatpush.bf16.msrb.mxu0 %v8616_v30  ;;  %5335 = vmatmul.bf16.vlgmr.msra.gmra.mxu1 %v11166_v9  ;;  %v9993_v57 = vld [vmem:[%s15042_s1 + $0x16a4] sm:$0xf]  ;;  %v9029_v58 = vld [vmem:[%s15042_s1 + $0x16b0] sm:$0xf0]  ;;  %v8904_v3 = vor.u32 %v9961_v54, %v8901_v55 }
 0x170   :  { %5379 = vmatpush.bf16.msrb.mxu1 %v8808_v23  ;;  %5348 = vmatmul.bf16.vlgmr.msra.gmra.mxu2 %v11176_v14  ;;  %v9877_v61 = vld [vmem:[%s15042_s1 + $0x1304] sm:$0xf]  ;;  %v8565_v62 = vld [vmem:[%s15042_s1 + $0x1310] sm:$0xf0]  ;;  %v9032_v11 = vor.u32 %v9993_v57, %v9029_v58 }
 0x171   :  { %5392 = vmatpush.bf16.msrb.mxu2 %v8936_v33  ;;  %5361 = vmatmul.bf16.vlgmr.msra.gmra.mxu3 %v11174_v13  ;;  %v9925_v32 = vld [vmem:[%s15042_s1 + $0x1484] sm:$0xf]  ;;  %v8757_v8 = vld [vmem:[%s15042_s1 + $0x1490] sm:$0xf0]  ;;  %v8568_v33 = vor.u32 %v9877_v61, %v8565_v62 }
 0x172   :  { %5405 = vmatpush.bf16.msrb.mxu3 %v9064_v37  ;;  %v9957_v10 = vld [vmem:[%s15042_s1 + $0x1584] sm:$0xf]  ;;  %v8885_v24 = vld [vmem:[%s15042_s1 + $0x1590] sm:$0xf0]  ;;  %v8760_v35 = vor.u32 %v9925_v32, %v8757_v8 }
 0x173   :  { %5371 = vmatpush.bf16.msrb.mxu0 %v8600_v34  ;;  %v9989_v25 = vld [vmem:[%s15042_s1 + $0x1684] sm:$0xf]  ;;  %v9013_v29 = vld [vmem:[%s15042_s1 + $0x1690] sm:$0xf0]  ;;  %v8888_v36 = vor.u32 %v9957_v10, %v8885_v24  ;;  %v5141_v55 = vpop.f32.mrf.mxu2 }
 0x174   :  { %5380 = vmatpush.bf16.msrb.mxu1 %v8792_v44  ;;  %v10033_v30 = vld [vmem:[%s15042_s1 + $0x17e4] sm:$0xf]  ;;  %v9189_v23 = vld [vmem:[%s15042_s1 + $0x17f0] sm:$0xf0]  ;;  %v9016_v39 = vor.u32 %v9989_v25, %v9013_v29  ;;  %v5129_v44 = vadd.f32 %v5128_v31, %v807_v28 }
 0x175   :  { %5393 = vmatpush.bf16.msrb.mxu2 %v8920_v45  ;;  %v9921_v37 = vld [vmem:[%s15042_s1 + $0x1464] sm:$0xf]  ;;  %v8741_v38 = vld [vmem:[%s15042_s1 + $0x1470] sm:$0xf0]  ;;  %v9192_v40 = vor.u32 %v10033_v30, %v9189_v23 }
 0x176   :  { %5406 = vmatpush.bf16.msrb.mxu3 %v9048_v53  ;;  %v9953_v41 = vld [vmem:[%s15042_s1 + $0x1564] sm:$0xf]  ;;  %v8869_v42 = vld [vmem:[%s15042_s1 + $0x1570] sm:$0xf0]  ;;  %v8744_v52 = vor.u32 %v9921_v37, %v8741_v38  ;;  %v5142_v62 = vadd.f32 %v5141_v55, %v5129_v44 }
 0x177   :  { %5372 = vmatpush.bf16.msrb.mxu0 %v8584_v59  ;;  %v9985_v34 = vld [vmem:[%s15042_s1 + $0x1664] sm:$0xf]  ;;  %v8997_v45 = vld [vmem:[%s15042_s1 + $0x1670] sm:$0xf0]  ;;  %v8872_v53 = vor.u32 %v9953_v41, %v8869_v42 }
 0x178   :  { %5381 = vmatpush.bf16.msrb.mxu1 %v8776_v63  ;;  %v10029_v50 = vld [vmem:[%s15042_s1 + $0x17c4] sm:$0xf]  ;;  %v9173_v51 = vld [vmem:[%s15042_s1 + $0x17d0] sm:$0xf0]  ;;  %v9000_v56 = vor.u32 %v9985_v34, %v8997_v45  ;;  %v5154_v63 = vpop.f32.mrf.mxu3 }
 0x179   :  { %5394 = vmatpush.bf16.msrb.mxu2 %v8904_v3  ;;  %v9917_v43 = vld [vmem:[%s15042_s1 + $0x1444] sm:$0xf]  ;;  %v8725_v54 = vld [vmem:[%s15042_s1 + $0x1450] sm:$0xf0]  ;;  %v9176_v57 = vor.u32 %v10029_v50, %v9173_v51  ;;  %v5155_v10 = vadd.f32 %v5154_v63, %v5142_v62 }
 0x17a   :  { %5407 = vmatpush.bf16.msrb.mxu3 %v9032_v11  ;;  %v9949_v58 = vld [vmem:[%s15042_s1 + $0x1544] sm:$0xf]  ;;  %v8853_v59 = vld [vmem:[%s15042_s1 + $0x1550] sm:$0xf0]  ;;  %v5130_v11 = vpop.f32.mrf.mxu1  ;;  %v8728_v24 = vor.u32 %v9917_v43, %v8725_v54 }
 0x17b   :  { %5373 = vmatpush.bf16.msrb.mxu0 %v8568_v33  ;;  %v9981_v61 = vld [vmem:[%s15042_s1 + $0x1644] sm:$0xf]  ;;  %v8981_v3 = vld [vmem:[%s15042_s1 + $0x1650] sm:$0xf0]  ;;  %v8856_v25 = vor.u32 %v9949_v58, %v8853_v59  ;;  %v5167_v38 = vpop.f32.mrf.mxu0  ;;  %v5143_v45 = vpop.f32.mrf.mxu2  ;;  %v6251_v59 = vld [vmem:[%s15042_s1 + $0xe8] sm:$0xf] }
 0x17c   :  { %5382 = vmatpush.bf16.msrb.mxu1 %v8760_v35  ;;  %v10025_v32 = vld [vmem:[%s15042_s1 + $0x17a4] sm:$0xf]  ;;  %v9157_v8 = vld [vmem:[%s15042_s1 + $0x17b0] sm:$0xf0]  ;;  %v8984_v29 = vor.u32 %v9981_v61, %v8981_v3  ;;  %v12530_v44 = vadd.f32 %v5167_v38, %v5155_v10  ;;  %v9300_v61 = vld [vmem:[%s15042_s1 + $0xf4] sm:$0xf0] }
 0x17d   :  { %5395 = vmatpush.bf16.msrb.mxu2 %v8888_v36  ;;  %v9913_v27 = vld [vmem:[%s15042_s1 + $0x1424] sm:$0xf]  ;;  %v8709_v28 = vld [vmem:[%s15042_s1 + $0x1430] sm:$0xf0]  ;;  %v9160_v30 = vor.u32 %v10025_v32, %v9157_v8  ;;  %v6379_v3 = vld [vmem:[%s15042_s1 + $0x1e8] sm:$0xf] }
 0x17e   :  { %5408 = vmatpush.bf16.msrb.mxu3 %v9016_v39  ;;  %5374 = vmatmul.bf16.vlgmr.msrb.gmra.mxu0 %v11178_v18  ;;  %v9945_v23 = vld [vmem:[%s15042_s1 + $0x1524] sm:$0xf]  ;;  %v8837_v33 = vld [vmem:[%s15042_s1 + $0x1530] sm:$0xf0]  ;;  %v8712_v39 = vor.u32 %v9913_v27, %v8709_v28  ;;  %v9332_v32 = vld [vmem:[%s15042_s1 + $0x1f4] sm:$0xf0] }
 0x17f   :  { %5418 = vmatpush.bf16.msra.mxu0 %v9192_v40  ;;  %v9977_v31 = vld [vmem:[%s15042_s1 + $0x1624] sm:$0xf]  ;;  %v8965_v35 = vld [vmem:[%s15042_s1 + $0x1630] sm:$0xf0]  ;;  %v8840_v40 = vor.u32 %v9945_v23, %v8837_v33  ;;  %v6235_v23 = vld [vmem:[%s15042_s1 + $0xc8] sm:$0xf] }
 0x180   :  { %5383 = vmatpush.bf16.msrb.mxu1 %v8744_v52  ;;  %v10021_v36 = vld [vmem:[%s15042_s1 + $0x1784] sm:$0xf]  ;;  %v9141_v37 = vld [vmem:[%s15042_s1 + $0x1790] sm:$0xf0]  ;;  %v8968_v50 = vor.u32 %v9977_v31, %v8965_v35  ;;  %v5156_v54 = vpop.f32.mrf.mxu3  ;;  %v9296_v33 = vld [vmem:[%s15042_s1 + $0xd4] sm:$0xf0] }
 0x181   :  { %5396 = vmatpush.bf16.msrb.mxu2 %v8872_v53  ;;  %v9909_v41 = vld [vmem:[%s15042_s1 + $0x1404] sm:$0xf]  ;;  %v8693_v42 = vld [vmem:[%s15042_s1 + $0x1410] sm:$0xf0]  ;;  %v9144_v51 = vor.u32 %v10021_v36, %v9141_v37  ;;  %v6363_v35 = vld [vmem:[%s15042_s1 + $0x1c8] sm:$0xf] }
 0x182   :  { %5409 = vmatpush.bf16.msrb.mxu3 %v9000_v56  ;;  %v9941_v34 = vld [vmem:[%s15042_s1 + $0x1504] sm:$0xf]  ;;  %v8821_v52 = vld [vmem:[%s15042_s1 + $0x1510] sm:$0xf0]  ;;  %v8696_v62 = vor.u32 %v9909_v41, %v8693_v42  ;;  %v9328_v36 = vld [vmem:[%s15042_s1 + $0x1d4] sm:$0xf0] }
 0x183   :  { %5419 = vmatpush.bf16.msra.mxu0 %v9176_v57  ;;  %v9973_v53 = vld [vmem:[%s15042_s1 + $0x1604] sm:$0xf]  ;;  %v8949_v43 = vld [vmem:[%s15042_s1 + $0x1610] sm:$0xf0]  ;;  %v8824_v63 = vor.u32 %v9941_v34, %v8821_v52  ;;  %v5169_v31 = vpop.f32.mrf.mxu0  ;;  %v6364_v34 = vor.u32 %v9328_v36, %v6363_v35  ;;  %v6347_v52 = vld [vmem:[%s15042_s1 + $0x1a8] sm:$0xf] }
 0x184   :  { %5384 = vmatpush.bf16.msrb.mxu1 %v8728_v24  ;;  %v10017_v55 = vld [vmem:[%s15042_s1 + $0x1764] sm:$0xf]  ;;  %v9125_v56 = vld [vmem:[%s15042_s1 + $0x1770] sm:$0xf0]  ;;  %v8952_v8 = vor.u32 %v9973_v53, %v8949_v43  ;;  %v6252_v24 = vor.u32 %v9300_v61, %v6251_v59  ;;  %v9324_v53 = vld [vmem:[%s15042_s1 + $0x1b4] sm:$0xf0] }
 0x185   :  { %5397 = vmatpush.bf16.msrb.mxu2 %v8856_v25  ;;  %v10049_v57 = vld [vmem:[%s15042_s1 + $0x1864] sm:$0xf]  ;;  %v9253_v58 = vld [vmem:[%s15042_s1 + $0x1870] sm:$0xf0]  ;;  %v9128_v10 = vor.u32 %v10017_v55, %v9125_v56  ;;  %v6348_v61 = vor.u32 %v9324_v53, %v6347_v52  ;;  %v6187_v31 = vld [vmem:[%s15042_s1 + $0x68] sm:$0xf] }
 0x186   :  { %5410 = vmatpush.bf16.msrb.mxu3 %v8984_v29  ;;  %v9256_v11 = vor.u32 %v10049_v57, %v9253_v58  ;;  %v10013_v25 = vld [vmem:[%s15042_s1 + $0x1744] sm:$0xf]  ;;  %v9109_v27 = vld [vmem:[%s15042_s1 + $0x1750] sm:$0xf0]  ;;  %v6380_v29 = vor.u32 %v9332_v32, %v6379_v3  ;;  %v6331_v3 = vld [vmem:[%s15042_s1 + $0x188] sm:$0xf] }
 0x187   :  { %5420 = vmatpush.bf16.msra.mxu0 %v9160_v30  ;;  %v10045_v28 = vld [vmem:[%s15042_s1 + $0x1844] sm:$0xf]  ;;  %v9237_v30 = vld [vmem:[%s15042_s1 + $0x1850] sm:$0xf0]  ;;  %v9112_v37 = vor.u32 %v10013_v25, %v9109_v27  ;;  %v9320_v32 = vld [vmem:[%s15042_s1 + $0x194] sm:$0xf0] }
 0x188   :  { %5385 = vmatpush.bf16.msrb.mxu1 %v8712_v39  ;;  %v9240_v38 = vor.u32 %v10045_v28, %v9237_v30  ;;  %v6236_v39 = vor.u32 %v9296_v33, %v6235_v23  ;;  %v9093_v41 = vld [vmem:[%s15042_s1 + $0x1730] sm:$0xf0]  ;;  %v10041_v42 = vld [vmem:[%s15042_s1 + $0x1824] sm:$0xf]  ;;  %v9396_v25 = vld [vmem:[%s15042_s1 + $0x3f4] sm:$0xf0]  ;;  %v6332_v23 = vor.u32 %v9320_v32, %v6331_v3 }
 0x189   :  { %5398 = vmatpush.bf16.msrb.mxu2 %v8840_v40  ;;  %v10009_v40 = vld [vmem:[%s15042_s1 + $0x1724] sm:$0xf]  ;;  %v9221_v45 = vld [vmem:[%s15042_s1 + $0x1830] sm:$0xf0]  ;;  %v9284_v35 = vld [vmem:[%s15042_s1 + $0x74] sm:$0xf0] }
 0x18a   :  { %5411 = vmatpush.bf16.msrb.mxu3 %v8968_v50  ;;  %v6219_v50 = vld [vmem:[%s15042_s1 + $0xa8] sm:$0xf]  ;;  %v9096_v43 = vor.u32 %v10009_v40, %v9093_v41  ;;  %v10005_v54 = vld [vmem:[%s15042_s1 + $0x1704] sm:$0xf]  ;;  %v9224_v55 = vor.u32 %v10041_v42, %v9221_v45  ;;  %v9077_v57 = vld [vmem:[%s15042_s1 + $0x1710] sm:$0xf0]  ;;  %v6188_v42 = vor.u32 %v9284_v35, %v6187_v31 }
 0x18b   :  { %5421 = vmatpush.bf16.msra.mxu0 %v9144_v51  ;;  %v9292_v51 = vld [vmem:[%s15042_s1 + $0xb4] sm:$0xf0]  ;;  %v10037_v58 = vld [vmem:[%s15042_s1 + $0x1804] sm:$0xf]  ;;  %v9205_v59 = vld [vmem:[%s15042_s1 + $0x1810] sm:$0xf0] }
 0x18c   :  { %5386 = vmatpush.bf16.msrb.mxu1 %v8696_v62  ;;  %v6220_v56 = vor.u32 %v9292_v51, %v6219_v50  ;;  %v6203_v62 = vld [vmem:[%s15042_s1 + $0x88] sm:$0xf]  ;;  %v5180_v27 = vpop.f32.mrf.mxu1  ;;  %v9208_v28 = vor.u32 %v10037_v58, %v9205_v59  ;;  %v9392_v41 = vld [vmem:[%s15042_s1 + $0x3d4] sm:$0xf0] }
 0x18d   :  { %5399 = vmatpush.bf16.msrb.mxu2 %v8824_v63  ;;  %v9288_v63 = vld [vmem:[%s15042_s1 + $0x94] sm:$0xf0]  ;;  %v5181_v30 = vadd.f32 %v5180_v27, %v12530_v44  ;;  %v6315_v36 = vld [vmem:[%s15042_s1 + $0x168] sm:$0xf] }
 0x18e   :  { %5412 = vmatpush.bf16.msrb.mxu3 %v8952_v8  ;;  %v6507_v8 = vld [vmem:[%s15042_s1 + $0x2e8] sm:$0xf]  ;;  %v9316_v44 = vld [vmem:[%s15042_s1 + $0x174] sm:$0xf0] }
 0x18f   :  { %5422 = vmatpush.bf16.msra.mxu0 %v9128_v10  ;;  %5387 = vmatmul.bf16.vlgmr.msrb.gmra.mxu1 %v11259_v4  ;;  %v9364_v10 = vld [vmem:[%s15042_s1 + $0x2f4] sm:$0xf0]  ;;  %v6619_v40 = vld [vmem:[%s15042_s1 + $0x3c8] sm:$0xf]  ;;  %v6316_v45 = vor.u32 %v9316_v44, %v6315_v36 }
 0x190   :  { %5435 = vmatpush.bf16.msra.mxu1 %v9256_v11  ;;  %5400 = vmatmul.bf16.vlgmr.msrb.gmra.mxu2 %v11263_v6  ;;  %v9080_v11 = vor.u32 %v10005_v54, %v9077_v57  ;;  %v6508_v33 = vor.u32 %v9364_v10, %v6507_v8  ;;  %v6171_v51 = vld [vmem:[%s15042_s1 + $0x48] sm:$0xf]  ;;  %v9280_v52 = vld [vmem:[%s15042_s1 + $0x54] sm:$0xf0] }
 0x191   :  { %5444 = vmatpush.bf16.msra.mxu2 %v6252_v24  ;;  %5413 = vmatmul.bf16.vlgmr.msrb.gmra.mxu3 %v11261_v5  ;;  %v6635_v24 = vld [vmem:[%s15042_s1 + $0x3e8] sm:$0xf]  ;;  %v9356_v58 = vld [vmem:[%s15042_s1 + $0x2b4] sm:$0xf0]  ;;  %v6172_v3 = vor.u32 %v9280_v52, %v6171_v51 }
 0x192   :  { %5457 = vmatpush.bf16.msra.mxu3 %v6380_v29  ;;  %v6204_v29 = vor.u32 %v9288_v63, %v6203_v62  ;;  %v6299_v53 = vld [vmem:[%s15042_s1 + $0x148] sm:$0xf]  ;;  %v9308_v27 = vld [vmem:[%s15042_s1 + $0x134] sm:$0xf0] }
 0x193   :  { %5423 = vmatpush.bf16.msra.mxu0 %v9112_v37  ;;  %v6636_v37 = vor.u32 %v9396_v25, %v6635_v24  ;;  %v6475_v57 = vld [vmem:[%s15042_s1 + $0x2a8] sm:$0xf]  ;;  %v9384_v31 = vld [vmem:[%s15042_s1 + $0x394] sm:$0xf0] }
 0x194   :  { %5436 = vmatpush.bf16.msra.mxu1 %v9240_v38  ;;  %v6491_v38 = vld [vmem:[%s15042_s1 + $0x2c8] sm:$0xf]  ;;  %v5206_v54 = vpop.f32.mrf.mxu3  ;;  %v5182_v63 = vpop.f32.mrf.mxu1  ;;  %v6476_v8 = vor.u32 %v9356_v58, %v6475_v57  ;;  %v9348_v51 = vld [vmem:[%s15042_s1 + $0x274] sm:$0xf0] }
 0x195   :  { %5445 = vmatpush.bf16.msra.mxu2 %v6236_v39  ;;  %v9360_v39 = vld [vmem:[%s15042_s1 + $0x2d4] sm:$0xf0]  ;;  %v6603_v59 = vld [vmem:[%s15042_s1 + $0x3a8] sm:$0xf] }
 0x196   :  { %5458 = vmatpush.bf16.msra.mxu3 %v6364_v34  ;;  %v5193_v34 = vpop.f32.mrf.mxu2  ;;  %v6492_v50 = vor.u32 %v9360_v39, %v6491_v38  ;;  %v6155_v10 = vld [vmem:[%s15042_s1 + $0x28] sm:$0xf]  ;;  %v9460_v57 = vld [vmem:[%s15042_s1 + $0x5f4] sm:$0xf0] }
 0x197   :  { %5424 = vmatpush.bf16.msra.mxu0 %v9096_v43  ;;  %v5194_v43 = vadd.f32 %v5193_v34, %v5181_v30  ;;  %v6283_v24 = vld [vmem:[%s15042_s1 + $0x128] sm:$0xf]  ;;  %v10055_v30 = vld [vmem:[#allocation1] sm:$0xff] }
 0x198   :  { %5437 = vmatpush.bf16.msra.mxu1 %v9224_v55  ;;  %v6620_v55 = vor.u32 %v9392_v41, %v6619_v40  ;;  %v6284_v38 = vor.u32 %v9308_v27, %v6283_v24  ;;  %v9272_v40 = vld [vmem:[%s15042_s1 + $0x14] sm:$0xf0]  ;;  %v6267_v41 = vld [vmem:[%s15042_s1 + $0x108] sm:$0xf] }
 0x199   :  { %5446 = vmatpush.bf16.msra.mxu2 %v6220_v56  ;;  %v9312_v56 = vld [vmem:[%s15042_s1 + $0x154] sm:$0xf0]  ;;  %v5207_v62 = vadd.f32 %v5206_v54, %v5194_v43  ;;  %v6571_v52 = vld [vmem:[%s15042_s1 + $0x368] sm:$0xf] }
 0x19a   :  { %5459 = vmatpush.bf16.msra.mxu3 %v6348_v61  ;;  %v9388_v61 = vld [vmem:[%s15042_s1 + $0x3b4] sm:$0xf0]  ;;  %v6300_v32 = vor.u32 %v9312_v56, %v6299_v53  ;;  %v6763_v43 = vld [vmem:[%s15042_s1 + $0x4e8] sm:$0xf] }
 0x19b   :  { %5425 = vmatpush.bf16.msra.mxu0 %v9080_v11  ;;  %v9276_v11 = vld [vmem:[%s15042_s1 + $0x34] sm:$0xf0]  ;;  %v6604_v25 = vor.u32 %v9388_v61, %v6603_v59  ;;  %v6891_v56 = vld [vmem:[%s15042_s1 + $0x5e8] sm:$0xf] }
 0x19c   :  { %5438 = vmatpush.bf16.msra.mxu1 %v9208_v28  ;;  %v6459_v28 = vld [vmem:[%s15042_s1 + $0x288] sm:$0xf]  ;;  %v6156_v35 = vor.u32 %v9276_v11, %v6155_v10  ;;  %v5208_v34 = vpop.f32.mrf.mxu3  ;;  %v9380_v53 = vld [vmem:[%s15042_s1 + $0x374] sm:$0xf0] }
 0x19d   :  { %5447 = vmatpush.bf16.msra.mxu2 %v6204_v29  ;;  %v9352_v29 = vld [vmem:[%s15042_s1 + $0x294] sm:$0xf0]  ;;  %v6572_v61 = vor.u32 %v9380_v53, %v6571_v52  ;;  %v6427_v63 = vld [vmem:[%s15042_s1 + $0x248] sm:$0xf] }
 0x19e   :  { %5460 = vmatpush.bf16.msra.mxu3 %v6332_v23  ;;  %5426 = vmatmul.bf16.vlgmr.msra.gmra.mxu0 %v11265_v7  ;;  %v5219_v23 = vpop.f32.mrf.mxu0  ;;  %v5195_v44 = vpop.f32.mrf.mxu2  ;;  %v6460_v39 = vor.u32 %v9352_v29, %v6459_v28  ;;  %v9428_v54 = vld [vmem:[%s15042_s1 + $0x4f4] sm:$0xf0]  ;;  %v6747_v11 = vld [vmem:[%s15042_s1 + $0x4c8] sm:$0xf] }
 0x19f   :  { %5470 = vmatpush.bf16.msrb.mxu0 %v6508_v33  ;;  %9266 = vmatmul.msk.bf16.vlgmr.msra.gmra.mxu1 %vm4791_vm0, %v10055_v30  ;;  %v6587_v33 = vld [vmem:[%s15042_s1 + $0x388] sm:$0xf]  ;;  %v12727_v36 = vadd.f32 %v5219_v23, %v5207_v62  ;;  %v6764_v62 = vor.u32 %v9428_v54, %v6763_v43  ;;  %v9376_v10 = vld [vmem:[%s15042_s1 + $0x354] sm:$0xf0] }
 0x1a0   :  { %5483 = vmatpush.bf16.msrb.mxu1 %v6636_v37  ;;  %v6139_v37 = vld [vmem:[%s15042_s1 + $0x8] sm:$0xf]  ;;  %v9424_v24 = vld [vmem:[%s15042_s1 + $0x4d4] sm:$0xf0] }
 0x1a1   :  { %5448 = vmatpush.bf16.msra.mxu2 %v6188_v42  ;;  %v9304_v42 = vld [vmem:[%s15042_s1 + $0x114] sm:$0xf0]  ;;  %v6875_v27 = vld [vmem:[%s15042_s1 + $0x5c8] sm:$0xf]  ;;  %v6748_v23 = vor.u32 %v9424_v24, %v6747_v11 }
 0x1a2   :  { %5461 = vmatpush.bf16.msra.mxu3 %v6316_v45  ;;  %v6588_v45 = vor.u32 %v9384_v31, %v6587_v33  ;;  %v6268_v58 = vor.u32 %v9304_v42, %v6267_v41  ;;  %v9456_v28 = vld [vmem:[%s15042_s1 + $0x5d4] sm:$0xf0]  ;;  %v6411_v33 = vld [vmem:[%s15042_s1 + $0x228] sm:$0xf] }
 0x1a3   :  { %5471 = vmatpush.bf16.msrb.mxu0 %v6492_v50  ;;  %v6443_v50 = vld [vmem:[%s15042_s1 + $0x268] sm:$0xf]  ;;  %v9340_v31 = vld [vmem:[%s15042_s1 + $0x234] sm:$0xf0] }
 0x1a4   :  { %5484 = vmatpush.bf16.msrb.mxu1 %v6620_v55  ;;  %v6140_v55 = vor.u32 %v9272_v40, %v6139_v37  ;;  %v6444_v59 = vor.u32 %v9348_v51, %v6443_v50  ;;  %v6876_v37 = vor.u32 %v9456_v28, %v6875_v27  ;;  %v9372_v44 = vld [vmem:[%s15042_s1 + $0x334] sm:$0xf0]  ;;  %v6859_v40 = vld [vmem:[%s15042_s1 + $0x5a8] sm:$0xf]  ;;  %v6412_v42 = vor.u32 %v9340_v31, %v6411_v33 }
 0x1a5   :  { %5449 = vmatpush.bf16.msra.mxu2 %v6172_v3  ;;  %v9344_v3 = vld [vmem:[%s15042_s1 + $0x254] sm:$0xf0]  ;;  %v6395_v34 = vld [vmem:[%s15042_s1 + $0x208] sm:$0xf] }
 0x1a6   :  { %5462 = vmatpush.bf16.msra.mxu3 %v6300_v32  ;;  %v6555_v32 = vld [vmem:[%s15042_s1 + $0x348] sm:$0xf]  ;;  %v6428_v29 = vor.u32 %v9344_v3, %v6427_v63  ;;  %v9452_v41 = vld [vmem:[%s15042_s1 + $0x5b4] sm:$0xf0] }
 0x1a7   :  { %5472 = vmatpush.bf16.msrb.mxu0 %v6476_v8  ;;  %v6892_v8 = vor.u32 %v9460_v57, %v6891_v56  ;;  %v6556_v30 = vor.u32 %v9376_v10, %v6555_v32  ;;  %v9336_v51 = vld [vmem:[%s15042_s1 + $0x214] sm:$0xf0]  ;;  %v6523_v52 = vld [vmem:[%s15042_s1 + $0x308] sm:$0xf]  ;;  %v6860_v43 = vor.u32 %v9452_v41, %v6859_v40 }
 0x1a8   :  { %5485 = vmatpush.bf16.msrb.mxu1 %v6604_v25  ;;  %v5221_v25 = vpop.f32.mrf.mxu0  ;;  %v9368_v53 = vld [vmem:[%s15042_s1 + $0x314] sm:$0xf0]  ;;  %v6715_v54 = vld [vmem:[%s15042_s1 + $0x488] sm:$0xf]  ;;  %v6396_v63 = vor.u32 %v9336_v51, %v6395_v34 }
 0x1a9   :  { %5450 = vmatpush.bf16.msra.mxu2 %v6156_v35  ;;  %v6539_v35 = vld [vmem:[%s15042_s1 + $0x328] sm:$0xf]  ;;  %v9524_v32 = vld [vmem:[%s15042_s1 + $0x7f4] sm:$0xf0] }
 0x1aa   :  { %5463 = vmatpush.bf16.msra.mxu3 %v6284_v38  ;;  %v6731_v38 = vld [vmem:[%s15042_s1 + $0x4a8] sm:$0xf]  ;;  %v9412_v25 = vld [vmem:[%s15042_s1 + $0x474] sm:$0xf0] }
 0x1ab   :  { %5473 = vmatpush.bf16.msrb.mxu0 %v6460_v39  ;;  %v9420_v39 = vld [vmem:[%s15042_s1 + $0x4b4] sm:$0xf0]  ;;  %v6843_v56 = vld [vmem:[%s15042_s1 + $0x588] sm:$0xf] }
 0x1ac   :  { %5486 = vmatpush.bf16.msrb.mxu1 %v6588_v45  ;;  %v6540_v45 = vor.u32 %v9372_v44, %v6539_v35  ;;  %v6732_v50 = vor.u32 %v9420_v39, %v6731_v38  ;;  %v5232_v57 = vpop.f32.mrf.mxu1  ;;  %v7147_v3 = vld [vmem:[%s15042_s1 + $0x7e8] sm:$0xf]  ;;  %v9520_v31 = vld [vmem:[%s15042_s1 + $0x7d4] sm:$0xf0] }
 0x1ad   :  { %5451 = vmatpush.bf16.msra.mxu2 %v6140_v55  ;;  %v9416_v55 = vld [vmem:[%s15042_s1 + $0x494] sm:$0xf0]  ;;  %v6827_v27 = vld [vmem:[%s15042_s1 + $0x568] sm:$0xf]  ;;  %v7148_v28 = vor.u32 %v9524_v32, %v7147_v3 }
 0x1ae   :  { %5464 = vmatpush.bf16.msra.mxu3 %v6268_v58  ;;  %v9448_v58 = vld [vmem:[%s15042_s1 + $0x594] sm:$0xf0]  ;;  %v6716_v10 = vor.u32 %v9416_v55, %v6715_v54  ;;  %v7131_v33 = vld [vmem:[%s15042_s1 + $0x7c8] sm:$0xf] }
 0x1af   :  { %5474 = vmatpush.bf16.msrb.mxu0 %v6444_v59  ;;  %v7019_v59 = vld [vmem:[%s15042_s1 + $0x6e8] sm:$0xf]  ;;  %v6844_v11 = vor.u32 %v9448_v58, %v6843_v56  ;;  %v9408_v41 = vld [vmem:[%s15042_s1 + $0x454] sm:$0xf0] }
 0x1b0   :  { %5487 = vmatpush.bf16.msrb.mxu1 %v6572_v61  ;;  %5452 = vmatmul.bf16.vlgmr.msra.gmra.mxu2 %v10412_v21  ;;  %v9492_v61 = vld [vmem:[%s15042_s1 + $0x6f4] sm:$0xf0]  ;;  %v6683_v40 = vld [vmem:[%s15042_s1 + $0x448] sm:$0xf] }
 0x1b1   :  { %5496 = vmatpush.bf16.msrb.mxu2 %v6764_v62  ;;  %5465 = vmatmul.bf16.vlgmr.msra.gmra.mxu3 %v10423_v26  ;;  %v5233_v62 = vadd.f32 %v5232_v57, %v12727_v36  ;;  %v7020_v24 = vor.u32 %v9492_v61, %v7019_v59  ;;  %v6699_v36 = vld [vmem:[%s15042_s1 + $0x468] sm:$0xf]  ;;  %v9516_v54 = vld [vmem:[%s15042_s1 + $0x7b4] sm:$0xf0]  ;;  %v6684_v56 = vor.u32 %v9408_v41, %v6683_v40 }
 0x1b2   :  { %5509 = vmatpush.bf16.msrb.mxu3 %v6892_v8  ;;  %v6524_v8 = vor.u32 %v9368_v53, %v6523_v52  ;;  %v6700_v35 = vor.u32 %v9412_v25, %v6699_v36  ;;  %v6987_v51 = vld [vmem:[%s15042_s1 + $0x6a8] sm:$0xf]  ;;  %v9484_v52 = vld [vmem:[%s15042_s1 + $0x6b4] sm:$0xf0] }
 0x1b3   :  { %5475 = vmatpush.bf16.msrb.mxu0 %v6428_v29  ;;  %v9444_v29 = vld [vmem:[%s15042_s1 + $0x574] sm:$0xf0]  ;;  %v5245_v44 = vpop.f32.mrf.mxu2  ;;  %v6988_v58 = vor.u32 %v9484_v52, %v6987_v51  ;;  %v6667_v59 = vld [vmem:[%s15042_s1 + $0x428] sm:$0xf] }
 0x1b4   :  { %5488 = vmatpush.bf16.msrb.mxu1 %v6556_v30  ;;  %v7003_v30 = vld [vmem:[%s15042_s1 + $0x6c8] sm:$0xf]  ;;  %v5258_v39 = vpop.f32.mrf.mxu3  ;;  %v5246_v34 = vadd.f32 %v5245_v44, %v5233_v62  ;;  %v5234_v53 = vpop.f32.mrf.mxu1  ;;  %v9404_v61 = vld [vmem:[%s15042_s1 + $0x434] sm:$0xf0] }
 0x1b5   :  { %5497 = vmatpush.bf16.msrb.mxu2 %v6748_v23  ;;  %v9488_v23 = vld [vmem:[%s15042_s1 + $0x6d4] sm:$0xf0]  ;;  %v6795_v62 = vld [vmem:[%s15042_s1 + $0x528] sm:$0xf]  ;;  %v6668_v25 = vor.u32 %v9404_v61, %v6667_v59 }
 0x1b6   :  { %5510 = vmatpush.bf16.msrb.mxu3 %v6876_v37  ;;  %v6828_v37 = vor.u32 %v9444_v29, %v6827_v27  ;;  %v7004_v38 = vor.u32 %v9488_v23, %v7003_v30  ;;  %v5259_v55 = vadd.f32 %v5258_v39, %v5246_v34  ;;  %v9436_v3 = vld [vmem:[%s15042_s1 + $0x534] sm:$0xf0]  ;;  %v6971_v32 = vld [vmem:[%s15042_s1 + $0x688] sm:$0xf] }
 0x1b7   :  { %5476 = vmatpush.bf16.msrb.mxu0 %v6412_v42  ;;  %v6811_v42 = vld [vmem:[%s15042_s1 + $0x548] sm:$0xf]  ;;  %v9400_v30 = vld [vmem:[%s15042_s1 + $0x414] sm:$0xf0] }
 0x1b8   :  { %5489 = vmatpush.bf16.msrb.mxu1 %v6540_v45  ;;  %v7132_v45 = vor.u32 %v9520_v31, %v7131_v33  ;;  %v6651_v27 = vld [vmem:[%s15042_s1 + $0x408] sm:$0xf]  ;;  %v9432_v33 = vld [vmem:[%s15042_s1 + $0x514] sm:$0xf0] }
 0x1b9   :  { %5498 = vmatpush.bf16.msrb.mxu2 %v6732_v50  ;;  %v9440_v50 = vld [vmem:[%s15042_s1 + $0x554] sm:$0xf0]  ;;  %v6779_v23 = vld [vmem:[%s15042_s1 + $0x508] sm:$0xf]  ;;  %v6652_v34 = vor.u32 %v9400_v30, %v6651_v27 }
 0x1ba   :  { %5511 = vmatpush.bf16.msrb.mxu3 %v6860_v43  ;;  %v7115_v43 = vld [vmem:[%s15042_s1 + $0x7a8] sm:$0xf]  ;;  %v6812_v57 = vor.u32 %v9440_v50, %v6811_v42  ;;  %v9508_v40 = vld [vmem:[%s15042_s1 + $0x774] sm:$0xf0]  ;;  %v6780_v51 = vor.u32 %v9432_v33, %v6779_v23 }
 0x1bb   :  { %5477 = vmatpush.bf16.msrb.mxu0 %v6396_v63  ;;  %v7116_v63 = vor.u32 %v9516_v54, %v7115_v43  ;;  %v5247_v31 = vpop.f32.mrf.mxu2  ;;  %v6955_v44 = vld [vmem:[%s15042_s1 + $0x668] sm:$0xf]  ;;  %v9556_v42 = vld [vmem:[%s15042_s1 + $0x8f4] sm:$0xf0] }
 0x1bc   :  { %5490 = vmatpush.bf16.msrb.mxu1 %v6524_v8  ;;  %v9480_v8 = vld [vmem:[%s15042_s1 + $0x694] sm:$0xf0]  ;;  %v7083_v39 = vld [vmem:[%s15042_s1 + $0x768] sm:$0xf] }
 0x1bd   :  { %5499 = vmatpush.bf16.msrb.mxu2 %v6716_v10  ;;  %v5271_v10 = vpop.f32.mrf.mxu0  ;;  %v6972_v29 = vor.u32 %v9480_v8, %v6971_v32  ;;  %v7275_v41 = vld [vmem:[%s15042_s1 + $0x8e8] sm:$0xf]  ;;  %v9588_v50 = vld [vmem:[%s15042_s1 + $0x9f4] sm:$0xf0]  ;;  %v7084_v53 = vor.u32 %v9508_v40, %v7083_v39 }
 0x1be   :  { %5512 = vmatpush.bf16.msrb.mxu3 %v6844_v11  ;;  %5478 = vmatmul.bf16.vlgmr.msrb.gmra.mxu0 %v10410_v20  ;;  %v7099_v11 = vld [vmem:[%s15042_s1 + $0x788] sm:$0xf]  ;;  %v12926_v36 = vadd.f32 %v5271_v10, %v5259_v55  ;;  %v7276_v43 = vor.u32 %v9556_v42, %v7275_v41  ;;  %v9472_v55 = vld [vmem:[%s15042_s1 + $0x654] sm:$0xf0] }
 0x1bf   :  { %5522 = vmatpush.bf16.msra.mxu0 %v7020_v24  ;;  %5491 = vmatmul.bf16.vlgmr.msrb.gmra.mxu1 %v10414_v22  ;;  %v9512_v24 = vld [vmem:[%s15042_s1 + $0x794] sm:$0xf0]  ;;  %v6939_v54 = vld [vmem:[%s15042_s1 + $0x648] sm:$0xf] }
 0x1c0   :  { %5535 = vmatpush.bf16.msra.mxu1 %v7148_v28  ;;  %v6796_v28 = vor.u32 %v9436_v3, %v6795_v62  ;;  %v7259_v59 = vld [vmem:[%s15042_s1 + $0x8c8] sm:$0xf]  ;;  %v9552_v61 = vld [vmem:[%s15042_s1 + $0x8d4] sm:$0xf0]  ;;  %v6940_v32 = vor.u32 %v9472_v55, %v6939_v54 }
 0x1c1   :  { %5500 = vmatpush.bf16.msrb.mxu2 %v6700_v35  ;;  %v5260_v35 = vpop.f32.mrf.mxu3  ;;  %v9584_v3 = vld [vmem:[%s15042_s1 + $0x9d4] sm:$0xf0]  ;;  %v7260_v10 = vor.u32 %v9552_v61, %v7259_v59  ;;  %v7371_v23 = vld [vmem:[%s15042_s1 + $0x9a8] sm:$0xf] }
 0x1c2   :  { %5513 = vmatpush.bf16.msrb.mxu3 %v6828_v37  ;;  %v7100_v37 = vor.u32 %v9512_v24, %v7099_v11  ;;  %v6923_v11 = vld [vmem:[%s15042_s1 + $0x628] sm:$0xf]  ;;  %v9468_v24 = vld [vmem:[%s15042_s1 + $0x634] sm:$0xf0] }
 0x1c3   :  { %5523 = vmatpush.bf16.msra.mxu0 %v7004_v38  ;;  %v9476_v38 = vld [vmem:[%s15042_s1 + $0x674] sm:$0xf0]  ;;  %v6924_v31 = vor.u32 %v9468_v24, %v6923_v11  ;;  %v6907_v35 = vld [vmem:[%s15042_s1 + $0x608] sm:$0xf] }
 0x1c4   :  { %5536 = vmatpush.bf16.msra.mxu1 %v7132_v45  ;;  %v7403_v45 = vld [vmem:[%s15042_s1 + $0x9e8] sm:$0xf]  ;;  %v6956_v52 = vor.u32 %v9476_v38, %v6955_v44  ;;  %v9548_v30 = vld [vmem:[%s15042_s1 + $0x8b4] sm:$0xf0] }
 0x1c5   :  { %5501 = vmatpush.bf16.msrb.mxu2 %v6684_v56  ;;  %v7067_v56 = vld [vmem:[%s15042_s1 + $0x748] sm:$0xf]  ;;  %v5273_v62 = vpop.f32.mrf.mxu0  ;;  %v9580_v33 = vld [vmem:[%s15042_s1 + $0x9b4] sm:$0xf0] }
 0x1c6   :  { %5514 = vmatpush.bf16.msrb.mxu3 %v6812_v57  ;;  %v7404_v57 = vor.u32 %v9588_v50, %v7403_v45  ;;  %v9464_v38 = vld [vmem:[%s15042_s1 + $0x614] sm:$0xf0]  ;;  %v7035_v39 = vld [vmem:[%s15042_s1 + $0x708] sm:$0xf]  ;;  %v7372_v41 = vor.u32 %v9580_v33, %v7371_v23 }
 0x1c7   :  { %5524 = vmatpush.bf16.msra.mxu0 %v6988_v58  ;;  %v9504_v58 = vld [vmem:[%s15042_s1 + $0x754] sm:$0xf0]  ;;  %v7227_v42 = vld [vmem:[%s15042_s1 + $0x888] sm:$0xf]  ;;  %v6908_v54 = vor.u32 %v9464_v38, %v6907_v35 }
 0x1c8   :  { %5537 = vmatpush.bf16.msra.mxu1 %v7116_v63  ;;  %v7387_v63 = vld [vmem:[%s15042_s1 + $0x9c8] sm:$0xf]  ;;  %v7068_v8 = vor.u32 %v9504_v58, %v7067_v56  ;;  %v9496_v40 = vld [vmem:[%s15042_s1 + $0x714] sm:$0xf0] }
 0x1c9   :  { %5502 = vmatpush.bf16.msrb.mxu2 %v6668_v25  ;;  %v7051_v25 = vld [vmem:[%s15042_s1 + $0x728] sm:$0xf]  ;;  %v7388_v27 = vor.u32 %v9584_v3, %v7387_v63  ;;  %v9652_v56 = vld [vmem:[%s15042_s1 + $0xbf4] sm:$0xf0] }
 0x1ca   :  { %5515 = vmatpush.bf16.msrb.mxu3 %v6796_v28  ;;  %v9500_v28 = vld [vmem:[%s15042_s1 + $0x734] sm:$0xf0]  ;;  %v7355_v45 = vld [vmem:[%s15042_s1 + $0x988] sm:$0xf] }
 0x1cb   :  { %5525 = vmatpush.bf16.msra.mxu0 %v6972_v29  ;;  %v7243_v29 = vld [vmem:[%s15042_s1 + $0x8a8] sm:$0xf]  ;;  %v9540_v62 = vld [vmem:[%s15042_s1 + $0x874] sm:$0xf0] }
 0x1cc   :  { %5538 = vmatpush.bf16.msra.mxu1 %v7100_v37  ;;  %v7052_v37 = vor.u32 %v9500_v28, %v7051_v25  ;;  %v7244_v44 = vor.u32 %v9548_v30, %v7243_v29  ;;  %v5284_v50 = vpop.f32.mrf.mxu1  ;;  %v7659_v55 = vld [vmem:[%s15042_s1 + $0xbe8] sm:$0xf]  ;;  %v9648_v24 = vld [vmem:[%s15042_s1 + $0xbd4] sm:$0xf0] }
 0x1cd   :  { %5503 = vmatpush.bf16.msrb.mxu2 %v6652_v34  ;;  %v9544_v34 = vld [vmem:[%s15042_s1 + $0x894] sm:$0xf0]  ;;  %v7339_v63 = vld [vmem:[%s15042_s1 + $0x968] sm:$0xf]  ;;  %v7660_v3 = vor.u32 %v9652_v56, %v7659_v55 }
 0x1ce   :  { %5516 = vmatpush.bf16.msrb.mxu3 %v6780_v51  ;;  %v9576_v51 = vld [vmem:[%s15042_s1 + $0x994] sm:$0xf0]  ;;  %v7228_v58 = vor.u32 %v9544_v34, %v7227_v42  ;;  %v7643_v11 = vld [vmem:[%s15042_s1 + $0xbc8] sm:$0xf] }
 0x1cf   :  { %5526 = vmatpush.bf16.msra.mxu0 %v6956_v52  ;;  %v7531_v52 = vld [vmem:[%s15042_s1 + $0xae8] sm:$0xf]  ;;  %v7356_v59 = vor.u32 %v9576_v51, %v7355_v45  ;;  %v9536_v33 = vld [vmem:[%s15042_s1 + $0x854] sm:$0xf0] }
 0x1d0   :  { %5539 = vmatpush.bf16.msra.mxu1 %v7084_v53  ;;  %5504 = vmatmul.bf16.vlgmr.msrb.gmra.mxu2 %v10505_v0  ;;  %v9620_v53 = vld [vmem:[%s15042_s1 + $0xaf4] sm:$0xf0]  ;;  %v7195_v23 = vld [vmem:[%s15042_s1 + $0x848] sm:$0xf] }
 0x1d1   :  { %5548 = vmatpush.bf16.msra.mxu2 %v7276_v43  ;;  %5517 = vmatmul.bf16.vlgmr.msrb.gmra.mxu3 %v10509_v2  ;;  %v5285_v43 = vadd.f32 %v5284_v50, %v12926_v36  ;;  %v7532_v61 = vor.u32 %v9620_v53, %v7531_v52  ;;  %v7211_v36 = vld [vmem:[%s15042_s1 + $0x868] sm:$0xf]  ;;  %v9644_v42 = vld [vmem:[%s15042_s1 + $0xbb4] sm:$0xf0]  ;;  %v7196_v45 = vor.u32 %v9536_v33, %v7195_v23 }
 0x1d2   :  { %5561 = vmatpush.bf16.msra.mxu3 %v7404_v57  ;;  %v7036_v57 = vor.u32 %v9496_v40, %v7035_v39  ;;  %v7212_v25 = vor.u32 %v9540_v62, %v7211_v36  ;;  %v7499_v38 = vld [vmem:[%s15042_s1 + $0xaa8] sm:$0xf]  ;;  %v9612_v39 = vld [vmem:[%s15042_s1 + $0xab4] sm:$0xf0] }
 0x1d3   :  { %5527 = vmatpush.bf16.msra.mxu0 %v6940_v32  ;;  %v9572_v32 = vld [vmem:[%s15042_s1 + $0x974] sm:$0xf0]  ;;  %v5297_v28 = vpop.f32.mrf.mxu2  ;;  %v7500_v51 = vor.u32 %v9612_v39, %v7499_v38  ;;  %v7179_v52 = vld [vmem:[%s15042_s1 + $0x828] sm:$0xf] }
 0x1d4   :  { %5540 = vmatpush.bf16.msra.mxu1 %v7068_v8  ;;  %v7515_v8 = vld [vmem:[%s15042_s1 + $0xac8] sm:$0xf]  ;;  %v5310_v30 = vpop.f32.mrf.mxu3  ;;  %v5298_v35 = vadd.f32 %v5297_v28, %v5285_v43  ;;  %v5286_v40 = vpop.f32.mrf.mxu1  ;;  %v9532_v53 = vld [vmem:[%s15042_s1 + $0x834] sm:$0xf0] }
 0x1d5   :  { %5549 = vmatpush.bf16.msra.mxu2 %v7260_v10  ;;  %v9616_v10 = vld [vmem:[%s15042_s1 + $0xad4] sm:$0xf0]  ;;  %v7307_v43 = vld [vmem:[%s15042_s1 + $0x928] sm:$0xf]  ;;  %v7180_v62 = vor.u32 %v9532_v53, %v7179_v52 }
 0x1d6   :  { %5562 = vmatpush.bf16.msra.mxu3 %v7388_v27  ;;  %v7340_v27 = vor.u32 %v9572_v32, %v7339_v63  ;;  %v7516_v29 = vor.u32 %v9616_v10, %v7515_v8  ;;  %v5311_v34 = vadd.f32 %v5310_v30, %v5298_v35  ;;  %v9564_v55 = vld [vmem:[%s15042_s1 + $0x934] sm:$0xf0]  ;;  %v7483_v56 = vld [vmem:[%s15042_s1 + $0xa88] sm:$0xf] }
 0x1d7   :  { %5528 = vmatpush.bf16.msra.mxu0 %v6924_v31  ;;  %v7323_v31 = vld [vmem:[%s15042_s1 + $0x948] sm:$0xf]  ;;  %v9528_v8 = vld [vmem:[%s15042_s1 + $0x814] sm:$0xf0] }
 0x1d8   :  { %5541 = vmatpush.bf16.msra.mxu1 %v7052_v37  ;;  %v7644_v37 = vor.u32 %v9648_v24, %v7643_v11  ;;  %v7163_v63 = vld [vmem:[%s15042_s1 + $0x808] sm:$0xf]  ;;  %v9560_v11 = vld [vmem:[%s15042_s1 + $0x914] sm:$0xf0] }
 0x1d9   :  { %5550 = vmatpush.bf16.msra.mxu2 %v7244_v44  ;;  %v9568_v44 = vld [vmem:[%s15042_s1 + $0x954] sm:$0xf0]  ;;  %v7291_v10 = vld [vmem:[%s15042_s1 + $0x908] sm:$0xf]  ;;  %v7164_v35 = vor.u32 %v9528_v8, %v7163_v63 }
 0x1da   :  { %5563 = vmatpush.bf16.msra.mxu3 %v7372_v41  ;;  %v7627_v41 = vld [vmem:[%s15042_s1 + $0xba8] sm:$0xf]  ;;  %v7324_v50 = vor.u32 %v9568_v44, %v7323_v31  ;;  %v9636_v23 = vld [vmem:[%s15042_s1 + $0xb74] sm:$0xf0]  ;;  %v7292_v38 = vor.u32 %v9560_v11, %v7291_v10 }
 0x1db   :  { %5529 = vmatpush.bf16.msra.mxu0 %v6908_v54  ;;  %v7628_v54 = vor.u32 %v9644_v42, %v7627_v41  ;;  %v5299_v24 = vpop.f32.mrf.mxu2  ;;  %v7467_v28 = vld [vmem:[%s15042_s1 + $0xa68] sm:$0xf]  ;;  %v9684_v31 = vld [vmem:[%s15042_s1 + $0xcf4] sm:$0xf0] }
 0x1dc   :  { %5542 = vmatpush.bf16.msra.mxu1 %v7036_v57  ;;  %v9608_v57 = vld [vmem:[%s15042_s1 + $0xa94] sm:$0xf0]  ;;  %v7595_v30 = vld [vmem:[%s15042_s1 + $0xb68] sm:$0xf] }
 0x1dd   :  { %5551 = vmatpush.bf16.msra.mxu2 %v7228_v58  ;;  %v5323_v58 = vpop.f32.mrf.mxu0  ;;  %v7484_v32 = vor.u32 %v9608_v57, %v7483_v56  ;;  %v7787_v33 = vld [vmem:[%s15042_s1 + $0xce8] sm:$0xf]  ;;  %v9716_v44 = vld [vmem:[%s15042_s1 + $0xdf4] sm:$0xf0]  ;;  %v7596_v40 = vor.u32 %v9636_v23, %v7595_v30 }
 0x1de   :  { %5564 = vmatpush.bf16.msra.mxu3 %v7356_v59  ;;  %5530 = vmatmul.bf16.vlgmr.msra.gmra.mxu0 %v10500_v60  ;;  %v7611_v59 = vld [vmem:[%s15042_s1 + $0xb88] sm:$0xf]  ;;  %v13125_v36 = vadd.f32 %v5323_v58, %v5311_v34  ;;  %v7788_v41 = vor.u32 %v9684_v31, %v7787_v33  ;;  %v9600_v34 = vld [vmem:[%s15042_s1 + $0xa54] sm:$0xf0] }
 0x1df   :  { %5574 = vmatpush.bf16.msrb.mxu0 %v7532_v61  ;;  %5543 = vmatmul.bf16.vlgmr.msra.gmra.mxu1 %v10507_v1  ;;  %v9640_v61 = vld [vmem:[%s15042_s1 + $0xb94] sm:$0xf0]  ;;  %v7451_v42 = vld [vmem:[%s15042_s1 + $0xa48] sm:$0xf] }
 0x1e0   :  { %5587 = vmatpush.bf16.msrb.mxu1 %v7660_v3  ;;  %v7308_v3 = vor.u32 %v9564_v55, %v7307_v43  ;;  %v7771_v52 = vld [vmem:[%s15042_s1 + $0xcc8] sm:$0xf]  ;;  %v9680_v53 = vld [vmem:[%s15042_s1 + $0xcd4] sm:$0xf0]  ;;  %v7452_v56 = vor.u32 %v9600_v34, %v7451_v42 }
 0x1e1   :  { %5552 = vmatpush.bf16.msra.mxu2 %v7212_v25  ;;  %v5312_v25 = vpop.f32.mrf.mxu3  ;;  %v9712_v55 = vld [vmem:[%s15042_s1 + $0xdd4] sm:$0xf0]  ;;  %v7772_v58 = vor.u32 %v9680_v53, %v7771_v52  ;;  %v7883_v10 = vld [vmem:[%s15042_s1 + $0xda8] sm:$0xf] }
 0x1e2   :  { %5565 = vmatpush.bf16.msra.mxu3 %v7340_v27  ;;  %v7612_v27 = vor.u32 %v9640_v61, %v7611_v59  ;;  %v7435_v59 = vld [vmem:[%s15042_s1 + $0xa28] sm:$0xf]  ;;  %v9596_v61 = vld [vmem:[%s15042_s1 + $0xa34] sm:$0xf0] }
 0x1e3   :  { %5575 = vmatpush.bf16.msrb.mxu0 %v7516_v29  ;;  %v9604_v29 = vld [vmem:[%s15042_s1 + $0xa74] sm:$0xf0]  ;;  %v7436_v24 = vor.u32 %v9596_v61, %v7435_v59  ;;  %v7419_v25 = vld [vmem:[%s15042_s1 + $0xa08] sm:$0xf] }
 0x1e4   :  { %5588 = vmatpush.bf16.msrb.mxu1 %v7644_v37  ;;  %v7915_v37 = vld [vmem:[%s15042_s1 + $0xde8] sm:$0xf]  ;;  %v7468_v39 = vor.u32 %v9604_v29, %v7467_v28  ;;  %v9676_v8 = vld [vmem:[%s15042_s1 + $0xcb4] sm:$0xf0] }
 0x1e5   :  { %5553 = vmatpush.bf16.msra.mxu2 %v7196_v45  ;;  %v7579_v45 = vld [vmem:[%s15042_s1 + $0xb48] sm:$0xf]  ;;  %v5325_v43 = vpop.f32.mrf.mxu0  ;;  %v9708_v11 = vld [vmem:[%s15042_s1 + $0xdb4] sm:$0xf0] }
 0x1e6   :  { %5566 = vmatpush.bf16.msra.mxu3 %v7324_v50  ;;  %v7916_v50 = vor.u32 %v9716_v44, %v7915_v37  ;;  %v9592_v29 = vld [vmem:[%s15042_s1 + $0xa14] sm:$0xf0]  ;;  %v7547_v30 = vld [vmem:[%s15042_s1 + $0xb08] sm:$0xf]  ;;  %v7884_v33 = vor.u32 %v9708_v11, %v7883_v10 }
 0x1e7   :  { %5576 = vmatpush.bf16.msrb.mxu0 %v7500_v51  ;;  %v9632_v51 = vld [vmem:[%s15042_s1 + $0xb54] sm:$0xf0]  ;;  %v7739_v31 = vld [vmem:[%s15042_s1 + $0xc88] sm:$0xf]  ;;  %v7420_v42 = vor.u32 %v9592_v29, %v7419_v25 }
 0x1e8   :  { %5589 = vmatpush.bf16.msrb.mxu1 %v7628_v54  ;;  %v7899_v54 = vld [vmem:[%s15042_s1 + $0xdc8] sm:$0xf]  ;;  %v7580_v57 = vor.u32 %v9632_v51, %v7579_v45  ;;  %v9624_v23 = vld [vmem:[%s15042_s1 + $0xb14] sm:$0xf0] }
 0x1e9   :  { %5554 = vmatpush.bf16.msra.mxu2 %v7180_v62  ;;  %v7563_v62 = vld [vmem:[%s15042_s1 + $0xb28] sm:$0xf]  ;;  %v7900_v63 = vor.u32 %v9712_v55, %v7899_v54  ;;  %v9780_v45 = vld [vmem:[%s15042_s1 + $0xff4] sm:$0xf0] }
 0x1ea   :  { %5567 = vmatpush.bf16.msra.mxu3 %v7308_v3  ;;  %v9628_v3 = vld [vmem:[%s15042_s1 + $0xb34] sm:$0xf0]  ;;  %v7867_v37 = vld [vmem:[%s15042_s1 + $0xd88] sm:$0xf] }
 0x1eb   :  { %5577 = vmatpush.bf16.msrb.mxu0 %v7484_v32  ;;  %v7755_v32 = vld [vmem:[%s15042_s1 + $0xca8] sm:$0xf]  ;;  %v9668_v43 = vld [vmem:[%s15042_s1 + $0xc74] sm:$0xf0] }
 0x1ec   :  { %5590 = vmatpush.bf16.msrb.mxu1 %v7612_v27  ;;  %v7564_v27 = vor.u32 %v9628_v3, %v7563_v62  ;;  %v7756_v28 = vor.u32 %v9676_v8, %v7755_v32  ;;  %v5336_v44 = vpop.f32.mrf.mxu1  ;;  %v8171_v34 = vld [vmem:[%s15042_s1 + $0xfe8] sm:$0xf]  ;;  %v9776_v61 = vld [vmem:[%s15042_s1 + $0xfd4] sm:$0xf0] }
 0x1ed   :  { %5555 = vmatpush.bf16.msra.mxu2 %v7164_v35  ;;  %v9672_v35 = vld [vmem:[%s15042_s1 + $0xc94] sm:$0xf0]  ;;  %v7851_v54 = vld [vmem:[%s15042_s1 + $0xd68] sm:$0xf]  ;;  %v8172_v55 = vor.u32 %v9780_v45, %v8171_v34 }
 0x1ee   :  { %5568 = vmatpush.bf16.msra.mxu3 %v7292_v38  ;;  %v9704_v38 = vld [vmem:[%s15042_s1 + $0xd94] sm:$0xf0]  ;;  %v7740_v51 = vor.u32 %v9672_v35, %v7739_v31  ;;  %v8155_v59 = vld [vmem:[%s15042_s1 + $0xfc8] sm:$0xf] }
 0x1ef   :  { %5578 = vmatpush.bf16.msrb.mxu0 %v7468_v39  ;;  %v8043_v39 = vld [vmem:[%s15042_s1 + $0xee8] sm:$0xf]  ;;  %v7868_v52 = vor.u32 %v9704_v38, %v7867_v37  ;;  %v9664_v11 = vld [vmem:[%s15042_s1 + $0xc54] sm:$0xf0] }
 0x1f0   :  { %5591 = vmatpush.bf16.msrb.mxu1 %v7596_v40  ;;  %5556 = vmatmul.bf16.vlgmr.msra.gmra.mxu2 %v10755_v12  ;;  %v9748_v40 = vld [vmem:[%s15042_s1 + $0xef4] sm:$0xf0]  ;;  %v7707_v10 = vld [vmem:[%s15042_s1 + $0xc48] sm:$0xf] }
 0x1f1   :  { %5600 = vmatpush.bf16.msrb.mxu2 %v7788_v41  ;;  %5569 = vmatmul.bf16.vlgmr.msra.gmra.mxu3 %v10765_v16  ;;  %v5337_v41 = vadd.f32 %v5336_v44, %v13125_v36  ;;  %v8044_v53 = vor.u32 %v9748_v40, %v8043_v39  ;;  %v7723_v36 = vld [vmem:[%s15042_s1 + $0xc68] sm:$0xf]  ;;  %v9772_v31 = vld [vmem:[%s15042_s1 + $0xfb4] sm:$0xf0]  ;;  %v7708_v37 = vor.u32 %v9664_v11, %v7707_v10 }
 0x1f2   :  { %5613 = vmatpush.bf16.msrb.mxu3 %v7916_v50  ;;  %v7548_v50 = vor.u32 %v9624_v23, %v7547_v30  ;;  %v7724_v62 = vor.u32 %v9668_v43, %v7723_v36  ;;  %v8011_v29 = vld [vmem:[%s15042_s1 + $0xea8] sm:$0xf]  ;;  %v9740_v30 = vld [vmem:[%s15042_s1 + $0xeb4] sm:$0xf0] }
 0x1f3   :  { %5579 = vmatpush.bf16.msrb.mxu0 %v7452_v56  ;;  %v9700_v56 = vld [vmem:[%s15042_s1 + $0xd74] sm:$0xf0]  ;;  %v5349_v3 = vpop.f32.mrf.mxu2  ;;  %v8012_v38 = vor.u32 %v9740_v30, %v8011_v29  ;;  %v7691_v39 = vld [vmem:[%s15042_s1 + $0xc28] sm:$0xf] }
 0x1f4   :  { %5592 = vmatpush.bf16.msrb.mxu1 %v7580_v57  ;;  %v8027_v57 = vld [vmem:[%s15042_s1 + $0xec8] sm:$0xf]  ;;  %v5362_v8 = vpop.f32.mrf.mxu3  ;;  %v5350_v25 = vadd.f32 %v5349_v3, %v5337_v41  ;;  %v5338_v23 = vpop.f32.mrf.mxu1  ;;  %v9660_v40 = vld [vmem:[%s15042_s1 + $0xc34] sm:$0xf0] }
 0x1f5   :  { %5601 = vmatpush.bf16.msrb.mxu2 %v7772_v58  ;;  %v9744_v58 = vld [vmem:[%s15042_s1 + $0xed4] sm:$0xf0]  ;;  %v7819_v41 = vld [vmem:[%s15042_s1 + $0xd28] sm:$0xf]  ;;  %v7692_v43 = vor.u32 %v9660_v40, %v7691_v39 }
 0x1f6   :  { %5614 = vmatpush.bf16.msrb.mxu3 %v7900_v63  ;;  %v7852_v63 = vor.u32 %v9700_v56, %v7851_v54  ;;  %v8028_v32 = vor.u32 %v9744_v58, %v8027_v57  ;;  %v5363_v35 = vadd.f32 %v5362_v8, %v5350_v25  ;;  %v9692_v34 = vld [vmem:[%s15042_s1 + $0xd34] sm:$0xf0]  ;;  %v7995_v45 = vld [vmem:[%s15042_s1 + $0xe88] sm:$0xf] }
 0x1f7   :  { %5580 = vmatpush.bf16.msrb.mxu0 %v7436_v24  ;;  %v7835_v24 = vld [vmem:[%s15042_s1 + $0xd48] sm:$0xf]  ;;  %v9656_v57 = vld [vmem:[%s15042_s1 + $0xc14] sm:$0xf0] }
 0x1f8   :  { %5593 = vmatpush.bf16.msrb.mxu1 %v7564_v27  ;;  %v8156_v27 = vor.u32 %v9776_v61, %v8155_v59  ;;  %v7675_v54 = vld [vmem:[%s15042_s1 + $0xc08] sm:$0xf]  ;;  %v9688_v59 = vld [vmem:[%s15042_s1 + $0xd14] sm:$0xf0] }
 0x1f9   :  { %5602 = vmatpush.bf16.msrb.mxu2 %v7756_v28  ;;  %v9696_v28 = vld [vmem:[%s15042_s1 + $0xd54] sm:$0xf0]  ;;  %v7803_v58 = vld [vmem:[%s15042_s1 + $0xd08] sm:$0xf]  ;;  %v7676_v25 = vor.u32 %v9656_v57, %v7675_v54 }
 0x1fa   :  { %5615 = vmatpush.bf16.msrb.mxu3 %v7884_v33  ;;  %v8139_v33 = vld [vmem:[%s15042_s1 + $0xfa8] sm:$0xf]  ;;  %v7836_v44 = vor.u32 %v9696_v28, %v7835_v24  ;;  %v9764_v10 = vld [vmem:[%s15042_s1 + $0xf74] sm:$0xf0]  ;;  %v7804_v29 = vor.u32 %v9688_v59, %v7803_v58 }
 0x1fb   :  { %5581 = vmatpush.bf16.msrb.mxu0 %v7420_v42  ;;  %v8140_v42 = vor.u32 %v9772_v31, %v8139_v33  ;;  %v5351_v61 = vpop.f32.mrf.mxu2  ;;  %v7979_v3 = vld [vmem:[%s15042_s1 + $0xe68] sm:$0xf]  ;;  %v9812_v24 = vld [vmem:[%s15042_s1 + $0x10f4] sm:$0xf0] }
 0x1fc   :  { %5594 = vmatpush.bf16.msrb.mxu1 %v7548_v50  ;;  %v9736_v50 = vld [vmem:[%s15042_s1 + $0xe94] sm:$0xf0]  ;;  %v8107_v8 = vld [vmem:[%s15042_s1 + $0xf68] sm:$0xf] }
 0x1fd   :  { %5603 = vmatpush.bf16.msrb.mxu2 %v7740_v51  ;;  %v5375_v51 = vpop.f32.mrf.mxu0  ;;  %v7996_v56 = vor.u32 %v9736_v50, %v7995_v45  ;;  %v8299_v11 = vld [vmem:[%s15042_s1 + $0x10e8] sm:$0xf]  ;;  %v9844_v28 = vld [vmem:[%s15042_s1 + $0x11f4] sm:$0xf0]  ;;  %v8108_v23 = vor.u32 %v9764_v10, %v8107_v8 }
 0x1fe   :  { %5616 = vmatpush.bf16.msrb.mxu3 %v7868_v52  ;;  %5582 = vmatmul.bf16.vlgmr.msrb.gmra.mxu0 %v10763_v15  ;;  %v8123_v52 = vld [vmem:[%s15042_s1 + $0xf88] sm:$0xf]  ;;  %v13324_v36 = vadd.f32 %v5375_v51, %v5363_v35  ;;  %v8300_v33 = vor.u32 %v9812_v24, %v8299_v11  ;;  %v9728_v35 = vld [vmem:[%s15042_s1 + $0xe54] sm:$0xf0] }
 0x1ff   :  { %5626 = vmatpush.bf16.msra.mxu0 %v8044_v53  ;;  %5595 = vmatmul.bf16.vlgmr.msrb.gmra.mxu1 %v10767_v17  ;;  %v9768_v53 = vld [vmem:[%s15042_s1 + $0xf94] sm:$0xf0]  ;;  %v7963_v31 = vld [vmem:[%s15042_s1 + $0xe48] sm:$0xf] }
 0x200   :  { %5639 = vmatpush.bf16.msra.mxu1 %v8172_v55  ;;  %v7820_v55 = vor.u32 %v9692_v34, %v7819_v41  ;;  %v8283_v39 = vld [vmem:[%s15042_s1 + $0x10c8] sm:$0xf]  ;;  %v9808_v40 = vld [vmem:[%s15042_s1 + $0x10d4] sm:$0xf0]  ;;  %v7964_v45 = vor.u32 %v9728_v35, %v7963_v31 }
 0x201   :  { %5604 = vmatpush.bf16.msrb.mxu2 %v7724_v62  ;;  %v5364_v62 = vpop.f32.mrf.mxu3  ;;  %v9840_v34 = vld [vmem:[%s15042_s1 + $0x11d4] sm:$0xf0]  ;;  %v8284_v51 = vor.u32 %v9808_v40, %v8283_v39  ;;  %v8395_v58 = vld [vmem:[%s15042_s1 + $0x11a8] sm:$0xf] }
 0x202   :  { %5617 = vmatpush.bf16.msrb.mxu3 %v7852_v63  ;;  %v8124_v63 = vor.u32 %v9768_v53, %v8123_v52  ;;  %v7947_v52 = vld [vmem:[%s15042_s1 + $0xe28] sm:$0xf]  ;;  %v9724_v53 = vld [vmem:[%s15042_s1 + $0xe34] sm:$0xf0] }
 0x203   :  { %5627 = vmatpush.bf16.msra.mxu0 %v8028_v32  ;;  %v9732_v32 = vld [vmem:[%s15042_s1 + $0xe74] sm:$0xf0]  ;;  %v7948_v61 = vor.u32 %v9724_v53, %v7947_v52  ;;  %v7931_v62 = vld [vmem:[%s15042_s1 + $0xe08] sm:$0xf] }
 0x204   :  { %5640 = vmatpush.bf16.msra.mxu1 %v8156_v27  ;;  %v8427_v27 = vld [vmem:[%s15042_s1 + $0x11e8] sm:$0xf]  ;;  %v7980_v30 = vor.u32 %v9732_v32, %v7979_v3  ;;  %v9804_v57 = vld [vmem:[%s15042_s1 + $0x10b4] sm:$0xf0] }
 0x205   :  { %5605 = vmatpush.bf16.msrb.mxu2 %v7708_v37  ;;  %v8091_v37 = vld [vmem:[%s15042_s1 + $0xf48] sm:$0xf]  ;;  %v5377_v41 = vpop.f32.mrf.mxu0  ;;  %v9836_v59 = vld [vmem:[%s15042_s1 + $0x11b4] sm:$0xf0] }
 0x206   :  { %5618 = vmatpush.bf16.msrb.mxu3 %v7836_v44  ;;  %v8428_v44 = vor.u32 %v9844_v28, %v8427_v27  ;;  %v9720_v32 = vld [vmem:[%s15042_s1 + $0xe14] sm:$0xf0]  ;;  %v8059_v8 = vld [vmem:[%s15042_s1 + $0xf08] sm:$0xf]  ;;  %v8396_v11 = vor.u32 %v9836_v59, %v8395_v58 }
 0x207   :  { %5628 = vmatpush.bf16.msra.mxu0 %v8012_v38  ;;  %v9760_v38 = vld [vmem:[%s15042_s1 + $0xf54] sm:$0xf0]  ;;  %v8251_v24 = vld [vmem:[%s15042_s1 + $0x1088] sm:$0xf]  ;;  %v7932_v31 = vor.u32 %v9720_v32, %v7931_v62 }
 0x208   :  { %5641 = vmatpush.bf16.msra.mxu1 %v8140_v42  ;;  %v8411_v42 = vld [vmem:[%s15042_s1 + $0x11c8] sm:$0xf]  ;;  %v8092_v50 = vor.u32 %v9760_v38, %v8091_v37  ;;  %v9752_v10 = vld [vmem:[%s15042_s1 + $0xf14] sm:$0xf0] }
 0x209   :  { %5606 = vmatpush.bf16.msrb.mxu2 %v7692_v43  ;;  %v8075_v43 = vld [vmem:[%s15042_s1 + $0xf28] sm:$0xf]  ;;  %v8412_v54 = vor.u32 %v9840_v34, %v8411_v42  ;;  %v9908_v37 = vld [vmem:[%s15042_s1 + $0x13f4] sm:$0xf0] }
 0x20a   :  { %5619 = vmatpush.bf16.msrb.mxu3 %v7820_v55  ;;  %v9756_v55 = vld [vmem:[%s15042_s1 + $0xf34] sm:$0xf0]  ;;  %v8379_v27 = vld [vmem:[%s15042_s1 + $0x1188] sm:$0xf] }
 0x20b   :  { %5629 = vmatpush.bf16.msra.mxu0 %v7996_v56  ;;  %v8267_v56 = vld [vmem:[%s15042_s1 + $0x10a8] sm:$0xf]  ;;  %v9796_v41 = vld [vmem:[%s15042_s1 + $0x1074] sm:$0xf0] }
 0x20c   :  { %5642 = vmatpush.bf16.msra.mxu1 %v8124_v63  ;;  %v8076_v63 = vor.u32 %v9756_v55, %v8075_v43  ;;  %v8268_v3 = vor.u32 %v9804_v57, %v8267_v56  ;;  %v5388_v28 = vpop.f32.mrf.mxu1  ;;  %v8683_v35 = vld [vmem:[%s15042_s1 + $0x13e8] sm:$0xf]  ;;  %v9904_v53 = vld [vmem:[%s15042_s1 + $0x13d4] sm:$0xf0] }
 0x20d   :  { %5607 = vmatpush.bf16.msrb.mxu2 %v7676_v25  ;;  %v9800_v25 = vld [vmem:[%s15042_s1 + $0x1094] sm:$0xf0]  ;;  %v8363_v42 = vld [vmem:[%s15042_s1 + $0x1168] sm:$0xf]  ;;  %v8684_v34 = vor.u32 %v9908_v37, %v8683_v35 }
 0x20e   :  { %5620 = vmatpush.bf16.msrb.mxu3 %v7804_v29  ;;  %v9832_v29 = vld [vmem:[%s15042_s1 + $0x1194] sm:$0xf0]  ;;  %v8252_v38 = vor.u32 %v9800_v25, %v8251_v24  ;;  %v8667_v52 = vld [vmem:[%s15042_s1 + $0x13c8] sm:$0xf] }
 0x20f   :  { %5630 = vmatpush.bf16.msra.mxu0 %v7980_v30  ;;  %v8555_v30 = vld [vmem:[%s15042_s1 + $0x12e8] sm:$0xf]  ;;  %v8380_v39 = vor.u32 %v9832_v29, %v8379_v27  ;;  %v9792_v59 = vld [vmem:[%s15042_s1 + $0x1054] sm:$0xf0] }
 0x210   :  { %5643 = vmatpush.bf16.msra.mxu1 %v8108_v23  ;;  %5608 = vmatmul.bf16.vlgmr.msrb.gmra.mxu2 %v10929_v46  ;;  %v9876_v23 = vld [vmem:[%s15042_s1 + $0x12f4] sm:$0xf0]  ;;  %v8219_v58 = vld [vmem:[%s15042_s1 + $0x1048] sm:$0xf] }
 0x211   :  { %5652 = vmatpush.bf16.msra.mxu2 %v8300_v33  ;;  %5621 = vmatmul.bf16.vlgmr.msrb.gmra.mxu3 %v10933_v48  ;;  %v5389_v33 = vadd.f32 %v5388_v28, %v13324_v36  ;;  %v8556_v40 = vor.u32 %v9876_v23, %v8555_v30  ;;  %v8235_v36 = vld [vmem:[%s15042_s1 + $0x1068] sm:$0xf]  ;;  %v9824_v32 = vld [vmem:[%s15042_s1 + $0x1154] sm:$0xf0]  ;;  %v8220_v27 = vor.u32 %v9792_v59, %v8219_v58 }
 0x212   :  { %5665 = vmatpush.bf16.msra.mxu3 %v8428_v44  ;;  %v8060_v44 = vor.u32 %v9752_v10, %v8059_v8  ;;  %v8236_v43 = vor.u32 %v9796_v41, %v8235_v36  ;;  %v8523_v8 = vld [vmem:[%s15042_s1 + $0x12a8] sm:$0xf]  ;;  %v9868_v10 = vld [vmem:[%s15042_s1 + $0x12b4] sm:$0xf0] }
 0x213   :  { %5631 = vmatpush.bf16.msra.mxu0 %v7964_v45  ;;  %v9828_v45 = vld [vmem:[%s15042_s1 + $0x1174] sm:$0xf0]  ;;  %v5401_v55 = vpop.f32.mrf.mxu2  ;;  %v8524_v29 = vor.u32 %v9868_v10, %v8523_v8  ;;  %v8203_v30 = vld [vmem:[%s15042_s1 + $0x1028] sm:$0xf] }
 0x214   :  { %5644 = vmatpush.bf16.msra.mxu1 %v8092_v50  ;;  %v8539_v50 = vld [vmem:[%s15042_s1 + $0x12c8] sm:$0xf]  ;;  %v5414_v57 = vpop.f32.mrf.mxu3  ;;  %v5402_v62 = vadd.f32 %v5401_v55, %v5389_v33  ;;  %v9900_v24 = vld [vmem:[%s15042_s1 + $0x13b4] sm:$0xf0] }
 0x215   :  { %5653 = vmatpush.bf16.msra.mxu2 %v8284_v51  ;;  %v9872_v51 = vld [vmem:[%s15042_s1 + $0x12d4] sm:$0xf0]  ;;  %v8331_v33 = vld [vmem:[%s15042_s1 + $0x1128] sm:$0xf] }
 0x216   :  { %5666 = vmatpush.bf16.msra.mxu3 %v8412_v54  ;;  %v8364_v54 = vor.u32 %v9828_v45, %v8363_v42  ;;  %v8540_v56 = vor.u32 %v9872_v51, %v8539_v50  ;;  %v5415_v25 = vadd.f32 %v5414_v57, %v5402_v62  ;;  %v9788_v23 = vld [vmem:[%s15042_s1 + $0x1034] sm:$0xf0]  ;;  %v8507_v37 = vld [vmem:[%s15042_s1 + $0x1288] sm:$0xf] }
 0x217   :  { %5632 = vmatpush.bf16.msra.mxu0 %v7948_v61  ;;  %v8347_v61 = vld [vmem:[%s15042_s1 + $0x1148] sm:$0xf]  ;;  %v9820_v35 = vld [vmem:[%s15042_s1 + $0x1134] sm:$0xf0]  ;;  %v8204_v41 = vor.u32 %v9788_v23, %v8203_v30 }
 0x218   :  { %5645 = vmatpush.bf16.msra.mxu1 %v8076_v63  ;;  %v8668_v63 = vor.u32 %v9904_v53, %v8667_v52  ;;  %v8348_v28 = vor.u32 %v9824_v32, %v8347_v61  ;;  %v8187_v42 = vld [vmem:[%s15042_s1 + $0x1008] sm:$0xf]  ;;  %v9784_v50 = vld [vmem:[%s15042_s1 + $0x1014] sm:$0xf0] }
 0x219   :  { %5654 = vmatpush.bf16.msra.mxu2 %v8268_v3  ;;  %v5390_v3 = vpop.f32.mrf.mxu1  ;;  %v8315_v51 = vld [vmem:[%s15042_s1 + $0x1108] sm:$0xf]  ;;  %v9816_v52 = vld [vmem:[%s15042_s1 + $0x1114] sm:$0xf0] }
 0x21a   :  { %5667 = vmatpush.bf16.msra.mxu3 %v8396_v11  ;;  %v8651_v11 = vld [vmem:[%s15042_s1 + $0x13a8] sm:$0xf]  ;;  %v9892_v58 = vld [vmem:[%s15042_s1 + $0x1374] sm:$0xf0]  ;;  %v8316_v10 = vor.u32 %v9816_v52, %v8315_v51 }
 0x21b   :  { %5633 = vmatpush.bf16.msra.mxu0 %v7932_v31  ;;  %v8652_v31 = vor.u32 %v9900_v24, %v8651_v11  ;;  %v8491_v55 = vld [vmem:[%s15042_s1 + $0x1268] sm:$0xf]  ;;  %v9940_v61 = vld [vmem:[%s15042_s1 + $0x14f4] sm:$0xf0] }
 0x21c   :  { %5646 = vmatpush.bf16.msra.mxu1 %v8060_v44  ;;  %v9864_v44 = vld [vmem:[%s15042_s1 + $0x1294] sm:$0xf0]  ;;  %v5416_v53 = vpop.f32.mrf.mxu3  ;;  %v8619_v57 = vld [vmem:[%s15042_s1 + $0x1368] sm:$0xf] }
 0x21d   :  { %5655 = vmatpush.bf16.msra.mxu2 %v8252_v38  ;;  %v5427_v38 = vpop.f32.mrf.mxu0  ;;  %v8508_v45 = vor.u32 %v9864_v44, %v8507_v37  ;;  %v8811_v59 = vld [vmem:[%s15042_s1 + $0x14e8] sm:$0xf]  ;;  %v9972_v32 = vld [vmem:[%s15042_s1 + $0x15f4] sm:$0xf0] }
 0x21e   :  { %5668 = vmatpush.bf16.msra.mxu3 %v8380_v39  ;;  %5634 = vmatmul.bf16.vlgmr.msra.gmra.mxu0 %v10931_v47  ;;  %v8635_v39 = vld [vmem:[%s15042_s1 + $0x1388] sm:$0xf]  ;;  %v5428_v36 = vadd.f32 %v5427_v38, %v5415_v25  ;;  %v8620_v25 = vor.u32 %v9892_v58, %v8619_v57  ;;  %v9888_v30 = vld [vmem:[%s15042_s1 + $0x1354] sm:$0xf0] }
 0x21f   :  { %5678 = vmatpush.bf16.msrb.mxu0 %v8556_v40  ;;  %5647 = vmatmul.bf16.vlgmr.msra.gmra.mxu1 %v10935_v49  ;;  %v9896_v40 = vld [vmem:[%s15042_s1 + $0x1394] sm:$0xf0]  ;;  %v8939_v3 = vld [vmem:[%s15042_s1 + $0x15e8] sm:$0xf] }
 0x220   :  { %5691 = vmatpush.bf16.msrb.mxu1 %v8684_v34  ;;  %v8332_v34 = vor.u32 %v9820_v35, %v8331_v33  ;;  %v8475_v24 = vld [vmem:[%s15042_s1 + $0x1248] sm:$0xf]  ;;  %v8940_v33 = vor.u32 %v9972_v32, %v8939_v3  ;;  %v9936_v35 = vld [vmem:[%s15042_s1 + $0x14d4] sm:$0xf0] }
 0x221   :  { %5656 = vmatpush.bf16.msra.mxu2 %v8236_v43  ;;  %v5403_v43 = vpop.f32.mrf.mxu2  ;;  %v5440_v62 = vpop.f32.mrf.mxu1  ;;  %v8923_v44 = vld [vmem:[%s15042_s1 + $0x15c8] sm:$0xf]  ;;  %v9968_v38 = vld [vmem:[%s15042_s1 + $0x15d4] sm:$0xf0] }
 0x222   :  { %5669 = vmatpush.bf16.msra.mxu3 %v8364_v54  ;;  %v8636_v54 = vor.u32 %v9896_v40, %v8635_v39  ;;  %v5441_v8 = vadd.f32 %v5440_v62, %v5428_v36  ;;  %v6094_v39 = vmax.f32 %v12356_v19, 0.0  ;;  %v8587_v19 = vld [vmem:[%s15042_s1 + $0x1328] sm:$0xf]  ;;  %v9884_v51 = vld [vmem:[%s15042_s1 + $0x1334] sm:$0xf0] }
 0x223   :  { %5679 = vmatpush.bf16.msrb.mxu0 %v8540_v56  ;;  %v9860_v56 = vld [vmem:[%s15042_s1 + $0x1274] sm:$0xf0]  ;;  %v8779_v52 = vld [vmem:[%s15042_s1 + $0x14a8] sm:$0xf] }
 0x224   :  { %5692 = vmatpush.bf16.msrb.mxu1 %v8668_v63  ;;  %v8188_v63 = vor.u32 %v9784_v50, %v8187_v42  ;;  %v8492_v11 = vor.u32 %v9860_v56, %v8491_v55  ;;  %v6095_v23 = vmax.f32 %v5441_v8, 0.0  ;;  %v8924_v50 = vor.u32 %v9968_v38, %v8923_v44  ;;  %v9932_v53 = vld [vmem:[%s15042_s1 + $0x14b4] sm:$0xf0]  ;;  %v8443_v58 = vld [vmem:[%s15042_s1 + $0x1208] sm:$0xf] }
 0x225   :  { %5657 = vmatpush.bf16.msra.mxu2 %v8220_v27  ;;  %v8812_v27 = vor.u32 %v9940_v61, %v8811_v59  ;;  %v5429_v37 = vpop.f32.mrf.mxu0  ;;  %v9964_v55 = vld [vmem:[%s15042_s1 + $0x15b4] sm:$0xf0]  ;;  %v8588_v59 = vor.u32 %v9884_v51, %v8587_v19  ;;  %v8780_v61 = vor.u32 %v9932_v53, %v8779_v52  ;;  %v8763_v8 = vld [vmem:[%s15042_s1 + $0x1488] sm:$0xf] }
 0x226   :  { %5670 = vmatpush.bf16.msra.mxu3 %v8348_v28  ;;  %v9856_v28 = vld [vmem:[%s15042_s1 + $0x1254] sm:$0xf0]  ;;  %v6102_v40 = vrot.slane %v6095_v23, 6  ;;  %v8875_v38 = vld [vmem:[%s15042_s1 + $0x1568] sm:$0xf] }
 0x227   :  { %5680 = vmatpush.bf16.msrb.mxu0 %v8524_v29  ;;  %v8603_v29 = vld [vmem:[%s15042_s1 + $0x1348] sm:$0xf]  ;;  %v8476_v36 = vor.u32 %v9856_v28, %v8475_v24  ;;  %v9848_v62 = vld [vmem:[%s15042_s1 + $0x1214] sm:$0xf0] }
 0x228   :  { %5693 = vmatpush.bf16.msrb.mxu1 %v8652_v31  ;;  %v8795_v31 = vld [vmem:[%s15042_s1 + $0x14c8] sm:$0xf]  ;;  %v13604_v43 = vsel %vm6105_vm1, %v6094_v39, %v6102_v40  ;;  %v9880_v3 = vld [vmem:[%s15042_s1 + $0x1314] sm:$0xf0]  ;;  %v8444_v28 = vor.u32 %v9848_v62, %v8443_v58  ;;  %v10056_v39 = vld [vmem:[%s15043_s2] sm:$0xf] }
 0x229   :  { %5658 = vmatpush.bf16.msra.mxu2 %v8204_v41  ;;  %v8604_v41 = vor.u32 %v9888_v30, %v8603_v29  ;;  %v8796_v42 = vor.u32 %v9936_v35, %v8795_v31  ;;  %v5442_v56 = vpop.f32.mrf.mxu1  ;;  %v9960_v24 = vld [vmem:[%s15042_s1 + $0x1594] sm:$0xf0]  ;;  %v9195_v29 = vld [vmem:[%s15042_s1 + $0x17e8] sm:$0xf]  ;;  %v808_v40 = vperm.slane %v10056_v39, 2 }
 0x22a   :  { %5671 = vmatpush.bf16.msra.mxu3 %v8332_v34  ;;  %v8459_v34 = vld [vmem:[%s15042_s1 + $0x1228] sm:$0xf]  ;;  %v10036_v30 = vld [vmem:[%s15042_s1 + $0x17f4] sm:$0xf0] }
 0x22b   :  { %5681 = vmatpush.bf16.msrb.mxu0 %v8508_v45  ;;  %v9852_v45 = vld [vmem:[%s15042_s1 + $0x1234] sm:$0xf0]  ;;  %v8747_v31 = vld [vmem:[%s15042_s1 + $0x1468] sm:$0xf] }
 0x22c   :  { %5694 = vmatpush.bf16.msrb.mxu1 %v8636_v54  ;;  %v8907_v54 = vld [vmem:[%s15042_s1 + $0x15a8] sm:$0xf]  ;;  %v8460_v57 = vor.u32 %v9852_v45, %v8459_v34  ;;  %v9924_v44 = vld [vmem:[%s15042_s1 + $0x1474] sm:$0xf0] }
 0x22d   :  { %5659 = vmatpush.bf16.msra.mxu2 %v8188_v63  ;;  %v8571_v63 = vld [vmem:[%s15042_s1 + $0x1308] sm:$0xf]  ;;  %v8908_v32 = vor.u32 %v9964_v55, %v8907_v54  ;;  %v10000_v34 = vld [vmem:[%s15042_s1 + $0x16d4] sm:$0xf0] }
 0x22e   :  { %5672 = vmatpush.bf16.msra.mxu3 %v8316_v10  ;;  %v9928_v10 = vld [vmem:[%s15042_s1 + $0x1494] sm:$0xf0]  ;;  %v8572_v23 = vor.u32 %v9880_v3, %v8571_v63  ;;  %v9179_v45 = vld [vmem:[%s15042_s1 + $0x17c8] sm:$0xf] }
 0x22f   :  { %5682 = vmatpush.bf16.msrb.mxu0 %v8492_v11  ;;  %v8891_v11 = vld [vmem:[%s15042_s1 + $0x1588] sm:$0xf]  ;;  %v10032_v19 = vld [vmem:[%s15042_s1 + $0x17d4] sm:$0xf0] }
 0x230   :  { %5695 = vmatpush.bf16.msrb.mxu1 %v8620_v25  ;;  %5660 = vmatmul.bf16.vlgmr.msra.gmra.mxu2 %v11166_v9  ;;  %v9067_v25 = vld [vmem:[%s15042_s1 + $0x16e8] sm:$0xf]  ;;  %v8892_v35 = vor.u32 %v9960_v24, %v8891_v11  ;;  %v9920_v55 = vld [vmem:[%s15042_s1 + $0x1454] sm:$0xf0] }
 0x231   :  { %5704 = vmatpush.bf16.msrb.mxu2 %v8812_v27  ;;  %5673 = vmatmul.bf16.vlgmr.msra.gmra.mxu3 %v11176_v14  ;;  %v10004_v27 = vld [vmem:[%s15042_s1 + $0x16f4] sm:$0xf0]  ;;  %v8731_v54 = vld [vmem:[%s15042_s1 + $0x1448] sm:$0xf] }
 0x232   :  { %5717 = vmatpush.bf16.msrb.mxu3 %v8940_v33  ;;  %v8764_v33 = vor.u32 %v9928_v10, %v8763_v8  ;;  %v9068_v37 = vor.u32 %v10004_v27, %v9067_v25  ;;  %v8859_v56 = vld [vmem:[%s15042_s1 + $0x1548] sm:$0xf]  ;;  %v9996_v63 = vld [vmem:[%s15042_s1 + $0x16b4] sm:$0xf0]  ;;  %v8732_v10 = vor.u32 %v9920_v55, %v8731_v54 }
 0x233   :  { %5683 = vmatpush.bf16.msrb.mxu0 %v8476_v36  ;;  %v9196_v36 = vor.u32 %v10036_v30, %v9195_v29  ;;  %v5453_v51 = vpop.f32.mrf.mxu2  ;;  %v9035_v62 = vld [vmem:[%s15042_s1 + $0x16a8] sm:$0xf]  ;;  %v9916_v27 = vld [vmem:[%s15042_s1 + $0x1434] sm:$0xf0] }
 0x234   :  { %5696 = vmatpush.bf16.msrb.mxu1 %v8604_v41  ;;  %v9956_v41 = vld [vmem:[%s15042_s1 + $0x1574] sm:$0xf0]  ;;  %v5466_v58 = vpop.f32.mrf.mxu3  ;;  %v9163_v3 = vld [vmem:[%s15042_s1 + $0x17a8] sm:$0xf]  ;;  %v9036_v24 = vor.u32 %v9996_v63, %v9035_v62  ;;  %v6253_v62 = vld [vmem:[%s15042_s1 + $0xf8] sm:$0xf0] }
 0x235   :  { %5705 = vmatpush.bf16.msrb.mxu2 %v8796_v42  ;;  %v9051_v42 = vld [vmem:[%s15042_s1 + $0x16c8] sm:$0xf]  ;;  %v8876_v52 = vor.u32 %v9956_v41, %v8875_v38  ;;  %v9948_v30 = vld [vmem:[%s15042_s1 + $0x1534] sm:$0xf0] }
 0x236   :  { %5718 = vmatpush.bf16.msrb.mxu3 %v8924_v50  ;;  %v8748_v50 = vor.u32 %v9924_v44, %v8747_v31  ;;  %v9052_v53 = vor.u32 %v10000_v34, %v9051_v42  ;;  %v8715_v25 = vld [vmem:[%s15042_s1 + $0x1428] sm:$0xf]  ;;  %v9912_v34 = vld [vmem:[%s15042_s1 + $0x1414] sm:$0xf0] }
 0x237   :  { %5684 = vmatpush.bf16.msrb.mxu0 %v8460_v57  ;;  %v5454_v57 = vadd.f32 %v5453_v51, %v808_v40  ;;  %v9147_v31 = vld [vmem:[%s15042_s1 + $0x1788] sm:$0xf]  ;;  %v8716_v44 = vor.u32 %v9916_v27, %v8715_v25  ;;  %v10016_v27 = vld [vmem:[%s15042_s1 + $0x1754] sm:$0xf0] }
 0x238   :  { %5697 = vmatpush.bf16.msrb.mxu1 %v8588_v59  ;;  %v9180_v59 = vor.u32 %v10032_v19, %v9179_v45  ;;  %v8699_v38 = vld [vmem:[%s15042_s1 + $0x1408] sm:$0xf]  ;;  %v9944_v19 = vld [vmem:[%s15042_s1 + $0x1514] sm:$0xf0] }
 0x239   :  { %5706 = vmatpush.bf16.msrb.mxu2 %v8780_v61  ;;  %v9952_v61 = vld [vmem:[%s15042_s1 + $0x1554] sm:$0xf0]  ;;  %v5467_v8 = vadd.f32 %v5466_v58, %v5454_v57  ;;  %v8827_v45 = vld [vmem:[%s15042_s1 + $0x1508] sm:$0xf] }
 0x23a   :  { %5719 = vmatpush.bf16.msrb.mxu3 %v8908_v32  ;;  %v10028_v32 = vld [vmem:[%s15042_s1 + $0x17b4] sm:$0xf0]  ;;  %v8860_v11 = vor.u32 %v9952_v61, %v8859_v56  ;;  %v9131_v54 = vld [vmem:[%s15042_s1 + $0x1768] sm:$0xf]  ;;  %v9298_v61 = vld [vmem:[%s15042_s1 + $0xec] sm:$0xf]  ;;  %v8828_v63 = vor.u32 %v9944_v19, %v8827_v45 }
 0x23b   :  { %5685 = vmatpush.bf16.msrb.mxu0 %v8444_v28  ;;  %v8843_v28 = vld [vmem:[%s15042_s1 + $0x1528] sm:$0xf]  ;;  %v9164_v29 = vor.u32 %v10028_v32, %v9163_v3  ;;  %v10020_v56 = vld [vmem:[%s15042_s1 + $0x1774] sm:$0xf0]  ;;  %v6256_v25 = vor.u32 %v9298_v61, %v6253_v62  ;;  %v9290_v45 = vld [vmem:[%s15042_s1 + $0xac] sm:$0xf] }
 0x23c   :  { %5698 = vmatpush.bf16.msrb.mxu1 %v8572_v23  ;;  %v9019_v23 = vld [vmem:[%s15042_s1 + $0x1688] sm:$0xf]  ;;  %v5492_v40 = vpop.f32.mrf.mxu1  ;;  %v8844_v41 = vor.u32 %v9948_v30, %v8843_v28  ;;  %v10052_v58 = vld [vmem:[%s15042_s1 + $0x1874] sm:$0xf0]  ;;  %v9132_v32 = vor.u32 %v10020_v56, %v9131_v54  ;;  %v6221_v19 = vld [vmem:[%s15042_s1 + $0xb8] sm:$0xf0] }
 0x23d   :  { %5707 = vmatpush.bf16.msrb.mxu2 %v8764_v33  ;;  %v9992_v33 = vld [vmem:[%s15042_s1 + $0x1694] sm:$0xf0]  ;;  %v9259_v57 = vld [vmem:[%s15042_s1 + $0x1868] sm:$0xf]  ;;  %v9286_v62 = vld [vmem:[%s15042_s1 + $0x8c] sm:$0xf] }
 0x23e   :  { %5720 = vmatpush.bf16.msrb.mxu3 %v8892_v35  ;;  %5686 = vmatmul.bf16.vlgmr.msrb.gmra.mxu0 %v11174_v13  ;;  %v10024_v35 = vld [vmem:[%s15042_s1 + $0x1794] sm:$0xf0]  ;;  %v9020_v42 = vor.u32 %v9992_v33, %v9019_v23  ;;  %v9243_v28 = vld [vmem:[%s15042_s1 + $0x1848] sm:$0xf]  ;;  %v9294_v23 = vld [vmem:[%s15042_s1 + $0xcc] sm:$0xf] }
 0x23f   :  { %5730 = vmatpush.bf16.msra.mxu0 %v9068_v37  ;;  %5699 = vmatmul.bf16.vlgmr.msrb.gmra.mxu1 %v11178_v18  ;;  %v5479_v37 = vpop.f32.mrf.mxu0  ;;  %v9148_v51 = vor.u32 %v10024_v35, %v9147_v31  ;;  %v6237_v33 = vld [vmem:[%s15042_s1 + $0xd8] sm:$0xf0]  ;;  %v9083_v56 = vld [vmem:[%s15042_s1 + $0x1708] sm:$0xf]  ;;  %v10040_v61 = vld [vmem:[%s15042_s1 + $0x1814] sm:$0xf0] }
 0x240   :  { %5743 = vmatpush.bf16.msra.mxu1 %v9196_v36  ;;  %v5480_v39 = vadd.f32 %v5479_v37, %v5467_v8  ;;  %v5455_v36 = vpop.f32.mrf.mxu2  ;;  %v9260_v8 = vor.u32 %v10052_v58, %v9259_v57  ;;  %v10008_v57 = vld [vmem:[%s15042_s1 + $0x1714] sm:$0xf0]  ;;  %v9211_v58 = vld [vmem:[%s15042_s1 + $0x1808] sm:$0xf] }
 0x241   :  { %5708 = vmatpush.bf16.msrb.mxu2 %v8748_v50  ;;  %v5468_v50 = vpop.f32.mrf.mxu3  ;;  %v6240_v36 = vor.u32 %v9294_v23, %v6237_v33  ;;  %v9282_v23 = vld [vmem:[%s15042_s1 + $0x6c] sm:$0xf]  ;;  %v6189_v33 = vld [vmem:[%s15042_s1 + $0x78] sm:$0xf0] }
 0x242   :  { %5721 = vmatpush.bf16.msrb.mxu3 %v8876_v52  ;;  %v9003_v52 = vld [vmem:[%s15042_s1 + $0x1668] sm:$0xf]  ;;  %v13747_v55 = vadd.f32 %v5492_v40, %v5480_v39  ;;  %v9980_v39 = vld [vmem:[%s15042_s1 + $0x1634] sm:$0xf0] }
 0x243   :  { %5731 = vmatpush.bf16.msra.mxu0 %v9052_v53  ;;  %v9988_v53 = vld [vmem:[%s15042_s1 + $0x1674] sm:$0xf0]  ;;  %v9099_v40 = vld [vmem:[%s15042_s1 + $0x1728] sm:$0xf] }
 0x244   :  { %5744 = vmatpush.bf16.msra.mxu1 %v9180_v59  ;;  %v8700_v59 = vor.u32 %v9912_v34, %v8699_v38  ;;  %v9004_v3 = vor.u32 %v9988_v53, %v9003_v52  ;;  %v5494_v31 = vpop.f32.mrf.mxu1  ;;  %v8971_v38 = vld [vmem:[%s15042_s1 + $0x1628] sm:$0xf]  ;;  %v10044_v34 = vld [vmem:[%s15042_s1 + $0x1834] sm:$0xf0] }
 0x245   :  { %5709 = vmatpush.bf16.msrb.mxu2 %v8732_v10  ;;  %v8987_v10 = vld [vmem:[%s15042_s1 + $0x1648] sm:$0xf]  ;;  %v8972_v50 = vor.u32 %v9980_v39, %v8971_v38  ;;  %v9976_v52 = vld [vmem:[%s15042_s1 + $0x1614] sm:$0xf0]  ;;  %v9358_v38 = vld [vmem:[%s15042_s1 + $0x2cc] sm:$0xf] }
 0x246   :  { %5722 = vmatpush.bf16.msrb.mxu3 %v8860_v11  ;;  %v9984_v11 = vld [vmem:[%s15042_s1 + $0x1654] sm:$0xf0]  ;;  %v6493_v39 = vld [vmem:[%s15042_s1 + $0x2d8] sm:$0xf0] }
 0x247   :  { %5732 = vmatpush.bf16.msra.mxu0 %v9036_v24  ;;  %v9115_v24 = vld [vmem:[%s15042_s1 + $0x1748] sm:$0xf]  ;;  %v5481_v30 = vpop.f32.mrf.mxu0  ;;  %v8988_v35 = vor.u32 %v9984_v11, %v8987_v10  ;;  %v6509_v11 = vld [vmem:[%s15042_s1 + $0x2f8] sm:$0xf0] }
 0x248   :  { %5745 = vmatpush.bf16.msra.mxu1 %v9164_v29  ;;  %v10048_v29 = vld [vmem:[%s15042_s1 + $0x1854] sm:$0xf0]  ;;  %v9116_v37 = vor.u32 %v10016_v27, %v9115_v24  ;;  %v9394_v24 = vld [vmem:[%s15042_s1 + $0x3ec] sm:$0xf]  ;;  %v9084_v27 = vor.u32 %v10008_v57, %v9083_v56  ;;  %v6349_v56 = vld [vmem:[%s15042_s1 + $0x1b8] sm:$0xf0] }
 0x249   :  { %5710 = vmatpush.bf16.msrb.mxu2 %v8716_v44  ;;  %v9244_v44 = vor.u32 %v10048_v29, %v9243_v28  ;;  %v9212_v28 = vor.u32 %v10040_v61, %v9211_v58  ;;  %v9354_v57 = vld [vmem:[%s15042_s1 + $0x2ac] sm:$0xf] }
 0x24a   :  { %5723 = vmatpush.bf16.msrb.mxu3 %v8844_v41  ;;  %v10012_v41 = vld [vmem:[%s15042_s1 + $0x1734] sm:$0xf0]  ;;  %v9386_v58 = vld [vmem:[%s15042_s1 + $0x3ac] sm:$0xf] }
 0x24b   :  { %5733 = vmatpush.bf16.msra.mxu0 %v9020_v42  ;;  %v9227_v42 = vld [vmem:[%s15042_s1 + $0x1828] sm:$0xf]  ;;  %v9100_v53 = vor.u32 %v10012_v41, %v9099_v40  ;;  %v9390_v40 = vld [vmem:[%s15042_s1 + $0x3cc] sm:$0xf] }
 0x24c   :  { %5746 = vmatpush.bf16.msra.mxu1 %v9148_v51  ;;  %v8955_v51 = vld [vmem:[%s15042_s1 + $0x1608] sm:$0xf]  ;;  %v9228_v54 = vor.u32 %v10044_v34, %v9227_v42  ;;  %v6192_v42 = vor.u32 %v9282_v23, %v6189_v33  ;;  %v6589_v23 = vld [vmem:[%s15042_s1 + $0x398] sm:$0xf0] }
 0x24d   :  { %5711 = vmatpush.bf16.msrb.mxu2 %v8700_v59  ;;  %v6224_v59 = vor.u32 %v9290_v45, %v6221_v19  ;;  %v8956_v10 = vor.u32 %v9976_v52, %v8955_v51  ;;  %v9278_v45 = vld [vmem:[%s15042_s1 + $0x4c] sm:$0xf]  ;;  %v6173_v19 = vld [vmem:[%s15042_s1 + $0x58] sm:$0xf0]  ;;  %v6496_v52 = vor.u32 %v9358_v38, %v6493_v39 }
 0x24e   :  { %5724 = vmatpush.bf16.msrb.mxu3 %v8828_v63  ;;  %v6205_v63 = vld [vmem:[%s15042_s1 + $0x98] sm:$0xf0]  ;;  %v9270_v38 = vld [vmem:[%s15042_s1 + $0xc] sm:$0xf] }
 0x24f   :  { %5734 = vmatpush.bf16.msra.mxu0 %v9004_v3  ;;  %v9330_v3 = vld [vmem:[%s15042_s1 + $0x1ec] sm:$0xf]  ;;  %v6208_v29 = vor.u32 %v9286_v62, %v6205_v63  ;;  %v6176_v62 = vor.u32 %v9278_v45, %v6173_v19  ;;  %v6141_v39 = vld [vmem:[%s15042_s1 + $0x18] sm:$0xf0] }
 0x250   :  { %5747 = vmatpush.bf16.msra.mxu1 %v9132_v32  ;;  %5712 = vmatmul.bf16.vlgmr.msrb.gmra.mxu2 %v11259_v4  ;;  %v6381_v32 = vld [vmem:[%s15042_s1 + $0x1f8] sm:$0xf0]  ;;  %v9346_v19 = vld [vmem:[%s15042_s1 + $0x26c] sm:$0xf] }
 0x251   :  { %5760 = vmatpush.bf16.msra.mxu2 %v9260_v8  ;;  %5725 = vmatmul.bf16.vlgmr.msrb.gmra.mxu3 %v11263_v6  ;;  %v9362_v8 = vld [vmem:[%s15042_s1 + $0x2ec] sm:$0xf]  ;;  %v6384_v30 = vor.u32 %v9330_v3, %v6381_v32  ;;  %v6157_v32 = vld [vmem:[%s15042_s1 + $0x38] sm:$0xf0] }
 0x252   :  { %5769 = vmatpush.bf16.msra.mxu3 %v6256_v25  ;;  %v6637_v25 = vld [vmem:[%s15042_s1 + $0x3f8] sm:$0xf0]  ;;  %v6512_v31 = vor.u32 %v9362_v8, %v6509_v11  ;;  %v9274_v3 = vld [vmem:[%s15042_s1 + $0x2c] sm:$0xf] }
 0x253   :  { %5735 = vmatpush.bf16.msra.mxu0 %v8988_v35  ;;  %v6640_v35 = vor.u32 %v9394_v24, %v6637_v25  ;;  %v5505_v41 = vpop.f32.mrf.mxu2  ;;  %v9318_v11 = vld [vmem:[%s15042_s1 + $0x18c] sm:$0xf]  ;;  %v6333_v24 = vld [vmem:[%s15042_s1 + $0x198] sm:$0xf0] }
 0x254   :  { %5748 = vmatpush.bf16.msra.mxu1 %v9116_v37  ;;  %v9326_v37 = vld [vmem:[%s15042_s1 + $0x1cc] sm:$0xf]  ;;  %v5518_v51 = vpop.f32.mrf.mxu3  ;;  %v6317_v45 = vld [vmem:[%s15042_s1 + $0x178] sm:$0xf0] }
 0x255   :  { %5761 = vmatpush.bf16.msra.mxu2 %v9244_v44  ;;  %v6365_v44 = vld [vmem:[%s15042_s1 + $0x1d8] sm:$0xf0]  ;;  %v9350_v25 = vld [vmem:[%s15042_s1 + $0x28c] sm:$0xf] }
 0x256   :  { %5770 = vmatpush.bf16.msra.mxu3 %v6240_v36  ;;  %v6621_v36 = vld [vmem:[%s15042_s1 + $0x3d8] sm:$0xf0]  ;;  %v6368_v34 = vor.u32 %v9326_v37, %v6365_v44  ;;  %v6160_v37 = vor.u32 %v9274_v3, %v6157_v32  ;;  %v6336_v44 = vor.u32 %v9318_v11, %v6333_v24  ;;  %v9374_v32 = vld [vmem:[%s15042_s1 + $0x34c] sm:$0xf] }
 0x257   :  { %5736 = vmatpush.bf16.msra.mxu0 %v8972_v50  ;;  %v5506_v50 = vadd.f32 %v5505_v41, %v13747_v55  ;;  %v6477_v55 = vld [vmem:[%s15042_s1 + $0x2b8] sm:$0xf0]  ;;  %v9422_v11 = vld [vmem:[%s15042_s1 + $0x4cc] sm:$0xf] }
 0x258   :  { %5749 = vmatpush.bf16.msra.mxu1 %v9100_v53  ;;  %v6624_v53 = vor.u32 %v9390_v40, %v6621_v36  ;;  %v6480_v8 = vor.u32 %v9354_v57, %v6477_v55  ;;  %v6429_v3 = vld [vmem:[%s15042_s1 + $0x258] sm:$0xf0] }
 0x259   :  { %5762 = vmatpush.bf16.msra.mxu2 %v9228_v54  ;;  %v9322_v54 = vld [vmem:[%s15042_s1 + $0x1ac] sm:$0xf]  ;;  %v5519_v61 = vadd.f32 %v5518_v51, %v5506_v50  ;;  %v6445_v50 = vld [vmem:[%s15042_s1 + $0x278] sm:$0xf0] }
 0x25a   :  { %5771 = vmatpush.bf16.msra.mxu3 %v6224_v59  ;;  %v6605_v59 = vld [vmem:[%s15042_s1 + $0x3b8] sm:$0xf0]  ;;  %v6352_v63 = vor.u32 %v9322_v54, %v6349_v56  ;;  %v9378_v51 = vld [vmem:[%s15042_s1 + $0x36c] sm:$0xf]  ;;  %v6144_v56 = vor.u32 %v9270_v38, %v6141_v39  ;;  %v6448_v55 = vor.u32 %v9346_v19, %v6445_v50 }
 0x25b   :  { %5737 = vmatpush.bf16.msra.mxu0 %v8956_v10  ;;  %v6608_v10 = vor.u32 %v9386_v58, %v6605_v59  ;;  %v6765_v54 = vld [vmem:[%s15042_s1 + $0x4f8] sm:$0xf0]  ;;  %v9310_v59 = vld [vmem:[%s15042_s1 + $0x14c] sm:$0xf] }
 0x25c   :  { %5750 = vmatpush.bf16.msra.mxu1 %v9084_v27  ;;  %v10057_v27 = vld [vmem:[#allocation1] sm:$0xff]  ;;  %v5520_v40 = vpop.f32.mrf.mxu3  ;;  %v6749_v24 = vld [vmem:[%s15042_s1 + $0x4d8] sm:$0xf0]  ;;  %v9418_v38 = vld [vmem:[%s15042_s1 + $0x4ac] sm:$0xf] }
 0x25d   :  { %5763 = vmatpush.bf16.msra.mxu2 %v9212_v28  ;;  %v5531_v28 = vpop.f32.mrf.mxu0  ;;  %v6733_v39 = vld [vmem:[%s15042_s1 + $0x4b8] sm:$0xf0]  ;;  %v9334_v19 = vld [vmem:[%s15042_s1 + $0x20c] sm:$0xf] }
 0x25e   :  { %5772 = vmatpush.bf16.msra.mxu3 %v6208_v29  ;;  %5738 = vmatmul.bf16.vlgmr.msra.gmra.mxu0 %v11261_v5  ;;  %v6461_v29 = vld [vmem:[%s15042_s1 + $0x298] sm:$0xf0]  ;;  %v5532_v33 = vadd.f32 %v5531_v28, %v5519_v61  ;;  %v9366_v50 = vld [vmem:[%s15042_s1 + $0x30c] sm:$0xf] }
 0x25f   :  { %5782 = vmatpush.bf16.msrb.mxu0 %v6384_v30  ;;  %5751 = vmatmul.bf16.vlgmr.msra.gmra.mxu1 %v11265_v7  ;;  %v9382_v30 = vld [vmem:[%s15042_s1 + $0x38c] sm:$0xf]  ;;  %v6464_v36 = vor.u32 %v9350_v25, %v6461_v29  ;;  %v6301_v61 = vld [vmem:[%s15042_s1 + $0x158] sm:$0xf0] }
 0x260   :  { %5795 = vmatpush.bf16.msrb.mxu1 %v6512_v31  ;;  %9267 = vmatmul.msk.bf16.vlgmr.msra.gmra.mxu2 %vm4791_vm0, %v10057_v27  ;;  %v5544_v31 = vpop.f32.mrf.mxu1  ;;  %v6592_v41 = vor.u32 %v9382_v30, %v6589_v23  ;;  %v6304_v27 = vor.u32 %v9310_v59, %v6301_v61  ;;  %v9306_v30 = vld [vmem:[%s15042_s1 + $0x12c] sm:$0xf]  ;;  %v6285_v23 = vld [vmem:[%s15042_s1 + $0x138] sm:$0xf0] }
 0x261   :  { %5808 = vmatpush.bf16.msrb.mxu2 %v6640_v35  ;;  %v5507_v35 = vpop.f32.mrf.mxu2  ;;  %v6288_v40 = vor.u32 %v9306_v30, %v6285_v23  ;;  %v7021_v59 = vld [vmem:[%s15042_s1 + $0x6f8] sm:$0xf0]  ;;  %v9522_v61 = vld [vmem:[%s15042_s1 + $0x7ec] sm:$0xf] }
 0x262   :  { %5773 = vmatpush.bf16.msra.mxu3 %v6192_v42  ;;  %v13938_v42 = vadd.f32 %v5544_v31, %v5532_v33  ;;  %v9338_v33 = vld [vmem:[%s15042_s1 + $0x22c] sm:$0xf]  ;;  %v6752_v31 = vor.u32 %v9422_v11, %v6749_v24  ;;  %v6413_v35 = vld [vmem:[%s15042_s1 + $0x238] sm:$0xf0] }
 0x263   :  { %5783 = vmatpush.bf16.msrb.mxu0 %v6368_v34  ;;  %v9314_v34 = vld [vmem:[%s15042_s1 + $0x16c] sm:$0xf]  ;;  %v6701_v11 = vld [vmem:[%s15042_s1 + $0x478] sm:$0xf0] }
 0x264   :  { %5796 = vmatpush.bf16.msrb.mxu1 %v6496_v52  ;;  %v6573_v52 = vld [vmem:[%s15042_s1 + $0x378] sm:$0xf0]  ;;  %v6320_v57 = vor.u32 %v9314_v34, %v6317_v45  ;;  %v6416_v34 = vor.u32 %v9338_v33, %v6413_v35  ;;  %v9518_v23 = vld [vmem:[%s15042_s1 + $0x7cc] sm:$0xf] }
 0x265   :  { %5809 = vmatpush.bf16.msrb.mxu2 %v6624_v53  ;;  %v9426_v53 = vld [vmem:[%s15042_s1 + $0x4ec] sm:$0xf]  ;;  %v6576_v58 = vor.u32 %v9378_v51, %v6573_v52  ;;  %v6736_v51 = vor.u32 %v9418_v38, %v6733_v39  ;;  %v6525_v52 = vld [vmem:[%s15042_s1 + $0x318] sm:$0xf0] }
 0x266   :  { %5774 = vmatpush.bf16.msra.mxu3 %v6176_v62  ;;  %v9342_v62 = vld [vmem:[%s15042_s1 + $0x24c] sm:$0xf]  ;;  %v7005_v30 = vld [vmem:[%s15042_s1 + $0x6d8] sm:$0xf0] }
 0x267   :  { %5784 = vmatpush.bf16.msrb.mxu0 %v6352_v63  ;;  %v6768_v63 = vor.u32 %v9426_v53, %v6765_v54  ;;  %v6432_v28 = vor.u32 %v9342_v62, %v6429_v3  ;;  %v9414_v53 = vld [vmem:[%s15042_s1 + $0x48c] sm:$0xf]  ;;  %v6717_v54 = vld [vmem:[%s15042_s1 + $0x498] sm:$0xf0]  ;;  %v6528_v3 = vor.u32 %v9366_v50, %v6525_v52 }
 0x268   :  { %5797 = vmatpush.bf16.msrb.mxu1 %v6480_v8  ;;  %v6557_v8 = vld [vmem:[%s15042_s1 + $0x358] sm:$0xf0]  ;;  %v5546_v25 = vpop.f32.mrf.mxu1  ;;  %v9406_v39 = vld [vmem:[%s15042_s1 + $0x44c] sm:$0xf] }
 0x269   :  { %5810 = vmatpush.bf16.msrb.mxu2 %v6608_v10  ;;  %v5533_v10 = vpop.f32.mrf.mxu0  ;;  %v6560_v29 = vor.u32 %v9374_v32, %v6557_v8  ;;  %v7149_v62 = vld [vmem:[%s15042_s1 + $0x7f8] sm:$0xf0]  ;;  %v6720_v32 = vor.u32 %v9414_v53, %v6717_v54  ;;  %v9514_v50 = vld [vmem:[%s15042_s1 + $0x7ac] sm:$0xf] }
 0x26a   :  { %5775 = vmatpush.bf16.msra.mxu3 %v6160_v37  ;;  %v9370_v37 = vld [vmem:[%s15042_s1 + $0x32c] sm:$0xf]  ;;  %v7152_v25 = vor.u32 %v9522_v61, %v7149_v62  ;;  %v7133_v33 = vld [vmem:[%s15042_s1 + $0x7d8] sm:$0xf0] }
 0x26b   :  { %5785 = vmatpush.bf16.msrb.mxu0 %v6336_v44  ;;  %v6541_v44 = vld [vmem:[%s15042_s1 + $0x338] sm:$0xf0]  ;;  %v9410_v10 = vld [vmem:[%s15042_s1 + $0x46c] sm:$0xf] }
 0x26c   :  { %5798 = vmatpush.bf16.msrb.mxu1 %v6464_v36  ;;  %v9302_v36 = vld [vmem:[%s15042_s1 + $0x10c] sm:$0xf]  ;;  %v6544_v45 = vor.u32 %v9370_v37, %v6541_v44  ;;  %v6704_v35 = vor.u32 %v9410_v10, %v6701_v11  ;;  %v7101_v62 = vld [vmem:[%s15042_s1 + $0x798] sm:$0xf0] }
 0x26d   :  { %5811 = vmatpush.bf16.msrb.mxu2 %v6592_v41  ;;  %v6269_v41 = vld [vmem:[%s15042_s1 + $0x118] sm:$0xf0]  ;;  %v9402_v54 = vld [vmem:[%s15042_s1 + $0x42c] sm:$0xf] }
 0x26e   :  { %5776 = vmatpush.bf16.msra.mxu3 %v6144_v56  ;;  %v9458_v56 = vld [vmem:[%s15042_s1 + $0x5ec] sm:$0xf] }
 0x26f   :  { %5786 = vmatpush.bf16.msrb.mxu0 %v6320_v57  ;;  %v6893_v57 = vld [vmem:[%s15042_s1 + $0x5f8] sm:$0xf0]  ;;  %v9510_v61 = vld [vmem:[%s15042_s1 + $0x78c] sm:$0xf] }
 0x270   :  { %5799 = vmatpush.bf16.msrb.mxu1 %v6448_v55  ;;  %v9490_v55 = vld [vmem:[%s15042_s1 + $0x6ec] sm:$0xf]  ;;  %v6896_v8 = vor.u32 %v9458_v56, %v6893_v57  ;;  %v6669_v56 = vld [vmem:[%s15042_s1 + $0x438] sm:$0xf0] }
 0x271   :  { %5812 = vmatpush.bf16.msrb.mxu2 %v6576_v58  ;;  %5777 = vmatmul.bf16.vlgmr.msra.gmra.mxu3 %v10412_v21  ;;  %v6397_v21 = vld [vmem:[%s15042_s1 + $0x218] sm:$0xf0]  ;;  %v6272_v58 = vor.u32 %v9302_v36, %v6269_v41  ;;  %v7024_v24 = vor.u32 %v9490_v55, %v7021_v59  ;;  %v7136_v41 = vor.u32 %v9518_v23, %v7133_v33  ;;  %v9478_v55 = vld [vmem:[%s15042_s1 + $0x68c] sm:$0xf] }
 0x272   :  { %5821 = vmatpush.bf16.msrb.mxu3 %v6768_v63  ;;  %v6400_v63 = vor.u32 %v9334_v19, %v6397_v21  ;;  %v6989_v21 = vld [vmem:[%s15042_s1 + $0x6b8] sm:$0xf0]  ;;  %v9398_v11 = vld [vmem:[%s15042_s1 + $0x40c] sm:$0xf] }
 0x273   :  { %5787 = vmatpush.bf16.msrb.mxu0 %v6304_v27  ;;  %v9454_v27 = vld [vmem:[%s15042_s1 + $0x5cc] sm:$0xf]  ;;  %v6973_v59 = vld [vmem:[%s15042_s1 + $0x698] sm:$0xf0] }
 0x274   :  { %5800 = vmatpush.bf16.msrb.mxu1 %v6432_v28  ;;  %v6877_v28 = vld [vmem:[%s15042_s1 + $0x5d8] sm:$0xf0]  ;;  %v5570_v38 = vpop.f32.mrf.mxu3  ;;  %v9474_v33 = vld [vmem:[%s15042_s1 + $0x66c] sm:$0xf] }
 0x275   :  { %5813 = vmatpush.bf16.msrb.mxu2 %v6560_v29  ;;  %v9486_v29 = vld [vmem:[%s15042_s1 + $0x6cc] sm:$0xf]  ;;  %v6880_v44 = vor.u32 %v9454_v27, %v6877_v28  ;;  %v6976_v27 = vor.u32 %v9478_v55, %v6973_v59  ;;  %v7104_v28 = vor.u32 %v9510_v61, %v7101_v62  ;;  %v6829_v23 = vld [vmem:[%s15042_s1 + $0x578] sm:$0xf0] }
 0x276   :  { %5822 = vmatpush.bf16.msrb.mxu3 %v6752_v31  ;;  %v5557_v31 = vpop.f32.mrf.mxu2  ;;  %v7008_v36 = vor.u32 %v9486_v29, %v7005_v30  ;;  %v9442_v30 = vld [vmem:[%s15042_s1 + $0x56c] sm:$0xf]  ;;  %v6797_v55 = vld [vmem:[%s15042_s1 + $0x538] sm:$0xf0] }
 0x277   :  { %5788 = vmatpush.bf16.msrb.mxu0 %v6288_v40  ;;  %v5558_v37 = vadd.f32 %v5557_v31, %v13938_v42  ;;  %v6685_v40 = vld [vmem:[%s15042_s1 + $0x458] sm:$0xf0]  ;;  %v9498_v62 = vld [vmem:[%s15042_s1 + $0x72c] sm:$0xf] }
 0x278   :  { %5801 = vmatpush.bf16.msrb.mxu1 %v6416_v34  ;;  %v9450_v34 = vld [vmem:[%s15042_s1 + $0x5ac] sm:$0xf]  ;;  %v6861_v42 = vld [vmem:[%s15042_s1 + $0x5b8] sm:$0xf0]  ;;  %v6688_v52 = vor.u32 %v9406_v39, %v6685_v40  ;;  %v6832_v40 = vor.u32 %v9442_v30, %v6829_v23 }
 0x279   :  { %5814 = vmatpush.bf16.msrb.mxu2 %v6544_v45  ;;  %v9482_v45 = vld [vmem:[%s15042_s1 + $0x6ac] sm:$0xf]  ;;  %v5571_v19 = vadd.f32 %v5570_v38, %v5558_v37  ;;  %v6864_v53 = vor.u32 %v9450_v34, %v6861_v42  ;;  %v6957_v31 = vld [vmem:[%s15042_s1 + $0x678] sm:$0xf0] }
 0x27a   :  { %5823 = vmatpush.bf16.msrb.mxu3 %v6736_v51  ;;  %v7117_v51 = vld [vmem:[%s15042_s1 + $0x7b8] sm:$0xf0]  ;;  %v6992_v57 = vor.u32 %v9482_v45, %v6989_v21  ;;  %v9438_v34 = vld [vmem:[%s15042_s1 + $0x54c] sm:$0xf] }
 0x27b   :  { %5789 = vmatpush.bf16.msrb.mxu0 %v6272_v58  ;;  %v5583_v58 = vpop.f32.mrf.mxu0  ;;  %v7085_v37 = vld [vmem:[%s15042_s1 + $0x778] sm:$0xf0]  ;;  %v9470_v45 = vld [vmem:[%s15042_s1 + $0x64c] sm:$0xf] }
 0x27c   :  { %5802 = vmatpush.bf16.msrb.mxu1 %v6400_v63  ;;  %v5584_v63 = vadd.f32 %v5583_v58, %v5571_v19  ;;  %v7277_v38 = vld [vmem:[%s15042_s1 + $0x8f8] sm:$0xf0]  ;;  %v9466_v58 = vld [vmem:[%s15042_s1 + $0x62c] sm:$0xf] }
 0x27d   :  { %5815 = vmatpush.bf16.msrb.mxu2 %v6528_v3  ;;  %v5596_v3 = vpop.f32.mrf.mxu1  ;;  %v6813_v42 = vld [vmem:[%s15042_s1 + $0x558] sm:$0xf0] }
 0x27e   :  { %5824 = vmatpush.bf16.msrb.mxu3 %v6720_v32  ;;  %5790 = vmatmul.bf16.vlgmr.msrb.gmra.mxu0 %v10423_v26  ;;  %v6845_v26 = vld [vmem:[%s15042_s1 + $0x598] sm:$0xf0]  ;;  %v5559_v32 = vpop.f32.mrf.mxu2  ;;  %v14137_v29 = vadd.f32 %v5596_v3, %v5584_v63  ;;  %v9546_v3 = vld [vmem:[%s15042_s1 + $0x8ac] sm:$0xf] }
 0x27f   :  { %5834 = vmatpush.bf16.msra.mxu0 %v6896_v8  ;;  %5803 = vmatmul.bf16.vlgmr.msrb.gmra.mxu1 %v10410_v20  ;;  %v9446_v20 = vld [vmem:[%s15042_s1 + $0x58c] sm:$0xf]  ;;  %v6672_v8 = vor.u32 %v9402_v54, %v6669_v56  ;;  %v6941_v21 = vld [vmem:[%s15042_s1 + $0x658] sm:$0xf0] }
 0x280   :  { %5847 = vmatpush.bf16.msra.mxu1 %v7024_v24  ;;  %5816 = vmatmul.bf16.vlgmr.msrb.gmra.mxu2 %v10414_v22  ;;  %v7120_v22 = vor.u32 %v9514_v50, %v7117_v51  ;;  %v6848_v10 = vor.u32 %v9446_v20, %v6845_v26  ;;  %v6653_v24 = vld [vmem:[%s15042_s1 + $0x418] sm:$0xf0]  ;;  %v9502_v50 = vld [vmem:[%s15042_s1 + $0x74c] sm:$0xf] }
 0x281   :  { %5860 = vmatpush.bf16.msra.mxu2 %v7152_v25  ;;  %v5572_v25 = vpop.f32.mrf.mxu3  ;;  %v6656_v39 = vor.u32 %v9398_v11, %v6653_v24  ;;  %v7069_v51 = vld [vmem:[%s15042_s1 + $0x758] sm:$0xf0]  ;;  %v9434_v26 = vld [vmem:[%s15042_s1 + $0x52c] sm:$0xf] }
 0x282   :  { %5825 = vmatpush.bf16.msrb.mxu3 %v6704_v35  ;;  %v9506_v35 = vld [vmem:[%s15042_s1 + $0x76c] sm:$0xf]  ;;  %v7261_v54 = vld [vmem:[%s15042_s1 + $0x8d8] sm:$0xf0]  ;;  %v7072_v20 = vor.u32 %v9502_v50, %v7069_v51 }
 0x283   :  { %5835 = vmatpush.bf16.msra.mxu0 %v6880_v44  ;;  %v9554_v44 = vld [vmem:[%s15042_s1 + $0x8ec] sm:$0xf]  ;;  %v6925_v61 = vld [vmem:[%s15042_s1 + $0x638] sm:$0xf0] }
 0x284   :  { %5848 = vmatpush.bf16.msra.mxu1 %v7008_v36  ;;  %v6960_v36 = vor.u32 %v9474_v33, %v6957_v31  ;;  %v7280_v19 = vor.u32 %v9554_v44, %v7277_v38  ;;  %v7053_v63 = vld [vmem:[%s15042_s1 + $0x738] sm:$0xf0]  ;;  %v9462_v25 = vld [vmem:[%s15042_s1 + $0x60c] sm:$0xf] }
 0x285   :  { %5861 = vmatpush.bf16.msra.mxu2 %v7136_v41  ;;  %v7088_v41 = vor.u32 %v9506_v35, %v7085_v37  ;;  %v5598_v56 = vpop.f32.mrf.mxu1  ;;  %v7245_v32 = vld [vmem:[%s15042_s1 + $0x8b8] sm:$0xf0]  ;;  %v7056_v24 = vor.u32 %v9498_v62, %v7053_v63  ;;  %v9542_v33 = vld [vmem:[%s15042_s1 + $0x88c] sm:$0xf] }
 0x286   :  { %5826 = vmatpush.bf16.msrb.mxu3 %v6688_v52  ;;  %v5585_v52 = vpop.f32.mrf.mxu0  ;;  %v6781_v11 = vld [vmem:[%s15042_s1 + $0x518] sm:$0xf0]  ;;  %v7248_v30 = vor.u32 %v9546_v3, %v7245_v32  ;;  %v9586_v35 = vld [vmem:[%s15042_s1 + $0x9ec] sm:$0xf] }
 0x287   :  { %5836 = vmatpush.bf16.msra.mxu0 %v6864_v53  ;;  %v9550_v53 = vld [vmem:[%s15042_s1 + $0x8cc] sm:$0xf]  ;;  %v7037_v23 = vld [vmem:[%s15042_s1 + $0x718] sm:$0xf0] }
 0x288   :  { %5849 = vmatpush.bf16.msra.mxu1 %v6992_v57  ;;  %v6816_v57 = vor.u32 %v9438_v34, %v6813_v42  ;;  %v7264_v59 = vor.u32 %v9550_v53, %v7261_v54  ;;  %v7229_v31 = vld [vmem:[%s15042_s1 + $0x898] sm:$0xf0]  ;;  %v9618_v44 = vld [vmem:[%s15042_s1 + $0xaec] sm:$0xf] }
 0x289   :  { %5862 = vmatpush.bf16.msra.mxu2 %v7120_v22  ;;  %v6944_v22 = vor.u32 %v9470_v45, %v6941_v21  ;;  %v7405_v37 = vld [vmem:[%s15042_s1 + $0x9f8] sm:$0xf0]  ;;  %v7232_v42 = vor.u32 %v9542_v33, %v7229_v31  ;;  %v9582_v52 = vld [vmem:[%s15042_s1 + $0x9cc] sm:$0xf] }
 0x28a   :  { %5827 = vmatpush.bf16.msrb.mxu3 %v6672_v8  ;;  %v6800_v8 = vor.u32 %v9434_v26, %v6797_v55  ;;  %v7408_v45 = vor.u32 %v9586_v35, %v7405_v37  ;;  %v7213_v21 = vld [vmem:[%s15042_s1 + $0x878] sm:$0xf0]  ;;  %v9614_v54 = vld [vmem:[%s15042_s1 + $0xacc] sm:$0xf] }
 0x28b   :  { %5837 = vmatpush.bf16.msra.mxu0 %v6848_v10  ;;  %v9430_v10 = vld [vmem:[%s15042_s1 + $0x50c] sm:$0xf]  ;;  %v7389_v53 = vld [vmem:[%s15042_s1 + $0x9d8] sm:$0xf0] }
 0x28c   :  { %5850 = vmatpush.bf16.msra.mxu1 %v6976_v27  ;;  %v6909_v27 = vld [vmem:[%s15042_s1 + $0x618] sm:$0xf0]  ;;  %v6784_v38 = vor.u32 %v9430_v10, %v6781_v11  ;;  %v9578_v32 = vld [vmem:[%s15042_s1 + $0x9ac] sm:$0xf] }
 0x28d   :  { %5863 = vmatpush.bf16.msra.mxu2 %v7104_v28  ;;  %v9494_v28 = vld [vmem:[%s15042_s1 + $0x70c] sm:$0xf]  ;;  %v7517_v56 = vld [vmem:[%s15042_s1 + $0xad8] sm:$0xf0] }
 0x28e   :  { %5828 = vmatpush.bf16.msrb.mxu3 %v6656_v39  ;;  %v7533_v39 = vld [vmem:[%s15042_s1 + $0xaf8] sm:$0xf0]  ;;  %v7040_v34 = vor.u32 %v9494_v28, %v7037_v23  ;;  %v7520_v63 = vor.u32 %v9614_v54, %v7517_v56  ;;  %v9606_v33 = vld [vmem:[%s15042_s1 + $0xa8c] sm:$0xf] }
 0x28f   :  { %5838 = vmatpush.bf16.msra.mxu0 %v6832_v40  ;;  %v9650_v40 = vld [vmem:[%s15042_s1 + $0xbec] sm:$0xf]  ;;  %v7536_v50 = vor.u32 %v9618_v44, %v7533_v39  ;;  %v7197_v62 = vld [vmem:[%s15042_s1 + $0x858] sm:$0xf0] }
 0x290   :  { %5851 = vmatpush.bf16.msra.mxu1 %v6960_v36  ;;  %v7661_v36 = vld [vmem:[%s15042_s1 + $0xbf8] sm:$0xf0]  ;;  %v9638_v37 = vld [vmem:[%s15042_s1 + $0xb8c] sm:$0xf] }
 0x291   :  { %5864 = vmatpush.bf16.msra.mxu2 %v7088_v41  ;;  %5829 = vmatmul.bf16.vlgmr.msrb.gmra.mxu3 %v10505_v0  ;;  %v6928_v0 = vor.u32 %v9466_v58, %v6925_v61  ;;  %v6912_v41 = vor.u32 %v9462_v25, %v6909_v27  ;;  %v7664_v51 = vor.u32 %v9650_v40, %v7661_v36  ;;  %v9534_v61 = vld [vmem:[%s15042_s1 + $0x84c] sm:$0xf]  ;;  %v7501_v11 = vld [vmem:[%s15042_s1 + $0xab8] sm:$0xf0] }
 0x292   :  { %5873 = vmatpush.bf16.msra.mxu3 %v7280_v19  ;;  %v9538_v19 = vld [vmem:[%s15042_s1 + $0x86c] sm:$0xf]  ;;  %v7392_v58 = vor.u32 %v9582_v52, %v7389_v53  ;;  %v7181_v27 = vld [vmem:[%s15042_s1 + $0x838] sm:$0xf0] }
 0x293   :  { %5839 = vmatpush.bf16.msra.mxu0 %v6816_v57  ;;  %v9646_v57 = vld [vmem:[%s15042_s1 + $0xbcc] sm:$0xf]  ;;  %v7216_v26 = vor.u32 %v9538_v19, %v7213_v21  ;;  %v7357_v23 = vld [vmem:[%s15042_s1 + $0x998] sm:$0xf0] }
 0x294   :  { %5852 = vmatpush.bf16.msra.mxu1 %v6944_v22  ;;  %v7645_v22 = vld [vmem:[%s15042_s1 + $0xbd8] sm:$0xf0]  ;;  %v9602_v53 = vld [vmem:[%s15042_s1 + $0xa6c] sm:$0xf] }
 0x295   :  { %5865 = vmatpush.bf16.msra.mxu2 %v7072_v20  ;;  %v5609_v20 = vpop.f32.mrf.mxu2  ;;  %v7648_v3 = vor.u32 %v9646_v57, %v7645_v22  ;;  %v7485_v35 = vld [vmem:[%s15042_s1 + $0xa98] sm:$0xf0]  ;;  %v9634_v56 = vld [vmem:[%s15042_s1 + $0xb6c] sm:$0xf] }
 0x296   :  { %5874 = vmatpush.bf16.msra.mxu3 %v7264_v59  ;;  %v5610_v55 = vadd.f32 %v5609_v20, %v14137_v29  ;;  %v5622_v59 = vpop.f32.mrf.mxu3  ;;  %v7373_v29 = vld [vmem:[%s15042_s1 + $0x9b8] sm:$0xf0]  ;;  %v7488_v19 = vor.u32 %v9606_v33, %v7485_v35  ;;  %v9682_v22 = vld [vmem:[%s15042_s1 + $0xcec] sm:$0xf] }
 0x297   :  { %5840 = vmatpush.bf16.msra.mxu0 %v6800_v8  ;;  %v9610_v8 = vld [vmem:[%s15042_s1 + $0xaac] sm:$0xf]  ;;  %v7376_v25 = vor.u32 %v9578_v32, %v7373_v29  ;;  %v7613_v44 = vld [vmem:[%s15042_s1 + $0xb98] sm:$0xf0] }
 0x298   :  { %5853 = vmatpush.bf16.msra.mxu1 %v6928_v0  ;;  %v5623_v10 = vadd.f32 %v5622_v59, %v5610_v55  ;;  %v9642_v0 = vld [vmem:[%s15042_s1 + $0xbac] sm:$0xf]  ;;  %v7504_v28 = vor.u32 %v9610_v8, %v7501_v11  ;;  %v7616_v21 = vor.u32 %v9638_v37, %v7613_v44  ;;  %v7341_v52 = vld [vmem:[%s15042_s1 + $0x978] sm:$0xf0] }
 0x299   :  { %5866 = vmatpush.bf16.msra.mxu2 %v7056_v24  ;;  %v7629_v24 = vld [vmem:[%s15042_s1 + $0xbb8] sm:$0xf0]  ;;  %v9630_v29 = vld [vmem:[%s15042_s1 + $0xb4c] sm:$0xf] }
 0x29a   :  { %5875 = vmatpush.bf16.msra.mxu3 %v7248_v30  ;;  %v7632_v30 = vor.u32 %v9642_v0, %v7629_v24  ;;  %v7469_v54 = vld [vmem:[%s15042_s1 + $0xa78] sm:$0xf0]  ;;  %v9678_v11 = vld [vmem:[%s15042_s1 + $0xccc] sm:$0xf] }
 0x29b   :  { %5841 = vmatpush.bf16.msra.mxu0 %v6784_v38  ;;  %v5635_v31 = vpop.f32.mrf.mxu0  ;;  %v7597_v57 = vld [vmem:[%s15042_s1 + $0xb78] sm:$0xf0]  ;;  %v9626_v33 = vld [vmem:[%s15042_s1 + $0xb2c] sm:$0xf] }
 0x29c   :  { %5854 = vmatpush.bf16.msra.mxu1 %v6912_v41  ;;  %v5636_v38 = vadd.f32 %v5635_v31, %v5623_v10  ;;  %v5648_v39 = vpop.f32.mrf.mxu1  ;;  %v7789_v20 = vld [vmem:[%s15042_s1 + $0xcf8] sm:$0xf0]  ;;  %v7600_v59 = vor.u32 %v9634_v56, %v7597_v57  ;;  %v9674_v35 = vld [vmem:[%s15042_s1 + $0xcac] sm:$0xf] }
 0x29d   :  { %5867 = vmatpush.bf16.msra.mxu2 %v7040_v34  ;;  %v5611_v40 = vpop.f32.mrf.mxu2  ;;  %v9526_v34 = vld [vmem:[%s15042_s1 + $0x80c] sm:$0xf]  ;;  %v7453_v32 = vld [vmem:[%s15042_s1 + $0xa58] sm:$0xf0] }
 0x29e   :  { %5876 = vmatpush.bf16.msra.mxu3 %v7232_v42  ;;  %5842 = vmatmul.bf16.vlgmr.msra.gmra.mxu0 %v10509_v2  ;;  %v9530_v2 = vld [vmem:[%s15042_s1 + $0x82c] sm:$0xf]  ;;  %v7165_v42 = vld [vmem:[%s15042_s1 + $0x818] sm:$0xf0] }
 0x29f   :  { %5886 = vmatpush.bf16.msrb.mxu0 %v7408_v45  ;;  %5855 = vmatmul.bf16.vlgmr.msra.gmra.mxu1 %v10500_v60  ;;  %v9574_v60 = vld [vmem:[%s15042_s1 + $0x98c] sm:$0xf]  ;;  %v7184_v36 = vor.u32 %v9530_v2, %v7181_v27  ;;  %v5624_v45 = vpop.f32.mrf.mxu3  ;;  %v7581_v8 = vld [vmem:[%s15042_s1 + $0xb58] sm:$0xf0] }
 0x2a0   :  { %5899 = vmatpush.bf16.msrb.mxu1 %v7536_v50  ;;  %5868 = vmatmul.bf16.vlgmr.msra.gmra.mxu2 %v10507_v1  ;;  %v7200_v1 = vor.u32 %v9534_v61, %v7197_v62  ;;  %v7360_v41 = vor.u32 %v9574_v60, %v7357_v23  ;;  %v14336_v50 = vadd.f32 %v5648_v39, %v5636_v38  ;;  %v9566_v61 = vld [vmem:[%s15042_s1 + $0x94c] sm:$0xf]  ;;  %v7325_v62 = vld [vmem:[%s15042_s1 + $0x958] sm:$0xf0] }
 0x2a1   :  { %5912 = vmatpush.bf16.msrb.mxu2 %v7664_v51  ;;  %v9570_v51 = vld [vmem:[%s15042_s1 + $0x96c] sm:$0xf]  ;;  %v7773_v0 = vld [vmem:[%s15042_s1 + $0xcd8] sm:$0xf0]  ;;  %v7584_v2 = vor.u32 %v9630_v29, %v7581_v8 }
 0x2a2   :  { %5877 = vmatpush.bf16.msra.mxu3 %v7216_v26  ;;  %v7168_v26 = vor.u32 %v9526_v34, %v7165_v42  ;;  %v7344_v55 = vor.u32 %v9570_v51, %v7341_v52  ;;  %v9562_v27 = vld [vmem:[%s15042_s1 + $0x92c] sm:$0xf]  ;;  %v7776_v60 = vor.u32 %v9678_v11, %v7773_v0  ;;  %v7437_v23 = vld [vmem:[%s15042_s1 + $0xa38] sm:$0xf0] }
 0x2a3   :  { %5887 = vmatpush.bf16.msrb.mxu0 %v7392_v58  ;;  %v7472_v58 = vor.u32 %v9602_v53, %v7469_v54  ;;  %v5637_v10 = vpop.f32.mrf.mxu0  ;;  %v7565_v31 = vld [vmem:[%s15042_s1 + $0xb38] sm:$0xf0]  ;;  %v9558_v38 = vld [vmem:[%s15042_s1 + $0x90c] sm:$0xf] }
 0x2a4   :  { %5900 = vmatpush.bf16.msrb.mxu1 %v7520_v63  ;;  %v9598_v63 = vld [vmem:[%s15042_s1 + $0xa4c] sm:$0xf]  ;;  %v5650_v24 = vpop.f32.mrf.mxu1  ;;  %v7757_v37 = vld [vmem:[%s15042_s1 + $0xcb8] sm:$0xf0]  ;;  %v7568_v40 = vor.u32 %v9626_v33, %v7565_v31 }
 0x2a5   :  { %5913 = vmatpush.bf16.msrb.mxu2 %v7648_v3  ;;  %v7792_v3 = vor.u32 %v9682_v22, %v7789_v20  ;;  %v7293_v39 = vld [vmem:[%s15042_s1 + $0x918] sm:$0xf0]  ;;  %v9622_v34 = vld [vmem:[%s15042_s1 + $0xb0c] sm:$0xf]  ;;  %v7760_v42 = vor.u32 %v9674_v35, %v7757_v37 }
 0x2a6   :  { %5878 = vmatpush.bf16.msra.mxu3 %v7200_v1  ;;  %v7328_v1 = vor.u32 %v9566_v61, %v7325_v62  ;;  %v7549_v45 = vld [vmem:[%s15042_s1 + $0xb18] sm:$0xf0]  ;;  %v9714_v51 = vld [vmem:[%s15042_s1 + $0xdec] sm:$0xf]  ;;  %v7296_v54 = vor.u32 %v9558_v38, %v7293_v39 }
 0x2a7   :  { %5888 = vmatpush.bf16.msrb.mxu0 %v7376_v25  ;;  %v7456_v25 = vor.u32 %v9598_v63, %v7453_v32  ;;  %v7917_v52 = vld [vmem:[%s15042_s1 + $0xdf8] sm:$0xf0]  ;;  %v9746_v53 = vld [vmem:[%s15042_s1 + $0xeec] sm:$0xf] }
 0x2a8   :  { %5901 = vmatpush.bf16.msrb.mxu1 %v7504_v28  ;;  %v7309_v28 = vld [vmem:[%s15042_s1 + $0x938] sm:$0xf0]  ;;  %v9778_v57 = vld [vmem:[%s15042_s1 + $0xfec] sm:$0xf] }
 0x2a9   :  { %5914 = vmatpush.bf16.msrb.mxu2 %v7632_v30  ;;  %v9594_v30 = vld [vmem:[%s15042_s1 + $0xa2c] sm:$0xf]  ;;  %v7312_v44 = vor.u32 %v9562_v27, %v7309_v28  ;;  %v8045_v56 = vld [vmem:[%s15042_s1 + $0xef8] sm:$0xf0] }
 0x2aa   :  { %5879 = vmatpush.bf16.msra.mxu3 %v7184_v36  ;;  %v9590_v36 = vld [vmem:[%s15042_s1 + $0xa0c] sm:$0xf]  ;;  %v8173_v22 = vld [vmem:[%s15042_s1 + $0xff8] sm:$0xf0]  ;;  %v8048_v62 = vor.u32 %v9746_v53, %v8045_v56 }
 0x2ab   :  { %5889 = vmatpush.bf16.msrb.mxu0 %v7360_v41  ;;  %v7421_v41 = vld [vmem:[%s15042_s1 + $0xa18] sm:$0xf0]  ;;  %v8176_v63 = vor.u32 %v9778_v57, %v8173_v22  ;;  %v9742_v29 = vld [vmem:[%s15042_s1 + $0xecc] sm:$0xf] }
 0x2ac   :  { %5902 = vmatpush.bf16.msrb.mxu1 %v7488_v19  ;;  %v9670_v19 = vld [vmem:[%s15042_s1 + $0xc8c] sm:$0xf]  ;;  %v7424_v20 = vor.u32 %v9590_v36, %v7421_v41  ;;  %v7725_v61 = vld [vmem:[%s15042_s1 + $0xc78] sm:$0xf0] }
 0x2ad   :  { %5915 = vmatpush.bf16.msrb.mxu2 %v7616_v21  ;;  %v7741_v21 = vld [vmem:[%s15042_s1 + $0xc98] sm:$0xf0]  ;;  %v9774_v10 = vld [vmem:[%s15042_s1 + $0xfcc] sm:$0xf] }
 0x2ae   :  { %5880 = vmatpush.bf16.msra.mxu3 %v7168_v26  ;;  %v7552_v26 = vor.u32 %v9622_v34, %v7549_v45  ;;  %v7901_v32 = vld [vmem:[%s15042_s1 + $0xdd8] sm:$0xf0]  ;;  %v9662_v27 = vld [vmem:[%s15042_s1 + $0xc4c] sm:$0xf] }
 0x2af   :  { %5890 = vmatpush.bf16.msrb.mxu0 %v7344_v55  ;;  %v7744_v55 = vor.u32 %v9670_v19, %v7741_v21  ;;  %v8029_v8 = vld [vmem:[%s15042_s1 + $0xed8] sm:$0xf0]  ;;  %v9738_v33 = vld [vmem:[%s15042_s1 + $0xeac] sm:$0xf] }
 0x2b0   :  { %5903 = vmatpush.bf16.msrb.mxu1 %v7472_v58  ;;  %v7920_v58 = vor.u32 %v9714_v51, %v7917_v52  ;;  %v8157_v11 = vld [vmem:[%s15042_s1 + $0xfd8] sm:$0xf0]  ;;  %v9770_v37 = vld [vmem:[%s15042_s1 + $0xfac] sm:$0xf] }
 0x2b1   :  { %5916 = vmatpush.bf16.msrb.mxu2 %v7600_v59  ;;  %5881 = vmatmul.bf16.vlgmr.msra.gmra.mxu3 %v10755_v12  ;;  %v7440_v12 = vor.u32 %v9594_v30, %v7437_v23  ;;  %v9666_v59 = vld [vmem:[%s15042_s1 + $0xc6c] sm:$0xf]  ;;  %v7709_v28 = vld [vmem:[%s15042_s1 + $0xc58] sm:$0xf0]  ;;  %v8032_v30 = vor.u32 %v9742_v29, %v8029_v8 }
 0x2b2   :  { %5925 = vmatpush.bf16.msrb.mxu3 %v7792_v3  ;;  %v9710_v3 = vld [vmem:[%s15042_s1 + $0xdcc] sm:$0xf]  ;;  %v7728_v24 = vor.u32 %v9666_v59, %v7725_v61  ;;  %v8013_v35 = vld [vmem:[%s15042_s1 + $0xeb8] sm:$0xf0] }
 0x2b3   :  { %5891 = vmatpush.bf16.msrb.mxu0 %v7328_v1  ;;  %v5661_v0 = vpop.f32.mrf.mxu2  ;;  %v9706_v23 = vld [vmem:[%s15042_s1 + $0xdac] sm:$0xf]  ;;  %v7693_v39 = vld [vmem:[%s15042_s1 + $0xc38] sm:$0xf0] }
 0x2b4   :  { %5904 = vmatpush.bf16.msrb.mxu1 %v7456_v25  ;;  %v5662_v1 = vadd.f32 %v5661_v0, %v14336_v50  ;;  %v7904_v25 = vor.u32 %v9710_v3, %v7901_v32  ;;  %v7885_v50 = vld [vmem:[%s15042_s1 + $0xdb8] sm:$0xf0]  ;;  %v9734_v41 = vld [vmem:[%s15042_s1 + $0xe8c] sm:$0xf] }
 0x2b5   :  { %5917 = vmatpush.bf16.msrb.mxu2 %v7584_v2  ;;  %v5674_v2 = vpop.f32.mrf.mxu3  ;;  %v7888_v38 = vor.u32 %v9706_v23, %v7885_v50  ;;  %v7869_v36 = vld [vmem:[%s15042_s1 + $0xd98] sm:$0xf0]  ;;  %v9766_v45 = vld [vmem:[%s15042_s1 + $0xf8c] sm:$0xf] }
 0x2b6   :  { %5926 = vmatpush.bf16.msrb.mxu3 %v7776_v60  ;;  %v8160_v60 = vor.u32 %v9774_v10, %v8157_v11  ;;  %v5675_v31 = vadd.f32 %v5674_v2, %v5662_v1  ;;  %v8125_v19 = vld [vmem:[%s15042_s1 + $0xf98] sm:$0xf0]  ;;  %v9654_v56 = vld [vmem:[%s15042_s1 + $0xc0c] sm:$0xf] }
 0x2b7   :  { %5892 = vmatpush.bf16.msrb.mxu0 %v7312_v44  ;;  %v8141_v44 = vld [vmem:[%s15042_s1 + $0xfb8] sm:$0xf0]  ;;  %v9730_v61 = vld [vmem:[%s15042_s1 + $0xe6c] sm:$0xf] }
 0x2b8   :  { %5905 = vmatpush.bf16.msrb.mxu1 %v7440_v12  ;;  %v8016_v12 = vor.u32 %v9738_v33, %v8013_v35  ;;  %v7677_v57 = vld [vmem:[%s15042_s1 + $0xc18] sm:$0xf0]  ;;  %v9810_v32 = vld [vmem:[%s15042_s1 + $0x10ec] sm:$0xf] }
 0x2b9   :  { %5918 = vmatpush.bf16.msrb.mxu2 %v7568_v40  ;;  %v8144_v40 = vor.u32 %v9770_v37, %v8141_v44  ;;  %v7853_v59 = vld [vmem:[%s15042_s1 + $0xd78] sm:$0xf0]  ;;  %v7680_v8 = vor.u32 %v9654_v56, %v7677_v57  ;;  %v9806_v23 = vld [vmem:[%s15042_s1 + $0x10cc] sm:$0xf] }
 0x2ba   :  { %5927 = vmatpush.bf16.msrb.mxu3 %v7760_v42  ;;  %v7997_v42 = vld [vmem:[%s15042_s1 + $0xe98] sm:$0xf0]  ;;  %v9690_v44 = vld [vmem:[%s15042_s1 + $0xd2c] sm:$0xf] }
 0x2bb   :  { %5893 = vmatpush.bf16.msrb.mxu0 %v7296_v54  ;;  %v5687_v34 = vpop.f32.mrf.mxu0  ;;  %v5663_v52 = vpop.f32.mrf.mxu2  ;;  %v8109_v3 = vld [vmem:[%s15042_s1 + $0xf78] sm:$0xf0]  ;;  %v9842_v57 = vld [vmem:[%s15042_s1 + $0x11ec] sm:$0xf] }
 0x2bc   :  { %5906 = vmatpush.bf16.msrb.mxu1 %v7424_v20  ;;  %v5688_v21 = vadd.f32 %v5687_v34, %v5675_v31  ;;  %v5700_v51 = vpop.f32.mrf.mxu1  ;;  %v8000_v20 = vor.u32 %v9734_v41, %v7997_v42  ;;  %v8301_v29 = vld [vmem:[%s15042_s1 + $0x10f8] sm:$0xf0]  ;;  %v9686_v34 = vld [vmem:[%s15042_s1 + $0xd0c] sm:$0xf] }
 0x2bd   :  { %5919 = vmatpush.bf16.msrb.mxu2 %v7552_v26  ;;  %v5676_v22 = vpop.f32.mrf.mxu3  ;;  %v8128_v26 = vor.u32 %v9766_v45, %v8125_v19  ;;  %v7837_v1 = vld [vmem:[%s15042_s1 + $0xd58] sm:$0xf0]  ;;  %v8304_v2 = vor.u32 %v9810_v32, %v8301_v29  ;;  %v9718_v19 = vld [vmem:[%s15042_s1 + $0xe0c] sm:$0xf] }
 0x2be   :  { %5928 = vmatpush.bf16.msrb.mxu3 %v7744_v55  ;;  %5894 = vmatmul.bf16.vlgmr.msrb.gmra.mxu0 %v10765_v16  ;;  %v7712_v16 = vor.u32 %v9662_v27, %v7709_v28  ;;  %v14535_v55 = vadd.f32 %v5700_v51, %v5688_v21  ;;  %v7965_v27 = vld [vmem:[%s15042_s1 + $0xe58] sm:$0xf0]  ;;  %v9758_v28 = vld [vmem:[%s15042_s1 + $0xf4c] sm:$0xf] }
 0x2bf   :  { %5938 = vmatpush.bf16.msra.mxu0 %v7920_v58  ;;  %5907 = vmatmul.bf16.vlgmr.msrb.gmra.mxu1 %v10763_v15  ;;  %v9702_v15 = vld [vmem:[%s15042_s1 + $0xd8c] sm:$0xf]  ;;  %v8285_v50 = vld [vmem:[%s15042_s1 + $0x10d8] sm:$0xf0] }
 0x2c0   :  { %5951 = vmatpush.bf16.msra.mxu1 %v8048_v62  ;;  %5920 = vmatmul.bf16.vlgmr.msrb.gmra.mxu2 %v10767_v17  ;;  %v9658_v17 = vld [vmem:[%s15042_s1 + $0xc2c] sm:$0xf]  ;;  %v7872_v54 = vor.u32 %v9702_v15, %v7869_v36  ;;  %v7981_v62 = vld [vmem:[%s15042_s1 + $0xe78] sm:$0xf0] }
 0x2c1   :  { %5964 = vmatpush.bf16.msra.mxu2 %v8176_v63  ;;  %v7696_v53 = vor.u32 %v9658_v17, %v7693_v39  ;;  %v9698_v58 = vld [vmem:[%s15042_s1 + $0xd6c] sm:$0xf]  ;;  %v7984_v11 = vor.u32 %v9730_v61, %v7981_v62  ;;  %v8288_v17 = vor.u32 %v9806_v23, %v8285_v50  ;;  %v7949_v39 = vld [vmem:[%s15042_s1 + $0xe38] sm:$0xf0] }
 0x2c2   :  { %5929 = vmatpush.bf16.msrb.mxu3 %v7728_v24  ;;  %v9762_v63 = vld [vmem:[%s15042_s1 + $0xf6c] sm:$0xf]  ;;  %v7856_v10 = vor.u32 %v9698_v58, %v7853_v59  ;;  %v8269_v36 = vld [vmem:[%s15042_s1 + $0x10b8] sm:$0xf0] }
 0x2c3   :  { %5939 = vmatpush.bf16.msra.mxu0 %v7904_v25  ;;  %v8112_v0 = vor.u32 %v9762_v63, %v8109_v3  ;;  %v9694_v24 = vld [vmem:[%s15042_s1 + $0xd4c] sm:$0xf]  ;;  %v7805_v42 = vld [vmem:[%s15042_s1 + $0xd18] sm:$0xf0] }
 0x2c4   :  { %5952 = vmatpush.bf16.msra.mxu1 %v8032_v30  ;;  %v9726_v25 = vld [vmem:[%s15042_s1 + $0xe4c] sm:$0xf]  ;;  %v8093_v30 = vld [vmem:[%s15042_s1 + $0xf58] sm:$0xf0]  ;;  %v5702_v33 = vpop.f32.mrf.mxu1  ;;  %v7840_v31 = vor.u32 %v9694_v24, %v7837_v1 }
 0x2c5   :  { %5965 = vmatpush.bf16.msra.mxu2 %v8160_v60  ;;  %v5689_v60 = vpop.f32.mrf.mxu0  ;;  %v7968_v35 = vor.u32 %v9726_v25, %v7965_v27  ;;  %v8096_v37 = vor.u32 %v9758_v28, %v8093_v30  ;;  %v9802_v15 = vld [vmem:[%s15042_s1 + $0x10ac] sm:$0xf]  ;;  %v7933_v21 = vld [vmem:[%s15042_s1 + $0xe18] sm:$0xf0] }
 0x2c6   :  { %5930 = vmatpush.bf16.msrb.mxu3 %v7712_v16  ;;  %v7821_v16 = vld [vmem:[%s15042_s1 + $0xd38] sm:$0xf0]  ;;  %v9750_v51 = vld [vmem:[%s15042_s1 + $0xf0c] sm:$0xf]  ;;  %v8272_v52 = vor.u32 %v9802_v15, %v8269_v36  ;;  %v7936_v62 = vor.u32 %v9718_v19, %v7933_v21 }
 0x2c7   :  { %5940 = vmatpush.bf16.msra.mxu0 %v7888_v38  ;;  %v9722_v38 = vld [vmem:[%s15042_s1 + $0xe2c] sm:$0xf]  ;;  %v7824_v41 = vor.u32 %v9690_v44, %v7821_v16  ;;  %v8253_v56 = vld [vmem:[%s15042_s1 + $0x1098] sm:$0xf0] }
 0x2c8   :  { %5953 = vmatpush.bf16.msra.mxu1 %v8016_v12  ;;  %v9754_v12 = vld [vmem:[%s15042_s1 + $0xf2c] sm:$0xf]  ;;  %v8429_v22 = vld [vmem:[%s15042_s1 + $0x11f8] sm:$0xf0] }
 0x2c9   :  { %5966 = vmatpush.bf16.msra.mxu2 %v8144_v40  ;;  %v8077_v40 = vld [vmem:[%s15042_s1 + $0xf38] sm:$0xf0]  ;;  %v9906_v59 = vld [vmem:[%s15042_s1 + $0x13ec] sm:$0xf]  ;;  %v8432_v32 = vor.u32 %v9842_v57, %v8429_v22 }
 0x2ca   :  { %5931 = vmatpush.bf16.msrb.mxu3 %v7696_v53  ;;  %v8080_v45 = vor.u32 %v9754_v12, %v8077_v40  ;;  %v8061_v53 = vld [vmem:[%s15042_s1 + $0xf18] sm:$0xf0]  ;;  %v9794_v29 = vld [vmem:[%s15042_s1 + $0x106c] sm:$0xf] }
 0x2cb   :  { %5941 = vmatpush.bf16.msra.mxu0 %v7872_v54  ;;  %v9798_v54 = vld [vmem:[%s15042_s1 + $0x108c] sm:$0xf]  ;;  %v8557_v58 = vld [vmem:[%s15042_s1 + $0x12f8] sm:$0xf0]  ;;  %v8064_v63 = vor.u32 %v9750_v51, %v8061_v53 }
 0x2cc   :  { %5954 = vmatpush.bf16.msra.mxu1 %v8000_v20  ;;  %v9874_v20 = vld [vmem:[%s15042_s1 + $0x12ec] sm:$0xf]  ;;  %v8685_v61 = vld [vmem:[%s15042_s1 + $0x13f8] sm:$0xf0]  ;;  %v8256_v3 = vor.u32 %v9798_v54, %v8253_v56 }
 0x2cd   :  { %5967 = vmatpush.bf16.msra.mxu2 %v8128_v26  ;;  %v7808_v26 = vor.u32 %v9686_v34, %v7805_v42  ;;  %v8413_v24 = vld [vmem:[%s15042_s1 + $0x11d8] sm:$0xf0]  ;;  %v9870_v1 = vld [vmem:[%s15042_s1 + $0x12cc] sm:$0xf] }
 0x2ce   :  { %5932 = vmatpush.bf16.msrb.mxu3 %v7680_v8  ;;  %v8237_v8 = vld [vmem:[%s15042_s1 + $0x1078] sm:$0xf0]  ;;  %v9790_v33 = vld [vmem:[%s15042_s1 + $0x104c] sm:$0xf] }
 0x2cf   :  { %5942 = vmatpush.bf16.msra.mxu0 %v7856_v10  ;;  %v8560_v10 = vor.u32 %v9874_v20, %v8557_v58  ;;  %v8541_v25 = vld [vmem:[%s15042_s1 + $0x12d8] sm:$0xf0]  ;;  %v8240_v30 = vor.u32 %v9794_v29, %v8237_v8  ;;  %v9834_v44 = vld [vmem:[%s15042_s1 + $0x11ac] sm:$0xf] }
 0x2d0   :  { %5955 = vmatpush.bf16.msra.mxu1 %v7984_v11  ;;  %v8688_v11 = vor.u32 %v9906_v59, %v8685_v61  ;;  %v8669_v27 = vld [vmem:[%s15042_s1 + $0x13d8] sm:$0xf0]  ;;  %v9866_v16 = vld [vmem:[%s15042_s1 + $0x12ac] sm:$0xf] }
 0x2d1   :  { %5968 = vmatpush.bf16.msra.mxu2 %v8112_v0  ;;  %5933 = vmatmul.bf16.vlgmr.msrb.gmra.mxu3 %v10929_v46  ;;  %v7952_v46 = vor.u32 %v9722_v38, %v7949_v39  ;;  %v9838_v0 = vld [vmem:[%s15042_s1 + $0x11cc] sm:$0xf]  ;;  %v8653_v12 = vld [vmem:[%s15042_s1 + $0x13b8] sm:$0xf0] }
 0x2d2   :  { %5977 = vmatpush.bf16.msra.mxu3 %v8304_v2  ;;  %v9902_v2 = vld [vmem:[%s15042_s1 + $0x13cc] sm:$0xf]  ;;  %v8416_v23 = vor.u32 %v9838_v0, %v8413_v24  ;;  %v8205_v15 = vld [vmem:[%s15042_s1 + $0x1038] sm:$0xf0] }
 0x2d3   :  { %5943 = vmatpush.bf16.msra.mxu0 %v7840_v31  ;;  %v5713_v28 = vpop.f32.mrf.mxu2  ;;  %v8221_v31 = vld [vmem:[%s15042_s1 + $0x1058] sm:$0xf0]  ;;  %v9898_v39 = vld [vmem:[%s15042_s1 + $0x13ac] sm:$0xf] }
 0x2d4   :  { %5956 = vmatpush.bf16.msra.mxu1 %v7968_v35  ;;  %v5714_v60 = vadd.f32 %v5713_v28, %v14535_v55  ;;  %v5726_v50 = vpop.f32.mrf.mxu3  ;;  %v8544_v35 = vor.u32 %v9870_v1, %v8541_v25  ;;  %v8397_v55 = vld [vmem:[%s15042_s1 + $0x11b8] sm:$0xf0]  ;;  %v9862_v42 = vld [vmem:[%s15042_s1 + $0x128c] sm:$0xf] }
 0x2d5   :  { %5969 = vmatpush.bf16.msra.mxu2 %v8096_v37  ;;  %v8672_v37 = vor.u32 %v9902_v2, %v8669_v27  ;;  %v8400_v40 = vor.u32 %v9834_v44, %v8397_v55  ;;  %v8381_v34 = vld [vmem:[%s15042_s1 + $0x1198] sm:$0xf0]  ;;  %v9782_v57 = vld [vmem:[%s15042_s1 + $0x100c] sm:$0xf] }
 0x2d6   :  { %5978 = vmatpush.bf16.msra.mxu3 %v8288_v17  ;;  %v5727_v38 = vadd.f32 %v5726_v50, %v5714_v60  ;;  %v8525_v17 = vld [vmem:[%s15042_s1 + $0x12b8] sm:$0xf0]  ;;  %v9826_v59 = vld [vmem:[%s15042_s1 + $0x116c] sm:$0xf] }
 0x2d7   :  { %5944 = vmatpush.bf16.msra.mxu0 %v7824_v41  ;;  %v8528_v36 = vor.u32 %v9866_v16, %v8525_v17  ;;  %v8656_v41 = vor.u32 %v9898_v39, %v8653_v12  ;;  %v8637_v19 = vld [vmem:[%s15042_s1 + $0x1398] sm:$0xf0]  ;;  %v9938_v8 = vld [vmem:[%s15042_s1 + $0x14ec] sm:$0xf] }
 0x2d8   :  { %5957 = vmatpush.bf16.msra.mxu1 %v7952_v46  ;;  %v8509_v46 = vld [vmem:[%s15042_s1 + $0x1298] sm:$0xf0]  ;;  %v9822_v25 = vld [vmem:[%s15042_s1 + $0x114c] sm:$0xf] }
 0x2d9   :  { %5970 = vmatpush.bf16.msra.mxu2 %v8080_v45  ;;  %v9894_v45 = vld [vmem:[%s15042_s1 + $0x138c] sm:$0xf]  ;;  %v8189_v22 = vld [vmem:[%s15042_s1 + $0x1018] sm:$0xf0] }
 0x2da   :  { %5979 = vmatpush.bf16.msra.mxu3 %v8272_v52  ;;  %v8640_v58 = vor.u32 %v9894_v45, %v8637_v19  ;;  %v8365_v61 = vld [vmem:[%s15042_s1 + $0x1178] sm:$0xf0]  ;;  %v9854_v27 = vld [vmem:[%s15042_s1 + $0x124c] sm:$0xf] }
 0x2db   :  { %5945 = vmatpush.bf16.msra.mxu0 %v7808_v26  ;;  %v5739_v21 = vpop.f32.mrf.mxu0  ;;  %v5715_v51 = vpop.f32.mrf.mxu2  ;;  %v8512_v26 = vor.u32 %v9862_v42, %v8509_v46  ;;  %v8621_v29 = vld [vmem:[%s15042_s1 + $0x1378] sm:$0xf0]  ;;  %v8368_v0 = vor.u32 %v9826_v59, %v8365_v61  ;;  %v9886_v60 = vld [vmem:[%s15042_s1 + $0x134c] sm:$0xf] }
 0x2dc   :  { %5958 = vmatpush.bf16.msra.mxu1 %v7936_v62  ;;  %v5740_v52 = vadd.f32 %v5739_v21, %v5727_v38  ;;  %v5752_v56 = vpop.f32.mrf.mxu1  ;;  %v5728_v20 = vpop.f32.mrf.mxu3  ;;  %v9858_v62 = vld [vmem:[%s15042_s1 + $0x126c] sm:$0xf]  ;;  %v8349_v2 = vld [vmem:[%s15042_s1 + $0x1158] sm:$0xf0] }
 0x2dd   :  { %5971 = vmatpush.bf16.msra.mxu2 %v8064_v63  ;;  %v9934_v50 = vld [vmem:[%s15042_s1 + $0x14cc] sm:$0xf]  ;;  %v8333_v17 = vld [vmem:[%s15042_s1 + $0x1138] sm:$0xf0] }
 0x2de   :  { %5980 = vmatpush.bf16.msra.mxu3 %v8256_v3  ;;  %5946 = vmatmul.bf16.vlgmr.msra.gmra.mxu0 %v10933_v48  ;;  %v8224_v48 = vor.u32 %v9790_v33, %v8221_v31  ;;  %v5753_v63 = vadd.f32 %v5752_v56, %v5740_v52  ;;  %v8493_v3 = vld [vmem:[%s15042_s1 + $0x1278] sm:$0xf0]  ;;  %v9818_v38 = vld [vmem:[%s15042_s1 + $0x112c] sm:$0xf] }
 0x2df   :  { %5990 = vmatpush.bf16.msrb.mxu0 %v8432_v32  ;;  %5959 = vmatmul.bf16.vlgmr.msra.gmra.mxu1 %v10931_v47  ;;  %v9830_v47 = vld [vmem:[%s15042_s1 + $0x118c] sm:$0xf]  ;;  %v8496_v24 = vor.u32 %v9858_v62, %v8493_v3  ;;  %v8797_v33 = vld [vmem:[%s15042_s1 + $0x14d8] sm:$0xf0] }
 0x2e0   :  { %6003 = vmatpush.bf16.msrb.mxu1 %v8560_v10  ;;  %5972 = vmatmul.bf16.vlgmr.msra.gmra.mxu2 %v10935_v49  ;;  %v9786_v49 = vld [vmem:[%s15042_s1 + $0x102c] sm:$0xf]  ;;  %v8384_v54 = vor.u32 %v9830_v47, %v8381_v34  ;;  %v8813_v10 = vld [vmem:[%s15042_s1 + $0x14f8] sm:$0xf0]  ;;  %v8336_v47 = vor.u32 %v9818_v38, %v8333_v17 }
 0x2e1   :  { %6016 = vmatpush.bf16.msrb.mxu2 %v8688_v11  ;;  %v8208_v53 = vor.u32 %v9786_v49, %v8205_v15  ;;  %v9890_v32 = vld [vmem:[%s15042_s1 + $0x136c] sm:$0xf]  ;;  %v8192_v11 = vor.u32 %v9782_v57, %v8189_v22  ;;  %v8816_v28 = vor.u32 %v9938_v8, %v8813_v10  ;;  %v8589_v15 = vld [vmem:[%s15042_s1 + $0x1338] sm:$0xf0] }
 0x2e2   :  { %5981 = vmatpush.bf16.msra.mxu3 %v8240_v30  ;;  %v8624_v1 = vor.u32 %v9890_v32, %v8621_v29  ;;  %v8477_v30 = vld [vmem:[%s15042_s1 + $0x1258] sm:$0xf0]  ;;  %v9850_v39 = vld [vmem:[%s15042_s1 + $0x122c] sm:$0xf] }
 0x2e3   :  { %5991 = vmatpush.bf16.msrb.mxu0 %v8416_v23  ;;  %v8605_v23 = vld [vmem:[%s15042_s1 + $0x1358] sm:$0xf0]  ;;  %v5741_v31 = vpop.f32.mrf.mxu0  ;;  %v5765_v44 = vpop.f32.mrf.mxu2  ;;  %v8480_v55 = vor.u32 %v9854_v27, %v8477_v30  ;;  %v9882_v49 = vld [vmem:[%s15042_s1 + $0x132c] sm:$0xf] }
 0x2e4   :  { %6004 = vmatpush.bf16.msrb.mxu1 %v8544_v35  ;;  %v8352_v35 = vor.u32 %v9822_v25, %v8349_v2  ;;  %v8608_v16 = vor.u32 %v9886_v60, %v8605_v23  ;;  %v14791_v12 = vadd.f32 %v5765_v44, %v5753_v63  ;;  %v9814_v34 = vld [vmem:[%s15042_s1 + $0x110c] sm:$0xf]  ;;  %v8317_v42 = vld [vmem:[%s15042_s1 + $0x1118] sm:$0xf0]  ;;  %v8592_v46 = vor.u32 %v9882_v49, %v8589_v15 }
 0x2e5   :  { %6017 = vmatpush.bf16.msrb.mxu2 %v8672_v37  ;;  %v5754_v37 = vpop.f32.mrf.mxu1  ;;  %v9846_v45 = vld [vmem:[%s15042_s1 + $0x120c] sm:$0xf]  ;;  %v8445_v19 = vld [vmem:[%s15042_s1 + $0x1218] sm:$0xf0]  ;;  %v8320_v20 = vor.u32 %v9814_v34, %v8317_v42 }
 0x2e6   :  { %5982 = vmatpush.bf16.msra.mxu3 %v8224_v48  ;;  %v8800_v48 = vor.u32 %v9934_v50, %v8797_v33  ;;  %v9878_v21 = vld [vmem:[%s15042_s1 + $0x130c] sm:$0xf]  ;;  %v8573_v52 = vld [vmem:[%s15042_s1 + $0x1318] sm:$0xf0]  ;;  %v8448_v61 = vor.u32 %v9846_v45, %v8445_v19  ;;  %v10058_v50 = vld [vmem:[%s15043_s2] sm:$0xf] }
 0x2e7   :  { %5992 = vmatpush.bf16.msrb.mxu0 %v8400_v40  ;;  %v8461_v40 = vld [vmem:[%s15042_s1 + $0x1238] sm:$0xf0]  ;;  %v9970_v56 = vld [vmem:[%s15042_s1 + $0x15ec] sm:$0xf]  ;;  %v8576_v62 = vor.u32 %v9878_v21, %v8573_v52  ;;  %v809_v33 = vperm.slane %v10058_v50, 3 }
 0x2e8   :  { %6005 = vmatpush.bf16.msrb.mxu1 %v8528_v36  ;;  %v9930_v36 = vld [vmem:[%s15042_s1 + $0x14ac] sm:$0xf]  ;;  %v8941_v57 = vld [vmem:[%s15042_s1 + $0x15f8] sm:$0xf0] }
 0x2e9   :  { %6018 = vmatpush.bf16.msrb.mxu2 %v8656_v41  ;;  %v8781_v41 = vld [vmem:[%s15042_s1 + $0x14b8] sm:$0xf0]  ;;  %v10002_v22 = vld [vmem:[%s15042_s1 + $0x16ec] sm:$0xf]  ;;  %v8944_v32 = vor.u32 %v9970_v56, %v8941_v57 }
 0x2ea   :  { %5983 = vmatpush.bf16.msra.mxu3 %v8208_v53  ;;  %v8784_v51 = vor.u32 %v9930_v36, %v8781_v41  ;;  %v9926_v53 = vld [vmem:[%s15042_s1 + $0x148c] sm:$0xf]  ;;  %v9197_v59 = vld [vmem:[%s15042_s1 + $0x17f8] sm:$0xf0] }
 0x2eb   :  { %5993 = vmatpush.bf16.msrb.mxu0 %v8384_v54  ;;  %v8765_v54 = vld [vmem:[%s15042_s1 + $0x1498] sm:$0xf0]  ;;  %v5767_v63 = vpop.f32.mrf.mxu2  ;;  %v9922_v29 = vld [vmem:[%s15042_s1 + $0x146c] sm:$0xf] }
 0x2ec   :  { %6006 = vmatpush.bf16.msrb.mxu1 %v8512_v26  ;;  %v9069_v26 = vld [vmem:[%s15042_s1 + $0x16f8] sm:$0xf0]  ;;  %v8768_v3 = vor.u32 %v9926_v53, %v8765_v54  ;;  %v10030_v2 = vld [vmem:[%s15042_s1 + $0x17cc] sm:$0xf] }
 0x2ed   :  { %6019 = vmatpush.bf16.msrb.mxu2 %v8640_v58  ;;  %v10034_v58 = vld [vmem:[%s15042_s1 + $0x17ec] sm:$0xf]  ;;  %v8749_v8 = vld [vmem:[%s15042_s1 + $0x1478] sm:$0xf0]  ;;  %v9072_v10 = vor.u32 %v10002_v22, %v9069_v26 }
 0x2ee   :  { %5984 = vmatpush.bf16.msra.mxu3 %v8192_v11  ;;  %v9200_v11 = vor.u32 %v10034_v58, %v9197_v59  ;;  %v9053_v25 = vld [vmem:[%s15042_s1 + $0x16d8] sm:$0xf0]  ;;  %v9918_v60 = vld [vmem:[%s15042_s1 + $0x144c] sm:$0xf] }
 0x2ef   :  { %5994 = vmatpush.bf16.msrb.mxu0 %v8368_v0  ;;  %v9966_v0 = vld [vmem:[%s15042_s1 + $0x15cc] sm:$0xf]  ;;  %v9181_v27 = vld [vmem:[%s15042_s1 + $0x17d8] sm:$0xf0] }
 0x2f0   :  { %6007 = vmatpush.bf16.msrb.mxu1 %v8496_v24  ;;  %v8925_v24 = vld [vmem:[%s15042_s1 + $0x15d8] sm:$0xf0]  ;;  %v9184_v37 = vor.u32 %v10030_v2, %v9181_v27  ;;  %v9962_v44 = vld [vmem:[%s15042_s1 + $0x15ac] sm:$0xf] }
 0x2f1   :  { %6020 = vmatpush.bf16.msrb.mxu2 %v8624_v1  ;;  %5985 = vmatmul.bf16.vlgmr.msra.gmra.mxu3 %v11166_v9  ;;  %v8464_v9 = vor.u32 %v9850_v39, %v8461_v40  ;;  %v9998_v1 = vld [vmem:[%s15042_s1 + $0x16cc] sm:$0xf]  ;;  %v8928_v30 = vor.u32 %v9966_v0, %v8925_v24  ;;  %v8733_v23 = vld [vmem:[%s15042_s1 + $0x1458] sm:$0xf0] }
 0x2f2   :  { %6029 = vmatpush.bf16.msrb.mxu3 %v8816_v28  ;;  %v8752_v28 = vor.u32 %v9922_v29, %v8749_v8  ;;  %v9037_v38 = vld [vmem:[%s15042_s1 + $0x16b8] sm:$0xf0]  ;;  %v10026_v17 = vld [vmem:[%s15042_s1 + $0x17ac] sm:$0xf] }
 0x2f3   :  { %5995 = vmatpush.bf16.msrb.mxu0 %v8352_v35  ;;  %v9056_v35 = vor.u32 %v9998_v1, %v9053_v25  ;;  %v9165_v39 = vld [vmem:[%s15042_s1 + $0x17b8] sm:$0xf0]  ;;  %v10022_v42 = vld [vmem:[%s15042_s1 + $0x178c] sm:$0xf] }
 0x2f4   :  { %6008 = vmatpush.bf16.msrb.mxu1 %v8480_v55  ;;  %v5778_v31 = vpop.f32.mrf.mxu3  ;;  %v8909_v55 = vld [vmem:[%s15042_s1 + $0x15b8] sm:$0xf0]  ;;  %v9168_v36 = vor.u32 %v10026_v17, %v9165_v39  ;;  %v9910_v21 = vld [vmem:[%s15042_s1 + $0x140c] sm:$0xf] }
 0x2f5   :  { %6021 = vmatpush.bf16.msrb.mxu2 %v8608_v16  ;;  %v9994_v16 = vld [vmem:[%s15042_s1 + $0x16ac] sm:$0xf]  ;;  %v8717_v40 = vld [vmem:[%s15042_s1 + $0x1438] sm:$0xf0]  ;;  %v5779_v49 = vadd.f32 %v5778_v31, %v809_v33 }
 0x2f6   :  { %6030 = vmatpush.bf16.msrb.mxu3 %v8800_v48  ;;  %v8736_v48 = vor.u32 %v9918_v60, %v8733_v23  ;;  %v9040_v15 = vor.u32 %v9994_v16, %v9037_v38  ;;  %v8893_v41 = vld [vmem:[%s15042_s1 + $0x1598] sm:$0xf0]  ;;  %v9954_v22 = vld [vmem:[%s15042_s1 + $0x156c] sm:$0xf] }
 0x2f7   :  { %5996 = vmatpush.bf16.msrb.mxu0 %v8336_v47  ;;  %v9990_v47 = vld [vmem:[%s15042_s1 + $0x168c] sm:$0xf]  ;;  %v9021_v34 = vld [vmem:[%s15042_s1 + $0x1698] sm:$0xf0] }
 0x2f8   :  { %6009 = vmatpush.bf16.msrb.mxu1 %v8464_v9  ;;  %v9149_v9 = vld [vmem:[%s15042_s1 + $0x1798] sm:$0xf0]  ;;  %v9024_v56 = vor.u32 %v9990_v47, %v9021_v34  ;;  %v9986_v26 = vld [vmem:[%s15042_s1 + $0x166c] sm:$0xf] }
 0x2f9   :  { %6022 = vmatpush.bf16.msrb.mxu2 %v8592_v46  ;;  %v9152_v57 = vor.u32 %v10022_v42, %v9149_v9  ;;  %v9005_v58 = vld [vmem:[%s15042_s1 + $0x1678] sm:$0xf0]  ;;  %v10018_v59 = vld [vmem:[%s15042_s1 + $0x176c] sm:$0xf] }
 0x2fa   :  { %6031 = vmatpush.bf16.msrb.mxu3 %v8784_v51  ;;  %v8701_v51 = vld [vmem:[%s15042_s1 + $0x1418] sm:$0xf0]  ;;  %v10050_v63 = vld [vmem:[%s15042_s1 + $0x186c] sm:$0xf]  ;;  %v9008_v8 = vor.u32 %v9986_v26, %v9005_v58 }
 0x2fb   :  { %5997 = vmatpush.bf16.msrb.mxu0 %v8320_v20  ;;  %v5791_v46 = vpop.f32.mrf.mxu0  ;;  %v8877_v20 = vld [vmem:[%s15042_s1 + $0x1578] sm:$0xf0]  ;;  %v9982_v24 = vld [vmem:[%s15042_s1 + $0x164c] sm:$0xf] }
 0x2fc   :  { %6010 = vmatpush.bf16.msrb.mxu1 %v8448_v61  ;;  %v5792_v52 = vadd.f32 %v5791_v46, %v5779_v49  ;;  %v5804_v53 = vpop.f32.mrf.mxu1  ;;  %v5780_v54 = vpop.f32.mrf.mxu3  ;;  %v9133_v61 = vld [vmem:[%s15042_s1 + $0x1778] sm:$0xf0]  ;;  %v8880_v29 = vor.u32 %v9954_v22, %v8877_v20  ;;  %v10014_v27 = vld [vmem:[%s15042_s1 + $0x174c] sm:$0xf] }
 0x2fd   :  { %6023 = vmatpush.bf16.msrb.mxu2 %v8576_v62  ;;  %v8861_v0 = vld [vmem:[%s15042_s1 + $0x1558] sm:$0xf0]  ;;  %v10046_v60 = vld [vmem:[%s15042_s1 + $0x184c] sm:$0xf] }
 0x2fe   :  { %6032 = vmatpush.bf16.msrb.mxu3 %v8768_v3  ;;  %5998 = vmatmul.bf16.vlgmr.msrb.gmra.mxu0 %v11176_v14  ;;  %v8912_v14 = vor.u32 %v9962_v44, %v8909_v55  ;;  %v5805_v62 = vadd.f32 %v5804_v53, %v5792_v52  ;;  %v9261_v3 = vld [vmem:[%s15042_s1 + $0x1878] sm:$0xf0]  ;;  %v9946_v44 = vld [vmem:[%s15042_s1 + $0x152c] sm:$0xf] }
 0x2ff   :  { %6042 = vmatpush.bf16.msra.mxu0 %v8944_v32  ;;  %6011 = vmatmul.bf16.vlgmr.msrb.gmra.mxu1 %v11174_v13  ;;  %v9958_v13 = vld [vmem:[%s15042_s1 + $0x158c] sm:$0xf]  ;;  %v8704_v32 = vor.u32 %v9910_v21, %v8701_v51  ;;  %v9264_v25 = vor.u32 %v10050_v63, %v9261_v3  ;;  %v8989_v2 = vld [vmem:[%s15042_s1 + $0x1658] sm:$0xf0] }
 0x300   :  { %6055 = vmatpush.bf16.msra.mxu1 %v9072_v10  ;;  %6024 = vmatmul.bf16.vlgmr.msrb.gmra.mxu2 %v11178_v18  ;;  %v9914_v18 = vld [vmem:[%s15042_s1 + $0x142c] sm:$0xf]  ;;  %v8896_v19 = vor.u32 %v9958_v13, %v8893_v41  ;;  %v9136_v10 = vor.u32 %v10018_v59, %v9133_v61  ;;  %v9245_v23 = vld [vmem:[%s15042_s1 + $0x1858] sm:$0xf0] }
 0x301   :  { %6068 = vmatpush.bf16.msra.mxu2 %v9200_v11  ;;  %v8720_v45 = vor.u32 %v9914_v18, %v8717_v40  ;;  %v9950_v11 = vld [vmem:[%s15042_s1 + $0x154c] sm:$0xf]  ;;  %v8845_v55 = vld [vmem:[%s15042_s1 + $0x1538] sm:$0xf0]  ;;  %v9248_v38 = vor.u32 %v10046_v60, %v9245_v23 }
 0x302   :  { %6033 = vmatpush.bf16.msrb.mxu3 %v8752_v28  ;;  %v9117_v28 = vld [vmem:[%s15042_s1 + $0x1758] sm:$0xf0]  ;;  %v8864_v33 = vor.u32 %v9950_v11, %v8861_v0  ;;  %v9978_v16 = vld [vmem:[%s15042_s1 + $0x162c] sm:$0xf]  ;;  %v8848_v40 = vor.u32 %v9946_v44, %v8845_v55 }
 0x303   :  { %6043 = vmatpush.bf16.msra.mxu0 %v8928_v30  ;;  %v5817_v1 = vpop.f32.mrf.mxu2  ;;  %v5793_v50 = vpop.f32.mrf.mxu0  ;;  %v8973_v17 = vld [vmem:[%s15042_s1 + $0x1638] sm:$0xf0]  ;;  %v10010_v39 = vld [vmem:[%s15042_s1 + $0x172c] sm:$0xf] }
 0x304   :  { %6056 = vmatpush.bf16.msra.mxu1 %v9056_v35  ;;  %v5818_v30 = vadd.f32 %v5817_v1, %v5805_v62  ;;  %v5806_v31 = vpop.f32.mrf.mxu1  ;;  %v8992_v35 = vor.u32 %v9982_v24, %v8989_v2  ;;  %v9229_v18 = vld [vmem:[%s15042_s1 + $0x1838] sm:$0xf0]  ;;  %v8976_v49 = vor.u32 %v9978_v16, %v8973_v17  ;;  %v9974_v13 = vld [vmem:[%s15042_s1 + $0x160c] sm:$0xf] }
 0x305   :  { %6069 = vmatpush.bf16.msra.mxu2 %v9184_v37  ;;  %v9120_v37 = vor.u32 %v10014_v27, %v9117_v28  ;;  %v8957_v34 = vld [vmem:[%s15042_s1 + $0x1618] sm:$0xf0]  ;;  %v10006_v42 = vld [vmem:[%s15042_s1 + $0x170c] sm:$0xf] }
 0x306   :  { %6034 = vmatpush.bf16.msrb.mxu3 %v8736_v48  ;;  %v9101_v48 = vld [vmem:[%s15042_s1 + $0x1738] sm:$0xf0]  ;;  %v10038_v46 = vld [vmem:[%s15042_s1 + $0x180c] sm:$0xf]  ;;  %v8960_v21 = vor.u32 %v9974_v13, %v8957_v34 }
 0x307   :  { %6044 = vmatpush.bf16.msra.mxu0 %v8912_v14  ;;  %v10042_v14 = vld [vmem:[%s15042_s1 + $0x182c] sm:$0xf]  ;;  %v9085_v9 = vld [vmem:[%s15042_s1 + $0x1718] sm:$0xf0] }
 0x308   :  { %6057 = vmatpush.bf16.msra.mxu1 %v9040_v15  ;;  %v9104_v15 = vor.u32 %v10010_v39, %v9101_v48  ;;  %v9232_v47 = vor.u32 %v10042_v14, %v9229_v18  ;;  %v9088_v51 = vor.u32 %v10006_v42, %v9085_v9 }
 0x309   :  { %6070 = vmatpush.bf16.msra.mxu2 %v9168_v36  ;;  %v9942_v36 = vld [vmem:[%s15042_s1 + $0x150c] sm:$0xf] }
 0x30a   :  { %6035 = vmatpush.bf16.msrb.mxu3 %v8720_v45  ;;  %v9213_v45 = vld [vmem:[%s15042_s1 + $0x1818] sm:$0xf0] }
 0x30b   :  { %6045 = vmatpush.bf16.msra.mxu0 %v8896_v19  ;;  %v5819_v41 = vpop.f32.mrf.mxu2  ;;  %v9216_v52 = vor.u32 %v10038_v46, %v9213_v45 }
 0x30c   :  { %6058 = vmatpush.bf16.msra.mxu1 %v9024_v56  ;;  %v10059_v56 = vld [vmem:[#allocation1] sm:$0xff] }
 0x30d   :  { %6071 = vmatpush.bf16.msra.mxu2 %v9152_v57 }
 0x30e   :  { %6036 = vmatpush.bf16.msrb.mxu3 %v8704_v32 }
 0x30f   :  { %6046 = vmatpush.bf16.msra.mxu0 %v8880_v29 }
 0x310   :  { %6059 = vmatpush.bf16.msra.mxu1 %v9008_v8 }
 0x311   :  { %6072 = vmatpush.bf16.msra.mxu2 %v9136_v10  ;;  %6037 = vmatmul.bf16.vlgmr.msrb.gmra.mxu3 %v11259_v4  ;;  %v8829_v4 = vld [vmem:[%s15042_s1 + $0x1518] sm:$0xf0]  ;;  %s10086_s1 = smov [#allocation2]  }
 0x312   :  { %6085 = vmatpush.bf16.msra.mxu3 %v9264_v25  ;;  %v8832_v19 = vor.u32 %v9942_v36, %v8829_v4  ;;  %s6118_s22 = sshll.u32 %s10086_s1, 4  ;;  %s6119_s22 = int_to_ptr.vmem [resolvable:$true] %s6118_s22 }
 0x313   :  { %6047 = vmatpush.bf16.msra.mxu0 %v8864_v33 }
 0x314   :  { %6060 = vmatpush.bf16.msra.mxu1 %v8992_v35  ;;  %v5830_v53 = vpop.f32.mrf.mxu3 }
 0x315   :  { %6073 = vmatpush.bf16.msra.mxu2 %v9120_v37  ;;  %v5831_v54 = vadd.f32 %v5830_v53, %v5818_v30 }
 0x316   :  { %6086 = vmatpush.bf16.msra.mxu3 %v9248_v38 }
 0x317   :  { %6048 = vmatpush.bf16.msra.mxu0 %v8848_v40 }
 0x318   :  { %6061 = vmatpush.bf16.msra.mxu1 %v8976_v49 }
 0x319   :  { %6074 = vmatpush.bf16.msra.mxu2 %v9104_v15 }
 0x31a   :  { %6087 = vmatpush.bf16.msra.mxu3 %v9232_v47 }
 0x31b   :  { %6049 = vmatpush.bf16.msra.mxu0 %v8832_v19  ;;  %v5843_v57 = vpop.f32.mrf.mxu0 }
 0x31c   :  { %6062 = vmatpush.bf16.msra.mxu1 %v8960_v21  ;;  %v5844_v22 = vadd.f32 %v5843_v57, %v5831_v54  ;;  %v5856_v20 = vpop.f32.mrf.mxu1  ;;  %v5832_v26 = vpop.f32.mrf.mxu3 }
 0x31d   :  { %6075 = vmatpush.bf16.msra.mxu2 %v9088_v51 }
 0x31e   :  { %6088 = vmatpush.bf16.msra.mxu3 %v9216_v52  ;;  %6050 = vmatmul.bf16.vlgmr.msra.gmra.mxu0 %v11263_v6  ;;  %v5857_v58 = vadd.f32 %v5856_v20, %v5844_v22  ;;  %v6096_v52 = vmax.f32 %v14791_v12, 0.0 }
 0x31f   :  { %6063 = vmatmul.bf16.vlgmr.msra.gmra.mxu1 %v11261_v5 }
 0x320   :  { %6076 = vmatmul.bf16.vlgmr.msra.gmra.mxu2 %v11265_v7 }
 0x321   :  { %9268 = vmatmul.msk.bf16.vlgmr.msra.gmra.mxu3 %vm4791_vm0, %v10059_v56  ;;  %v6103_v56 = vrot.slane %v6096_v52, 4 }
 0x323   :  { %v5869_v59 = vpop.f32.mrf.mxu2  ;;  %v5845_v62 = vpop.f32.mrf.mxu0 }
 0x324   :  { %v5870_v61 = vadd.f32 %v5869_v59, %v5857_v58  ;;  %v5858_v63 = vpop.f32.mrf.mxu1 }
 0x32b   :  { %v5871_v3 = vpop.f32.mrf.mxu2 }
 0x334   :  { %v5882_v32 = vpop.f32.mrf.mxu3 }
 0x335   :  { %v5883_v6 = vadd.f32 %v5882_v32, %v5870_v61 }
 0x33b   :  { %v5895_v29 = vpop.f32.mrf.mxu0 }
 0x33c   :  { %v5896_v8 = vadd.f32 %v5895_v29, %v5883_v6  ;;  %v5908_v5 = vpop.f32.mrf.mxu1  ;;  %v5884_v10 = vpop.f32.mrf.mxu3 }
 0x33e   :  { %v5909_v7 = vadd.f32 %v5908_v5, %v5896_v8 }
 0x343   :  { %v5921_v11 = vpop.f32.mrf.mxu2  ;;  %v5897_v24 = vpop.f32.mrf.mxu0 }
 0x344   :  { %v5922_v0 = vadd.f32 %v5921_v11, %v5909_v7  ;;  %v5910_v1 = vpop.f32.mrf.mxu1 }
 0x34b   :  { %v5923_v25 = vpop.f32.mrf.mxu2 }
 0x354   :  { %v5934_v2 = vpop.f32.mrf.mxu3 }
 0x355   :  { %v5935_v38 = vadd.f32 %v5934_v2, %v5922_v0 }
 0x35b   :  { %v5947_v27 = vpop.f32.mrf.mxu0 }
 0x35c   :  { %v5960_v28 = vpop.f32.mrf.mxu1  ;;  %v5936_v30 = vpop.f32.mrf.mxu3  ;;  %v5948_v39 = vadd.f32 %v5947_v27, %v5935_v38 }
 0x35e   :  { %v5961_v14 = vadd.f32 %v5960_v28, %v5948_v39 }
 0x363   :  { %v5973_v60 = vpop.f32.mrf.mxu2  ;;  %v5949_v23 = vpop.f32.mrf.mxu0 }
 0x364   :  { %v5962_v50 = vpop.f32.mrf.mxu1  ;;  %v5974_v18 = vadd.f32 %v5973_v60, %v5961_v14 }
 0x36b   :  { %v5975_v33 = vpop.f32.mrf.mxu2 }
 0x374   :  { %v5986_v31 = vpop.f32.mrf.mxu3 }
 0x375   :  { %v5987_v40 = vadd.f32 %v5986_v31, %v5974_v18 }
 0x37b   :  { %v5999_v35 = vpop.f32.mrf.mxu0 }
 0x37c   :  { %v6012_v37 = vpop.f32.mrf.mxu1  ;;  %v5988_v44 = vpop.f32.mrf.mxu3  ;;  %v6000_v49 = vadd.f32 %v5999_v35, %v5987_v40 }
 0x37e   :  { %v6013_v36 = vadd.f32 %v6012_v37, %v6000_v49 }
 0x383   :  { %v6025_v55 = vpop.f32.mrf.mxu2  ;;  %v6001_v16 = vpop.f32.mrf.mxu0 }
 0x384   :  { %v6014_v17 = vpop.f32.mrf.mxu1  ;;  %v6026_v4 = vadd.f32 %v6025_v55, %v6013_v36 }
 0x38b   :  { %v6027_v48 = vpop.f32.mrf.mxu2 }
 0x394   :  { %v6038_v15 = vpop.f32.mrf.mxu3 }
 0x395   :  { %v6039_v13 = vadd.f32 %v6038_v15, %v6026_v4 }
 0x39b   :  { %v6051_v41 = vpop.f32.mrf.mxu0 }
 0x39c   :  { %v6064_v47 = vpop.f32.mrf.mxu1  ;;  %v6052_v34 = vadd.f32 %v6051_v41, %v6039_v13  ;;  %v6040_v42 = vpop.f32.mrf.mxu3 }
 0x39e   :  { %v6065_v9 = vadd.f32 %v6064_v47, %v6052_v34 }
 0x3a3   :  { %v6077_v46 = vpop.f32.mrf.mxu2  ;;  %v6053_v19 = vpop.f32.mrf.mxu0 }
 0x3a4   :  { %v6078_v45 = vadd.f32 %v6077_v46, %v6065_v9  ;;  %v6066_v21 = vpop.f32.mrf.mxu1  ;;  %v6090_v51 = vpop.f32.mrf.mxu3 }
 0x3a6   :  { %v6091_v53 = vadd.f32 %v6090_v51, %v6078_v45 }
 0x3a8   :  { %v6097_v54 = vmax.f32 %v6091_v53, 0.0 }
 0x3aa   :  { %v6104_v57 = vrot.slane %v6097_v54, 2 }
 0x3ab   :  { %v6079_v22 = vpop.f32.mrf.mxu2 }
 0x3ac   :  { %v6108_v20 = vsel %vm6107_vm2, %v6103_v56, %v6104_v57  ;;  %v6092_v26 = vpop.f32.mrf.mxu3 }
 0x3ad   :  { %v6110_v58 = vsel %vm6109_vm3, %v13604_v43, %v6108_v20 }
 0x3ae   :  { %6112 = vst [vmem:[#allocation2] sm:$0xff] %v6110_v58 }
 0x3af   :  { %6123 = dma.vmem_to_hbm [thread:$0]  %s6119_s22, 128, %s6121_s25, [#allocation3]  }
 0x3b0   :  { %10084 = dma.done.wait [#allocation3], 128  }
 0x3b1   :  { %10085 = vsyncadd [#allocation3], 4294967168 }
 0x3b2   :  { %6128 = vsyncpa [#allocation3], 1 }

</bundles_post_ra>
